<compile_context>
chip_gen: v7x
topology: tpu7x:2x2x1
jax: 0.10.0
libtpu: 0.0.40
codegen_flags: <defaults>
</compile_context>

<pallas_src>
import functools

import jax
import jax.numpy as jnp
from jax import lax
from jax.experimental import pallas as pl
from jax.experimental.pallas import tpu as pltpu


# ---------------------------------------------------------------------------
# Kernel 1: fully fused localisation network (per-batch program).
#
# Flat-lane conv trick: with the input row u[r], r = y*W + x, a valid 5x5 conv
# output at (i, j) lives at lane r = i*W + j and reads lanes r + (dy*W + dx).
# After a 2x2/2 maxpool the surviving values stay at their *original* lanes
# (anchor 2*(a*W+b)); the next conv just uses doubled ("dilated") tap offsets.
# Lanes that do not correspond to a valid output hold finite garbage and are
# never read by a later stage.
# ---------------------------------------------------------------------------
def _localisation_kernel(u_ref, w1_ref, s1_ref, w2_ref, s2_ref, sel_ref,
                         w3_ref, b3_ref, w4_ref, b4_ref, th_ref,
                         *, H, W, K, C1, C2):
    uf = u_ref[0]                                  # (1, H*W)   input image row
    w1 = w1_ref[...]                               # (C1, K*K)  scale-folded conv1 weights

    # ---- conv1 (1->C1, valid) + BN + ReLU :  channels in sublanes, pixels in lanes
    L1 = H * W - (K - 1) * (W + 1)                 # 668 : covers all valid conv1 lanes
    acc1 = jnp.zeros((C1, L1), jnp.float32)
    for dy in range(K):
        for dx in range(K):
            t = dy * K + dx
            o = dy * W + dx
            acc1 = acc1 + w1[:, t:t + 1] * uf[:, o:o + L1]     # (C1,1)*(1,L1)
    a1 = jnp.maximum(acc1 + s1_ref[...], 0.0)      # (C1, L1)

    # ---- maxpool 2x2 stride 2 (values stay on the original 28-stride lane grid)
    L2 = L1 - (W + 1)                              # 639
    m1 = jnp.maximum(jnp.maximum(a1[:, 0:L2], a1[:, 1:1 + L2]),
                     jnp.maximum(a1[:, W:W + L2], a1[:, W + 1:W + 1 + L2]))

    # ---- conv2 (C1->C2, valid) + BN + ReLU : dilated tap offsets, MXU matmuls
    L3 = L2 - 2 * (K - 1) * (W + 1)                # 407
    acc2 = jnp.zeros((C2, L3), jnp.float32)
    for dy in range(K):
        for dx in range(K):
            t = dy * K + dx
            o = 2 * (dy * W + dx)
            acc2 = acc2 + jnp.dot(w2_ref[t], m1[:, o:o + L3],
                                  preferred_element_type=jnp.float32)
    a2 = jnp.maximum(acc2 + s2_ref[...], 0.0)      # (C2, L3)

    # ---- maxpool 2x2 stride 2 (anchor stride now 2 on the original grid)
    L4 = L3 - (2 * W + 2)                          # 349
    m2 = jnp.maximum(jnp.maximum(a2[:, 0:L4], a2[:, 2:2 + L4]),
                     jnp.maximum(a2[:, 2 * W:2 * W + L4],
                                 a2[:, 2 * W + 2:2 * W + 2 + L4]))

    # ---- Flatten: gather the 16 valid lanes per channel with a one-hot matmul
    F = jnp.dot(m2, sel_ref[...], preferred_element_type=jnp.float32)   # (C2, 16)

    # ---- fc1 (256->64) + ReLU : sum over channels of (1,16)@(16,64) MXU dots
    h = b3_ref[...]                                # (1, 64), bias as accumulator init
    for c in range(C2):
        h = h + jnp.dot(F[c:c + 1, :], w3_ref[c],
                        preferred_element_type=jnp.float32)
    h = jnp.maximum(h, 0.0)

    # ---- fc2 (64->6): zero weight / identity bias at init
    th_ref[0] = (jnp.dot(h, w4_ref[...], preferred_element_type=jnp.float32)
                 + b4_ref[...])                    # (1, 6)


def localisation_fused(U, p):
    B, C_in, H, W = U.shape
    assert C_in == 1 and H == 28 and W == 28, "localisation net expects 1x28x28 inputs"
    K, C1, C2 = 5, 8, 16
    HW = H * W
    L1 = HW - (K - 1) * (W + 1)
    L2 = L1 - (W + 1)
    L3 = L2 - 2 * (K - 1) * (W + 1)
    L4 = L3 - (2 * W + 2)

    uflat = U.reshape(B, 1, HW).astype(jnp.float32)

    # Fold BatchNorm(eval) + conv bias:  scale -> weights, shift -> per-channel add.
    w1 = (p["conv1_w"].reshape(C1, K * K) * p["bn1_scale"][:, None]).astype(jnp.float32)
    s1 = (p["conv1_b"] * p["bn1_scale"] + p["bn1_shift"]).reshape(C1, 1).astype(jnp.float32)
    w2 = (p["conv2_w"] * p["bn2_scale"][:, None, None, None]).transpose(2, 3, 0, 1)
    w2 = w2.reshape(K * K, C2, C1).astype(jnp.float32)           # (tap, C_out, C_in)
    s2 = (p["conv2_b"] * p["bn2_scale"] + p["bn2_shift"]).reshape(C2, 1).astype(jnp.float32)

    # One-hot selection: lane q = 4*W*e + 4*f  ->  feature position p = e*4 + f
    pp = jnp.arange(16)
    qq = 4 * W * (pp // 4) + 4 * (pp % 4)
    sel = jnp.zeros((L4, 16), jnp.float32).at[qq, pp].set(1.0)

    # fc1 weight (64, 256) -> (channel, position, hidden) matching Flatten(C,H,W) order.
    w3 = p["fc1_w"].reshape(64, C2, 16).transpose(1, 2, 0).astype(jnp.float32)
    b3 = p["fc1_b"].reshape(1, 64).astype(jnp.float32)
    w4 = p["fc2_w"].T.astype(jnp.float32)                        # (64, 6)
    b4 = p["fc2_b"].reshape(1, 6).astype(jnp.float32)

    theta = pl.pallas_call(
        functools.partial(_localisation_kernel, H=H, W=W, K=K, C1=C1, C2=C2),
        out_shape=jax.ShapeDtypeStruct((B, 1, 6), jnp.float32),
        grid=(B,),
        in_specs=[
            pl.BlockSpec((1, 1, HW), lambda b: (b, 0, 0)),         # image row
            pl.BlockSpec((C1, K * K), lambda b: (0, 0)),           # conv1 w (scaled)
            pl.BlockSpec((C1, 1), lambda b: (0, 0)),               # conv1 shift
            pl.BlockSpec((K * K, C2, C1), lambda b: (0, 0, 0)),    # conv2 w (scaled)
            pl.BlockSpec((C2, 1), lambda b: (0, 0)),               # conv2 shift
            pl.BlockSpec((L4, 16), lambda b: (0, 0)),              # flatten selector
            pl.BlockSpec((C2, 16, 64), lambda b: (0, 0, 0)),       # fc1 w
            pl.BlockSpec((1, 64), lambda b: (0, 0)),               # fc1 b
            pl.BlockSpec((64, 6), lambda b: (0, 0)),               # fc2 w
            pl.BlockSpec((1, 6), lambda b: (0, 0)),                # fc2 b
        ],
        out_specs=pl.BlockSpec((1, 1, 6), lambda b: (b, 0, 0)),
        compiler_params=pltpu.CompilerParams(dimension_semantics=("parallel",)),
    )(uflat, w1, s1, w2, s2, sel, w3, b3, w4, b4)
    return theta                                                   # (B, 1, 6)


# ---------------------------------------------------------------------------
# Kernel 2: affine_grid + bilinear grid_sample (zero padding), per batch.
# Separable one-hot operators, chunked over the output HW lanes.
# ---------------------------------------------------------------------------
def _sampler_kernel(theta_ref, u_ref, o_ref, *, H, W, chunk):
    b = pl.program_id(0)
    t00 = theta_ref[b, 0]
    t01 = theta_ref[b, 1]
    t02 = theta_ref[b, 2]
    t10 = theta_ref[b, 3]
    t11 = theta_ref[b, 4]
    t12 = theta_ref[b, 5]
    u = u_ref[0]                                           # (H, W)
    HW = H * W

    for start in range(0, HW, chunk):
        cw = min(chunk, HW - start)
        # base grid (align_corners=False) built in-kernel from iota
        o_idx = lax.broadcasted_iota(jnp.int32, (1, cw), 1).astype(jnp.float32) + float(start)
        i_row = jnp.floor((o_idx + 0.5) * (1.0 / W))       # output row index
        j_col = o_idx - i_row * W                          # output col index
        x_n = (2.0 * j_col + 1.0) / W - 1.0
        y_n = (2.0 * i_row + 1.0) / H - 1.0

        xs = t00 * x_n + t01 * y_n + t02
        ys = t10 * x_n + t11 * y_n + t12
        ix = ((xs + 1.0) * W - 1.0) * 0.5                  # source pixel coords
        iy = ((ys + 1.0) * H - 1.0) * 0.5
        ix0 = jnp.floor(ix)
        iy0 = jnp.floor(iy)
        wx1 = ix - ix0
        wy1 = iy - iy0
        wx0 = 1.0 - wx1
        wy0 = 1.0 - wy1

        # separable one-hot interpolation operators; out-of-range corners never
        # match the [0,H)/[0,W) iota -> contribute 0 (grid_sample zero padding)
        hh = lax.broadcasted_iota(jnp.int32, (H, cw), 0).astype(jnp.float32)
        ww = lax.broadcasted_iota(jnp.int32, (W, cw), 0).astype(jnp.float32)
        ry = jnp.where(hh == iy0, wy0, 0.0) + jnp.where(hh == iy0 + 1.0, wy1, 0.0)
        rx = jnp.where(ww == ix0, wx0, 0.0) + jnp.where(ww == ix0 + 1.0, wx1, 0.0)

        s = jnp.dot(u, rx, preferred_element_type=jnp.float32,
                    precision=lax.Precision.HIGHEST)       # (H, cw)
        out_chunk = jnp.sum(ry * s, axis=0, keepdims=True) # (1, cw)
        o_ref[:, :, start:start + cw] = out_chunk.reshape(1, 1, cw)


def affine_grid_sample(U, theta):
    # U: (B, C, H, W); theta: (B, 6) == row-major flattened (B, 2, 3) affine matrix
    B, C, H, W = U.shape
    assert C == 1, "sampler kernel assumes C == 1"
    HW = H * W
    u2d = U.reshape(B, H, W).astype(jnp.float32)

    out = pl.pallas_call(
        functools.partial(_sampler_kernel, H=H, W=W, chunk=256),
        out_shape=jax.ShapeDtypeStruct((B, 1, HW), jnp.float32),
        grid=(B,),
        in_specs=[
            pl.BlockSpec(memory_space=pltpu.MemorySpace.SMEM),     # theta (B, 6)
            pl.BlockSpec((1, H, W), lambda b: (b, 0, 0)),          # image per batch
        ],
        out_specs=pl.BlockSpec((1, 1, HW), lambda b: (b, 0, 0)),
        compiler_params=pltpu.CompilerParams(dimension_semantics=("parallel",)),
    )(theta.astype(jnp.float32), u2d)
    return out.reshape(B, C, H, W)


# ---------------------------------------------------------------------------
# Parameters (matching the PyTorch module at init) and full forward
# ---------------------------------------------------------------------------
def init_params(key):
    k1, k2, k3, k4, k5, k6 = jax.random.split(key, 6)
    eps = 1e-5
    p = {}
    p["conv1_w"] = 0.1 * jax.random.normal(k1, (8, 1, 5, 5), jnp.float32)
    p["conv1_b"] = 0.1 * jax.random.normal(k2, (8,), jnp.float32)
    p["bn1_scale"] = jnp.ones((8,), jnp.float32) / jnp.sqrt(1.0 + eps)   # gamma/sqrt(var+eps)
    p["bn1_shift"] = jnp.zeros((8,), jnp.float32)                        # beta - mean*scale
    p["conv2_w"] = 0.1 * jax.random.normal(k3, (16, 8, 5, 5), jnp.float32)
    p["conv2_b"] = 0.1 * jax.random.normal(k4, (16,), jnp.float32)
    p["bn2_scale"] = jnp.ones((16,), jnp.float32) / jnp.sqrt(1.0 + eps)
    p["bn2_shift"] = jnp.zeros((16,), jnp.float32)
    p["fc1_w"] = 0.05 * jax.random.normal(k5, (64, 16 * 4 * 4), jnp.float32)
    p["fc1_b"] = 0.05 * jax.random.normal(k6, (64,), jnp.float32)
    # final layer initialised exactly as in the module: zero weight, identity-affine bias
    p["fc2_w"] = jnp.zeros((6, 64), jnp.float32)
    p["fc2_b"] = jnp.array([1.0, 0.0, 0.0, 0.0, 1.0, 0.0], jnp.float32)
    return p


def spatial_transformer_forward(U, params):
    U = U.astype(jnp.float32)
    theta = localisation_fused(U, params)                     # (B, 1, 6) == (B, 2, 3)
    return affine_grid_sample(U, theta.reshape(U.shape[0], 6))


if __name__ == "__main__":
    key = jax.random.PRNGKey(0)
    pkey, xkey = jax.random.split(key)
    params = init_params(pkey)
    # Localisation net requires 1x28x28 inputs (Flatten -> 16*4*4 = 256).
    U = jax.random.normal(xkey, (2, 1, 28, 28), jnp.float32)

    out = jax.block_until_ready(jax.jit(spatial_transformer_forward)(U, params))
    assert out.shape == U.shape, (out.shape, U.shape)

    # The last Linear is zero-weight with identity-affine bias, so theta must be
    # exactly the identity transform (also catches any NaN leaking out of the
    # fused localisation stack).
    theta = jax.block_until_ready(jax.jit(localisation_fused)(U, params))
    ident = jnp.array([1.0, 0.0, 0.0, 0.0, 1.0, 0.0], jnp.float32)
    assert float(jnp.max(jnp.abs(theta.reshape(-1, 6) - ident))) < 1e-4

    # Identity transform -> the sampled image must equal the input up to
    # bilinear floating-point error.
    max_err = float(jnp.max(jnp.abs(out - U)))
    assert max_err < 1e-3, max_err
    print("KERNEL_OK")
</pallas_src>

<mosaic_0001>
module attributes {stable_mosaic.version = 11 : i64} {
  func.func @_localisation_kernel(%arg0: i32, %arg1: memref<1x1x784xf32, #tpu.memory_space<vmem>>, %arg2: memref<8x25xf32, #tpu.memory_space<vmem>>, %arg3: memref<8x1xf32, #tpu.memory_space<vmem>>, %arg4: memref<25x16x8xf32, #tpu.memory_space<vmem>>, %arg5: memref<16x1xf32, #tpu.memory_space<vmem>>, %arg6: memref<349x16xf32, #tpu.memory_space<vmem>>, %arg7: memref<16x16x64xf32, #tpu.memory_space<vmem>>, %arg8: memref<1x64xf32, #tpu.memory_space<vmem>>, %arg9: memref<64x6xf32, #tpu.memory_space<vmem>>, %arg10: memref<1x6xf32, #tpu.memory_space<vmem>>, %arg11: memref<1x1x6xf32, #tpu.memory_space<vmem>>) attributes {dimension_semantics = [#tpu.dimension_semantics<parallel>], iteration_bounds = array<i64: 2>, scalar_prefetch = 0 : i64, scratch_operands = 0 : i64, tpu.core_type = #tpu.core_type<tc>, window_params = [{transform_indices = @transform_0, window_bounds = array<i64: 1, 1, 784>}, {pipeline_mode = #tpu.pipeline_mode<synchronous>, transform_indices = @transform_1, window_bounds = array<i64: 8, 25>}, {pipeline_mode = #tpu.pipeline_mode<synchronous>, transform_indices = @transform_2, window_bounds = array<i64: 8, 1>}, {pipeline_mode = #tpu.pipeline_mode<synchronous>, transform_indices = @transform_3, window_bounds = array<i64: 25, 16, 8>}, {pipeline_mode = #tpu.pipeline_mode<synchronous>, transform_indices = @transform_4, window_bounds = array<i64: 16, 1>}, {pipeline_mode = #tpu.pipeline_mode<synchronous>, transform_indices = @transform_5, window_bounds = array<i64: 349, 16>}, {pipeline_mode = #tpu.pipeline_mode<synchronous>, transform_indices = @transform_6, window_bounds = array<i64: 16, 16, 64>}, {pipeline_mode = #tpu.pipeline_mode<synchronous>, transform_indices = @transform_7, window_bounds = array<i64: 1, 64>}, {pipeline_mode = #tpu.pipeline_mode<synchronous>, transform_indices = @transform_8, window_bounds = array<i64: 64, 6>}, {pipeline_mode = #tpu.pipeline_mode<synchronous>, transform_indices = @transform_9, window_bounds = array<i64: 1, 6>}, {transform_indices = @transform_10, window_bounds = array<i64: 1, 1, 6>}]} {
    %c0 = arith.constant 0 : index
    %c0_0 = arith.constant 0 : index
    %c0_1 = arith.constant 0 : index
    %0 = vector.load %arg1[%c0, %c0_0, %c0_1] : memref<1x1x784xf32, #tpu.memory_space<vmem>>, vector<1x1x784xf32>
    %1 = vector.shape_cast %0 : vector<1x1x784xf32> to vector<1x784xf32>
    %c0_2 = arith.constant 0 : index
    %c0_3 = arith.constant 0 : index
    %2 = vector.load %arg2[%c0_2, %c0_3] : memref<8x25xf32, #tpu.memory_space<vmem>>, vector<8x25xf32>
    %cst = arith.constant 0.000000e+00 : f32
    %3 = vector.broadcast %cst : f32 to vector<8x668xf32>
    %4 = vector.extract_strided_slice %2 {offsets = [0, 0], sizes = [8, 1], strides = [1, 1]} : vector<8x25xf32> to vector<8x1xf32>
    %5 = vector.extract_strided_slice %1 {offsets = [0, 0], sizes = [1, 668], strides = [1, 1]} : vector<1x784xf32> to vector<1x668xf32>
    %6 = vector.broadcast %4 : vector<8x1xf32> to vector<8x668xf32>
    %7 = vector.broadcast %5 : vector<1x668xf32> to vector<8x668xf32>
    %8 = arith.mulf %6, %7 : vector<8x668xf32>
    %9 = arith.addf %3, %8 : vector<8x668xf32>
    %10 = vector.extract_strided_slice %2 {offsets = [0, 1], sizes = [8, 1], strides = [1, 1]} : vector<8x25xf32> to vector<8x1xf32>
    %11 = vector.extract_strided_slice %1 {offsets = [0, 1], sizes = [1, 668], strides = [1, 1]} : vector<1x784xf32> to vector<1x668xf32>
    %12 = vector.broadcast %10 : vector<8x1xf32> to vector<8x668xf32>
    %13 = vector.broadcast %11 : vector<1x668xf32> to vector<8x668xf32>
    %14 = arith.mulf %12, %13 : vector<8x668xf32>
    %15 = arith.addf %9, %14 : vector<8x668xf32>
    %16 = vector.extract_strided_slice %2 {offsets = [0, 2], sizes = [8, 1], strides = [1, 1]} : vector<8x25xf32> to vector<8x1xf32>
    %17 = vector.extract_strided_slice %1 {offsets = [0, 2], sizes = [1, 668], strides = [1, 1]} : vector<1x784xf32> to vector<1x668xf32>
    %18 = vector.broadcast %16 : vector<8x1xf32> to vector<8x668xf32>
    %19 = vector.broadcast %17 : vector<1x668xf32> to vector<8x668xf32>
    %20 = arith.mulf %18, %19 : vector<8x668xf32>
    %21 = arith.addf %15, %20 : vector<8x668xf32>
    %22 = vector.extract_strided_slice %2 {offsets = [0, 3], sizes = [8, 1], strides = [1, 1]} : vector<8x25xf32> to vector<8x1xf32>
    %23 = vector.extract_strided_slice %1 {offsets = [0, 3], sizes = [1, 668], strides = [1, 1]} : vector<1x784xf32> to vector<1x668xf32>
    %24 = vector.broadcast %22 : vector<8x1xf32> to vector<8x668xf32>
    %25 = vector.broadcast %23 : vector<1x668xf32> to vector<8x668xf32>
    %26 = arith.mulf %24, %25 : vector<8x668xf32>
    %27 = arith.addf %21, %26 : vector<8x668xf32>
    %28 = vector.extract_strided_slice %2 {offsets = [0, 4], sizes = [8, 1], strides = [1, 1]} : vector<8x25xf32> to vector<8x1xf32>
    %29 = vector.extract_strided_slice %1 {offsets = [0, 4], sizes = [1, 668], strides = [1, 1]} : vector<1x784xf32> to vector<1x668xf32>
    %30 = vector.broadcast %28 : vector<8x1xf32> to vector<8x668xf32>
    %31 = vector.broadcast %29 : vector<1x668xf32> to vector<8x668xf32>
    %32 = arith.mulf %30, %31 : vector<8x668xf32>
    %33 = arith.addf %27, %32 : vector<8x668xf32>
    %34 = vector.extract_strided_slice %2 {offsets = [0, 5], sizes = [8, 1], strides = [1, 1]} : vector<8x25xf32> to vector<8x1xf32>
    %35 = vector.extract_strided_slice %1 {offsets = [0, 28], sizes = [1, 668], strides = [1, 1]} : vector<1x784xf32> to vector<1x668xf32>
    %36 = vector.broadcast %34 : vector<8x1xf32> to vector<8x668xf32>
    %37 = vector.broadcast %35 : vector<1x668xf32> to vector<8x668xf32>
    %38 = arith.mulf %36, %37 : vector<8x668xf32>
    %39 = arith.addf %33, %38 : vector<8x668xf32>
    %40 = vector.extract_strided_slice %2 {offsets = [0, 6], sizes = [8, 1], strides = [1, 1]} : vector<8x25xf32> to vector<8x1xf32>
    %41 = vector.extract_strided_slice %1 {offsets = [0, 29], sizes = [1, 668], strides = [1, 1]} : vector<1x784xf32> to vector<1x668xf32>
    %42 = vector.broadcast %40 : vector<8x1xf32> to vector<8x668xf32>
    %43 = vector.broadcast %41 : vector<1x668xf32> to vector<8x668xf32>
    %44 = arith.mulf %42, %43 : vector<8x668xf32>
    %45 = arith.addf %39, %44 : vector<8x668xf32>
    %46 = vector.extract_strided_slice %2 {offsets = [0, 7], sizes = [8, 1], strides = [1, 1]} : vector<8x25xf32> to vector<8x1xf32>
    %47 = vector.extract_strided_slice %1 {offsets = [0, 30], sizes = [1, 668], strides = [1, 1]} : vector<1x784xf32> to vector<1x668xf32>
    %48 = vector.broadcast %46 : vector<8x1xf32> to vector<8x668xf32>
    %49 = vector.broadcast %47 : vector<1x668xf32> to vector<8x668xf32>
    %50 = arith.mulf %48, %49 : vector<8x668xf32>
    %51 = arith.addf %45, %50 : vector<8x668xf32>
    %52 = vector.extract_strided_slice %2 {offsets = [0, 8], sizes = [8, 1], strides = [1, 1]} : vector<8x25xf32> to vector<8x1xf32>
    %53 = vector.extract_strided_slice %1 {offsets = [0, 31], sizes = [1, 668], strides = [1, 1]} : vector<1x784xf32> to vector<1x668xf32>
    %54 = vector.broadcast %52 : vector<8x1xf32> to vector<8x668xf32>
    %55 = vector.broadcast %53 : vector<1x668xf32> to vector<8x668xf32>
    %56 = arith.mulf %54, %55 : vector<8x668xf32>
    %57 = arith.addf %51, %56 : vector<8x668xf32>
    %58 = vector.extract_strided_slice %2 {offsets = [0, 9], sizes = [8, 1], strides = [1, 1]} : vector<8x25xf32> to vector<8x1xf32>
    %59 = vector.extract_strided_slice %1 {offsets = [0, 32], sizes = [1, 668], strides = [1, 1]} : vector<1x784xf32> to vector<1x668xf32>
    %60 = vector.broadcast %58 : vector<8x1xf32> to vector<8x668xf32>
    %61 = vector.broadcast %59 : vector<1x668xf32> to vector<8x668xf32>
    %62 = arith.mulf %60, %61 : vector<8x668xf32>
    %63 = arith.addf %57, %62 : vector<8x668xf32>
    %64 = vector.extract_strided_slice %2 {offsets = [0, 10], sizes = [8, 1], strides = [1, 1]} : vector<8x25xf32> to vector<8x1xf32>
    %65 = vector.extract_strided_slice %1 {offsets = [0, 56], sizes = [1, 668], strides = [1, 1]} : vector<1x784xf32> to vector<1x668xf32>
    %66 = vector.broadcast %64 : vector<8x1xf32> to vector<8x668xf32>
    %67 = vector.broadcast %65 : vector<1x668xf32> to vector<8x668xf32>
    %68 = arith.mulf %66, %67 : vector<8x668xf32>
    %69 = arith.addf %63, %68 : vector<8x668xf32>
    %70 = vector.extract_strided_slice %2 {offsets = [0, 11], sizes = [8, 1], strides = [1, 1]} : vector<8x25xf32> to vector<8x1xf32>
    %71 = vector.extract_strided_slice %1 {offsets = [0, 57], sizes = [1, 668], strides = [1, 1]} : vector<1x784xf32> to vector<1x668xf32>
    %72 = vector.broadcast %70 : vector<8x1xf32> to vector<8x668xf32>
    %73 = vector.broadcast %71 : vector<1x668xf32> to vector<8x668xf32>
    %74 = arith.mulf %72, %73 : vector<8x668xf32>
    %75 = arith.addf %69, %74 : vector<8x668xf32>
    %76 = vector.extract_strided_slice %2 {offsets = [0, 12], sizes = [8, 1], strides = [1, 1]} : vector<8x25xf32> to vector<8x1xf32>
    %77 = vector.extract_strided_slice %1 {offsets = [0, 58], sizes = [1, 668], strides = [1, 1]} : vector<1x784xf32> to vector<1x668xf32>
    %78 = vector.broadcast %76 : vector<8x1xf32> to vector<8x668xf32>
    %79 = vector.broadcast %77 : vector<1x668xf32> to vector<8x668xf32>
    %80 = arith.mulf %78, %79 : vector<8x668xf32>
    %81 = arith.addf %75, %80 : vector<8x668xf32>
    %82 = vector.extract_strided_slice %2 {offsets = [0, 13], sizes = [8, 1], strides = [1, 1]} : vector<8x25xf32> to vector<8x1xf32>
    %83 = vector.extract_strided_slice %1 {offsets = [0, 59], sizes = [1, 668], strides = [1, 1]} : vector<1x784xf32> to vector<1x668xf32>
    %84 = vector.broadcast %82 : vector<8x1xf32> to vector<8x668xf32>
    %85 = vector.broadcast %83 : vector<1x668xf32> to vector<8x668xf32>
    %86 = arith.mulf %84, %85 : vector<8x668xf32>
    %87 = arith.addf %81, %86 : vector<8x668xf32>
    %88 = vector.extract_strided_slice %2 {offsets = [0, 14], sizes = [8, 1], strides = [1, 1]} : vector<8x25xf32> to vector<8x1xf32>
    %89 = vector.extract_strided_slice %1 {offsets = [0, 60], sizes = [1, 668], strides = [1, 1]} : vector<1x784xf32> to vector<1x668xf32>
    %90 = vector.broadcast %88 : vector<8x1xf32> to vector<8x668xf32>
    %91 = vector.broadcast %89 : vector<1x668xf32> to vector<8x668xf32>
    %92 = arith.mulf %90, %91 : vector<8x668xf32>
    %93 = arith.addf %87, %92 : vector<8x668xf32>
    %94 = vector.extract_strided_slice %2 {offsets = [0, 15], sizes = [8, 1], strides = [1, 1]} : vector<8x25xf32> to vector<8x1xf32>
    %95 = vector.extract_strided_slice %1 {offsets = [0, 84], sizes = [1, 668], strides = [1, 1]} : vector<1x784xf32> to vector<1x668xf32>
    %96 = vector.broadcast %94 : vector<8x1xf32> to vector<8x668xf32>
    %97 = vector.broadcast %95 : vector<1x668xf32> to vector<8x668xf32>
    %98 = arith.mulf %96, %97 : vector<8x668xf32>
    %99 = arith.addf %93, %98 : vector<8x668xf32>
    %100 = vector.extract_strided_slice %2 {offsets = [0, 16], sizes = [8, 1], strides = [1, 1]} : vector<8x25xf32> to vector<8x1xf32>
    %101 = vector.extract_strided_slice %1 {offsets = [0, 85], sizes = [1, 668], strides = [1, 1]} : vector<1x784xf32> to vector<1x668xf32>
    %102 = vector.broadcast %100 : vector<8x1xf32> to vector<8x668xf32>
    %103 = vector.broadcast %101 : vector<1x668xf32> to vector<8x668xf32>
    %104 = arith.mulf %102, %103 : vector<8x668xf32>
    %105 = arith.addf %99, %104 : vector<8x668xf32>
    %106 = vector.extract_strided_slice %2 {offsets = [0, 17], sizes = [8, 1], strides = [1, 1]} : vector<8x25xf32> to vector<8x1xf32>
    %107 = vector.extract_strided_slice %1 {offsets = [0, 86], sizes = [1, 668], strides = [1, 1]} : vector<1x784xf32> to vector<1x668xf32>
    %108 = vector.broadcast %106 : vector<8x1xf32> to vector<8x668xf32>
    %109 = vector.broadcast %107 : vector<1x668xf32> to vector<8x668xf32>
    %110 = arith.mulf %108, %109 : vector<8x668xf32>
    %111 = arith.addf %105, %110 : vector<8x668xf32>
    %112 = vector.extract_strided_slice %2 {offsets = [0, 18], sizes = [8, 1], strides = [1, 1]} : vector<8x25xf32> to vector<8x1xf32>
    %113 = vector.extract_strided_slice %1 {offsets = [0, 87], sizes = [1, 668], strides = [1, 1]} : vector<1x784xf32> to vector<1x668xf32>
    %114 = vector.broadcast %112 : vector<8x1xf32> to vector<8x668xf32>
    %115 = vector.broadcast %113 : vector<1x668xf32> to vector<8x668xf32>
    %116 = arith.mulf %114, %115 : vector<8x668xf32>
    %117 = arith.addf %111, %116 : vector<8x668xf32>
    %118 = vector.extract_strided_slice %2 {offsets = [0, 19], sizes = [8, 1], strides = [1, 1]} : vector<8x25xf32> to vector<8x1xf32>
    %119 = vector.extract_strided_slice %1 {offsets = [0, 88], sizes = [1, 668], strides = [1, 1]} : vector<1x784xf32> to vector<1x668xf32>
    %120 = vector.broadcast %118 : vector<8x1xf32> to vector<8x668xf32>
    %121 = vector.broadcast %119 : vector<1x668xf32> to vector<8x668xf32>
    %122 = arith.mulf %120, %121 : vector<8x668xf32>
    %123 = arith.addf %117, %122 : vector<8x668xf32>
    %124 = vector.extract_strided_slice %2 {offsets = [0, 20], sizes = [8, 1], strides = [1, 1]} : vector<8x25xf32> to vector<8x1xf32>
    %125 = vector.extract_strided_slice %1 {offsets = [0, 112], sizes = [1, 668], strides = [1, 1]} : vector<1x784xf32> to vector<1x668xf32>
    %126 = vector.broadcast %124 : vector<8x1xf32> to vector<8x668xf32>
    %127 = vector.broadcast %125 : vector<1x668xf32> to vector<8x668xf32>
    %128 = arith.mulf %126, %127 : vector<8x668xf32>
    %129 = arith.addf %123, %128 : vector<8x668xf32>
    %130 = vector.extract_strided_slice %2 {offsets = [0, 21], sizes = [8, 1], strides = [1, 1]} : vector<8x25xf32> to vector<8x1xf32>
    %131 = vector.extract_strided_slice %1 {offsets = [0, 113], sizes = [1, 668], strides = [1, 1]} : vector<1x784xf32> to vector<1x668xf32>
    %132 = vector.broadcast %130 : vector<8x1xf32> to vector<8x668xf32>
    %133 = vector.broadcast %131 : vector<1x668xf32> to vector<8x668xf32>
    %134 = arith.mulf %132, %133 : vector<8x668xf32>
    %135 = arith.addf %129, %134 : vector<8x668xf32>
    %136 = vector.extract_strided_slice %2 {offsets = [0, 22], sizes = [8, 1], strides = [1, 1]} : vector<8x25xf32> to vector<8x1xf32>
    %137 = vector.extract_strided_slice %1 {offsets = [0, 114], sizes = [1, 668], strides = [1, 1]} : vector<1x784xf32> to vector<1x668xf32>
    %138 = vector.broadcast %136 : vector<8x1xf32> to vector<8x668xf32>
    %139 = vector.broadcast %137 : vector<1x668xf32> to vector<8x668xf32>
    %140 = arith.mulf %138, %139 : vector<8x668xf32>
    %141 = arith.addf %135, %140 : vector<8x668xf32>
    %142 = vector.extract_strided_slice %2 {offsets = [0, 23], sizes = [8, 1], strides = [1, 1]} : vector<8x25xf32> to vector<8x1xf32>
    %143 = vector.extract_strided_slice %1 {offsets = [0, 115], sizes = [1, 668], strides = [1, 1]} : vector<1x784xf32> to vector<1x668xf32>
    %144 = vector.broadcast %142 : vector<8x1xf32> to vector<8x668xf32>
    %145 = vector.broadcast %143 : vector<1x668xf32> to vector<8x668xf32>
    %146 = arith.mulf %144, %145 : vector<8x668xf32>
    %147 = arith.addf %141, %146 : vector<8x668xf32>
    %148 = vector.extract_strided_slice %2 {offsets = [0, 24], sizes = [8, 1], strides = [1, 1]} : vector<8x25xf32> to vector<8x1xf32>
    %149 = vector.extract_strided_slice %1 {offsets = [0, 116], sizes = [1, 668], strides = [1, 1]} : vector<1x784xf32> to vector<1x668xf32>
    %150 = vector.broadcast %148 : vector<8x1xf32> to vector<8x668xf32>
    %151 = vector.broadcast %149 : vector<1x668xf32> to vector<8x668xf32>
    %152 = arith.mulf %150, %151 : vector<8x668xf32>
    %153 = arith.addf %147, %152 : vector<8x668xf32>
    %c0_4 = arith.constant 0 : index
    %c0_5 = arith.constant 0 : index
    %154 = vector.load %arg3[%c0_4, %c0_5] : memref<8x1xf32, #tpu.memory_space<vmem>>, vector<8x1xf32>
    %155 = vector.broadcast %154 : vector<8x1xf32> to vector<8x668xf32>
    %156 = arith.addf %153, %155 : vector<8x668xf32>
    %cst_6 = arith.constant 0.000000e+00 : f32
    %157 = vector.broadcast %cst_6 : f32 to vector<8x668xf32>
    %158 = arith.maximumf %156, %157 : vector<8x668xf32>
    %159 = vector.extract_strided_slice %158 {offsets = [0, 0], sizes = [8, 639], strides = [1, 1]} : vector<8x668xf32> to vector<8x639xf32>
    %160 = vector.extract_strided_slice %158 {offsets = [0, 1], sizes = [8, 639], strides = [1, 1]} : vector<8x668xf32> to vector<8x639xf32>
    %161 = arith.maximumf %159, %160 : vector<8x639xf32>
    %162 = vector.extract_strided_slice %158 {offsets = [0, 28], sizes = [8, 639], strides = [1, 1]} : vector<8x668xf32> to vector<8x639xf32>
    %163 = vector.extract_strided_slice %158 {offsets = [0, 29], sizes = [8, 639], strides = [1, 1]} : vector<8x668xf32> to vector<8x639xf32>
    %164 = arith.maximumf %162, %163 : vector<8x639xf32>
    %165 = arith.maximumf %161, %164 : vector<8x639xf32>
    %cst_7 = arith.constant 0.000000e+00 : f32
    %166 = vector.broadcast %cst_7 : f32 to vector<16x407xf32>
    %c0_8 = arith.constant 0 : index
    %c0_9 = arith.constant 0 : index
    %c0_10 = arith.constant 0 : index
    %167 = vector.load %arg4[%c0_8, %c0_9, %c0_10] : memref<25x16x8xf32, #tpu.memory_space<vmem>>, vector<1x16x8xf32>
    %168 = vector.shape_cast %167 : vector<1x16x8xf32> to vector<16x8xf32>
    %169 = vector.extract_strided_slice %165 {offsets = [0, 0], sizes = [8, 407], strides = [1, 1]} : vector<8x639xf32> to vector<8x407xf32>
    %cst_11 = arith.constant dense<0.000000e+00> : vector<16x407xf32>
    %170 = tpu.matmul %168, %169, %cst_11 {dimension_numbers = #tpu.dot_dimension_numbers<[1], [0], [0], [1], [0, 0, 1, 1], [], []>} : vector<16x8xf32>, vector<8x407xf32>, vector<16x407xf32> -> vector<16x407xf32>
    %171 = arith.addf %166, %170 : vector<16x407xf32>
    %c1 = arith.constant 1 : index
    %c0_12 = arith.constant 0 : index
    %c0_13 = arith.constant 0 : index
    %172 = vector.load %arg4[%c1, %c0_12, %c0_13] : memref<25x16x8xf32, #tpu.memory_space<vmem>>, vector<1x16x8xf32>
    %173 = vector.shape_cast %172 : vector<1x16x8xf32> to vector<16x8xf32>
    %174 = vector.extract_strided_slice %165 {offsets = [0, 2], sizes = [8, 407], strides = [1, 1]} : vector<8x639xf32> to vector<8x407xf32>
    %cst_14 = arith.constant dense<0.000000e+00> : vector<16x407xf32>
    %175 = tpu.matmul %173, %174, %cst_14 {dimension_numbers = #tpu.dot_dimension_numbers<[1], [0], [0], [1], [0, 0, 1, 1], [], []>} : vector<16x8xf32>, vector<8x407xf32>, vector<16x407xf32> -> vector<16x407xf32>
    %176 = arith.addf %171, %175 : vector<16x407xf32>
    %c2 = arith.constant 2 : index
    %c0_15 = arith.constant 0 : index
    %c0_16 = arith.constant 0 : index
    %177 = vector.load %arg4[%c2, %c0_15, %c0_16] : memref<25x16x8xf32, #tpu.memory_space<vmem>>, vector<1x16x8xf32>
    %178 = vector.shape_cast %177 : vector<1x16x8xf32> to vector<16x8xf32>
    %179 = vector.extract_strided_slice %165 {offsets = [0, 4], sizes = [8, 407], strides = [1, 1]} : vector<8x639xf32> to vector<8x407xf32>
    %cst_17 = arith.constant dense<0.000000e+00> : vector<16x407xf32>
    %180 = tpu.matmul %178, %179, %cst_17 {dimension_numbers = #tpu.dot_dimension_numbers<[1], [0], [0], [1], [0, 0, 1, 1], [], []>} : vector<16x8xf32>, vector<8x407xf32>, vector<16x407xf32> -> vector<16x407xf32>
    %181 = arith.addf %176, %180 : vector<16x407xf32>
    %c3 = arith.constant 3 : index
    %c0_18 = arith.constant 0 : index
    %c0_19 = arith.constant 0 : index
    %182 = vector.load %arg4[%c3, %c0_18, %c0_19] : memref<25x16x8xf32, #tpu.memory_space<vmem>>, vector<1x16x8xf32>
    %183 = vector.shape_cast %182 : vector<1x16x8xf32> to vector<16x8xf32>
    %184 = vector.extract_strided_slice %165 {offsets = [0, 6], sizes = [8, 407], strides = [1, 1]} : vector<8x639xf32> to vector<8x407xf32>
    %cst_20 = arith.constant dense<0.000000e+00> : vector<16x407xf32>
    %185 = tpu.matmul %183, %184, %cst_20 {dimension_numbers = #tpu.dot_dimension_numbers<[1], [0], [0], [1], [0, 0, 1, 1], [], []>} : vector<16x8xf32>, vector<8x407xf32>, vector<16x407xf32> -> vector<16x407xf32>
    %186 = arith.addf %181, %185 : vector<16x407xf32>
    %c4 = arith.constant 4 : index
    %c0_21 = arith.constant 0 : index
    %c0_22 = arith.constant 0 : index
    %187 = vector.load %arg4[%c4, %c0_21, %c0_22] : memref<25x16x8xf32, #tpu.memory_space<vmem>>, vector<1x16x8xf32>
    %188 = vector.shape_cast %187 : vector<1x16x8xf32> to vector<16x8xf32>
    %189 = vector.extract_strided_slice %165 {offsets = [0, 8], sizes = [8, 407], strides = [1, 1]} : vector<8x639xf32> to vector<8x407xf32>
    %cst_23 = arith.constant dense<0.000000e+00> : vector<16x407xf32>
    %190 = tpu.matmul %188, %189, %cst_23 {dimension_numbers = #tpu.dot_dimension_numbers<[1], [0], [0], [1], [0, 0, 1, 1], [], []>} : vector<16x8xf32>, vector<8x407xf32>, vector<16x407xf32> -> vector<16x407xf32>
    %191 = arith.addf %186, %190 : vector<16x407xf32>
    %c5 = arith.constant 5 : index
    %c0_24 = arith.constant 0 : index
    %c0_25 = arith.constant 0 : index
    %192 = vector.load %arg4[%c5, %c0_24, %c0_25] : memref<25x16x8xf32, #tpu.memory_space<vmem>>, vector<1x16x8xf32>
    %193 = vector.shape_cast %192 : vector<1x16x8xf32> to vector<16x8xf32>
    %194 = vector.extract_strided_slice %165 {offsets = [0, 56], sizes = [8, 407], strides = [1, 1]} : vector<8x639xf32> to vector<8x407xf32>
    %cst_26 = arith.constant dense<0.000000e+00> : vector<16x407xf32>
    %195 = tpu.matmul %193, %194, %cst_26 {dimension_numbers = #tpu.dot_dimension_numbers<[1], [0], [0], [1], [0, 0, 1, 1], [], []>} : vector<16x8xf32>, vector<8x407xf32>, vector<16x407xf32> -> vector<16x407xf32>
    %196 = arith.addf %191, %195 : vector<16x407xf32>
    %c6 = arith.constant 6 : index
    %c0_27 = arith.constant 0 : index
    %c0_28 = arith.constant 0 : index
    %197 = vector.load %arg4[%c6, %c0_27, %c0_28] : memref<25x16x8xf32, #tpu.memory_space<vmem>>, vector<1x16x8xf32>
    %198 = vector.shape_cast %197 : vector<1x16x8xf32> to vector<16x8xf32>
    %199 = vector.extract_strided_slice %165 {offsets = [0, 58], sizes = [8, 407], strides = [1, 1]} : vector<8x639xf32> to vector<8x407xf32>
    %cst_29 = arith.constant dense<0.000000e+00> : vector<16x407xf32>
    %200 = tpu.matmul %198, %199, %cst_29 {dimension_numbers = #tpu.dot_dimension_numbers<[1], [0], [0], [1], [0, 0, 1, 1], [], []>} : vector<16x8xf32>, vector<8x407xf32>, vector<16x407xf32> -> vector<16x407xf32>
    %201 = arith.addf %196, %200 : vector<16x407xf32>
    %c7 = arith.constant 7 : index
    %c0_30 = arith.constant 0 : index
    %c0_31 = arith.constant 0 : index
    %202 = vector.load %arg4[%c7, %c0_30, %c0_31] : memref<25x16x8xf32, #tpu.memory_space<vmem>>, vector<1x16x8xf32>
    %203 = vector.shape_cast %202 : vector<1x16x8xf32> to vector<16x8xf32>
    %204 = vector.extract_strided_slice %165 {offsets = [0, 60], sizes = [8, 407], strides = [1, 1]} : vector<8x639xf32> to vector<8x407xf32>
    %cst_32 = arith.constant dense<0.000000e+00> : vector<16x407xf32>
    %205 = tpu.matmul %203, %204, %cst_32 {dimension_numbers = #tpu.dot_dimension_numbers<[1], [0], [0], [1], [0, 0, 1, 1], [], []>} : vector<16x8xf32>, vector<8x407xf32>, vector<16x407xf32> -> vector<16x407xf32>
    %206 = arith.addf %201, %205 : vector<16x407xf32>
    %c8 = arith.constant 8 : index
    %c0_33 = arith.constant 0 : index
    %c0_34 = arith.constant 0 : index
    %207 = vector.load %arg4[%c8, %c0_33, %c0_34] : memref<25x16x8xf32, #tpu.memory_space<vmem>>, vector<1x16x8xf32>
    %208 = vector.shape_cast %207 : vector<1x16x8xf32> to vector<16x8xf32>
    %209 = vector.extract_strided_slice %165 {offsets = [0, 62], sizes = [8, 407], strides = [1, 1]} : vector<8x639xf32> to vector<8x407xf32>
    %cst_35 = arith.constant dense<0.000000e+00> : vector<16x407xf32>
    %210 = tpu.matmul %208, %209, %cst_35 {dimension_numbers = #tpu.dot_dimension_numbers<[1], [0], [0], [1], [0, 0, 1, 1], [], []>} : vector<16x8xf32>, vector<8x407xf32>, vector<16x407xf32> -> vector<16x407xf32>
    %211 = arith.addf %206, %210 : vector<16x407xf32>
    %c9 = arith.constant 9 : index
    %c0_36 = arith.constant 0 : index
    %c0_37 = arith.constant 0 : index
    %212 = vector.load %arg4[%c9, %c0_36, %c0_37] : memref<25x16x8xf32, #tpu.memory_space<vmem>>, vector<1x16x8xf32>
    %213 = vector.shape_cast %212 : vector<1x16x8xf32> to vector<16x8xf32>
    %214 = vector.extract_strided_slice %165 {offsets = [0, 64], sizes = [8, 407], strides = [1, 1]} : vector<8x639xf32> to vector<8x407xf32>
    %cst_38 = arith.constant dense<0.000000e+00> : vector<16x407xf32>
    %215 = tpu.matmul %213, %214, %cst_38 {dimension_numbers = #tpu.dot_dimension_numbers<[1], [0], [0], [1], [0, 0, 1, 1], [], []>} : vector<16x8xf32>, vector<8x407xf32>, vector<16x407xf32> -> vector<16x407xf32>
    %216 = arith.addf %211, %215 : vector<16x407xf32>
    %c10 = arith.constant 10 : index
    %c0_39 = arith.constant 0 : index
    %c0_40 = arith.constant 0 : index
    %217 = vector.load %arg4[%c10, %c0_39, %c0_40] : memref<25x16x8xf32, #tpu.memory_space<vmem>>, vector<1x16x8xf32>
    %218 = vector.shape_cast %217 : vector<1x16x8xf32> to vector<16x8xf32>
    %219 = vector.extract_strided_slice %165 {offsets = [0, 112], sizes = [8, 407], strides = [1, 1]} : vector<8x639xf32> to vector<8x407xf32>
    %cst_41 = arith.constant dense<0.000000e+00> : vector<16x407xf32>
    %220 = tpu.matmul %218, %219, %cst_41 {dimension_numbers = #tpu.dot_dimension_numbers<[1], [0], [0], [1], [0, 0, 1, 1], [], []>} : vector<16x8xf32>, vector<8x407xf32>, vector<16x407xf32> -> vector<16x407xf32>
    %221 = arith.addf %216, %220 : vector<16x407xf32>
    %c11 = arith.constant 11 : index
    %c0_42 = arith.constant 0 : index
    %c0_43 = arith.constant 0 : index
    %222 = vector.load %arg4[%c11, %c0_42, %c0_43] : memref<25x16x8xf32, #tpu.memory_space<vmem>>, vector<1x16x8xf32>
    %223 = vector.shape_cast %222 : vector<1x16x8xf32> to vector<16x8xf32>
    %224 = vector.extract_strided_slice %165 {offsets = [0, 114], sizes = [8, 407], strides = [1, 1]} : vector<8x639xf32> to vector<8x407xf32>
    %cst_44 = arith.constant dense<0.000000e+00> : vector<16x407xf32>
    %225 = tpu.matmul %223, %224, %cst_44 {dimension_numbers = #tpu.dot_dimension_numbers<[1], [0], [0], [1], [0, 0, 1, 1], [], []>} : vector<16x8xf32>, vector<8x407xf32>, vector<16x407xf32> -> vector<16x407xf32>
    %226 = arith.addf %221, %225 : vector<16x407xf32>
    %c12 = arith.constant 12 : index
    %c0_45 = arith.constant 0 : index
    %c0_46 = arith.constant 0 : index
    %227 = vector.load %arg4[%c12, %c0_45, %c0_46] : memref<25x16x8xf32, #tpu.memory_space<vmem>>, vector<1x16x8xf32>
    %228 = vector.shape_cast %227 : vector<1x16x8xf32> to vector<16x8xf32>
    %229 = vector.extract_strided_slice %165 {offsets = [0, 116], sizes = [8, 407], strides = [1, 1]} : vector<8x639xf32> to vector<8x407xf32>
    %cst_47 = arith.constant dense<0.000000e+00> : vector<16x407xf32>
    %230 = tpu.matmul %228, %229, %cst_47 {dimension_numbers = #tpu.dot_dimension_numbers<[1], [0], [0], [1], [0, 0, 1, 1], [], []>} : vector<16x8xf32>, vector<8x407xf32>, vector<16x407xf32> -> vector<16x407xf32>
    %231 = arith.addf %226, %230 : vector<16x407xf32>
    %c13 = arith.constant 13 : index
    %c0_48 = arith.constant 0 : index
    %c0_49 = arith.constant 0 : index
    %232 = vector.load %arg4[%c13, %c0_48, %c0_49] : memref<25x16x8xf32, #tpu.memory_space<vmem>>, vector<1x16x8xf32>
    %233 = vector.shape_cast %232 : vector<1x16x8xf32> to vector<16x8xf32>
    %234 = vector.extract_strided_slice %165 {offsets = [0, 118], sizes = [8, 407], strides = [1, 1]} : vector<8x639xf32> to vector<8x407xf32>
    %cst_50 = arith.constant dense<0.000000e+00> : vector<16x407xf32>
    %235 = tpu.matmul %233, %234, %cst_50 {dimension_numbers = #tpu.dot_dimension_numbers<[1], [0], [0], [1], [0, 0, 1, 1], [], []>} : vector<16x8xf32>, vector<8x407xf32>, vector<16x407xf32> -> vector<16x407xf32>
    %236 = arith.addf %231, %235 : vector<16x407xf32>
    %c14 = arith.constant 14 : index
    %c0_51 = arith.constant 0 : index
    %c0_52 = arith.constant 0 : index
    %237 = vector.load %arg4[%c14, %c0_51, %c0_52] : memref<25x16x8xf32, #tpu.memory_space<vmem>>, vector<1x16x8xf32>
    %238 = vector.shape_cast %237 : vector<1x16x8xf32> to vector<16x8xf32>
    %239 = vector.extract_strided_slice %165 {offsets = [0, 120], sizes = [8, 407], strides = [1, 1]} : vector<8x639xf32> to vector<8x407xf32>
    %cst_53 = arith.constant dense<0.000000e+00> : vector<16x407xf32>
    %240 = tpu.matmul %238, %239, %cst_53 {dimension_numbers = #tpu.dot_dimension_numbers<[1], [0], [0], [1], [0, 0, 1, 1], [], []>} : vector<16x8xf32>, vector<8x407xf32>, vector<16x407xf32> -> vector<16x407xf32>
    %241 = arith.addf %236, %240 : vector<16x407xf32>
    %c15 = arith.constant 15 : index
    %c0_54 = arith.constant 0 : index
    %c0_55 = arith.constant 0 : index
    %242 = vector.load %arg4[%c15, %c0_54, %c0_55] : memref<25x16x8xf32, #tpu.memory_space<vmem>>, vector<1x16x8xf32>
    %243 = vector.shape_cast %242 : vector<1x16x8xf32> to vector<16x8xf32>
    %244 = vector.extract_strided_slice %165 {offsets = [0, 168], sizes = [8, 407], strides = [1, 1]} : vector<8x639xf32> to vector<8x407xf32>
    %cst_56 = arith.constant dense<0.000000e+00> : vector<16x407xf32>
    %245 = tpu.matmul %243, %244, %cst_56 {dimension_numbers = #tpu.dot_dimension_numbers<[1], [0], [0], [1], [0, 0, 1, 1], [], []>} : vector<16x8xf32>, vector<8x407xf32>, vector<16x407xf32> -> vector<16x407xf32>
    %246 = arith.addf %241, %245 : vector<16x407xf32>
    %c16 = arith.constant 16 : index
    %c0_57 = arith.constant 0 : index
    %c0_58 = arith.constant 0 : index
    %247 = vector.load %arg4[%c16, %c0_57, %c0_58] : memref<25x16x8xf32, #tpu.memory_space<vmem>>, vector<1x16x8xf32>
    %248 = vector.shape_cast %247 : vector<1x16x8xf32> to vector<16x8xf32>
    %249 = vector.extract_strided_slice %165 {offsets = [0, 170], sizes = [8, 407], strides = [1, 1]} : vector<8x639xf32> to vector<8x407xf32>
    %cst_59 = arith.constant dense<0.000000e+00> : vector<16x407xf32>
    %250 = tpu.matmul %248, %249, %cst_59 {dimension_numbers = #tpu.dot_dimension_numbers<[1], [0], [0], [1], [0, 0, 1, 1], [], []>} : vector<16x8xf32>, vector<8x407xf32>, vector<16x407xf32> -> vector<16x407xf32>
    %251 = arith.addf %246, %250 : vector<16x407xf32>
    %c17 = arith.constant 17 : index
    %c0_60 = arith.constant 0 : index
    %c0_61 = arith.constant 0 : index
    %252 = vector.load %arg4[%c17, %c0_60, %c0_61] : memref<25x16x8xf32, #tpu.memory_space<vmem>>, vector<1x16x8xf32>
    %253 = vector.shape_cast %252 : vector<1x16x8xf32> to vector<16x8xf32>
    %254 = vector.extract_strided_slice %165 {offsets = [0, 172], sizes = [8, 407], strides = [1, 1]} : vector<8x639xf32> to vector<8x407xf32>
    %cst_62 = arith.constant dense<0.000000e+00> : vector<16x407xf32>
    %255 = tpu.matmul %253, %254, %cst_62 {dimension_numbers = #tpu.dot_dimension_numbers<[1], [0], [0], [1], [0, 0, 1, 1], [], []>} : vector<16x8xf32>, vector<8x407xf32>, vector<16x407xf32> -> vector<16x407xf32>
    %256 = arith.addf %251, %255 : vector<16x407xf32>
    %c18 = arith.constant 18 : index
    %c0_63 = arith.constant 0 : index
    %c0_64 = arith.constant 0 : index
    %257 = vector.load %arg4[%c18, %c0_63, %c0_64] : memref<25x16x8xf32, #tpu.memory_space<vmem>>, vector<1x16x8xf32>
    %258 = vector.shape_cast %257 : vector<1x16x8xf32> to vector<16x8xf32>
    %259 = vector.extract_strided_slice %165 {offsets = [0, 174], sizes = [8, 407], strides = [1, 1]} : vector<8x639xf32> to vector<8x407xf32>
    %cst_65 = arith.constant dense<0.000000e+00> : vector<16x407xf32>
    %260 = tpu.matmul %258, %259, %cst_65 {dimension_numbers = #tpu.dot_dimension_numbers<[1], [0], [0], [1], [0, 0, 1, 1], [], []>} : vector<16x8xf32>, vector<8x407xf32>, vector<16x407xf32> -> vector<16x407xf32>
    %261 = arith.addf %256, %260 : vector<16x407xf32>
    %c19 = arith.constant 19 : index
    %c0_66 = arith.constant 0 : index
    %c0_67 = arith.constant 0 : index
    %262 = vector.load %arg4[%c19, %c0_66, %c0_67] : memref<25x16x8xf32, #tpu.memory_space<vmem>>, vector<1x16x8xf32>
    %263 = vector.shape_cast %262 : vector<1x16x8xf32> to vector<16x8xf32>
    %264 = vector.extract_strided_slice %165 {offsets = [0, 176], sizes = [8, 407], strides = [1, 1]} : vector<8x639xf32> to vector<8x407xf32>
    %cst_68 = arith.constant dense<0.000000e+00> : vector<16x407xf32>
    %265 = tpu.matmul %263, %264, %cst_68 {dimension_numbers = #tpu.dot_dimension_numbers<[1], [0], [0], [1], [0, 0, 1, 1], [], []>} : vector<16x8xf32>, vector<8x407xf32>, vector<16x407xf32> -> vector<16x407xf32>
    %266 = arith.addf %261, %265 : vector<16x407xf32>
    %c20 = arith.constant 20 : index
    %c0_69 = arith.constant 0 : index
    %c0_70 = arith.constant 0 : index
    %267 = vector.load %arg4[%c20, %c0_69, %c0_70] : memref<25x16x8xf32, #tpu.memory_space<vmem>>, vector<1x16x8xf32>
    %268 = vector.shape_cast %267 : vector<1x16x8xf32> to vector<16x8xf32>
    %269 = vector.extract_strided_slice %165 {offsets = [0, 224], sizes = [8, 407], strides = [1, 1]} : vector<8x639xf32> to vector<8x407xf32>
    %cst_71 = arith.constant dense<0.000000e+00> : vector<16x407xf32>
    %270 = tpu.matmul %268, %269, %cst_71 {dimension_numbers = #tpu.dot_dimension_numbers<[1], [0], [0], [1], [0, 0, 1, 1], [], []>} : vector<16x8xf32>, vector<8x407xf32>, vector<16x407xf32> -> vector<16x407xf32>
    %271 = arith.addf %266, %270 : vector<16x407xf32>
    %c21 = arith.constant 21 : index
    %c0_72 = arith.constant 0 : index
    %c0_73 = arith.constant 0 : index
    %272 = vector.load %arg4[%c21, %c0_72, %c0_73] : memref<25x16x8xf32, #tpu.memory_space<vmem>>, vector<1x16x8xf32>
    %273 = vector.shape_cast %272 : vector<1x16x8xf32> to vector<16x8xf32>
    %274 = vector.extract_strided_slice %165 {offsets = [0, 226], sizes = [8, 407], strides = [1, 1]} : vector<8x639xf32> to vector<8x407xf32>
    %cst_74 = arith.constant dense<0.000000e+00> : vector<16x407xf32>
    %275 = tpu.matmul %273, %274, %cst_74 {dimension_numbers = #tpu.dot_dimension_numbers<[1], [0], [0], [1], [0, 0, 1, 1], [], []>} : vector<16x8xf32>, vector<8x407xf32>, vector<16x407xf32> -> vector<16x407xf32>
    %276 = arith.addf %271, %275 : vector<16x407xf32>
    %c22 = arith.constant 22 : index
    %c0_75 = arith.constant 0 : index
    %c0_76 = arith.constant 0 : index
    %277 = vector.load %arg4[%c22, %c0_75, %c0_76] : memref<25x16x8xf32, #tpu.memory_space<vmem>>, vector<1x16x8xf32>
    %278 = vector.shape_cast %277 : vector<1x16x8xf32> to vector<16x8xf32>
    %279 = vector.extract_strided_slice %165 {offsets = [0, 228], sizes = [8, 407], strides = [1, 1]} : vector<8x639xf32> to vector<8x407xf32>
    %cst_77 = arith.constant dense<0.000000e+00> : vector<16x407xf32>
    %280 = tpu.matmul %278, %279, %cst_77 {dimension_numbers = #tpu.dot_dimension_numbers<[1], [0], [0], [1], [0, 0, 1, 1], [], []>} : vector<16x8xf32>, vector<8x407xf32>, vector<16x407xf32> -> vector<16x407xf32>
    %281 = arith.addf %276, %280 : vector<16x407xf32>
    %c23 = arith.constant 23 : index
    %c0_78 = arith.constant 0 : index
    %c0_79 = arith.constant 0 : index
    %282 = vector.load %arg4[%c23, %c0_78, %c0_79] : memref<25x16x8xf32, #tpu.memory_space<vmem>>, vector<1x16x8xf32>
    %283 = vector.shape_cast %282 : vector<1x16x8xf32> to vector<16x8xf32>
    %284 = vector.extract_strided_slice %165 {offsets = [0, 230], sizes = [8, 407], strides = [1, 1]} : vector<8x639xf32> to vector<8x407xf32>
    %cst_80 = arith.constant dense<0.000000e+00> : vector<16x407xf32>
    %285 = tpu.matmul %283, %284, %cst_80 {dimension_numbers = #tpu.dot_dimension_numbers<[1], [0], [0], [1], [0, 0, 1, 1], [], []>} : vector<16x8xf32>, vector<8x407xf32>, vector<16x407xf32> -> vector<16x407xf32>
    %286 = arith.addf %281, %285 : vector<16x407xf32>
    %c24 = arith.constant 24 : index
    %c0_81 = arith.constant 0 : index
    %c0_82 = arith.constant 0 : index
    %287 = vector.load %arg4[%c24, %c0_81, %c0_82] : memref<25x16x8xf32, #tpu.memory_space<vmem>>, vector<1x16x8xf32>
    %288 = vector.shape_cast %287 : vector<1x16x8xf32> to vector<16x8xf32>
    %289 = vector.extract_strided_slice %165 {offsets = [0, 232], sizes = [8, 407], strides = [1, 1]} : vector<8x639xf32> to vector<8x407xf32>
    %cst_83 = arith.constant dense<0.000000e+00> : vector<16x407xf32>
    %290 = tpu.matmul %288, %289, %cst_83 {dimension_numbers = #tpu.dot_dimension_numbers<[1], [0], [0], [1], [0, 0, 1, 1], [], []>} : vector<16x8xf32>, vector<8x407xf32>, vector<16x407xf32> -> vector<16x407xf32>
    %291 = arith.addf %286, %290 : vector<16x407xf32>
    %c0_84 = arith.constant 0 : index
    %c0_85 = arith.constant 0 : index
    %292 = vector.load %arg5[%c0_84, %c0_85] : memref<16x1xf32, #tpu.memory_space<vmem>>, vector<16x1xf32>
    %293 = vector.broadcast %292 : vector<16x1xf32> to vector<16x407xf32>
    %294 = arith.addf %291, %293 : vector<16x407xf32>
    %cst_86 = arith.constant 0.000000e+00 : f32
    %295 = vector.broadcast %cst_86 : f32 to vector<16x407xf32>
    %296 = arith.maximumf %294, %295 : vector<16x407xf32>
    %297 = vector.extract_strided_slice %296 {offsets = [0, 0], sizes = [16, 349], strides = [1, 1]} : vector<16x407xf32> to vector<16x349xf32>
    %298 = vector.extract_strided_slice %296 {offsets = [0, 2], sizes = [16, 349], strides = [1, 1]} : vector<16x407xf32> to vector<16x349xf32>
    %299 = arith.maximumf %297, %298 : vector<16x349xf32>
    %300 = vector.extract_strided_slice %296 {offsets = [0, 56], sizes = [16, 349], strides = [1, 1]} : vector<16x407xf32> to vector<16x349xf32>
    %301 = vector.extract_strided_slice %296 {offsets = [0, 58], sizes = [16, 349], strides = [1, 1]} : vector<16x407xf32> to vector<16x349xf32>
    %302 = arith.maximumf %300, %301 : vector<16x349xf32>
    %303 = arith.maximumf %299, %302 : vector<16x349xf32>
    %c0_87 = arith.constant 0 : index
    %c0_88 = arith.constant 0 : index
    %304 = vector.load %arg6[%c0_87, %c0_88] : memref<349x16xf32, #tpu.memory_space<vmem>>, vector<349x16xf32>
    %cst_89 = arith.constant dense<0.000000e+00> : vector<16x16xf32>
    %305 = tpu.matmul %303, %304, %cst_89 {dimension_numbers = #tpu.dot_dimension_numbers<[1], [0], [0], [1], [0, 0, 1, 1], [], []>} : vector<16x349xf32>, vector<349x16xf32>, vector<16x16xf32> -> vector<16x16xf32>
    %c0_90 = arith.constant 0 : index
    %c0_91 = arith.constant 0 : index
    %306 = vector.load %arg8[%c0_90, %c0_91] : memref<1x64xf32, #tpu.memory_space<vmem>>, vector<1x64xf32>
    %307 = vector.extract_strided_slice %305 {offsets = [0, 0], sizes = [1, 16], strides = [1, 1]} : vector<16x16xf32> to vector<1x16xf32>
    %c0_92 = arith.constant 0 : index
    %c0_93 = arith.constant 0 : index
    %c0_94 = arith.constant 0 : index
    %308 = vector.load %arg7[%c0_92, %c0_93, %c0_94] : memref<16x16x64xf32, #tpu.memory_space<vmem>>, vector<1x16x64xf32>
    %309 = vector.shape_cast %308 : vector<1x16x64xf32> to vector<16x64xf32>
    %cst_95 = arith.constant dense<0.000000e+00> : vector<1x64xf32>
    %310 = tpu.matmul %307, %309, %cst_95 {dimension_numbers = #tpu.dot_dimension_numbers<[1], [0], [0], [1], [0, 0, 1, 1], [], []>} : vector<1x16xf32>, vector<16x64xf32>, vector<1x64xf32> -> vector<1x64xf32>
    %311 = arith.addf %306, %310 : vector<1x64xf32>
    %312 = vector.extract_strided_slice %305 {offsets = [1, 0], sizes = [1, 16], strides = [1, 1]} : vector<16x16xf32> to vector<1x16xf32>
    %c1_96 = arith.constant 1 : index
    %c0_97 = arith.constant 0 : index
    %c0_98 = arith.constant 0 : index
    %313 = vector.load %arg7[%c1_96, %c0_97, %c0_98] : memref<16x16x64xf32, #tpu.memory_space<vmem>>, vector<1x16x64xf32>
    %314 = vector.shape_cast %313 : vector<1x16x64xf32> to vector<16x64xf32>
    %cst_99 = arith.constant dense<0.000000e+00> : vector<1x64xf32>
    %315 = tpu.matmul %312, %314, %cst_99 {dimension_numbers = #tpu.dot_dimension_numbers<[1], [0], [0], [1], [0, 0, 1, 1], [], []>} : vector<1x16xf32>, vector<16x64xf32>, vector<1x64xf32> -> vector<1x64xf32>
    %316 = arith.addf %311, %315 : vector<1x64xf32>
    %317 = vector.extract_strided_slice %305 {offsets = [2, 0], sizes = [1, 16], strides = [1, 1]} : vector<16x16xf32> to vector<1x16xf32>
    %c2_100 = arith.constant 2 : index
    %c0_101 = arith.constant 0 : index
    %c0_102 = arith.constant 0 : index
    %318 = vector.load %arg7[%c2_100, %c0_101, %c0_102] : memref<16x16x64xf32, #tpu.memory_space<vmem>>, vector<1x16x64xf32>
    %319 = vector.shape_cast %318 : vector<1x16x64xf32> to vector<16x64xf32>
    %cst_103 = arith.constant dense<0.000000e+00> : vector<1x64xf32>
    %320 = tpu.matmul %317, %319, %cst_103 {dimension_numbers = #tpu.dot_dimension_numbers<[1], [0], [0], [1], [0, 0, 1, 1], [], []>} : vector<1x16xf32>, vector<16x64xf32>, vector<1x64xf32> -> vector<1x64xf32>
    %321 = arith.addf %316, %320 : vector<1x64xf32>
    %322 = vector.extract_strided_slice %305 {offsets = [3, 0], sizes = [1, 16], strides = [1, 1]} : vector<16x16xf32> to vector<1x16xf32>
    %c3_104 = arith.constant 3 : index
    %c0_105 = arith.constant 0 : index
    %c0_106 = arith.constant 0 : index
    %323 = vector.load %arg7[%c3_104, %c0_105, %c0_106] : memref<16x16x64xf32, #tpu.memory_space<vmem>>, vector<1x16x64xf32>
    %324 = vector.shape_cast %323 : vector<1x16x64xf32> to vector<16x64xf32>
    %cst_107 = arith.constant dense<0.000000e+00> : vector<1x64xf32>
    %325 = tpu.matmul %322, %324, %cst_107 {dimension_numbers = #tpu.dot_dimension_numbers<[1], [0], [0], [1], [0, 0, 1, 1], [], []>} : vector<1x16xf32>, vector<16x64xf32>, vector<1x64xf32> -> vector<1x64xf32>
    %326 = arith.addf %321, %325 : vector<1x64xf32>
    %327 = vector.extract_strided_slice %305 {offsets = [4, 0], sizes = [1, 16], strides = [1, 1]} : vector<16x16xf32> to vector<1x16xf32>
    %c4_108 = arith.constant 4 : index
    %c0_109 = arith.constant 0 : index
    %c0_110 = arith.constant 0 : index
    %328 = vector.load %arg7[%c4_108, %c0_109, %c0_110] : memref<16x16x64xf32, #tpu.memory_space<vmem>>, vector<1x16x64xf32>
    %329 = vector.shape_cast %328 : vector<1x16x64xf32> to vector<16x64xf32>
    %cst_111 = arith.constant dense<0.000000e+00> : vector<1x64xf32>
    %330 = tpu.matmul %327, %329, %cst_111 {dimension_numbers = #tpu.dot_dimension_numbers<[1], [0], [0], [1], [0, 0, 1, 1], [], []>} : vector<1x16xf32>, vector<16x64xf32>, vector<1x64xf32> -> vector<1x64xf32>
    %331 = arith.addf %326, %330 : vector<1x64xf32>
    %332 = vector.extract_strided_slice %305 {offsets = [5, 0], sizes = [1, 16], strides = [1, 1]} : vector<16x16xf32> to vector<1x16xf32>
    %c5_112 = arith.constant 5 : index
    %c0_113 = arith.constant 0 : index
    %c0_114 = arith.constant 0 : index
    %333 = vector.load %arg7[%c5_112, %c0_113, %c0_114] : memref<16x16x64xf32, #tpu.memory_space<vmem>>, vector<1x16x64xf32>
    %334 = vector.shape_cast %333 : vector<1x16x64xf32> to vector<16x64xf32>
    %cst_115 = arith.constant dense<0.000000e+00> : vector<1x64xf32>
    %335 = tpu.matmul %332, %334, %cst_115 {dimension_numbers = #tpu.dot_dimension_numbers<[1], [0], [0], [1], [0, 0, 1, 1], [], []>} : vector<1x16xf32>, vector<16x64xf32>, vector<1x64xf32> -> vector<1x64xf32>
    %336 = arith.addf %331, %335 : vector<1x64xf32>
    %337 = vector.extract_strided_slice %305 {offsets = [6, 0], sizes = [1, 16], strides = [1, 1]} : vector<16x16xf32> to vector<1x16xf32>
    %c6_116 = arith.constant 6 : index
    %c0_117 = arith.constant 0 : index
    %c0_118 = arith.constant 0 : index
    %338 = vector.load %arg7[%c6_116, %c0_117, %c0_118] : memref<16x16x64xf32, #tpu.memory_space<vmem>>, vector<1x16x64xf32>
    %339 = vector.shape_cast %338 : vector<1x16x64xf32> to vector<16x64xf32>
    %cst_119 = arith.constant dense<0.000000e+00> : vector<1x64xf32>
    %340 = tpu.matmul %337, %339, %cst_119 {dimension_numbers = #tpu.dot_dimension_numbers<[1], [0], [0], [1], [0, 0, 1, 1], [], []>} : vector<1x16xf32>, vector<16x64xf32>, vector<1x64xf32> -> vector<1x64xf32>
    %341 = arith.addf %336, %340 : vector<1x64xf32>
    %342 = vector.extract_strided_slice %305 {offsets = [7, 0], sizes = [1, 16], strides = [1, 1]} : vector<16x16xf32> to vector<1x16xf32>
    %c7_120 = arith.constant 7 : index
    %c0_121 = arith.constant 0 : index
    %c0_122 = arith.constant 0 : index
    %343 = vector.load %arg7[%c7_120, %c0_121, %c0_122] : memref<16x16x64xf32, #tpu.memory_space<vmem>>, vector<1x16x64xf32>
    %344 = vector.shape_cast %343 : vector<1x16x64xf32> to vector<16x64xf32>
    %cst_123 = arith.constant dense<0.000000e+00> : vector<1x64xf32>
    %345 = tpu.matmul %342, %344, %cst_123 {dimension_numbers = #tpu.dot_dimension_numbers<[1], [0], [0], [1], [0, 0, 1, 1], [], []>} : vector<1x16xf32>, vector<16x64xf32>, vector<1x64xf32> -> vector<1x64xf32>
    %346 = arith.addf %341, %345 : vector<1x64xf32>
    %347 = vector.extract_strided_slice %305 {offsets = [8, 0], sizes = [1, 16], strides = [1, 1]} : vector<16x16xf32> to vector<1x16xf32>
    %c8_124 = arith.constant 8 : index
    %c0_125 = arith.constant 0 : index
    %c0_126 = arith.constant 0 : index
    %348 = vector.load %arg7[%c8_124, %c0_125, %c0_126] : memref<16x16x64xf32, #tpu.memory_space<vmem>>, vector<1x16x64xf32>
    %349 = vector.shape_cast %348 : vector<1x16x64xf32> to vector<16x64xf32>
    %cst_127 = arith.constant dense<0.000000e+00> : vector<1x64xf32>
    %350 = tpu.matmul %347, %349, %cst_127 {dimension_numbers = #tpu.dot_dimension_numbers<[1], [0], [0], [1], [0, 0, 1, 1], [], []>} : vector<1x16xf32>, vector<16x64xf32>, vector<1x64xf32> -> vector<1x64xf32>
    %351 = arith.addf %346, %350 : vector<1x64xf32>
    %352 = vector.extract_strided_slice %305 {offsets = [9, 0], sizes = [1, 16], strides = [1, 1]} : vector<16x16xf32> to vector<1x16xf32>
    %c9_128 = arith.constant 9 : index
    %c0_129 = arith.constant 0 : index
    %c0_130 = arith.constant 0 : index
    %353 = vector.load %arg7[%c9_128, %c0_129, %c0_130] : memref<16x16x64xf32, #tpu.memory_space<vmem>>, vector<1x16x64xf32>
    %354 = vector.shape_cast %353 : vector<1x16x64xf32> to vector<16x64xf32>
    %cst_131 = arith.constant dense<0.000000e+00> : vector<1x64xf32>
    %355 = tpu.matmul %352, %354, %cst_131 {dimension_numbers = #tpu.dot_dimension_numbers<[1], [0], [0], [1], [0, 0, 1, 1], [], []>} : vector<1x16xf32>, vector<16x64xf32>, vector<1x64xf32> -> vector<1x64xf32>
    %356 = arith.addf %351, %355 : vector<1x64xf32>
    %357 = vector.extract_strided_slice %305 {offsets = [10, 0], sizes = [1, 16], strides = [1, 1]} : vector<16x16xf32> to vector<1x16xf32>
    %c10_132 = arith.constant 10 : index
    %c0_133 = arith.constant 0 : index
    %c0_134 = arith.constant 0 : index
    %358 = vector.load %arg7[%c10_132, %c0_133, %c0_134] : memref<16x16x64xf32, #tpu.memory_space<vmem>>, vector<1x16x64xf32>
    %359 = vector.shape_cast %358 : vector<1x16x64xf32> to vector<16x64xf32>
    %cst_135 = arith.constant dense<0.000000e+00> : vector<1x64xf32>
    %360 = tpu.matmul %357, %359, %cst_135 {dimension_numbers = #tpu.dot_dimension_numbers<[1], [0], [0], [1], [0, 0, 1, 1], [], []>} : vector<1x16xf32>, vector<16x64xf32>, vector<1x64xf32> -> vector<1x64xf32>
    %361 = arith.addf %356, %360 : vector<1x64xf32>
    %362 = vector.extract_strided_slice %305 {offsets = [11, 0], sizes = [1, 16], strides = [1, 1]} : vector<16x16xf32> to vector<1x16xf32>
    %c11_136 = arith.constant 11 : index
    %c0_137 = arith.constant 0 : index
    %c0_138 = arith.constant 0 : index
    %363 = vector.load %arg7[%c11_136, %c0_137, %c0_138] : memref<16x16x64xf32, #tpu.memory_space<vmem>>, vector<1x16x64xf32>
    %364 = vector.shape_cast %363 : vector<1x16x64xf32> to vector<16x64xf32>
    %cst_139 = arith.constant dense<0.000000e+00> : vector<1x64xf32>
    %365 = tpu.matmul %362, %364, %cst_139 {dimension_numbers = #tpu.dot_dimension_numbers<[1], [0], [0], [1], [0, 0, 1, 1], [], []>} : vector<1x16xf32>, vector<16x64xf32>, vector<1x64xf32> -> vector<1x64xf32>
    %366 = arith.addf %361, %365 : vector<1x64xf32>
    %367 = vector.extract_strided_slice %305 {offsets = [12, 0], sizes = [1, 16], strides = [1, 1]} : vector<16x16xf32> to vector<1x16xf32>
    %c12_140 = arith.constant 12 : index
    %c0_141 = arith.constant 0 : index
    %c0_142 = arith.constant 0 : index
    %368 = vector.load %arg7[%c12_140, %c0_141, %c0_142] : memref<16x16x64xf32, #tpu.memory_space<vmem>>, vector<1x16x64xf32>
    %369 = vector.shape_cast %368 : vector<1x16x64xf32> to vector<16x64xf32>
    %cst_143 = arith.constant dense<0.000000e+00> : vector<1x64xf32>
    %370 = tpu.matmul %367, %369, %cst_143 {dimension_numbers = #tpu.dot_dimension_numbers<[1], [0], [0], [1], [0, 0, 1, 1], [], []>} : vector<1x16xf32>, vector<16x64xf32>, vector<1x64xf32> -> vector<1x64xf32>
    %371 = arith.addf %366, %370 : vector<1x64xf32>
    %372 = vector.extract_strided_slice %305 {offsets = [13, 0], sizes = [1, 16], strides = [1, 1]} : vector<16x16xf32> to vector<1x16xf32>
    %c13_144 = arith.constant 13 : index
    %c0_145 = arith.constant 0 : index
    %c0_146 = arith.constant 0 : index
    %373 = vector.load %arg7[%c13_144, %c0_145, %c0_146] : memref<16x16x64xf32, #tpu.memory_space<vmem>>, vector<1x16x64xf32>
    %374 = vector.shape_cast %373 : vector<1x16x64xf32> to vector<16x64xf32>
    %cst_147 = arith.constant dense<0.000000e+00> : vector<1x64xf32>
    %375 = tpu.matmul %372, %374, %cst_147 {dimension_numbers = #tpu.dot_dimension_numbers<[1], [0], [0], [1], [0, 0, 1, 1], [], []>} : vector<1x16xf32>, vector<16x64xf32>, vector<1x64xf32> -> vector<1x64xf32>
    %376 = arith.addf %371, %375 : vector<1x64xf32>
    %377 = vector.extract_strided_slice %305 {offsets = [14, 0], sizes = [1, 16], strides = [1, 1]} : vector<16x16xf32> to vector<1x16xf32>
    %c14_148 = arith.constant 14 : index
    %c0_149 = arith.constant 0 : index
    %c0_150 = arith.constant 0 : index
    %378 = vector.load %arg7[%c14_148, %c0_149, %c0_150] : memref<16x16x64xf32, #tpu.memory_space<vmem>>, vector<1x16x64xf32>
    %379 = vector.shape_cast %378 : vector<1x16x64xf32> to vector<16x64xf32>
    %cst_151 = arith.constant dense<0.000000e+00> : vector<1x64xf32>
    %380 = tpu.matmul %377, %379, %cst_151 {dimension_numbers = #tpu.dot_dimension_numbers<[1], [0], [0], [1], [0, 0, 1, 1], [], []>} : vector<1x16xf32>, vector<16x64xf32>, vector<1x64xf32> -> vector<1x64xf32>
    %381 = arith.addf %376, %380 : vector<1x64xf32>
    %382 = vector.extract_strided_slice %305 {offsets = [15, 0], sizes = [1, 16], strides = [1, 1]} : vector<16x16xf32> to vector<1x16xf32>
    %c15_152 = arith.constant 15 : index
    %c0_153 = arith.constant 0 : index
    %c0_154 = arith.constant 0 : index
    %383 = vector.load %arg7[%c15_152, %c0_153, %c0_154] : memref<16x16x64xf32, #tpu.memory_space<vmem>>, vector<1x16x64xf32>
    %384 = vector.shape_cast %383 : vector<1x16x64xf32> to vector<16x64xf32>
    %cst_155 = arith.constant dense<0.000000e+00> : vector<1x64xf32>
    %385 = tpu.matmul %382, %384, %cst_155 {dimension_numbers = #tpu.dot_dimension_numbers<[1], [0], [0], [1], [0, 0, 1, 1], [], []>} : vector<1x16xf32>, vector<16x64xf32>, vector<1x64xf32> -> vector<1x64xf32>
    %386 = arith.addf %381, %385 : vector<1x64xf32>
    %cst_156 = arith.constant 0.000000e+00 : f32
    %387 = vector.broadcast %cst_156 : f32 to vector<1x64xf32>
    %388 = arith.maximumf %386, %387 : vector<1x64xf32>
    %c0_157 = arith.constant 0 : index
    %c0_158 = arith.constant 0 : index
    %389 = vector.load %arg9[%c0_157, %c0_158] : memref<64x6xf32, #tpu.memory_space<vmem>>, vector<64x6xf32>
    %cst_159 = arith.constant dense<0.000000e+00> : vector<1x6xf32>
    %390 = tpu.matmul %388, %389, %cst_159 {dimension_numbers = #tpu.dot_dimension_numbers<[1], [0], [0], [1], [0, 0, 1, 1], [], []>} : vector<1x64xf32>, vector<64x6xf32>, vector<1x6xf32> -> vector<1x6xf32>
    %c0_160 = arith.constant 0 : index
    %c0_161 = arith.constant 0 : index
    %391 = vector.load %arg10[%c0_160, %c0_161] : memref<1x6xf32, #tpu.memory_space<vmem>>, vector<1x6xf32>
    %392 = arith.addf %390, %391 : vector<1x6xf32>
    %c0_162 = arith.constant 0 : index
    %c0_163 = arith.constant 0 : index
    %c0_164 = arith.constant 0 : index
    %393 = vector.load %arg11[%c0_162, %c0_163, %c0_164] : memref<1x1x6xf32, #tpu.memory_space<vmem>>, vector<1x1x6xf32>
    %394 = vector.shape_cast %393 : vector<1x1x6xf32> to vector<1x6xf32>
    %395 = vector.shape_cast %392 : vector<1x6xf32> to vector<1x1x6xf32>
    tpu.vector_store %arg11[%c0_162, %c0_163, %c0_164], %395 {strides = array<i32>} : memref<1x1x6xf32, #tpu.memory_space<vmem>>, vector<1x1x6xf32>,
    return
  }
  func.func @transform_0(%arg0: i32) -> (i32, i32, i32) {
    %c0_i32 = arith.constant 0 : i32
    %c0_i32_0 = arith.constant 0 : i32
    %c0_i32_1 = arith.constant 0 : i32
    return %arg0, %c0_i32, %c0_i32_0 : i32, i32, i32
  }
  func.func @transform_1(%arg0: i32) -> (i32, i32) {
    %c0_i32 = arith.constant 0 : i32
    %c0_i32_0 = arith.constant 0 : i32
    %c0_i32_1 = arith.constant 0 : i32
    return %c0_i32, %c0_i32_0 : i32, i32
  }
  func.func @transform_2(%arg0: i32) -> (i32, i32) {
    %c0_i32 = arith.constant 0 : i32
    %c0_i32_0 = arith.constant 0 : i32
    %c0_i32_1 = arith.constant 0 : i32
    return %c0_i32, %c0_i32_0 : i32, i32
  }
  func.func @transform_3(%arg0: i32) -> (i32, i32, i32) {
    %c0_i32 = arith.constant 0 : i32
    %c0_i32_0 = arith.constant 0 : i32
    %c0_i32_1 = arith.constant 0 : i32
    %c0_i32_2 = arith.constant 0 : i32
    return %c0_i32, %c0_i32_0, %c0_i32_1 : i32, i32, i32
  }
  func.func @transform_4(%arg0: i32) -> (i32, i32) {
    %c0_i32 = arith.constant 0 : i32
    %c0_i32_0 = arith.constant 0 : i32
    %c0_i32_1 = arith.constant 0 : i32
    return %c0_i32, %c0_i32_0 : i32, i32
  }
  func.func @transform_5(%arg0: i32) -> (i32, i32) {
    %c0_i32 = arith.constant 0 : i32
    %c0_i32_0 = arith.constant 0 : i32
    %c0_i32_1 = arith.constant 0 : i32
    return %c0_i32, %c0_i32_0 : i32, i32
  }
  func.func @transform_6(%arg0: i32) -> (i32, i32, i32) {
    %c0_i32 = arith.constant 0 : i32
    %c0_i32_0 = arith.constant 0 : i32
    %c0_i32_1 = arith.constant 0 : i32
    %c0_i32_2 = arith.constant 0 : i32
    return %c0_i32, %c0_i32_0, %c0_i32_1 : i32, i32, i32
  }
  func.func @transform_7(%arg0: i32) -> (i32, i32) {
    %c0_i32 = arith.constant 0 : i32
    %c0_i32_0 = arith.constant 0 : i32
    %c0_i32_1 = arith.constant 0 : i32
    return %c0_i32, %c0_i32_0 : i32, i32
  }
  func.func @transform_8(%arg0: i32) -> (i32, i32) {
    %c0_i32 = arith.constant 0 : i32
    %c0_i32_0 = arith.constant 0 : i32
    %c0_i32_1 = arith.constant 0 : i32
    return %c0_i32, %c0_i32_0 : i32, i32
  }
  func.func @transform_9(%arg0: i32) -> (i32, i32) {
    %c0_i32 = arith.constant 0 : i32
    %c0_i32_0 = arith.constant 0 : i32
    %c0_i32_1 = arith.constant 0 : i32
    return %c0_i32, %c0_i32_0 : i32, i32
  }
  func.func @transform_10(%arg0: i32) -> (i32, i32, i32) {
    %c0_i32 = arith.constant 0 : i32
    %c0_i32_0 = arith.constant 0 : i32
    %c0_i32_1 = arith.constant 0 : i32
    return %arg0, %c0_i32, %c0_i32_0 : i32, i32, i32
  }
}

module attributes {stable_mosaic.version = 11 : i64} {
  func.func @_sampler_kernel(%arg0: i32, %arg1: memref<2x6xf32, #tpu.memory_space<smem>>, %arg2: memref<1x28x28xf32, #tpu.memory_space<vmem>>, %arg3: memref<1x1x784xf32, #tpu.memory_space<vmem>>) attributes {dimension_semantics = [#tpu.dimension_semantics<parallel>], iteration_bounds = array<i64: 2>, scalar_prefetch = 0 : i64, scratch_operands = 0 : i64, tpu.core_type = #tpu.core_type<tc>, window_params = [{transform_indices = @transform_0, window_bounds = array<i64: 2, 6>}, {transform_indices = @transform_1, window_bounds = array<i64: 1, 28, 28>}, {transform_indices = @transform_2, window_bounds = array<i64: 1, 1, 784>}]} {
    %0 = arith.index_cast %arg0 : i32 to index
    %c0 = arith.constant 0 : index
    %1 = memref.load %arg1[%0, %c0] : memref<2x6xf32, #tpu.memory_space<smem>>
    %2 = arith.index_cast %arg0 : i32 to index
    %c1 = arith.constant 1 : index
    %3 = memref.load %arg1[%2, %c1] : memref<2x6xf32, #tpu.memory_space<smem>>
    %4 = arith.index_cast %arg0 : i32 to index
    %c2 = arith.constant 2 : index
    %5 = memref.load %arg1[%4, %c2] : memref<2x6xf32, #tpu.memory_space<smem>>
    %6 = arith.index_cast %arg0 : i32 to index
    %c3 = arith.constant 3 : index
    %7 = memref.load %arg1[%6, %c3] : memref<2x6xf32, #tpu.memory_space<smem>>
    %8 = arith.index_cast %arg0 : i32 to index
    %c4 = arith.constant 4 : index
    %9 = memref.load %arg1[%8, %c4] : memref<2x6xf32, #tpu.memory_space<smem>>
    %10 = arith.index_cast %arg0 : i32 to index
    %c5 = arith.constant 5 : index
    %11 = memref.load %arg1[%10, %c5] : memref<2x6xf32, #tpu.memory_space<smem>>
    %c0_0 = arith.constant 0 : index
    %c0_1 = arith.constant 0 : index
    %c0_2 = arith.constant 0 : index
    %12 = vector.load %arg2[%c0_0, %c0_1, %c0_2] : memref<1x28x28xf32, #tpu.memory_space<vmem>>, vector<1x28x28xf32>
    %13 = vector.shape_cast %12 : vector<1x28x28xf32> to vector<28x28xf32>
    %14 = tpu.iota {dimensions = array<i32: 1>} : vector<1x256xi32>
    %15 = arith.sitofp %14 : vector<1x256xi32> to vector<1x256xf32>
    %cst = arith.constant 0.000000e+00 : f32
    %16 = vector.broadcast %cst : f32 to vector<1x256xf32>
    %17 = arith.addf %15, %16 : vector<1x256xf32>
    %cst_3 = arith.constant 5.000000e-01 : f32
    %18 = vector.broadcast %cst_3 : f32 to vector<1x256xf32>
    %19 = arith.addf %17, %18 : vector<1x256xf32>
    %cst_4 = arith.constant 0.0357142873 : f32
    %20 = vector.broadcast %cst_4 : f32 to vector<1x256xf32>
    %21 = arith.mulf %19, %20 : vector<1x256xf32>
    %22 = math.floor %21 : vector<1x256xf32>
    %cst_5 = arith.constant 2.800000e+01 : f32
    %23 = vector.broadcast %cst_5 : f32 to vector<1x256xf32>
    %24 = arith.mulf %22, %23 : vector<1x256xf32>
    %25 = arith.subf %17, %24 : vector<1x256xf32>
    %cst_6 = arith.constant 2.000000e+00 : f32
    %26 = vector.broadcast %cst_6 : f32 to vector<1x256xf32>
    %27 = arith.mulf %26, %25 : vector<1x256xf32>
    %cst_7 = arith.constant 1.000000e+00 : f32
    %28 = vector.broadcast %cst_7 : f32 to vector<1x256xf32>
    %29 = arith.addf %27, %28 : vector<1x256xf32>
    %cst_8 = arith.constant 2.800000e+01 : f32
    %30 = vector.broadcast %cst_8 : f32 to vector<1x256xf32>
    %31 = arith.divf %29, %30 : vector<1x256xf32>
    %cst_9 = arith.constant 1.000000e+00 : f32
    %32 = vector.broadcast %cst_9 : f32 to vector<1x256xf32>
    %33 = arith.subf %31, %32 : vector<1x256xf32>
    %cst_10 = arith.constant 2.000000e+00 : f32
    %34 = vector.broadcast %cst_10 : f32 to vector<1x256xf32>
    %35 = arith.mulf %34, %22 : vector<1x256xf32>
    %cst_11 = arith.constant 1.000000e+00 : f32
    %36 = vector.broadcast %cst_11 : f32 to vector<1x256xf32>
    %37 = arith.addf %35, %36 : vector<1x256xf32>
    %cst_12 = arith.constant 2.800000e+01 : f32
    %38 = vector.broadcast %cst_12 : f32 to vector<1x256xf32>
    %39 = arith.divf %37, %38 : vector<1x256xf32>
    %cst_13 = arith.constant 1.000000e+00 : f32
    %40 = vector.broadcast %cst_13 : f32 to vector<1x256xf32>
    %41 = arith.subf %39, %40 : vector<1x256xf32>
    %42 = vector.broadcast %1 : f32 to vector<1x256xf32>
    %43 = arith.mulf %42, %33 : vector<1x256xf32>
    %44 = vector.broadcast %3 : f32 to vector<1x256xf32>
    %45 = arith.mulf %44, %41 : vector<1x256xf32>
    %46 = arith.addf %43, %45 : vector<1x256xf32>
    %47 = vector.broadcast %5 : f32 to vector<1x256xf32>
    %48 = arith.addf %46, %47 : vector<1x256xf32>
    %49 = vector.broadcast %7 : f32 to vector<1x256xf32>
    %50 = arith.mulf %49, %33 : vector<1x256xf32>
    %51 = vector.broadcast %9 : f32 to vector<1x256xf32>
    %52 = arith.mulf %51, %41 : vector<1x256xf32>
    %53 = arith.addf %50, %52 : vector<1x256xf32>
    %54 = vector.broadcast %11 : f32 to vector<1x256xf32>
    %55 = arith.addf %53, %54 : vector<1x256xf32>
    %cst_14 = arith.constant 1.000000e+00 : f32
    %56 = vector.broadcast %cst_14 : f32 to vector<1x256xf32>
    %57 = arith.addf %48, %56 : vector<1x256xf32>
    %cst_15 = arith.constant 2.800000e+01 : f32
    %58 = vector.broadcast %cst_15 : f32 to vector<1x256xf32>
    %59 = arith.mulf %57, %58 : vector<1x256xf32>
    %cst_16 = arith.constant 1.000000e+00 : f32
    %60 = vector.broadcast %cst_16 : f32 to vector<1x256xf32>
    %61 = arith.subf %59, %60 : vector<1x256xf32>
    %cst_17 = arith.constant 5.000000e-01 : f32
    %62 = vector.broadcast %cst_17 : f32 to vector<1x256xf32>
    %63 = arith.mulf %61, %62 : vector<1x256xf32>
    %cst_18 = arith.constant 1.000000e+00 : f32
    %64 = vector.broadcast %cst_18 : f32 to vector<1x256xf32>
    %65 = arith.addf %55, %64 : vector<1x256xf32>
    %cst_19 = arith.constant 2.800000e+01 : f32
    %66 = vector.broadcast %cst_19 : f32 to vector<1x256xf32>
    %67 = arith.mulf %65, %66 : vector<1x256xf32>
    %cst_20 = arith.constant 1.000000e+00 : f32
    %68 = vector.broadcast %cst_20 : f32 to vector<1x256xf32>
    %69 = arith.subf %67, %68 : vector<1x256xf32>
    %cst_21 = arith.constant 5.000000e-01 : f32
    %70 = vector.broadcast %cst_21 : f32 to vector<1x256xf32>
    %71 = arith.mulf %69, %70 : vector<1x256xf32>
    %72 = math.floor %63 : vector<1x256xf32>
    %73 = math.floor %71 : vector<1x256xf32>
    %74 = arith.subf %63, %72 : vector<1x256xf32>
    %75 = arith.subf %71, %73 : vector<1x256xf32>
    %cst_22 = arith.constant 1.000000e+00 : f32
    %76 = vector.broadcast %cst_22 : f32 to vector<1x256xf32>
    %77 = arith.subf %76, %74 : vector<1x256xf32>
    %cst_23 = arith.constant 1.000000e+00 : f32
    %78 = vector.broadcast %cst_23 : f32 to vector<1x256xf32>
    %79 = arith.subf %78, %75 : vector<1x256xf32>
    %80 = tpu.iota {dimensions = array<i32: 0>} : vector<28x256xi32>
    %81 = arith.sitofp %80 : vector<28x256xi32> to vector<28x256xf32>
    %82 = tpu.iota {dimensions = array<i32: 0>} : vector<28x256xi32>
    %83 = arith.sitofp %82 : vector<28x256xi32> to vector<28x256xf32>
    %84 = vector.broadcast %73 : vector<1x256xf32> to vector<28x256xf32>
    %85 = arith.cmpf oeq, %81, %84 : vector<28x256xf32>
    %cst_24 = arith.constant 0.000000e+00 : f32
    %86 = vector.shape_cast %79 : vector<1x256xf32> to vector<1x256xf32>
    %87 = vector.broadcast %86 : vector<1x256xf32> to vector<28x256xf32>
    %88 = vector.broadcast %cst_24 : f32 to vector<28x256xf32>
    %89 = arith.select %85, %87, %88 : vector<28x256xi1>, vector<28x256xf32>
    %cst_25 = arith.constant 1.000000e+00 : f32
    %90 = vector.broadcast %cst_25 : f32 to vector<1x256xf32>
    %91 = arith.addf %73, %90 : vector<1x256xf32>
    %92 = vector.broadcast %91 : vector<1x256xf32> to vector<28x256xf32>
    %93 = arith.cmpf oeq, %81, %92 : vector<28x256xf32>
    %cst_26 = arith.constant 0.000000e+00 : f32
    %94 = vector.shape_cast %75 : vector<1x256xf32> to vector<1x256xf32>
    %95 = vector.broadcast %94 : vector<1x256xf32> to vector<28x256xf32>
    %96 = vector.broadcast %cst_26 : f32 to vector<28x256xf32>
    %97 = arith.select %93, %95, %96 : vector<28x256xi1>, vector<28x256xf32>
    %98 = arith.addf %89, %97 : vector<28x256xf32>
    %99 = vector.broadcast %72 : vector<1x256xf32> to vector<28x256xf32>
    %100 = arith.cmpf oeq, %83, %99 : vector<28x256xf32>
    %cst_27 = arith.constant 0.000000e+00 : f32
    %101 = vector.shape_cast %77 : vector<1x256xf32> to vector<1x256xf32>
    %102 = vector.broadcast %101 : vector<1x256xf32> to vector<28x256xf32>
    %103 = vector.broadcast %cst_27 : f32 to vector<28x256xf32>
    %104 = arith.select %100, %102, %103 : vector<28x256xi1>, vector<28x256xf32>
    %cst_28 = arith.constant 1.000000e+00 : f32
    %105 = vector.broadcast %cst_28 : f32 to vector<1x256xf32>
    %106 = arith.addf %72, %105 : vector<1x256xf32>
    %107 = vector.broadcast %106 : vector<1x256xf32> to vector<28x256xf32>
    %108 = arith.cmpf oeq, %83, %107 : vector<28x256xf32>
    %cst_29 = arith.constant 0.000000e+00 : f32
    %109 = vector.shape_cast %74 : vector<1x256xf32> to vector<1x256xf32>
    %110 = vector.broadcast %109 : vector<1x256xf32> to vector<28x256xf32>
    %111 = vector.broadcast %cst_29 : f32 to vector<28x256xf32>
    %112 = arith.select %108, %110, %111 : vector<28x256xi1>, vector<28x256xf32>
    %113 = arith.addf %104, %112 : vector<28x256xf32>
    %cst_30 = arith.constant dense<0.000000e+00> : vector<28x256xf32>
    %114 = tpu.matmul %13, %113, %cst_30 {dimension_numbers = #tpu.dot_dimension_numbers<[1], [0], [0], [1], [0, 0, 1, 1], [], []>, precision = #tpu.contract_precision<fp32>} : vector<28x28xf32>, vector<28x256xf32>, vector<28x256xf32> -> vector<28x256xf32>
    %115 = arith.mulf %98, %114 : vector<28x256xf32>
    %cst_31 = arith.constant dense<0.000000e+00> : vector<256xf32>
    %116 = vector.multi_reduction <add>, %115, %cst_31 [0] : vector<28x256xf32> to vector<256xf32>
    %117 = vector.shape_cast %116 : vector<256xf32> to vector<1x256xf32>
    %118 = vector.shape_cast %117 : vector<1x256xf32> to vector<1x1x256xf32>
    %c0_32 = arith.constant 0 : index
    %c0_33 = arith.constant 0 : index
    %c0_34 = arith.constant 0 : index
    %119 = vector.load %arg3[%c0_32, %c0_33, %c0_34] : memref<1x1x784xf32, #tpu.memory_space<vmem>>, vector<1x1x256xf32>
    tpu.vector_store %arg3[%c0_32, %c0_33, %c0_34], %118 {strides = array<i32>} : memref<1x1x784xf32, #tpu.memory_space<vmem>>, vector<1x1x256xf32>,
    %120 = tpu.iota {dimensions = array<i32: 1>} : vector<1x256xi32>
    %121 = arith.sitofp %120 : vector<1x256xi32> to vector<1x256xf32>
    %cst_35 = arith.constant 2.560000e+02 : f32
    %122 = vector.broadcast %cst_35 : f32 to vector<1x256xf32>
    %123 = arith.addf %121, %122 : vector<1x256xf32>
    %cst_36 = arith.constant 5.000000e-01 : f32
    %124 = vector.broadcast %cst_36 : f32 to vector<1x256xf32>
    %125 = arith.addf %123, %124 : vector<1x256xf32>
    %cst_37 = arith.constant 0.0357142873 : f32
    %126 = vector.broadcast %cst_37 : f32 to vector<1x256xf32>
    %127 = arith.mulf %125, %126 : vector<1x256xf32>
    %128 = math.floor %127 : vector<1x256xf32>
    %cst_38 = arith.constant 2.800000e+01 : f32
    %129 = vector.broadcast %cst_38 : f32 to vector<1x256xf32>
    %130 = arith.mulf %128, %129 : vector<1x256xf32>
    %131 = arith.subf %123, %130 : vector<1x256xf32>
    %cst_39 = arith.constant 2.000000e+00 : f32
    %132 = vector.broadcast %cst_39 : f32 to vector<1x256xf32>
    %133 = arith.mulf %132, %131 : vector<1x256xf32>
    %cst_40 = arith.constant 1.000000e+00 : f32
    %134 = vector.broadcast %cst_40 : f32 to vector<1x256xf32>
    %135 = arith.addf %133, %134 : vector<1x256xf32>
    %cst_41 = arith.constant 2.800000e+01 : f32
    %136 = vector.broadcast %cst_41 : f32 to vector<1x256xf32>
    %137 = arith.divf %135, %136 : vector<1x256xf32>
    %cst_42 = arith.constant 1.000000e+00 : f32
    %138 = vector.broadcast %cst_42 : f32 to vector<1x256xf32>
    %139 = arith.subf %137, %138 : vector<1x256xf32>
    %cst_43 = arith.constant 2.000000e+00 : f32
    %140 = vector.broadcast %cst_43 : f32 to vector<1x256xf32>
    %141 = arith.mulf %140, %128 : vector<1x256xf32>
    %cst_44 = arith.constant 1.000000e+00 : f32
    %142 = vector.broadcast %cst_44 : f32 to vector<1x256xf32>
    %143 = arith.addf %141, %142 : vector<1x256xf32>
    %cst_45 = arith.constant 2.800000e+01 : f32
    %144 = vector.broadcast %cst_45 : f32 to vector<1x256xf32>
    %145 = arith.divf %143, %144 : vector<1x256xf32>
    %cst_46 = arith.constant 1.000000e+00 : f32
    %146 = vector.broadcast %cst_46 : f32 to vector<1x256xf32>
    %147 = arith.subf %145, %146 : vector<1x256xf32>
    %148 = vector.broadcast %1 : f32 to vector<1x256xf32>
    %149 = arith.mulf %148, %139 : vector<1x256xf32>
    %150 = vector.broadcast %3 : f32 to vector<1x256xf32>
    %151 = arith.mulf %150, %147 : vector<1x256xf32>
    %152 = arith.addf %149, %151 : vector<1x256xf32>
    %153 = vector.broadcast %5 : f32 to vector<1x256xf32>
    %154 = arith.addf %152, %153 : vector<1x256xf32>
    %155 = vector.broadcast %7 : f32 to vector<1x256xf32>
    %156 = arith.mulf %155, %139 : vector<1x256xf32>
    %157 = vector.broadcast %9 : f32 to vector<1x256xf32>
    %158 = arith.mulf %157, %147 : vector<1x256xf32>
    %159 = arith.addf %156, %158 : vector<1x256xf32>
    %160 = vector.broadcast %11 : f32 to vector<1x256xf32>
    %161 = arith.addf %159, %160 : vector<1x256xf32>
    %cst_47 = arith.constant 1.000000e+00 : f32
    %162 = vector.broadcast %cst_47 : f32 to vector<1x256xf32>
    %163 = arith.addf %154, %162 : vector<1x256xf32>
    %cst_48 = arith.constant 2.800000e+01 : f32
    %164 = vector.broadcast %cst_48 : f32 to vector<1x256xf32>
    %165 = arith.mulf %163, %164 : vector<1x256xf32>
    %cst_49 = arith.constant 1.000000e+00 : f32
    %166 = vector.broadcast %cst_49 : f32 to vector<1x256xf32>
    %167 = arith.subf %165, %166 : vector<1x256xf32>
    %cst_50 = arith.constant 5.000000e-01 : f32
    %168 = vector.broadcast %cst_50 : f32 to vector<1x256xf32>
    %169 = arith.mulf %167, %168 : vector<1x256xf32>
    %cst_51 = arith.constant 1.000000e+00 : f32
    %170 = vector.broadcast %cst_51 : f32 to vector<1x256xf32>
    %171 = arith.addf %161, %170 : vector<1x256xf32>
    %cst_52 = arith.constant 2.800000e+01 : f32
    %172 = vector.broadcast %cst_52 : f32 to vector<1x256xf32>
    %173 = arith.mulf %171, %172 : vector<1x256xf32>
    %cst_53 = arith.constant 1.000000e+00 : f32
    %174 = vector.broadcast %cst_53 : f32 to vector<1x256xf32>
    %175 = arith.subf %173, %174 : vector<1x256xf32>
    %cst_54 = arith.constant 5.000000e-01 : f32
    %176 = vector.broadcast %cst_54 : f32 to vector<1x256xf32>
    %177 = arith.mulf %175, %176 : vector<1x256xf32>
    %178 = math.floor %169 : vector<1x256xf32>
    %179 = math.floor %177 : vector<1x256xf32>
    %180 = arith.subf %169, %178 : vector<1x256xf32>
    %181 = arith.subf %177, %179 : vector<1x256xf32>
    %cst_55 = arith.constant 1.000000e+00 : f32
    %182 = vector.broadcast %cst_55 : f32 to vector<1x256xf32>
    %183 = arith.subf %182, %180 : vector<1x256xf32>
    %cst_56 = arith.constant 1.000000e+00 : f32
    %184 = vector.broadcast %cst_56 : f32 to vector<1x256xf32>
    %185 = arith.subf %184, %181 : vector<1x256xf32>
    %186 = tpu.iota {dimensions = array<i32: 0>} : vector<28x256xi32>
    %187 = arith.sitofp %186 : vector<28x256xi32> to vector<28x256xf32>
    %188 = tpu.iota {dimensions = array<i32: 0>} : vector<28x256xi32>
    %189 = arith.sitofp %188 : vector<28x256xi32> to vector<28x256xf32>
    %190 = vector.broadcast %179 : vector<1x256xf32> to vector<28x256xf32>
    %191 = arith.cmpf oeq, %187, %190 : vector<28x256xf32>
    %cst_57 = arith.constant 0.000000e+00 : f32
    %192 = vector.shape_cast %185 : vector<1x256xf32> to vector<1x256xf32>
    %193 = vector.broadcast %192 : vector<1x256xf32> to vector<28x256xf32>
    %194 = vector.broadcast %cst_57 : f32 to vector<28x256xf32>
    %195 = arith.select %191, %193, %194 : vector<28x256xi1>, vector<28x256xf32>
    %cst_58 = arith.constant 1.000000e+00 : f32
    %196 = vector.broadcast %cst_58 : f32 to vector<1x256xf32>
    %197 = arith.addf %179, %196 : vector<1x256xf32>
    %198 = vector.broadcast %197 : vector<1x256xf32> to vector<28x256xf32>
    %199 = arith.cmpf oeq, %187, %198 : vector<28x256xf32>
    %cst_59 = arith.constant 0.000000e+00 : f32
    %200 = vector.shape_cast %181 : vector<1x256xf32> to vector<1x256xf32>
    %201 = vector.broadcast %200 : vector<1x256xf32> to vector<28x256xf32>
    %202 = vector.broadcast %cst_59 : f32 to vector<28x256xf32>
    %203 = arith.select %199, %201, %202 : vector<28x256xi1>, vector<28x256xf32>
    %204 = arith.addf %195, %203 : vector<28x256xf32>
    %205 = vector.broadcast %178 : vector<1x256xf32> to vector<28x256xf32>
    %206 = arith.cmpf oeq, %189, %205 : vector<28x256xf32>
    %cst_60 = arith.constant 0.000000e+00 : f32
    %207 = vector.shape_cast %183 : vector<1x256xf32> to vector<1x256xf32>
    %208 = vector.broadcast %207 : vector<1x256xf32> to vector<28x256xf32>
    %209 = vector.broadcast %cst_60 : f32 to vector<28x256xf32>
    %210 = arith.select %206, %208, %209 : vector<28x256xi1>, vector<28x256xf32>
    %cst_61 = arith.constant 1.000000e+00 : f32
    %211 = vector.broadcast %cst_61 : f32 to vector<1x256xf32>
    %212 = arith.addf %178, %211 : vector<1x256xf32>
    %213 = vector.broadcast %212 : vector<1x256xf32> to vector<28x256xf32>
    %214 = arith.cmpf oeq, %189, %213 : vector<28x256xf32>
    %cst_62 = arith.constant 0.000000e+00 : f32
    %215 = vector.shape_cast %180 : vector<1x256xf32> to vector<1x256xf32>
    %216 = vector.broadcast %215 : vector<1x256xf32> to vector<28x256xf32>
    %217 = vector.broadcast %cst_62 : f32 to vector<28x256xf32>
    %218 = arith.select %214, %216, %217 : vector<28x256xi1>, vector<28x256xf32>
    %219 = arith.addf %210, %218 : vector<28x256xf32>
    %cst_63 = arith.constant dense<0.000000e+00> : vector<28x256xf32>
    %220 = tpu.matmul %13, %219, %cst_63 {dimension_numbers = #tpu.dot_dimension_numbers<[1], [0], [0], [1], [0, 0, 1, 1], [], []>, precision = #tpu.contract_precision<fp32>} : vector<28x28xf32>, vector<28x256xf32>, vector<28x256xf32> -> vector<28x256xf32>
    %221 = arith.mulf %204, %220 : vector<28x256xf32>
    %cst_64 = arith.constant dense<0.000000e+00> : vector<256xf32>
    %222 = vector.multi_reduction <add>, %221, %cst_64 [0] : vector<28x256xf32> to vector<256xf32>
    %223 = vector.shape_cast %222 : vector<256xf32> to vector<1x256xf32>
    %224 = vector.shape_cast %223 : vector<1x256xf32> to vector<1x1x256xf32>
    %c0_65 = arith.constant 0 : index
    %c0_66 = arith.constant 0 : index
    %c256 = arith.constant 256 : index
    %225 = vector.load %arg3[%c0_65, %c0_66, %c256] : memref<1x1x784xf32, #tpu.memory_space<vmem>>, vector<1x1x256xf32>
    tpu.vector_store %arg3[%c0_65, %c0_66, %c256], %224 {strides = array<i32>} : memref<1x1x784xf32, #tpu.memory_space<vmem>>, vector<1x1x256xf32>,
    %226 = tpu.iota {dimensions = array<i32: 1>} : vector<1x256xi32>
    %227 = arith.sitofp %226 : vector<1x256xi32> to vector<1x256xf32>
    %cst_67 = arith.constant 5.120000e+02 : f32
    %228 = vector.broadcast %cst_67 : f32 to vector<1x256xf32>
    %229 = arith.addf %227, %228 : vector<1x256xf32>
    %cst_68 = arith.constant 5.000000e-01 : f32
    %230 = vector.broadcast %cst_68 : f32 to vector<1x256xf32>
    %231 = arith.addf %229, %230 : vector<1x256xf32>
    %cst_69 = arith.constant 0.0357142873 : f32
    %232 = vector.broadcast %cst_69 : f32 to vector<1x256xf32>
    %233 = arith.mulf %231, %232 : vector<1x256xf32>
    %234 = math.floor %233 : vector<1x256xf32>
    %cst_70 = arith.constant 2.800000e+01 : f32
    %235 = vector.broadcast %cst_70 : f32 to vector<1x256xf32>
    %236 = arith.mulf %234, %235 : vector<1x256xf32>
    %237 = arith.subf %229, %236 : vector<1x256xf32>
    %cst_71 = arith.constant 2.000000e+00 : f32
    %238 = vector.broadcast %cst_71 : f32 to vector<1x256xf32>
    %239 = arith.mulf %238, %237 : vector<1x256xf32>
    %cst_72 = arith.constant 1.000000e+00 : f32
    %240 = vector.broadcast %cst_72 : f32 to vector<1x256xf32>
    %241 = arith.addf %239, %240 : vector<1x256xf32>
    %cst_73 = arith.constant 2.800000e+01 : f32
    %242 = vector.broadcast %cst_73 : f32 to vector<1x256xf32>
    %243 = arith.divf %241, %242 : vector<1x256xf32>
    %cst_74 = arith.constant 1.000000e+00 : f32
    %244 = vector.broadcast %cst_74 : f32 to vector<1x256xf32>
    %245 = arith.subf %243, %244 : vector<1x256xf32>
    %cst_75 = arith.constant 2.000000e+00 : f32
    %246 = vector.broadcast %cst_75 : f32 to vector<1x256xf32>
    %247 = arith.mulf %246, %234 : vector<1x256xf32>
    %cst_76 = arith.constant 1.000000e+00 : f32
    %248 = vector.broadcast %cst_76 : f32 to vector<1x256xf32>
    %249 = arith.addf %247, %248 : vector<1x256xf32>
    %cst_77 = arith.constant 2.800000e+01 : f32
    %250 = vector.broadcast %cst_77 : f32 to vector<1x256xf32>
    %251 = arith.divf %249, %250 : vector<1x256xf32>
    %cst_78 = arith.constant 1.000000e+00 : f32
    %252 = vector.broadcast %cst_78 : f32 to vector<1x256xf32>
    %253 = arith.subf %251, %252 : vector<1x256xf32>
    %254 = vector.broadcast %1 : f32 to vector<1x256xf32>
    %255 = arith.mulf %254, %245 : vector<1x256xf32>
    %256 = vector.broadcast %3 : f32 to vector<1x256xf32>
    %257 = arith.mulf %256, %253 : vector<1x256xf32>
    %258 = arith.addf %255, %257 : vector<1x256xf32>
    %259 = vector.broadcast %5 : f32 to vector<1x256xf32>
    %260 = arith.addf %258, %259 : vector<1x256xf32>
    %261 = vector.broadcast %7 : f32 to vector<1x256xf32>
    %262 = arith.mulf %261, %245 : vector<1x256xf32>
    %263 = vector.broadcast %9 : f32 to vector<1x256xf32>
    %264 = arith.mulf %263, %253 : vector<1x256xf32>
    %265 = arith.addf %262, %264 : vector<1x256xf32>
    %266 = vector.broadcast %11 : f32 to vector<1x256xf32>
    %267 = arith.addf %265, %266 : vector<1x256xf32>
    %cst_79 = arith.constant 1.000000e+00 : f32
    %268 = vector.broadcast %cst_79 : f32 to vector<1x256xf32>
    %269 = arith.addf %260, %268 : vector<1x256xf32>
    %cst_80 = arith.constant 2.800000e+01 : f32
    %270 = vector.broadcast %cst_80 : f32 to vector<1x256xf32>
    %271 = arith.mulf %269, %270 : vector<1x256xf32>
    %cst_81 = arith.constant 1.000000e+00 : f32
    %272 = vector.broadcast %cst_81 : f32 to vector<1x256xf32>
    %273 = arith.subf %271, %272 : vector<1x256xf32>
    %cst_82 = arith.constant 5.000000e-01 : f32
    %274 = vector.broadcast %cst_82 : f32 to vector<1x256xf32>
    %275 = arith.mulf %273, %274 : vector<1x256xf32>
    %cst_83 = arith.constant 1.000000e+00 : f32
    %276 = vector.broadcast %cst_83 : f32 to vector<1x256xf32>
    %277 = arith.addf %267, %276 : vector<1x256xf32>
    %cst_84 = arith.constant 2.800000e+01 : f32
    %278 = vector.broadcast %cst_84 : f32 to vector<1x256xf32>
    %279 = arith.mulf %277, %278 : vector<1x256xf32>
    %cst_85 = arith.constant 1.000000e+00 : f32
    %280 = vector.broadcast %cst_85 : f32 to vector<1x256xf32>
    %281 = arith.subf %279, %280 : vector<1x256xf32>
    %cst_86 = arith.constant 5.000000e-01 : f32
    %282 = vector.broadcast %cst_86 : f32 to vector<1x256xf32>
    %283 = arith.mulf %281, %282 : vector<1x256xf32>
    %284 = math.floor %275 : vector<1x256xf32>
    %285 = math.floor %283 : vector<1x256xf32>
    %286 = arith.subf %275, %284 : vector<1x256xf32>
    %287 = arith.subf %283, %285 : vector<1x256xf32>
    %cst_87 = arith.constant 1.000000e+00 : f32
    %288 = vector.broadcast %cst_87 : f32 to vector<1x256xf32>
    %289 = arith.subf %288, %286 : vector<1x256xf32>
    %cst_88 = arith.constant 1.000000e+00 : f32
    %290 = vector.broadcast %cst_88 : f32 to vector<1x256xf32>
    %291 = arith.subf %290, %287 : vector<1x256xf32>
    %292 = tpu.iota {dimensions = array<i32: 0>} : vector<28x256xi32>
    %293 = arith.sitofp %292 : vector<28x256xi32> to vector<28x256xf32>
    %294 = tpu.iota {dimensions = array<i32: 0>} : vector<28x256xi32>
    %295 = arith.sitofp %294 : vector<28x256xi32> to vector<28x256xf32>
    %296 = vector.broadcast %285 : vector<1x256xf32> to vector<28x256xf32>
    %297 = arith.cmpf oeq, %293, %296 : vector<28x256xf32>
    %cst_89 = arith.constant 0.000000e+00 : f32
    %298 = vector.shape_cast %291 : vector<1x256xf32> to vector<1x256xf32>
    %299 = vector.broadcast %298 : vector<1x256xf32> to vector<28x256xf32>
    %300 = vector.broadcast %cst_89 : f32 to vector<28x256xf32>
    %301 = arith.select %297, %299, %300 : vector<28x256xi1>, vector<28x256xf32>
    %cst_90 = arith.constant 1.000000e+00 : f32
    %302 = vector.broadcast %cst_90 : f32 to vector<1x256xf32>
    %303 = arith.addf %285, %302 : vector<1x256xf32>
    %304 = vector.broadcast %303 : vector<1x256xf32> to vector<28x256xf32>
    %305 = arith.cmpf oeq, %293, %304 : vector<28x256xf32>
    %cst_91 = arith.constant 0.000000e+00 : f32
    %306 = vector.shape_cast %287 : vector<1x256xf32> to vector<1x256xf32>
    %307 = vector.broadcast %306 : vector<1x256xf32> to vector<28x256xf32>
    %308 = vector.broadcast %cst_91 : f32 to vector<28x256xf32>
    %309 = arith.select %305, %307, %308 : vector<28x256xi1>, vector<28x256xf32>
    %310 = arith.addf %301, %309 : vector<28x256xf32>
    %311 = vector.broadcast %284 : vector<1x256xf32> to vector<28x256xf32>
    %312 = arith.cmpf oeq, %295, %311 : vector<28x256xf32>
    %cst_92 = arith.constant 0.000000e+00 : f32
    %313 = vector.shape_cast %289 : vector<1x256xf32> to vector<1x256xf32>
    %314 = vector.broadcast %313 : vector<1x256xf32> to vector<28x256xf32>
    %315 = vector.broadcast %cst_92 : f32 to vector<28x256xf32>
    %316 = arith.select %312, %314, %315 : vector<28x256xi1>, vector<28x256xf32>
    %cst_93 = arith.constant 1.000000e+00 : f32
    %317 = vector.broadcast %cst_93 : f32 to vector<1x256xf32>
    %318 = arith.addf %284, %317 : vector<1x256xf32>
    %319 = vector.broadcast %318 : vector<1x256xf32> to vector<28x256xf32>
    %320 = arith.cmpf oeq, %295, %319 : vector<28x256xf32>
    %cst_94 = arith.constant 0.000000e+00 : f32
    %321 = vector.shape_cast %286 : vector<1x256xf32> to vector<1x256xf32>
    %322 = vector.broadcast %321 : vector<1x256xf32> to vector<28x256xf32>
    %323 = vector.broadcast %cst_94 : f32 to vector<28x256xf32>
    %324 = arith.select %320, %322, %323 : vector<28x256xi1>, vector<28x256xf32>
    %325 = arith.addf %316, %324 : vector<28x256xf32>
    %cst_95 = arith.constant dense<0.000000e+00> : vector<28x256xf32>
    %326 = tpu.matmul %13, %325, %cst_95 {dimension_numbers = #tpu.dot_dimension_numbers<[1], [0], [0], [1], [0, 0, 1, 1], [], []>, precision = #tpu.contract_precision<fp32>} : vector<28x28xf32>, vector<28x256xf32>, vector<28x256xf32> -> vector<28x256xf32>
    %327 = arith.mulf %310, %326 : vector<28x256xf32>
    %cst_96 = arith.constant dense<0.000000e+00> : vector<256xf32>
    %328 = vector.multi_reduction <add>, %327, %cst_96 [0] : vector<28x256xf32> to vector<256xf32>
    %329 = vector.shape_cast %328 : vector<256xf32> to vector<1x256xf32>
    %330 = vector.shape_cast %329 : vector<1x256xf32> to vector<1x1x256xf32>
    %c0_97 = arith.constant 0 : index
    %c0_98 = arith.constant 0 : index
    %c512 = arith.constant 512 : index
    %331 = vector.load %arg3[%c0_97, %c0_98, %c512] : memref<1x1x784xf32, #tpu.memory_space<vmem>>, vector<1x1x256xf32>
    tpu.vector_store %arg3[%c0_97, %c0_98, %c512], %330 {strides = array<i32>} : memref<1x1x784xf32, #tpu.memory_space<vmem>>, vector<1x1x256xf32>,
    %332 = tpu.iota {dimensions = array<i32: 1>} : vector<1x16xi32>
    %333 = arith.sitofp %332 : vector<1x16xi32> to vector<1x16xf32>
    %cst_99 = arith.constant 7.680000e+02 : f32
    %334 = vector.broadcast %cst_99 : f32 to vector<1x16xf32>
    %335 = arith.addf %333, %334 : vector<1x16xf32>
    %cst_100 = arith.constant 5.000000e-01 : f32
    %336 = vector.broadcast %cst_100 : f32 to vector<1x16xf32>
    %337 = arith.addf %335, %336 : vector<1x16xf32>
    %cst_101 = arith.constant 0.0357142873 : f32
    %338 = vector.broadcast %cst_101 : f32 to vector<1x16xf32>
    %339 = arith.mulf %337, %338 : vector<1x16xf32>
    %340 = math.floor %339 : vector<1x16xf32>
    %cst_102 = arith.constant 2.800000e+01 : f32
    %341 = vector.broadcast %cst_102 : f32 to vector<1x16xf32>
    %342 = arith.mulf %340, %341 : vector<1x16xf32>
    %343 = arith.subf %335, %342 : vector<1x16xf32>
    %cst_103 = arith.constant 2.000000e+00 : f32
    %344 = vector.broadcast %cst_103 : f32 to vector<1x16xf32>
    %345 = arith.mulf %344, %343 : vector<1x16xf32>
    %cst_104 = arith.constant 1.000000e+00 : f32
    %346 = vector.broadcast %cst_104 : f32 to vector<1x16xf32>
    %347 = arith.addf %345, %346 : vector<1x16xf32>
    %cst_105 = arith.constant 2.800000e+01 : f32
    %348 = vector.broadcast %cst_105 : f32 to vector<1x16xf32>
    %349 = arith.divf %347, %348 : vector<1x16xf32>
    %cst_106 = arith.constant 1.000000e+00 : f32
    %350 = vector.broadcast %cst_106 : f32 to vector<1x16xf32>
    %351 = arith.subf %349, %350 : vector<1x16xf32>
    %cst_107 = arith.constant 2.000000e+00 : f32
    %352 = vector.broadcast %cst_107 : f32 to vector<1x16xf32>
    %353 = arith.mulf %352, %340 : vector<1x16xf32>
    %cst_108 = arith.constant 1.000000e+00 : f32
    %354 = vector.broadcast %cst_108 : f32 to vector<1x16xf32>
    %355 = arith.addf %353, %354 : vector<1x16xf32>
    %cst_109 = arith.constant 2.800000e+01 : f32
    %356 = vector.broadcast %cst_109 : f32 to vector<1x16xf32>
    %357 = arith.divf %355, %356 : vector<1x16xf32>
    %cst_110 = arith.constant 1.000000e+00 : f32
    %358 = vector.broadcast %cst_110 : f32 to vector<1x16xf32>
    %359 = arith.subf %357, %358 : vector<1x16xf32>
    %360 = vector.broadcast %1 : f32 to vector<1x16xf32>
    %361 = arith.mulf %360, %351 : vector<1x16xf32>
    %362 = vector.broadcast %3 : f32 to vector<1x16xf32>
    %363 = arith.mulf %362, %359 : vector<1x16xf32>
    %364 = arith.addf %361, %363 : vector<1x16xf32>
    %365 = vector.broadcast %5 : f32 to vector<1x16xf32>
    %366 = arith.addf %364, %365 : vector<1x16xf32>
    %367 = vector.broadcast %7 : f32 to vector<1x16xf32>
    %368 = arith.mulf %367, %351 : vector<1x16xf32>
    %369 = vector.broadcast %9 : f32 to vector<1x16xf32>
    %370 = arith.mulf %369, %359 : vector<1x16xf32>
    %371 = arith.addf %368, %370 : vector<1x16xf32>
    %372 = vector.broadcast %11 : f32 to vector<1x16xf32>
    %373 = arith.addf %371, %372 : vector<1x16xf32>
    %cst_111 = arith.constant 1.000000e+00 : f32
    %374 = vector.broadcast %cst_111 : f32 to vector<1x16xf32>
    %375 = arith.addf %366, %374 : vector<1x16xf32>
    %cst_112 = arith.constant 2.800000e+01 : f32
    %376 = vector.broadcast %cst_112 : f32 to vector<1x16xf32>
    %377 = arith.mulf %375, %376 : vector<1x16xf32>
    %cst_113 = arith.constant 1.000000e+00 : f32
    %378 = vector.broadcast %cst_113 : f32 to vector<1x16xf32>
    %379 = arith.subf %377, %378 : vector<1x16xf32>
    %cst_114 = arith.constant 5.000000e-01 : f32
    %380 = vector.broadcast %cst_114 : f32 to vector<1x16xf32>
    %381 = arith.mulf %379, %380 : vector<1x16xf32>
    %cst_115 = arith.constant 1.000000e+00 : f32
    %382 = vector.broadcast %cst_115 : f32 to vector<1x16xf32>
    %383 = arith.addf %373, %382 : vector<1x16xf32>
    %cst_116 = arith.constant 2.800000e+01 : f32
    %384 = vector.broadcast %cst_116 : f32 to vector<1x16xf32>
    %385 = arith.mulf %383, %384 : vector<1x16xf32>
    %cst_117 = arith.constant 1.000000e+00 : f32
    %386 = vector.broadcast %cst_117 : f32 to vector<1x16xf32>
    %387 = arith.subf %385, %386 : vector<1x16xf32>
    %cst_118 = arith.constant 5.000000e-01 : f32
    %388 = vector.broadcast %cst_118 : f32 to vector<1x16xf32>
    %389 = arith.mulf %387, %388 : vector<1x16xf32>
    %390 = math.floor %381 : vector<1x16xf32>
    %391 = math.floor %389 : vector<1x16xf32>
    %392 = arith.subf %381, %390 : vector<1x16xf32>
    %393 = arith.subf %389, %391 : vector<1x16xf32>
    %cst_119 = arith.constant 1.000000e+00 : f32
    %394 = vector.broadcast %cst_119 : f32 to vector<1x16xf32>
    %395 = arith.subf %394, %392 : vector<1x16xf32>
    %cst_120 = arith.constant 1.000000e+00 : f32
    %396 = vector.broadcast %cst_120 : f32 to vector<1x16xf32>
    %397 = arith.subf %396, %393 : vector<1x16xf32>
    %398 = tpu.iota {dimensions = array<i32: 0>} : vector<28x16xi32>
    %399 = arith.sitofp %398 : vector<28x16xi32> to vector<28x16xf32>
    %400 = tpu.iota {dimensions = array<i32: 0>} : vector<28x16xi32>
    %401 = arith.sitofp %400 : vector<28x16xi32> to vector<28x16xf32>
    %402 = vector.broadcast %391 : vector<1x16xf32> to vector<28x16xf32>
    %403 = arith.cmpf oeq, %399, %402 : vector<28x16xf32>
    %cst_121 = arith.constant 0.000000e+00 : f32
    %404 = vector.shape_cast %397 : vector<1x16xf32> to vector<1x16xf32>
    %405 = vector.broadcast %404 : vector<1x16xf32> to vector<28x16xf32>
    %406 = vector.broadcast %cst_121 : f32 to vector<28x16xf32>
    %407 = arith.select %403, %405, %406 : vector<28x16xi1>, vector<28x16xf32>
    %cst_122 = arith.constant 1.000000e+00 : f32
    %408 = vector.broadcast %cst_122 : f32 to vector<1x16xf32>
    %409 = arith.addf %391, %408 : vector<1x16xf32>
    %410 = vector.broadcast %409 : vector<1x16xf32> to vector<28x16xf32>
    %411 = arith.cmpf oeq, %399, %410 : vector<28x16xf32>
    %cst_123 = arith.constant 0.000000e+00 : f32
    %412 = vector.shape_cast %393 : vector<1x16xf32> to vector<1x16xf32>
    %413 = vector.broadcast %412 : vector<1x16xf32> to vector<28x16xf32>
    %414 = vector.broadcast %cst_123 : f32 to vector<28x16xf32>
    %415 = arith.select %411, %413, %414 : vector<28x16xi1>, vector<28x16xf32>
    %416 = arith.addf %407, %415 : vector<28x16xf32>
    %417 = vector.broadcast %390 : vector<1x16xf32> to vector<28x16xf32>
    %418 = arith.cmpf oeq, %401, %417 : vector<28x16xf32>
    %cst_124 = arith.constant 0.000000e+00 : f32
    %419 = vector.shape_cast %395 : vector<1x16xf32> to vector<1x16xf32>
    %420 = vector.broadcast %419 : vector<1x16xf32> to vector<28x16xf32>
    %421 = vector.broadcast %cst_124 : f32 to vector<28x16xf32>
    %422 = arith.select %418, %420, %421 : vector<28x16xi1>, vector<28x16xf32>
    %cst_125 = arith.constant 1.000000e+00 : f32
    %423 = vector.broadcast %cst_125 : f32 to vector<1x16xf32>
    %424 = arith.addf %390, %423 : vector<1x16xf32>
    %425 = vector.broadcast %424 : vector<1x16xf32> to vector<28x16xf32>
    %426 = arith.cmpf oeq, %401, %425 : vector<28x16xf32>
    %cst_126 = arith.constant 0.000000e+00 : f32
    %427 = vector.shape_cast %392 : vector<1x16xf32> to vector<1x16xf32>
    %428 = vector.broadcast %427 : vector<1x16xf32> to vector<28x16xf32>
    %429 = vector.broadcast %cst_126 : f32 to vector<28x16xf32>
    %430 = arith.select %426, %428, %429 : vector<28x16xi1>, vector<28x16xf32>
    %431 = arith.addf %422, %430 : vector<28x16xf32>
    %cst_127 = arith.constant dense<0.000000e+00> : vector<28x16xf32>
    %432 = tpu.matmul %13, %431, %cst_127 {dimension_numbers = #tpu.dot_dimension_numbers<[1], [0], [0], [1], [0, 0, 1, 1], [], []>, precision = #tpu.contract_precision<fp32>} : vector<28x28xf32>, vector<28x16xf32>, vector<28x16xf32> -> vector<28x16xf32>
    %433 = arith.mulf %416, %432 : vector<28x16xf32>
    %cst_128 = arith.constant dense<0.000000e+00> : vector<16xf32>
    %434 = vector.multi_reduction <add>, %433, %cst_128 [0] : vector<28x16xf32> to vector<16xf32>
    %435 = vector.shape_cast %434 : vector<16xf32> to vector<1x16xf32>
    %436 = vector.shape_cast %435 : vector<1x16xf32> to vector<1x1x16xf32>
    %c0_129 = arith.constant 0 : index
    %c0_130 = arith.constant 0 : index
    %c768 = arith.constant 768 : index
    %437 = vector.load %arg3[%c0_129, %c0_130, %c768] : memref<1x1x784xf32, #tpu.memory_space<vmem>>, vector<1x1x16xf32>
    tpu.vector_store %arg3[%c0_129, %c0_130, %c768], %436 {strides = array<i32>} : memref<1x1x784xf32, #tpu.memory_space<vmem>>, vector<1x1x16xf32>,
    return
  }
  func.func @transform_0(%arg0: i32) -> (i32, i32) {
    %c0_i32 = arith.constant 0 : i32
    %c0_i32_0 = arith.constant 0 : i32
    %c0_i32_1 = arith.constant 0 : i32
    return %c0_i32, %c0_i32_0 : i32, i32
  }
  func.func @transform_1(%arg0: i32) -> (i32, i32, i32) {
    %c0_i32 = arith.constant 0 : i32
    %c0_i32_0 = arith.constant 0 : i32
    %c0_i32_1 = arith.constant 0 : i32
    return %arg0, %c0_i32, %c0_i32_0 : i32, i32, i32
  }
  func.func @transform_2(%arg0: i32) -> (i32, i32, i32) {
    %c0_i32 = arith.constant 0 : i32
    %c0_i32_0 = arith.constant 0 : i32
    %c0_i32_1 = arith.constant 0 : i32
    return %arg0, %c0_i32, %c0_i32_0 : i32, i32, i32
  }
}

</mosaic_0001>

<bundles_post_ra>
// kernel: spatial_transformer_forward.3
= control target key start
LH: loop header
LB: loop body
LE: loop exit
PB: predicated region body
PF: predicated region fallthrough
CT: control target
= control target key end

     0   :  { %7 = vsyncpa [#allocation3], 0  ;;  %s4266_s9 = smov 0   ;;  %s5401_s0 = inlined_call_operand.vmem [shape: f32[2,6], index: 0, kind: input, shape index: {}]   ;;  %s5402_s1 = inlined_call_operand.vmem [shape: f32[2,28,28], index: 1, kind: input, shape index: {}]   ;;  %s5403_s2 = inlined_call_operand.vmem [shape: f32[2,1,784], index: 2, kind: output, shape index: {}]  }
   0x1 LB: > { %s4272_s10 = sadd.s32 4294967295, %s4246_s9   ;;  %p3692_p0 = scmp.ge.s32.totalorder %s4246_s9, 1  ;;  %s4246_s9 = sphi %s4266_s9, %s13_s9  }
   0x2   : > { %p91_p1 = scmp.lt.s32.totalorder %s4246_s9, 3  ;;  %s104_s13 = sshll.u32 %s5401_s0, 4  ;;  %s105_s13 = int_to_ptr.vmem [resolvable:$true] %s104_s13 }
   0x3   : > { %p4208_p3 = scmp.eq.s32.totalorder %s4272_s10, 0  ;;  %s4221_s15 = scalar_lea.vmem %s105_s13, 32 }
   0x4   : > { %p4279_p2 = pnand %p3692_p0, %p91_p1  ;;  %p4222_p6 = scmp.ne.s32.totalorder %s105_s13, %s4221_s15 }
   0x5   : > { %p4229_p10 = scmp.lt.s32.totalorder %s105_s13, %s105_s13  ;;  %p4230_p11 = scmp.lt.s32.totalorder %s4221_s15, %s4221_s15 }
   0x6   : > { %p4204_p4 = pneg %p4279_p2 }
   0x7   : > { %p4231_p12 = por %p4230_p11, %p4229_p10 }
   0x8   : > { %p4205_p5 = pnand %p4208_p3, %p4204_p4 }
   0xa   : > { %p4223_p7 = pneg %p4205_p5 }
   0xc   : > { %p4224_p8 = pnand %p4223_p7, %p4222_p6 }
   0xe   : > { %p4225_p9 = pneg %p4224_p8 }
  0x10   : > { %p4232_p13 = pnand %p4231_p12, %p4225_p9 }
  0x12   : > { %4235 = shalt.err (!%p4232_p13)
}
  0x13   : > { %s4248_s16 = smov [#allocation2]   ;;  %125 = sbr.rel (%p4279_p2) target bundleno = 504 (0x1f8), region = 28 }
  0x14   : > { %4207 = dma.vmem_to_smem (!%p4205_p5), %s105_s13, 32, %s4248_s16, [#allocation3]  }
  0x1a   : > { %4241 = dma.done.wait (%p4208_p3), [#allocation3], 32  }
  0x1b   : > { %4243 = vsyncadd (%p4208_p3), [#allocation3], 4294967264 }
  0x1c   : > { %131 = sfence }
  0x1d   : > { %s4295_s17 = sshll.u32 %s4272_s10, 7  ;;  %v5404_v0 = vlaneseq  ;;  %p147_p0 = scmp.lt.s32.totalorder %s4272_s10, 1  ;;  %v5406_v1 = vmov 0.0   ;;  %vm349_vm0 = vcmask 228352   ;;  %vm362_vm8 = vcmask 1043456  }
  0x1e   : > { %441 = vmatprep.mubr.f32.mxu1 %v5406_v1  ;;  %590 = vmatprep.mubr.f32.mxu0 %v5406_v1  ;;  %s4305_s18 = sld [smem:[#allocation2 + %s4295_s17]]  ;;  %s158_s19 = sadd.s32 1, %s4295_s17 }
  0x1f   : > { %v173_v2 = vand.u32 127, %v5404_v0  ;;  %v4302_v3 = vshrl.u32 %v5404_v0, 7  ;;  %s5517_s10 = smov (!%p147_p0, %s4272_s10), 1  ;;  %s160_s21 = sadd.s32 2, %s4295_s17 }
  0x20   : > { %s3730_s20 = sshll.u32 %s5517_s10, 5  ;;  %s4322_s25 = sld [smem:[#allocation2 + %s158_s19]] }
  0x21   : > { %5451 = vst [vmem:[#allocation5_spill] sm:$0xff] %v4302_v3  ;;  %v174_v4 = vadd.s32 128, %v173_v2  ;;  %v258_v5 = vadd.s32 8, %v4302_v3  ;;  %v4312_v6 = vcvt.s32.f32 %v173_v2  ;;  %v259_v8 = vadd.s32 16, %v4302_v3  ;;  %s151_s24 = scalar_lea.vmem %s5402_s1, %s3730_s20  ;;  %s4333_s26 = sld [smem:[#allocation2 + %s160_s21]] }
  0x22   : > { %v260_v9 = vadd.s32 24, %v4302_v3  ;;  %v4325_v12 = vcvt.s32.f32 %v4302_v3  ;;  %v168_v13 = vld [vmem:[%s151_s24] sm:$0xff]  ;;  %v169_v14 = vld [vmem:[%s151_s24 + $0x8] sm:$0xff]  ;;  %v170_v15 = vld [vmem:[%s151_s24 + $0x10] sm:$0xff]  ;;  %s162_s27 = sadd.s32 3, %s4295_s17  ;;  %s164_s28 = sadd.s32 4, %s4295_s17 }
  0x23   : > { %v176_v7 = vcvt.s32.f32 %v174_v4  ;;  %v179_v10 = vadd.f32 0.5, %v4312_v6  ;;  %v4329_v17 = vcvt.s32.f32 %v258_v5  ;;  %v351_v19 = vsel %vm349_vm0, %v168_v13, 0  ;;  %v171_v21 = vld [vmem:[%s151_s24 + $0x18] sm:$0xf]  ;;  %s163_s29 = sld [smem:[#allocation2 + %s162_s27]]  ;;  %s166_s3 = sadd.s32 5, %s4295_s17 }
  0x24   : > { %v354_v20 = vsel %vm349_vm0, %v169_v14, 0  ;;  %v4335_v23 = vand.u32 4294901760, %v351_v19  ;;  %v357_v25 = vsel %vm349_vm0, %v170_v15, 0  ;;  %v4340_v26 = vcvt.s32.f32 %v259_v8  ;;  %s165_s30 = sld [smem:[#allocation2 + %s164_s28]]  ;;  %s4199_s5 = smul.u32 7, %s5517_s10 }
  0x25   : > { %v180_v11 = vadd.f32 0.5, %v176_v7  ;;  %v4327_v16 = vadd.f32 256.0, %v176_v7  ;;  %v181_v18 = vmul.f32 0.035714287, %v179_v10  ;;  %v4337_v24 = vand.u32 4294901760, %v354_v20  ;;  %s167_s4 = sld [smem:[#allocation2 + %s166_s3]] }
  0x26   : > { %v4342_v27 = vcvt.s32.f32 %v260_v9  ;;  %v4344_v29 = vand.u32 4294901760, %v357_v25  ;;  %v4347_v31 = vstv %s4305_s18  ;;  %v360_v32 = vsel %vm349_vm0, %v171_v21, 0  ;;  %s5220_s8 = scalar_lea.vmem %s5403_s2, %s4199_s5 }
  0x27   : > { %v182_v22 = vmul.f32 0.035714287, %v180_v11  ;;  %v183_v28 = vfloor.f32 %v181_v18  ;;  %v1113_v33 = vadd.f32 0.5, %v4327_v16  ;;  %v4352_v36 = vsub.f32 %v351_v19, %v4335_v23 }
  0x28   : > { %v4355_v37 = vsub.f32 %v354_v20, %v4337_v24  ;;  %v4358_v40 = vadd.f32 256.0, %v4312_v6  ;;  %v4361_v41 = vadd.f32 512.0, %v4312_v6  ;;  %v4365_v44 = vsub.f32 %v357_v25, %v4344_v29 }
  0x29   : > { %v184_v30 = vfloor.f32 %v182_v22  ;;  %v185_v34 = vmul.f32 28.0, %v183_v28  ;;  %v198_v35 = vmul.f32 2.0, %v183_v28  ;;  %v4367_v45 = vand.u32 4294901760, %v360_v32 }
  0x2a   : > { %5452 = vst [vmem:[#allocation6_spill] sm:$0xff] %v4355_v37  ;;  %5453 = vst [vmem:[#allocation7_spill] sm:$0xff] %v4365_v44  ;;  %v1115_v48 = vmul.f32 0.035714287, %v1113_v33  ;;  %v2010_v49 = vadd.f32 512.0, %v176_v7  ;;  %v4370_v52 = vand.u32 4294901760, %v4352_v36  ;;  %v4376_v56 = vstv %s4322_s25 }
  0x2b   : > { %v186_v38 = vmul.f32 28.0, %v184_v30  ;;  %v199_v39 = vmul.f32 2.0, %v184_v30  ;;  %v187_v42 = vsub.f32 %v4312_v6, %v185_v34  ;;  %v200_v43 = vadd.f32 1.0, %v198_v35 }
  0x2c   : > { %v4373_v53 = vand.u32 4294901760, %v4355_v37  ;;  %v4379_v57 = vstv %s4333_s26  ;;  %v4384_v60 = vand.u32 4294901760, %v4365_v44  ;;  %v4387_v61 = vsub.f32 %v360_v32, %v4367_v45 }
  0x2d   : > { %v188_v46 = vsub.f32 %v176_v7, %v186_v38  ;;  %v201_v47 = vadd.f32 1.0, %v199_v39  ;;  %v189_v50 = vmul.f32 2.0, %v187_v42  ;;  %v202_v51 = vmul.f32 0.035714287, %v200_v43 }
  0x2e   : > { %5455 = vst [vmem:[#allocation9_spill] sm:$0xff] %v4387_v61  ;;  %v1117_v2 = vfloor.f32 %v1115_v48  ;;  %v1112_v4 = vadd.f32 0.5, %v4358_v40  ;;  %v445_v7 = vsub.f32 %v4352_v36, %v4370_v52  ;;  %v456_v8 = vsub.f32 %v4355_v37, %v4373_v53 }
  0x2f   : > { %v190_v54 = vmul.f32 2.0, %v188_v46  ;;  %v203_v55 = vmul.f32 0.035714287, %v201_v47  ;;  %v191_v58 = vadd.f32 1.0, %v189_v50  ;;  %v4381_v59 = vadd.f32 -1.0, %v202_v51 }
  0x30   : > { %v2012_v9 = vadd.f32 0.5, %v2010_v49  ;;  %v1119_v13 = vmul.f32 28.0, %v1117_v2  ;;  %v1131_v14 = vmul.f32 2.0, %v1117_v2  ;;  %v1114_v18 = vmul.f32 0.035714287, %v1112_v4 }
  0x31   : > { %5454 = vst [vmem:[#allocation8_spill] sm:$0xff] %v4381_v59  ;;  %v192_v62 = vadd.f32 1.0, %v190_v54  ;;  %v4389_v63 = vadd.f32 -1.0, %v203_v55  ;;  %v194_v5 = vmul.f32 0.035714287, %v191_v58  ;;  %v210_v11 = vmul.f32 %v4381_v59, %v4376_v56 }
  0x32   : > { %v2014_v19 = vmul.f32 0.035714287, %v2012_v9  ;;  %v2011_v20 = vadd.f32 0.5, %v4361_v41  ;;  %v1121_v25 = vsub.f32 %v4327_v16, %v1119_v13  ;;  %v1133_v28 = vadd.f32 1.0, %v1131_v14 }
  0x33   : > { %5456 = vst [vmem:[#allocation10_spill] sm:$0xff] %v4389_v63  ;;  %v195_v10 = vmul.f32 0.035714287, %v192_v62  ;;  %v4398_v15 = vadd.f32 -1.0, %v194_v5  ;;  %v211_v22 = vmul.f32 %v4389_v63, %v4376_v56  ;;  %v1116_v33 = vfloor.f32 %v1114_v18 }
  0x34   : > { %v2016_v34 = vfloor.f32 %v2014_v19  ;;  %v1123_v38 = vmul.f32 2.0, %v1121_v25  ;;  %v1135_v39 = vmul.f32 0.035714287, %v1133_v28  ;;  %v4412_v42 = vmul.f32 0.035714287, %v2011_v20 }
  0x35   : > { %5457 = vst [vmem:[#allocation11_spill] sm:$0xff] %v4398_v15  ;;  %v4401_v21 = vadd.f32 -1.0, %v195_v10  ;;  %v207_v30 = vmul.f32 %v4398_v15, %v4347_v31  ;;  %v1118_v46 = vmul.f32 28.0, %v1116_v33  ;;  %v1130_v47 = vmul.f32 2.0, %v1116_v33 }
  0x36   : > { %v2018_v16 = vmul.f32 28.0, %v2016_v34  ;;  %v1125_v50 = vadd.f32 1.0, %v1123_v38  ;;  %v4414_v51 = vadd.f32 -1.0, %v1135_v39  ;;  %v2030_v54 = vmul.f32 2.0, %v2016_v34 }
  0x37   : > { %5458 = vst [vmem:[#allocation12_spill] sm:$0xff] %v4401_v21  ;;  %v208_v35 = vmul.f32 %v4401_v21, %v4347_v31  ;;  %v212_v43 = vadd.f32 %v210_v11, %v207_v30  ;;  %v1120_v58 = vsub.f32 %v4358_v40, %v1118_v46  ;;  %v1132_v62 = vadd.f32 1.0, %v1130_v47 }
  0x38   : > { %5459 = vst [vmem:[#allocation13_spill] sm:$0xff] %v4414_v51  ;;  %v2020_v2 = vsub.f32 %v2010_v49, %v2018_v16  ;;  %v4420_v5 = vand.u32 4294901760, %v4387_v61  ;;  %v1127_v9 = vmul.f32 0.035714287, %v1125_v50  ;;  %v2032_v10 = vadd.f32 1.0, %v2030_v54 }
  0x39   : > { %v213_v48 = vadd.f32 %v211_v22, %v208_v35  ;;  %v215_v55 = vadd.f32 %v4379_v57, %v212_v43  ;;  %v1122_v13 = vmul.f32 2.0, %v1120_v58  ;;  %v1134_v14 = vmul.f32 0.035714287, %v1132_v62 }
  0x3a   : > { %v2022_v18 = vmul.f32 2.0, %v2020_v2  ;;  %v4422_v20 = vadd.f32 -1.0, %v1127_v9  ;;  %v1141_v22 = vmul.f32 %v4414_v51, %v4376_v56  ;;  %v5408_v40 = vfloor.f32 %v4412_v42 }
  0x3b   : > { %v216_v4 = vadd.f32 %v4379_v57, %v213_v48  ;;  %v228_v11 = vadd.f32 1.0, %v215_v55  ;;  %v1124_v25 = vadd.f32 1.0, %v1122_v13  ;;  %v4428_v30 = vadd.f32 768.0, %v4312_v6 }
  0x3c   : > { %5460 = vst [vmem:[#allocation14_spill] sm:$0xff] %v4422_v20  ;;  %v2024_v28 = vadd.f32 1.0, %v2022_v18  ;;  %v1139_v34 = vmul.f32 %v4422_v20, %v4347_v31  ;;  %v2034_v35 = vmul.f32 0.035714287, %v2032_v10  ;;  %v2017_v38 = vmul.f32 28.0, %v5408_v40 }
  0x3d   : > { %v229_v19 = vadd.f32 1.0, %v216_v4  ;;  %v230_v49 = vmul.f32 28.0, %v228_v11  ;;  %v1126_v43 = vmul.f32 0.035714287, %v1124_v25  ;;  %v4434_v46 = vadd.f32 -1.0, %v1134_v14 }
  0x3e   : > { %v2026_v47 = vmul.f32 0.035714287, %v2024_v28  ;;  %v4436_v48 = vand.u32 4294901760, %v445_v7  ;;  %v1143_v50 = vadd.f32 %v1141_v22, %v1139_v34  ;;  %v2019_v6 = vsub.f32 %v4361_v41, %v2017_v38 }
  0x3f   : > { %v231_v33 = vmul.f32 28.0, %v229_v19  ;;  %v3704_v39 = vadd.f32 -1.0, %v230_v49  ;;  %5461 = vst [vmem:[#allocation15_spill] sm:$0xff] %v4434_v46  ;;  %v4439_v55 = vand.u32 4294901760, %v456_v8  ;;  %v4443_v62 = vadd.f32 -1.0, %v1126_v43 }
  0x40   : > { %v1145_v4 = vadd.f32 %v1143_v50, %v4379_v57  ;;  %v2021_v9 = vmul.f32 2.0, %v2019_v6  ;;  %v4447_v10 = vadd.f32 0.5, %v4428_v30  ;;  %v4451_v11 = vmul.f32 %v4434_v46, %v4376_v56 }
  0x41   : > { %v3705_v16 = vadd.f32 -1.0, %v231_v33  ;;  %v234_v54 = vmul.f32 0.5, %v3704_v39  ;;  %5462 = vst [vmem:[#allocation16_spill] sm:$0xff] %v4443_v62  ;;  %v4453_v41 = vadd.f32 -1.0, %v2026_v47  ;;  %v4455_v8 = vadd.f32 -1.0, %v2034_v35 }
  0x42   : > { %v4457_v14 = vadd.f32 1.0, %v1145_v4  ;;  %v4461_v18 = vmul.f32 %v4443_v62, %v4347_v31  ;;  %v4463_v19 = vadd.f32 1.0, %v2021_v9 }
  0x43   : > { %v235_v2 = vmul.f32 0.5, %v3705_v16  ;;  %v244_v7 = vfloor.f32 %v234_v54  ;;  %5463 = vst [vmem:[#allocation17_spill] sm:$0xff] %v4453_v41  ;;  %5464 = vst [vmem:[#allocation18_spill] sm:$0xff] %v4455_v8 }
  0x45   : > { %v245_v13 = vfloor.f32 %v235_v2  ;;  %v248_v22 = vsub.f32 %v234_v54, %v244_v7  ;;  %vm307_vm1 = vcmp.eq.f32.partialorder %v4325_v12, %v244_v7  ;;  %vm309_vm2 = vcmp.eq.f32.partialorder %v4329_v17, %v244_v7 }
  0x46   : > { %v323_v49 = vadd.f32 1.0, %v244_v7  ;;  %vm311_vm14 = vcmp.eq.f32.partialorder %v4340_v26, %v244_v7  ;;  %vm313_vm15 = vcmp.eq.f32.partialorder %v4342_v27, %v244_v7 }
  0x47   : > { %v249_v25 = vsub.f32 %v235_v2, %v245_v13  ;;  %vm308_vm3 = vcmp.eq.f32.partialorder %v4325_v12, %v245_v13  ;;  %vm310_vm4 = vcmp.eq.f32.partialorder %v4329_v17, %v245_v13  ;;  %v324_v28 = vadd.f32 1.0, %v245_v13 }
  0x48   : > { %v252_v33 = vsub.f32 1.0, %v248_v22  ;;  %vm325_vm5 = vcmp.eq.f32.partialorder %v4325_v12, %v323_v49  ;;  %vm327_vm6 = vcmp.eq.f32.partialorder %v4329_v17, %v323_v49  ;;  %vm312_vm7 = vcmp.eq.f32.partialorder %v4340_v26, %v245_v13 }
  0x49   : > { %v253_v34 = vsub.f32 1.0, %v249_v25  ;;  %vm326_vm9 = vcmp.eq.f32.partialorder %v4325_v12, %v324_v28  ;;  %vm328_vm10 = vcmp.eq.f32.partialorder %v4329_v17, %v324_v28  ;;  %v333_v35 = vsel %vm325_vm5, %v248_v22, 0.0 }
  0x4a   : > { %v334_v38 = vsel %vm326_vm9, %v249_v25, 0.0  ;;  %v336_v39 = vsel %vm328_vm10, %v249_v25, 0.0  ;;  %v315_v43 = vsel %vm307_vm1, %v252_v33, 0.0  ;;  %v317_v47 = vsel %vm309_vm2, %v252_v33, 0.0 }
  0x4b   : > { %v316_v16 = vsel %vm308_vm3, %v253_v34, 0.0  ;;  %v318_v50 = vsel %vm310_vm4, %v253_v34, 0.0  ;;  %v335_v6 = vsel %vm327_vm6, %v248_v22, 0.0  ;;  %v341_v54 = vadd.f32 %v333_v35, %v315_v43 }
  0x4c   : > { %v342_v2 = vadd.f32 %v334_v38, %v316_v16  ;;  %v344_v4 = vadd.f32 %v336_v39, %v318_v50  ;;  %v343_v9 = vadd.f32 %v335_v6, %v317_v47  ;;  %vm314_vm11 = vcmp.eq.f32.partialorder %v4342_v27, %v245_v13 }
  0x4d   : > { %v371_v0 = vand.u32 4294901760, %v341_v54  ;;  %v320_v58 = vsel %vm312_vm7, %v253_v34, 0.0  ;;  %v322_v32 = vsel %vm314_vm11, %v253_v34, 0.0  ;;  %vm330_vm12 = vcmp.eq.f32.partialorder %v4340_v26, %v324_v28 }
  0x4e   : > { %v369_v1 = vand.u32 4294901760, %v342_v2  ;;  %v373_v40 = vand.u32 4294901760, %v344_v4  ;;  %v375_v3 = vand.u32 4294901760, %v343_v9  ;;  %vm332_vm13 = vcmp.eq.f32.partialorder %v4342_v27, %v324_v28 }
  0x4f   : > { %v4487_v51 = vsub.f32 %v341_v54, %v371_v0  ;;  %v338_v35 = vsel %vm330_vm12, %v249_v25, 0.0  ;;  %v340_v38 = vsel %vm332_vm13, %v249_v25, 0.0  ;;  %v319_v28 = vsel %vm311_vm14, %v252_v33, 0.0 }
  0x50   : > { %v4490_v39 = vpack.c.bf16 %v373_v40, %v369_v1  ;;  %v4492_v43 = vsub.f32 %v342_v2, %v369_v1  ;;  %v4494_v13 = vsub.f32 %v344_v4, %v373_v40  ;;  %v4496_v34 = vpack.c.bf16 %v375_v3, %v371_v0 }
  0x51   : > { %v4498_v47 = vsub.f32 %v343_v9, %v375_v3  ;;  %v346_v16 = vadd.f32 %v338_v35, %v320_v58  ;;  %v348_v50 = vadd.f32 %v340_v38, %v322_v32  ;;  %v321_v25 = vsel %vm313_vm15, %v252_v33, 0.0 }
  0x52   : > { %3864 = vmatprep.subr.bf16.mxu1 %v4490_v39  ;;  %vm329_vm0 = vcmp.eq.f32.partialorder %v4340_v26, %v323_v49  ;;  %vm331_vm1 = vcmp.eq.f32.partialorder %v4342_v27, %v323_v49  ;;  %v5412_v7 = vand.u32 4294901760, %v4492_v43  ;;  %v5411_v33 = vand.u32 4294901760, %v4494_v13 }
  0x53   : > { %3866 = vmatpush1.bf16.msra.mxu1 %v4496_v34  ;;  %v367_v1 = vsel %vm362_vm8, %v348_v50, 0  ;;  %v377_v0 = vand.u32 4294901760, %v346_v16  ;;  %v337_v40 = vsel %vm329_vm0, %v248_v22, 0.0  ;;  %v339_v3 = vsel %vm331_vm1, %v248_v22, 0.0 }
  0x54   : > { %v381_v6 = vand.u32 4294901760, %v367_v1  ;;  %v345_v58 = vadd.f32 %v337_v40, %v319_v28  ;;  %v347_v32 = vadd.f32 %v339_v3, %v321_v25  ;;  %v5413_v2 = vand.u32 4294901760, %v4487_v51 }
  0x55   : > { %v4507_v54 = vsub.f32 %v346_v16, %v377_v0  ;;  %v5414_v49 = vand.u32 4294901760, %v4498_v47  ;;  %v489_v50 = vsub.f32 %v4492_v43, %v5412_v7  ;;  %v501_v16 = vsub.f32 %v4494_v13, %v5411_v33 }
  0x56   : > { %v4512_v4 = vpack.c.bf16 %v381_v6, %v377_v0  ;;  %v4514_v9 = vsub.f32 %v367_v1, %v381_v6  ;;  %v364_v35 = vsel %vm362_vm8, %v347_v32, 0  ;;  %v379_v22 = vand.u32 4294901760, %v345_v58 }
  0x57   : > { %v383_v38 = vand.u32 4294901760, %v364_v35  ;;  %v495_v28 = vsub.f32 %v4487_v51, %v5413_v2  ;;  %v507_v1 = vsub.f32 %v4498_v47, %v5414_v49  ;;  %v5416_v0 = vand.u32 4294901760, %v4507_v54 }
  0x58   : > { %3868 = vmatprep.subr.bf16.mxu1 %v4512_v4  ;;  %v4527_v25 = vsub.f32 %v345_v58, %v379_v22  ;;  %v5417_v40 = vand.u32 4294901760, %v4514_v9  ;;  %v490_v32 = vand.u32 4294901760, %v489_v50  ;;  %v502_v33 = vand.u32 4294901760, %v501_v16 }
  0x59   : > { %v4534_v3 = vpack.c.bf16 %v383_v38, %v379_v22  ;;  %v4536_v6 = vsub.f32 %v364_v35, %v383_v38  ;;  %v496_v7 = vand.u32 4294901760, %v495_v28  ;;  %v508_v2 = vand.u32 4294901760, %v507_v1 }
  0x5a   : > { %v513_v58 = vsub.f32 %v4507_v54, %v5416_v0  ;;  %v525_v49 = vsub.f32 %v4514_v9, %v5417_v40  ;;  %v3871_v20 = vpack.c.bf16 %v502_v33, %v490_v32  ;;  %v5419_v22 = vand.u32 4294901760, %v4527_v25 }
  0x5b   : > { %3870 = vmatpush1.bf16.msra.mxu1 %v4534_v3  ;;  %v5418_v35 = vand.u32 4294901760, %v4536_v6  ;;  %v2040_v38 = vmul.f32 %v4455_v8, %v4376_v56  ;;  %v3873_v50 = vpack.c.bf16 %v508_v2, %v496_v7  ;;  %v5465_v1 = vfloor.f32 %v4412_v42 }
  0x5c   : > { %v514_v16 = vand.u32 4294901760, %v513_v58  ;;  %v526_v28 = vand.u32 4294901760, %v525_v49  ;;  %3872 = vmatprep.subr.bf16.mxu0 %v3871_v20  ;;  %v519_v40 = vsub.f32 %v4527_v25, %v5419_v22  ;;  %4055 = vmatprep.subr.bf16.mxu1 %v3871_v20  ;;  %v1157_v32 = vmul.f32 28.0, %v4457_v14 }
  0x5d   : > { %v2029_v0 = vmul.f32 2.0, %v5465_v1  ;;  %v531_v33 = vsub.f32 %v4536_v6, %v5418_v35  ;;  %v2038_v7 = vmul.f32 %v4453_v41, %v4347_v31  ;;  %3874 = vmatpush1.bf16.msra.mxu0 %v3873_v50  ;;  %v1142_v2 = vadd.f32 %v4451_v11, %v4461_v18 }
  0x5e   : > { %447 = vmatmul.mubr.f32.vlgmr.msra.gmra.mrb[0].mxu1 %v4436_v48  ;;  %v3875_v42 = vpack.c.bf16 %v526_v28, %v514_v16  ;;  %v2025_v49 = vmul.f32 0.035714287, %v4463_v19  ;;  %v4565_v58 = vmul.f32 0.035714287, %v4447_v10  ;;  %v5466_v1 = vmov 0.0  }
  0x5f   : > { %452 = vmatprep.mubr.f32.mxu1 %v5466_v1  ;;  %v520_v20 = vand.u32 4294901760, %v519_v40  ;;  %v532_v35 = vand.u32 4294901760, %v531_v33  ;;  %v5467_v14 = vsub.f32 %v4365_v44, %v4384_v60  ;;  %4057 = vmatpush1.bf16.msra.mxu1 %v3873_v50  ;;  %v3713_v8 = vadd.f32 -1.0, %v1157_v32 }
  0x60   : > { %3876 = vmatprep.subr.bf16.mxu0 %v3875_v42  ;;  %v3879_v11 = vpack.c.bf16 %v4494_v13, %v4492_v43  ;;  %4056 = vmatprep.subr.bf16.mxu1 %v3875_v42  ;;  %v1144_v18 = vadd.f32 %v1142_v2, %v4379_v57  ;;  %v4576_v10 = vadd.f32 -1.0, %v2025_v49  ;;  %v2031_v19 = vadd.f32 1.0, %v2029_v0 }
  0x61   : > { %v4571_v22 = vand.u32 4294901760, %v5467_v14  ;;  %v3877_v16 = vpack.c.bf16 %v532_v35, %v520_v20  ;;  %v5469_v40 = vsub.f32 %v4387_v61, %v4420_v5  ;;  %v1161_v33 = vmul.f32 0.5, %v3713_v8 }
  0x62   : > { %5468 = vst [vmem:[#allocation19_spill] sm:$0xff] %v4576_v10  ;;  %v2042_v14 = vadd.f32 %v2040_v38, %v2038_v7  ;;  %458 = vmatmul.mubr.f32.gmra.mrb[2].mxu1 %v4439_v55  ;;  %v3881_v50 = vpack.c.bf16 %v4498_v47, %v4487_v51  ;;  %v3883_v32 = vpack.c.bf16 %v4514_v9, %v4507_v54  ;;  %v1154_v42 = vadd.f32 1.0, %v1144_v18 }
  0x63   : > { %v4581_v28 = vand.u32 4294901760, %v5469_v40  ;;  %3878 = vmatpush1.bf16.msra.mxu0 %v3877_v16  ;;  %463 = vmatprep.mubr.f32.mxu1 %v5466_v1  ;;  %v3885_v0 = vpack.c.bf16 %v4536_v6, %v4527_v25  ;;  %v1171_v35 = vfloor.f32 %v1161_v33  ;;  %v5470_v8 = vand.u32 4294901760, %v4492_v43 }
  0x64   : > { %v5471_v38 = vand.u32 4294901760, %v4494_v13  ;;  %v2044_v49 = vadd.f32 %v2042_v14, %v4379_v57  ;;  %3880 = vmatprep.subr.bf16.mxu0 %v3879_v11  ;;  %4058 = vmatpush1.bf16.msra.mxu1 %v3877_v16  ;;  %v1156_v20 = vmul.f32 28.0, %v1154_v42  ;;  %v5472_v18 = vand.u32 4294901760, %v4487_v51 }
  0x65   : > { %v5473_v40 = vand.u32 4294901760, %v4498_v47  ;;  %v2033_v41 = vmul.f32 0.035714287, %v2031_v19  ;;  %v4607_v46 = vmul.f32 %v4576_v10, %v4347_v31  ;;  %v1175_v43 = vsub.f32 %v1161_v33, %v1171_v35 }
  0x66   : > { %v4596_v7 = vpack.c.bf16 %v5471_v38, %v5470_v8  ;;  %vm1225_vm2 = vcmp.eq.f32.partialorder %v4325_v12, %v1171_v35  ;;  %vm1227_vm3 = vcmp.eq.f32.partialorder %v4329_v17, %v1171_v35  ;;  %v1241_v13 = vadd.f32 1.0, %v1171_v35  ;;  %469 = vmatmul.mubr.f32.gmra.mrb[4].mxu1 %v4571_v22  ;;  %592 = vmatmul.mubr.f32.vlgmr.msra.gmra.mrb[0].mxu0 %v4335_v23 }
  0x67   : > { %v4603_v2 = vpack.c.bf16 %v5473_v40, %v5472_v18  ;;  %v3712_v51 = vadd.f32 -1.0, %v1156_v20  ;;  %vm1229_vm4 = vcmp.eq.f32.partialorder %v4340_v26, %v1171_v35  ;;  %vm1231_vm5 = vcmp.eq.f32.partialorder %v4342_v27, %v1171_v35  ;;  %3882 = vmatpush1.bf16.msra.mxu0 %v3881_v50  ;;  %474 = vmatprep.mubr.f32.mxu1 %v5466_v1 }
  0x68   : > { %v2054_v47 = vadd.f32 1.0, %v2044_v49  ;;  %v1179_v11 = vsub.f32 1.0, %v1175_v43  ;;  %vm1243_vm6 = vcmp.eq.f32.partialorder %v4325_v12, %v1241_v13  ;;  %vm1245_vm7 = vcmp.eq.f32.partialorder %v4329_v17, %v1241_v13  ;;  %597 = vmatprep.mubr.f32.mxu0 %v5466_v1  ;;  %3884 = vmatprep.subr.bf16.mxu0 %v3883_v32 }
  0x69   : > { %vm1247_vm9 = vcmp.eq.f32.partialorder %v4340_v26, %v1241_v13  ;;  %v1251_v19 = vsel %vm1243_vm6, %v1175_v43, 0.0  ;;  %v1253_v16 = vsel %vm1245_vm7, %v1175_v43, 0.0  ;;  %v1160_v33 = vmul.f32 0.5, %v3712_v51 }
  0x6a   : > { %vm1249_vm10 = vcmp.eq.f32.partialorder %v4342_v27, %v1241_v13  ;;  %v1233_v14 = vsel %vm1225_vm2, %v1179_v11, 0.0  ;;  %v1235_v50 = vsel %vm1227_vm3, %v1179_v11, 0.0  ;;  %v1237_v42 = vsel %vm1229_vm4, %v1179_v11, 0.0  ;;  %480 = vmatmul.mubr.f32.gmra.mrb[6].mxu1 %v4581_v28  ;;  %599 = vmatmul.mubr.f32.gmra.mrb[2].mxu0 %v4337_v24 }
  0x6b   : > { %v1239_v8 = vsel %vm1231_vm5, %v1179_v11, 0.0  ;;  %v1259_v32 = vadd.f32 %v1251_v19, %v1233_v14  ;;  %v1261_v38 = vadd.f32 %v1253_v16, %v1235_v50  ;;  %v1170_v49 = vfloor.f32 %v1160_v33  ;;  %3886 = vmatpush1.bf16.msra.mxu0 %v3885_v0  ;;  %604 = vmatprep.mubr.f32.mxu1 %v5466_v1 }
  0x6c   : > { %v1255_v20 = vsel %vm1247_vm9, %v1175_v43, 0.0  ;;  %v1257_v18 = vsel %vm1249_vm10, %v1175_v43, 0.0  ;;  %v4634_v51 = vmul.f32 28.0, %v2054_v47  ;;  %v4636_v10 = vadd.f32 -1.0, %v2033_v41  ;;  %699 = vmatprep.mubr.f32.mxu0 %v5466_v1  ;;  %3888 = vmatprep.subr.bf16.mxu0 %v4490_v39 }
  0x6d   : > { %v1263_v40 = vadd.f32 %v1255_v20, %v1237_v42  ;;  %v1272_v35 = vand.u32 4294901760, %v1259_v32  ;;  %v1276_v11 = vand.u32 4294901760, %v1261_v38  ;;  %v1174_v19 = vsub.f32 %v1160_v33, %v1170_v49 }
  0x6e   : > { %5474 = vst [vmem:[#allocation20_spill] sm:$0xff] %v4636_v10  ;;  %vm1224_vm11 = vcmp.eq.f32.partialorder %v4325_v12, %v1170_v49  ;;  %vm1226_vm12 = vcmp.eq.f32.partialorder %v4329_v17, %v1170_v49  ;;  %v1240_v0 = vadd.f32 1.0, %v1170_v49  ;;  %v1265_v13 = vadd.f32 %v1257_v18, %v1239_v8  ;;  %606 = vmatmul.mubr.f32.vlgmr.msra.gmra.mrb[4].mxu1 %v4344_v29 }
  0x6f   : > { %v1280_v16 = vand.u32 4294901760, %v1263_v40  ;;  %702 = vmatmul.mubr.f32.vlgmr.msra.gmra.mrb[0].mxu0 %v4352_v36  ;;  %v4644_v41 = vpack.c.bf16 %v1276_v11, %v1272_v35  ;;  %v4646_v43 = vsub.f32 %v1259_v32, %v1272_v35  ;;  %v4648_v47 = vsub.f32 %v1261_v38, %v1276_v11  ;;  %611 = vmatprep.mubr.f32.mxu1 %v5466_v1 }
  0x70   : > { %v1178_v14 = vsub.f32 1.0, %v1174_v19  ;;  %3890 = vmatpush1.bf16.msra.mxu0 %v4496_v34  ;;  %vm1242_vm13 = vcmp.eq.f32.partialorder %v4325_v12, %v1240_v0  ;;  %vm1244_vm14 = vcmp.eq.f32.partialorder %v4329_v17, %v1240_v0  ;;  %v1270_v33 = vsel %vm362_vm8, %v1265_v13, 0  ;;  %707 = vmatprep.mubr.f32.mxu0 %v5466_v1 }
  0x71   : > { %v4655_v50 = vsub.f32 %v1263_v40, %v1280_v16  ;;  %3912 = vmatprep.subr.bf16.mxu1 %v4644_v41  ;;  %v1250_v32 = vsel %vm1242_vm13, %v1174_v19, 0.0  ;;  %v1252_v38 = vsel %vm1244_vm14, %v1174_v19, 0.0  ;;  %v1284_v35 = vand.u32 4294901760, %v1270_v33  ;;  %3892 = vmatprep.subr.bf16.mxu0 %v4512_v4 }
  0x72   : > { %v1232_v42 = vsel %vm1224_vm11, %v1178_v14, 0.0  ;;  %v1234_v8 = vsel %vm1226_vm12, %v1178_v14, 0.0  ;;  %vm1228_vm15 = vcmp.eq.f32.partialorder %v4340_v26, %v1170_v49  ;;  %613 = vmatmul.mubr.f32.gmra.mrb[6].mxu1 %v4367_v45  ;;  %vm1230_vm0 = vcmp.eq.f32.partialorder %v4342_v27, %v1170_v49 }
  0x73   : > { %v1258_v20 = vadd.f32 %v1250_v32, %v1232_v42  ;;  %v1260_v18 = vadd.f32 %v1252_v38, %v1234_v8  ;;  %710 = vmatmul.mubr.f32.gmra.mrb[2].mxu0 %v4355_v37  ;;  %v1236_v40 = vsel %vm1228_vm15, %v1178_v14, 0.0  ;;  %vm1246_vm1 = vcmp.eq.f32.partialorder %v4340_v26, %v1240_v0  ;;  %1344 = vmatprep.mubr.f32.mxu1 %v5466_v1 }
  0x74   : > { %vm1248_vm2 = vcmp.eq.f32.partialorder %v4342_v27, %v1240_v0  ;;  %v4670_v42 = vpack.c.bf16 %v1284_v35, %v1280_v16  ;;  %v4672_v8 = vsub.f32 %v1270_v33, %v1284_v35  ;;  %715 = vmatprep.mubr.f32.mxu0 %v5466_v1  ;;  %v1238_v32 = vsel %vm1230_vm0, %v1178_v14, 0.0  ;;  %3894 = vmatpush1.bf16.msra.mxu0 %v4534_v3 }
  0x75   : > { %v1274_v11 = vand.u32 4294901760, %v1258_v20  ;;  %v1278_v13 = vand.u32 4294901760, %v1260_v18  ;;  %v1254_v38 = vsel %vm1246_vm1, %v1174_v19, 0.0  ;;  %v1256_v62 = vsel %vm1248_vm2, %v1174_v19, 0.0  ;;  %3896 = vmatprep.subr.bf16.mxu0 %v4596_v7 }
  0x76   : > { %5475 = vst [vmem:[#allocation21_spill] sm:$0xff] %v4670_v42  ;;  %v5427_v49 = vand.u32 4294901760, %v4646_v43  ;;  %v1262_v16 = vadd.f32 %v1254_v38, %v1236_v40  ;;  %v1264_v33 = vadd.f32 %v1256_v62, %v1238_v32  ;;  %v5429_v14 = vand.u32 4294901760, %v4648_v47 }
  0x77   : > { %v4678_v63 = vpack.c.bf16 %v1278_v13, %v1274_v11  ;;  %v4680_v0 = vsub.f32 %v1258_v20, %v1274_v11  ;;  %v4682_v21 = vsub.f32 %v1260_v18, %v1278_v13  ;;  %718 = vmatmul.mubr.f32.gmra.mrb[4].mxu0 %v4365_v44  ;;  %v5431_v35 = vand.u32 4294901760, %v4655_v50 }
  0x78   : > { %v1392_v19 = vsub.f32 %v4646_v43, %v5427_v49  ;;  %v1282_v20 = vand.u32 4294901760, %v1262_v16  ;;  %723 = vmatprep.mubr.f32.mxu0 %v5466_v1  ;;  %v1267_v40 = vsel %vm362_vm8, %v1264_v33, 0  ;;  %v1404_v13 = vsub.f32 %v4648_v47, %v5429_v14 }
  0x79   : > { %3914 = vmatpush1.bf16.msra.mxu1 %v4678_v63  ;;  %v5434_v18 = vand.u32 4294901760, %v4680_v0  ;;  %v5437_v7 = vand.u32 4294901760, %v4682_v21  ;;  %v1416_v32 = vsub.f32 %v4655_v50, %v5431_v35  ;;  %v1286_v38 = vand.u32 4294901760, %v1267_v40 }
  0x7a   : > { %3916 = vmatprep.subr.bf16.mxu1 %v4670_v42  ;;  %v1393_v11 = vand.u32 4294901760, %v1392_v19  ;;  %v4704_v49 = vsub.f32 %v1262_v16, %v1282_v20  ;;  %v1405_v19 = vand.u32 4294901760, %v1404_v13  ;;  %v5476_v14 = vand.u32 4294901760, %v4672_v8 }
  0x7b   : > { %v1398_v62 = vsub.f32 %v4680_v0, %v5434_v18  ;;  %v1410_v33 = vsub.f32 %v4682_v21, %v5437_v7  ;;  %726 = vmatmul.mubr.f32.gmra.mrb[6].mxu0 %v4387_v61  ;;  %v1417_v59 = vand.u32 4294901760, %v1416_v32  ;;  %v2039_v16 = vmul.f32 %v4636_v10, %v4376_v56 }
  0x7c   : > { %v1428_v15 = vsub.f32 %v4672_v8, %v5476_v14  ;;  %v4718_v35 = vpack.c.bf16 %v1286_v38, %v1282_v20  ;;  %v4720_v44 = vsub.f32 %v1267_v40, %v1286_v38  ;;  %804 = vmatprep.mubr.f32.mxu0 %v5466_v1  ;;  %v3919_v7 = vpack.c.bf16 %v1405_v19, %v1393_v11 }
  0x7d   : > { %v1399_v18 = vand.u32 4294901760, %v1398_v62  ;;  %v1411_v37 = vand.u32 4294901760, %v1410_v33  ;;  %v1421_v13 = vand.u32 4294901760, %v4704_v49  ;;  %v5477_v32 = vand.u32 4294901760, %v4507_v54 }
  0x7e   : > { %v1429_v42 = vand.u32 4294901760, %v1428_v15  ;;  %v5478_v61 = vand.u32 4294901760, %v4514_v9  ;;  %3918 = vmatpush1.bf16.msra.mxu1 %v4718_v35  ;;  %v1433_v20 = vand.u32 4294901760, %v4720_v44  ;;  %v3721_v62 = vadd.f32 -1.0, %v4634_v51 }
  0x7f   : > { %v3921_v10 = vpack.c.bf16 %v1411_v37, %v1399_v18  ;;  %808 = vmatmul.mubr.f32.vlgmr.msra.gmra.mrb[0].mxu0 %v4370_v52  ;;  %3920 = vmatprep.subr.bf16.mxu1 %v3919_v7  ;;  %v1422_v15 = vsub.f32 %v4704_v49, %v1421_v13  ;;  %v2041_v54 = vadd.f32 %v2039_v16, %v4607_v46 }
  0x80   : > { %v3899_v14 = vpack.c.bf16 %v5478_v61, %v5477_v32  ;;  %v3923_v40 = vpack.c.bf16 %v1429_v42, %v1417_v59  ;;  %3898 = vmatpush1.bf16.msra.mxu0 %v4603_v2  ;;  %813 = vmatprep.mubr.f32.mxu0 %v5466_v1  ;;  %v1434_v37 = vsub.f32 %v4720_v44, %v1433_v20  ;;  %v5479_v61 = vand.u32 4294901760, %v4527_v25 }
  0x81   : > { %v5480_v59 = vand.u32 4294901760, %v4536_v6  ;;  %1350 = vmatmul.mubr.f32.vlgmr.msra.gmra.mrb[8].mxu1 %v4436_v48  ;;  %v1423_v42 = vand.u32 4294901760, %v1422_v15  ;;  %v2060_v51 = vmul.f32 0.5, %v3721_v62  ;;  %v2043_v46 = vadd.f32 %v2041_v54, %v4379_v57 }
  0x82   : > { %3900 = vmatprep.subr.bf16.mxu0 %v3899_v14  ;;  %v5481_v2 = vfloor.f32 %v4565_v58  ;;  %1355 = vmatprep.mubr.f32.mxu1 %v5466_v1  ;;  %v1435_v7 = vand.u32 4294901760, %v1434_v37  ;;  %v3927_v25 = vpack.c.bf16 %v4648_v47, %v4646_v43  ;;  %v3929_v58 = vpack.c.bf16 %v4682_v21, %v4680_v0 }
  0x83   : > { %v3901_v9 = vpack.c.bf16 %v5480_v59, %v5479_v61  ;;  %3922 = vmatpush1.bf16.msra.mxu1 %v3921_v10  ;;  %817 = vmatmul.mubr.f32.gmra.mrb[2].mxu0 %v4373_v53  ;;  %v2070_v6 = vfloor.f32 %v2060_v51  ;;  %v2053_v11 = vadd.f32 1.0, %v2043_v46 }
  0x84   : > { %v2912_v18 = vmul.f32 28.0, %v5481_v2  ;;  %3924 = vmatprep.subr.bf16.mxu1 %v3923_v40  ;;  %v3925_v38 = vpack.c.bf16 %v1435_v7, %v1423_v42  ;;  %822 = vmatprep.mubr.f32.mxu0 %v5466_v1  ;;  %v5482_v54 = vmov %v5481_v2  ;;  %v3931_v7 = vpack.c.bf16 %v4672_v8, %v4655_v50 }
  0x85   : > { %3902 = vmatpush1.bf16.msra.mxu0 %v3901_v9  ;;  %1361 = vmatmul.mubr.f32.gmra.mrb[10].mxu1 %v4439_v55  ;;  %v2074_v33 = vsub.f32 %v2060_v51, %v2070_v6  ;;  %v2140_v19 = vadd.f32 1.0, %v2070_v6  ;;  %vm2124_vm3 = vcmp.eq.f32.partialorder %v4325_v12, %v2070_v6  ;;  %vm2126_vm4 = vcmp.eq.f32.partialorder %v4329_v17, %v2070_v6 }
  0x86   : > { %3904 = vmatprep.subr.bf16.mxu0 %v4490_v39  ;;  %v2913_v10 = vsub.f32 %v4428_v30, %v2912_v18  ;;  %1366 = vmatprep.mubr.f32.mxu1 %v5466_v1  ;;  %v2055_v16 = vmul.f32 28.0, %v2053_v11  ;;  %vm2130_vm7 = vcmp.eq.f32.partialorder %v4342_v27, %v2070_v6  ;;  %v2918_v37 = vmul.f32 2.0, %v5482_v54 }
  0x87   : > { %3926 = vmatpush1.bf16.msra.mxu1 %v3925_v38  ;;  %826 = vmatmul.mubr.f32.gmra.mrb[4].mxu0 %v4384_v60  ;;  %v2078_v32 = vsub.f32 1.0, %v2074_v33  ;;  %vm2142_vm5 = vcmp.eq.f32.partialorder %v4325_v12, %v2140_v19  ;;  %vm2144_vm6 = vcmp.eq.f32.partialorder %v4329_v17, %v2140_v19  ;;  %vm2148_vm9 = vcmp.eq.f32.partialorder %v4342_v27, %v2140_v19 }
  0x88   : > { %3928 = vmatprep.subr.bf16.mxu1 %v3927_v25  ;;  %831 = vmatprep.mubr.f32.mxu0 %v5466_v1  ;;  %v2150_v30 = vsel %vm2142_vm5, %v2074_v33, 0.0  ;;  %v2152_v39 = vsel %vm2144_vm6, %v2074_v33, 0.0  ;;  %v3720_v14 = vadd.f32 -1.0, %v2055_v16  ;;  %v2914_v62 = vmul.f32 2.0, %v2913_v10 }
  0x89   : > { %1372 = vmatmul.mubr.f32.gmra.mrb[12].mxu1 %v4571_v22  ;;  %v2132_v40 = vsel %vm2124_vm3, %v2078_v32, 0.0  ;;  %v2134_v15 = vsel %vm2126_vm4, %v2078_v32, 0.0  ;;  %vm2128_vm10 = vcmp.eq.f32.partialorder %v4340_v26, %v2070_v6  ;;  %v2138_v42 = vsel %vm2130_vm7, %v2078_v32, 0.0 }
  0x8a   : > { %1377 = vmatprep.mubr.f32.mxu1 %v5466_v1  ;;  %v2158_v61 = vadd.f32 %v2150_v30, %v2132_v40  ;;  %v2160_v59 = vadd.f32 %v2152_v39, %v2134_v15  ;;  %v2059_v9 = vmul.f32 0.5, %v3720_v14  ;;  %vm2146_vm11 = vcmp.eq.f32.partialorder %v4340_v26, %v2140_v19 }
  0x8b   : > { %835 = vmatmul.mubr.f32.gmra.mrb[6].mxu0 %v4420_v5  ;;  %v2156_v51 = vsel %vm2148_vm9, %v2074_v33, 0.0  ;;  %v3933_v25 = vpack.c.bf16 %v4720_v44, %v4704_v49  ;;  %v2915_v11 = vadd.f32 1.0, %v2914_v62  ;;  %v2919_v38 = vadd.f32 1.0, %v2918_v37 }
  0x8c   : > { %929 = vmatprep.mubr.f32.mxu0 %v5466_v1  ;;  %v2171_v46 = vand.u32 4294901760, %v2158_v61  ;;  %v2175_v2 = vand.u32 4294901760, %v2160_v59  ;;  %v2069_v18 = vfloor.f32 %v2059_v9  ;;  %v2136_v10 = vsel %vm2128_vm10, %v2078_v32, 0.0 }
  0x8d   : > { %1383 = vmatmul.mubr.f32.gmra.mrb[14].mxu1 %v4581_v28  ;;  %v2154_v16 = vsel %vm2146_vm11, %v2074_v33, 0.0  ;;  %v2164_v30 = vadd.f32 %v2156_v51, %v2138_v42  ;;  %v2916_v37 = vmul.f32 0.035714287, %v2915_v11 }
  0x8e   : > { %1493 = vmatprep.mubr.f32.mxu1 %v5466_v1  ;;  %v2073_v19 = vsub.f32 %v2059_v9, %v2069_v18  ;;  %v4787_v39 = vpack.c.bf16 %v2175_v2, %v2171_v46  ;;  %vm2123_vm12 = vcmp.eq.f32.partialorder %v4325_v12, %v2069_v18  ;;  %vm2125_vm13 = vcmp.eq.f32.partialorder %v4329_v17, %v2069_v18 }
  0x8f   : > { %931 = vmatmul.mubr.f32.vlgmr.msra.gmra.mrb[0].mxu0 %v4335_v23  ;;  %v2139_v14 = vadd.f32 1.0, %v2069_v18  ;;  %v4793_v40 = vsub.f32 %v2158_v61, %v2171_v46  ;;  %v4795_v15 = vsub.f32 %v2160_v59, %v2175_v2  ;;  %vm2127_vm14 = vcmp.eq.f32.partialorder %v4340_v26, %v2069_v18 }
  0x90   : > { %3906 = vmatpush1.bf16.msra.mxu0 %v4496_v34  ;;  %936 = vmatprep.mubr.f32.mxu0 %v5466_v1  ;;  %v2077_v6 = vsub.f32 1.0, %v2073_v19  ;;  %vm2129_vm1 = vcmp.eq.f32.partialorder %v4342_v27, %v2069_v18  ;;  %v2162_v54 = vadd.f32 %v2154_v16, %v2136_v10  ;;  %v2920_v61 = vmul.f32 0.035714287, %v2919_v38 }
  0x91   : > { %1495 = vmatmul.mubr.f32.vlgmr.msra.gmra.mrb[8].mxu1 %v4335_v23  ;;  %3908 = vmatprep.subr.bf16.mxu0 %v4512_v4  ;;  %vm2141_vm15 = vcmp.eq.f32.partialorder %v4325_v12, %v2139_v14  ;;  %vm2143_vm0 = vcmp.eq.f32.partialorder %v4329_v17, %v2139_v14  ;;  %vm2145_vm2 = vcmp.eq.f32.partialorder %v4340_v26, %v2139_v14  ;;  %v2290_v46 = vand.u32 4294901760, %v4793_v40 }
  0x92   : > { %1500 = vmatprep.mubr.f32.mxu1 %v5466_v1  ;;  %3930 = vmatpush1.bf16.msra.mxu1 %v3929_v58  ;;  %v2131_v34 = vsel %vm2123_vm12, %v2077_v6, 0.0  ;;  %v2133_v33 = vsel %vm2125_vm13, %v2077_v6, 0.0  ;;  %v2149_v32 = vsel %vm2141_vm15, %v2073_v19, 0.0  ;;  %v2151_v62 = vsel %vm2143_vm0, %v2073_v19, 0.0 }
  0x93   : > { %938 = vmatmul.mubr.f32.gmra.mrb[2].mxu0 %v4337_v24  ;;  %3932 = vmatprep.subr.bf16.mxu1 %v3931_v7  ;;  %v2157_v4 = vadd.f32 %v2149_v32, %v2131_v34  ;;  %v2159_v59 = vadd.f32 %v2151_v62, %v2133_v33  ;;  %v2137_v9 = vsel %vm2129_vm1, %v2077_v6, 0.0  ;;  %vm2147_vm3 = vcmp.eq.f32.partialorder %v4342_v27, %v2139_v14 }
  0x94   : > { %943 = vmatprep.mubr.f32.mxu0 %v5466_v1  ;;  %3910 = vmatpush1.bf16.msra.mxu0 %v4534_v3  ;;  %v2135_v42 = vsel %vm2127_vm14, %v2077_v6, 0.0  ;;  %v2153_v51 = vsel %vm2145_vm2, %v2073_v19, 0.0  ;;  %v2155_v58 = vsel %vm2147_vm3, %v2073_v19, 0.0  ;;  %v2169_v3 = vsel %vm362_vm8, %v2164_v30, 0 }
  0x95   : > { %1502 = vmatmul.mubr.f32.gmra.mrb[10].mxu1 %v4337_v24  ;;  %3960 = vmatprep.subr.bf16.mxu0 %v4787_v39  ;;  %v2163_v2 = vadd.f32 %v2155_v58, %v2137_v9  ;;  %v5448_v7 = vand.u32 4294901760, %v4795_v15  ;;  %v4825_v11 = vadd.f32 -1.0, %v2916_v37  ;;  %v4827_v18 = vadd.f32 -1.0, %v2920_v61 }
  0x96   : > { %1507 = vmatprep.mubr.f32.mxu1 %v5466_v1  ;;  %3934 = vmatpush1.bf16.msra.mxu1 %v3933_v25  ;;  %v2173_v38 = vand.u32 4294901760, %v2157_v4  ;;  %v2177_v19 = vand.u32 4294901760, %v2159_v59  ;;  %v2179_v10 = vand.u32 4294901760, %v2162_v54  ;;  %v2161_v16 = vadd.f32 %v2153_v51, %v2135_v42 }
  0x97   : > { %945 = vmatmul.mubr.f32.gmra.mrb[4].mxu0 %v4344_v29  ;;  %3936 = vmatprep.subr.bf16.mxu1 %v4644_v41  ;;  %v2183_v25 = vand.u32 4294901760, %v2169_v3  ;;  %v2166_v30 = vsel %vm362_vm8, %v2163_v2, 0  ;;  %v2291_v14 = vsub.f32 %v4793_v40, %v2290_v46  ;;  %v2303_v6 = vsub.f32 %v4795_v15, %v5448_v7 }
  0x98   : > { %950 = vmatprep.mubr.f32.mxu0 %v5466_v1  ;;  %v4840_v34 = vsub.f32 %v2157_v4, %v2173_v38  ;;  %v4842_v33 = vsub.f32 %v2162_v54, %v2179_v10  ;;  %v2922_v32 = vmul.f32 %v4825_v11, %v4347_v31  ;;  %v2923_v62 = vmul.f32 %v4827_v18, %v4376_v56 }
  0x99   : > { %1509 = vmatmul.mubr.f32.gmra.mrb[12].mxu1 %v4344_v29  ;;  %v4849_v37 = vpack.c.bf16 %v2177_v19, %v2173_v38  ;;  %v4851_v61 = vsub.f32 %v2159_v59, %v2177_v19  ;;  %v2181_v9 = vand.u32 4294901760, %v2161_v16  ;;  %v2185_v42 = vand.u32 4294901760, %v2166_v30 }
  0x9a   : > { %1514 = vmatprep.mubr.f32.mxu1 %v5466_v1  ;;  %v4854_v4 = vpack.c.bf16 %v2183_v25, %v2179_v10  ;;  %v4856_v54 = vsub.f32 %v2169_v3, %v2183_v25  ;;  %v2292_v51 = vand.u32 4294901760, %v2291_v14  ;;  %v2304_v58 = vand.u32 4294901760, %v2303_v6 }
  0x9b   : > { %952 = vmatmul.mubr.f32.gmra.mrb[6].mxu0 %v4367_v45  ;;  %v5446_v31 = vand.u32 4294901760, %v4840_v34  ;;  %v2924_v56 = vadd.f32 %v2923_v62, %v2922_v32  ;;  %v4863_v59 = vpack.c.bf16 %v2185_v42, %v2181_v9  ;;  %v4865_v2 = vsub.f32 %v2161_v16, %v2181_v9  ;;  %v5483_v16 = vld [vmem:[#allocation21_spill] sm:$0xff] }
  0x9c   : > { %1030 = vmatprep.mubr.f32.mxu0 %v5466_v1  ;;  %v4867_v38 = vsub.f32 %v2166_v30, %v2185_v42  ;;  %v5445_v3 = vand.u32 4294901760, %v4851_v61  ;;  %v3967_v19 = vpack.c.bf16 %v2304_v58, %v2292_v51  ;;  %v5444_v10 = vand.u32 4294901760, %v4842_v33  ;;  %v5486_v51 = vld [vmem:[#allocation6_spill] sm:$0xff] }
  0x9d   : > { %1516 = vmatmul.mubr.f32.gmra.mrb[14].mxu1 %v4367_v45  ;;  %v5443_v25 = vand.u32 4294901760, %v4856_v54  ;;  %v2925_v14 = vadd.f32 %v2924_v56, %v4379_v57  ;;  %v5484_v30 = vand.u32 4294901760, %v4646_v43  ;;  %v5485_v6 = vand.u32 4294901760, %v4648_v47 }
  0x9e   : > { %1602 = vmatprep.mubr.f32.mxu1 %v5466_v1  ;;  %v2297_v57 = vsub.f32 %v4840_v34, %v5446_v31  ;;  %v2309_v9 = vsub.f32 %v4851_v61, %v5445_v3  ;;  %v5447_v42 = vand.u32 4294901760, %v4865_v2  ;;  %v5449_v43 = vand.u32 4294901760, %v4867_v38 }
  0x9f   : > { %1032 = vmatmul.mubr.f32.vlgmr.msra.gmra.mrb[0].mxu0 %v4335_v23  ;;  %v3943_v32 = vpack.c.bf16 %v5485_v6, %v5484_v30  ;;  %v2930_v62 = vadd.f32 1.0, %v2925_v14  ;;  %v2315_v47 = vsub.f32 %v4842_v33, %v5444_v10  ;;  %v2327_v58 = vsub.f32 %v4856_v54, %v5443_v25  ;;  %v5487_v25 = vld [vmem:[#allocation7_spill] sm:$0xff] }
  0xa0   : > { %3962 = vmatpush1.bf16.msra.mxu0 %v4849_v37  ;;  %1037 = vmatprep.mubr.f32.mxu0 %v5466_v1  ;;  %v2310_v30 = vand.u32 4294901760, %v2309_v9  ;;  %v2321_v6 = vsub.f32 %v4865_v2, %v5447_v42  ;;  %v5488_v42 = vld [vmem:[#allocation9_spill] sm:$0xff] }
  0xa1   : > { %1605 = vmatmul.mubr.f32.vlgmr.msra.gmra.mrb[8].mxu1 %v4352_v36  ;;  %3964 = vmatprep.subr.bf16.mxu0 %v4854_v4  ;;  %v2931_v56 = vmul.f32 28.0, %v2930_v62  ;;  %v2333_v62 = vsub.f32 %v4867_v38, %v5449_v43  ;;  %v2316_v10 = vand.u32 4294901760, %v2315_v47  ;;  %v2328_v3 = vand.u32 4294901760, %v2327_v58 }
  0xa2   : > { %1610 = vmatprep.mubr.f32.mxu1 %v5466_v1  ;;  %3938 = vmatpush1.bf16.msra.mxu1 %v4678_v63  ;;  %v5489_v47 = vand.u32 4294901760, %v4680_v0  ;;  %v5490_v58 = vand.u32 4294901760, %v4682_v21  ;;  %v5491_v43 = vand.u32 4294901760, %v4655_v50  ;;  %v3975_v21 = vpack.c.bf16 %v4795_v15, %v4793_v40 }
  0xa3   : > { %1039 = vmatmul.mubr.f32.gmra.mrb[2].mxu0 %v4337_v24  ;;  %3940 = vmatprep.subr.bf16.mxu1 %v5483_v16  ;;  %v3726_v14 = vadd.f32 -1.0, %v2931_v56  ;;  %v2334_v9 = vand.u32 4294901760, %v2333_v62  ;;  %v3971_v7 = vpack.c.bf16 %v2328_v3, %v2316_v10  ;;  %v3949_v50 = vpack.c.bf16 %v1433_v20, %v1421_v13 }
  0xa4   : > { %1044 = vmatprep.mubr.f32.mxu0 %v5466_v1  ;;  %3966 = vmatpush1.bf16.msra.mxu0 %v4863_v59  ;;  %v3977_v10 = vpack.c.bf16 %v4851_v61, %v4840_v34 }
  0xa5   : > { %1613 = vmatmul.mubr.f32.gmra.mrb[10].mxu1 %v5486_v51  ;;  %3968 = vmatprep.subr.bf16.mxu0 %v3967_v19  ;;  %v2298_v19 = vand.u32 4294901760, %v2297_v57  ;;  %v2933_v31 = vmul.f32 0.5, %v3726_v14  ;;  %v2322_v57 = vand.u32 4294901760, %v2321_v6  ;;  %v3945_v14 = vpack.c.bf16 %v5490_v58, %v5489_v47 }
  0xa6   : > { %1618 = vmatprep.mubr.f32.mxu1 %v5466_v1  ;;  %3942 = vmatpush1.bf16.msra.mxu1 %v4718_v35 }
  0xa7   : > { %1046 = vmatmul.mubr.f32.gmra.mrb[4].mxu0 %v4344_v29  ;;  %3944 = vmatprep.subr.bf16.mxu1 %v3943_v32  ;;  %v3969_v32 = vpack.c.bf16 %v2310_v30, %v2298_v19  ;;  %v4914_v56 = vfloor.f32 %v2933_v31  ;;  %v5492_v19 = vand.u32 4294901760, %v4672_v8  ;;  %v3973_v6 = vpack.c.bf16 %v2334_v9, %v2322_v57 }
  0xa8   : > { %1051 = vmatprep.mubr.f32.mxu0 %v5466_v1 }
  0xa9   : > { %1621 = vmatmul.mubr.f32.gmra.mrb[12].mxu1 %v5487_v25  ;;  %v3947_v30 = vpack.c.bf16 %v5492_v19, %v5491_v43  ;;  %v2940_v3 = vsub.f32 %v2933_v31, %v4914_v56  ;;  %v2973_v0 = vadd.f32 1.0, %v4914_v56  ;;  %vm2965_vm4 = vcmp.eq.f32.partialorder %v4325_v12, %v4914_v56 }
  0xaa   : > { %1626 = vmatprep.mubr.f32.mxu1 %v5466_v1  ;;  %vm2966_vm5 = vcmp.eq.f32.partialorder %v4329_v17, %v4914_v56  ;;  %vm2968_vm9 = vcmp.eq.f32.partialorder %v4342_v27, %v4914_v56  ;;  %vm2967_vm12 = vcmp.eq.f32.partialorder %v4340_v26, %v4914_v56 }
  0xab   : > { %1053 = vmatmul.mubr.f32.gmra.mrb[6].mxu0 %v4367_v45  ;;  %v2942_v8 = vsub.f32 1.0, %v2940_v3  ;;  %vm2974_vm6 = vcmp.eq.f32.partialorder %v4325_v12, %v2973_v0  ;;  %vm2975_vm7 = vcmp.eq.f32.partialorder %v4329_v17, %v2973_v0  ;;  %vm2977_vm10 = vcmp.eq.f32.partialorder %v4342_v27, %v2973_v0 }
  0xac   : > { %2243 = vmatprep.mubr.f32.mxu0 %v5466_v1  ;;  %v2978_v13 = vsel %vm2974_vm6, %v2940_v3, 0.0  ;;  %v2979_v20 = vsel %vm2975_vm7, %v2940_v3, 0.0  ;;  %vm2976_vm11 = vcmp.eq.f32.partialorder %v4340_v26, %v2973_v0  ;;  %v2981_v9 = vsel %vm2977_vm10, %v2940_v3, 0.0 }
  0xad   : > { %1629 = vmatmul.mubr.f32.gmra.mrb[14].mxu1 %v5488_v42  ;;  %v2969_v44 = vsel %vm2965_vm4, %v2942_v8, 0.0  ;;  %v2970_v49 = vsel %vm2966_vm5, %v2942_v8, 0.0  ;;  %v2972_v57 = vsel %vm2968_vm9, %v2942_v8, 0.0  ;;  %v2980_v47 = vsel %vm2976_vm11, %v2940_v3, 0.0 }
  0xae   : > { %1707 = vmatprep.mubr.f32.mxu1 %v5466_v1  ;;  %v2983_v31 = vadd.f32 %v2979_v20, %v2970_v49 }
  0xaf   : > { %2249 = vmatmul.mubr.f32.vlgmr.msra.gmra.mrb[8].mxu0 %v4436_v48 }
  0xb0   : > { %3970 = vmatpush1.bf16.msra.mxu0 %v3969_v32  ;;  %2254 = vmatprep.mubr.f32.mxu0 %v5466_v1  ;;  %v2993_v62 = vand.u32 4294901760, %v2983_v31  ;;  %v3981_v32 = vpack.c.bf16 %v4867_v38, %v4865_v2 }
  0xb1   : > { %1711 = vmatmul.mubr.f32.vlgmr.msra.gmra.mrb[8].mxu1 %v4370_v52  ;;  %3972 = vmatprep.subr.bf16.mxu0 %v3971_v7  ;;  %v2982_v7 = vadd.f32 %v2978_v13, %v2969_v44 }
  0xb2   : > { %1716 = vmatprep.mubr.f32.mxu1 %v5466_v1  ;;  %3946 = vmatpush1.bf16.msra.mxu1 %v3945_v14  ;;  %v2971_v14 = vsel %vm2967_vm12, %v2942_v8, 0.0  ;;  %v4980_v56 = vsub.f32 %v2983_v31, %v2993_v62 }
  0xb3   : > { %3948 = vmatprep.subr.bf16.mxu1 %v3947_v30  ;;  %2260 = vmatmul.mubr.f32.gmra.mrb[10].mxu0 %v4439_v55  ;;  %v2990_v43 = vand.u32 4294901760, %v2982_v7  ;;  %v2985_v30 = vadd.f32 %v2981_v9, %v2972_v57  ;;  %v5495_v57 = vand.u32 4294901760, %v4851_v61  ;;  %v5499_v61 = vand.u32 4294901760, %v4867_v38 }
  0xb4   : > { %2265 = vmatprep.mubr.f32.mxu0 %v5466_v1  ;;  %3974 = vmatpush1.bf16.msra.mxu0 %v3973_v6  ;;  %v3108_v6 = vand.u32 4294901760, %v4980_v56 }
  0xb5   : > { %1720 = vmatmul.mubr.f32.gmra.mrb[10].mxu1 %v4373_v53  ;;  %3976 = vmatprep.subr.bf16.mxu0 %v3975_v21  ;;  %v4976_v58 = vpack.c.bf16 %v2993_v62, %v2990_v43  ;;  %v4978_v19 = vsub.f32 %v2982_v7, %v2990_v43  ;;  %v2987_v3 = vsel %vm362_vm8, %v2985_v30, 0  ;;  %v5493_v7 = vand.u32 4294901760, %v4795_v15 }
  0xb6   : > { %1725 = vmatprep.mubr.f32.mxu1 %v5466_v1  ;;  %3950 = vmatpush1.bf16.msra.mxu1 %v3949_v50  ;;  %v3109_v50 = vsub.f32 %v4980_v56, %v3108_v6 }
  0xb7   : > { %2271 = vmatmul.mubr.f32.gmra.mrb[12].mxu0 %v4571_v22  ;;  %3952 = vmatprep.subr.bf16.mxu1 %v4644_v41  ;;  %v3979_v41 = vpack.c.bf16 %v4856_v54, %v4842_v33  ;;  %v3991_v31 = vpack.c.bf16 %v5493_v7, %v2290_v46 }
  0xb8   : > { %2276 = vmatprep.mubr.f32.mxu0 %v5466_v1  ;;  %v3110_v13 = vand.u32 4294901760, %v3109_v50 }
  0xb9   : > { %1729 = vmatmul.mubr.f32.gmra.mrb[12].mxu1 %v4384_v60 }
  0xba   : > { %1734 = vmatprep.mubr.f32.mxu1 %v5466_v1 }
  0xbb   : > { %2282 = vmatmul.mubr.f32.gmra.mrb[14].mxu0 %v4581_v28 }
  0xbc   : > { %2392 = vmatprep.mubr.f32.mxu0 %v5466_v1 }
  0xbd   : > { %1738 = vmatmul.mubr.f32.gmra.mrb[14].mxu1 %v4420_v5 }
  0xbe   : > { %1832 = vmatprep.mubr.f32.mxu1 %v5466_v1 }
  0xbf   : > { %2394 = vmatmul.mubr.f32.vlgmr.msra.gmra.mrb[8].mxu0 %v4335_v23 }
  0xc0   : > { %3978 = vmatpush1.bf16.msra.mxu0 %v3977_v10  ;;  %2399 = vmatprep.mubr.f32.mxu0 %v5466_v1 }
  0xc1   : > { %1834 = vmatmul.mubr.f32.vlgmr.msra.gmra.mrb[8].mxu1 %v4335_v23  ;;  %3980 = vmatprep.subr.bf16.mxu0 %v3979_v41 }
  0xc2   : > { %1839 = vmatprep.mubr.f32.mxu1 %v5466_v1  ;;  %3954 = vmatpush1.bf16.msra.mxu1 %v4678_v63  ;;  %v2984_v63 = vadd.f32 %v2980_v47, %v2971_v14  ;;  %v5496_v47 = vand.u32 4294901760, %v4842_v33  ;;  %v5497_v14 = vand.u32 4294901760, %v4856_v54  ;;  %v5502_v54 = vld [vmem:[#allocation12_spill] sm:$0xff] }
  0xc3   : > { %3956 = vmatprep.subr.bf16.mxu1 %v5483_v16  ;;  %2401 = vmatmul.mubr.f32.gmra.mrb[10].mxu0 %v4337_v24  ;;  %v3101_v16 = vand.u32 4294901760, %v4978_v19 }
  0xc4   : > { %2406 = vmatprep.mubr.f32.mxu0 %v5466_v1  ;;  %3982 = vmatpush1.bf16.msra.mxu0 %v3981_v32  ;;  %v2996_v21 = vand.u32 4294901760, %v2984_v63  ;;  %v5494_v32 = vand.u32 4294901760, %v4840_v34  ;;  %v3995_v30 = vpack.c.bf16 %v5497_v14, %v5496_v47  ;;  %v5498_v34 = vand.u32 4294901760, %v4865_v2  ;;  %v5503_v2 = vld [vmem:[#allocation10_spill] sm:$0xff] }
  0xc5   : > { %1841 = vmatmul.mubr.f32.gmra.mrb[10].mxu1 %v4337_v24  ;;  %3984 = vmatprep.subr.bf16.mxu0 %v4787_v39  ;;  %v3102_v0 = vsub.f32 %v4978_v19, %v3101_v16 }
  0xc6   : > { %1846 = vmatprep.mubr.f32.mxu1 %v5466_v1  ;;  %3958 = vmatpush1.bf16.msra.mxu1 %v4718_v35  ;;  %v2999_v35 = vand.u32 4294901760, %v2987_v3  ;;  %v5005_v8 = vsub.f32 %v2984_v63, %v2996_v21  ;;  %v3993_v9 = vpack.c.bf16 %v5495_v57, %v5494_v32 }
  0xc7   : > { %2408 = vmatmul.mubr.f32.gmra.mrb[12].mxu0 %v4344_v29  ;;  %4008 = vmatprep.subr.bf16.mxu1 %v4976_v58  ;;  %v3103_v49 = vand.u32 4294901760, %v3102_v0 }
  0xc8   : > { %2413 = vmatprep.mubr.f32.mxu0 %v5466_v1  ;;  %v5008_v44 = vpack.c.bf16 %v2999_v35, %v2996_v21  ;;  %v5010_v20 = vsub.f32 %v2987_v3, %v2999_v35  ;;  %v3115_v41 = vand.u32 4294901760, %v5005_v8  ;;  %v3997_v3 = vpack.c.bf16 %v5499_v61, %v5498_v34 }
  0xc9   : > { %1848 = vmatmul.mubr.f32.gmra.mrb[12].mxu1 %v4344_v29  ;;  %v4015_v10 = vpack.c.bf16 %v3110_v13, %v3103_v49 }
  0xca   : > { %1853 = vmatprep.mubr.f32.mxu1 %v5466_v1  ;;  %v3122_v43 = vand.u32 4294901760, %v5010_v20  ;;  %v3116_v40 = vsub.f32 %v5005_v8, %v3115_v41 }
  0xcb   : > { %2415 = vmatmul.mubr.f32.gmra.mrb[14].mxu0 %v4367_v45 }
  0xcc   : > { %2501 = vmatprep.mubr.f32.mxu0 %v5466_v1  ;;  %v3123_v15 = vsub.f32 %v5010_v20, %v3122_v43  ;;  %v3117_v46 = vand.u32 4294901760, %v3116_v40 }
  0xcd   : > { %1855 = vmatmul.mubr.f32.gmra.mrb[14].mxu1 %v4367_v45 }
  0xce   : > { %1933 = vmatprep.mubr.f32.mxu1 %v5466_v1  ;;  %v3124_v62 = vand.u32 4294901760, %v3123_v15 }
  0xcf   : > { %2504 = vmatmul.mubr.f32.vlgmr.msra.gmra.mrb[8].mxu0 %v4352_v36 }
  0xd0   : > { %3986 = vmatpush1.bf16.msra.mxu0 %v4849_v37  ;;  %2509 = vmatprep.mubr.f32.mxu0 %v5466_v1  ;;  %v4019_v63 = vpack.c.bf16 %v3124_v62, %v3117_v46 }
  0xd1   : > { %1935 = vmatmul.mubr.f32.vlgmr.msra.gmra.mrb[8].mxu1 %v4335_v23  ;;  %3988 = vmatprep.subr.bf16.mxu0 %v4854_v4 }
  0xd2   : > { %1940 = vmatprep.mubr.f32.mxu1 %v5466_v1  ;;  %4010 = vmatpush3.bf16.msra.mxu1 %v4976_v58 }
  0xd3   : > { %2512 = vmatmul.mubr.f32.gmra.mrb[10].mxu0 %v5486_v51  ;;  %4012 = vmatprep.subr.bf16.mxu1 %v5008_v44 }
  0xd4   : > { %2517 = vmatprep.mubr.f32.mxu0 %v5466_v1  ;;  %3990 = vmatpush1.bf16.msra.mxu0 %v4863_v59 }
  0xd5   : > { %1942 = vmatmul.mubr.f32.gmra.mrb[10].mxu1 %v4337_v24  ;;  %3992 = vmatprep.subr.bf16.mxu0 %v3991_v31 }
  0xd6   : > { %1947 = vmatprep.mubr.f32.mxu1 %v5466_v1  ;;  %4014 = vmatpush3.bf16.msra.mxu1 %v5008_v44 }
  0xd7   : > { %2520 = vmatmul.mubr.f32.gmra.mrb[12].mxu0 %v5487_v25  ;;  %4016 = vmatprep.subr.bf16.mxu1 %v4015_v10 }
  0xd8   : > { %2525 = vmatprep.mubr.f32.mxu0 %v5466_v1 }
  0xd9   : > { %1949 = vmatmul.mubr.f32.gmra.mrb[12].mxu1 %v4344_v29 }
  0xda   : > { %1954 = vmatprep.mubr.f32.mxu1 %v5466_v1 }
  0xdb   : > { %2528 = vmatmul.mubr.f32.gmra.mrb[14].mxu0 %v5488_v42 }
  0xdc   : > { %2606 = vmatprep.mubr.f32.mxu0 %v5466_v1 }
  0xdd   : > { %1956 = vmatmul.mubr.f32.gmra.mrb[14].mxu1 %v4367_v45 }
  0xde   : > { %3787 = vmatprep.mubr.f32.mxu1 %v4436_v48  ;;  %v4023_v48 = vpack.c.bf16 %v4980_v56, %v4978_v19 }
  0xdf   : > { %2610 = vmatmul.mubr.f32.vlgmr.msra.gmra.mrb[8].mxu0 %v4370_v52 }
  0xe0   : > { %3994 = vmatpush1.bf16.msra.mxu0 %v3993_v9  ;;  %2615 = vmatprep.mubr.f32.mxu0 %v5466_v1 }
  0xe1   : > { %3788 = vmatmul.mubr.f32.vlgmr.msra.gmra.mrb[16].mxu1 %v4439_v55  ;;  %3996 = vmatprep.subr.bf16.mxu0 %v3995_v30  ;;  %v4027_v55 = vpack.c.bf16 %v5010_v20, %v5005_v8 }
  0xe2   : > { %4018 = vmatpush3.bf16.msra.mxu1 %v4015_v10  ;;  %3790 = vmatprep.mubr.f32.mxu1 %v4571_v22  ;;  %v4043_v22 = vpack.c.bf16 %v3122_v43, %v3115_v41 }
  0xe3   : > { %4020 = vmatprep.subr.bf16.mxu1 %v4019_v63  ;;  %2619 = vmatmul.mubr.f32.gmra.mrb[10].mxu0 %v4373_v53 }
  0xe4   : > { %2624 = vmatprep.mubr.f32.mxu0 %v5466_v1  ;;  %3998 = vmatpush1.bf16.msra.mxu0 %v3997_v3 }
  0xe5   : > { %3791 = vmatmul.mubr.f32.gmra.mrb[18].mxu1 %v4581_v28  ;;  %4000 = vmatprep.subr.bf16.mxu0 %v4787_v39  ;;  %v5500_v39 = vld [vmem:[#allocation11_spill] sm:$0xff] }
  0xe6   : > { %4022 = vmatpush3.bf16.msra.mxu1 %v4019_v63  ;;  %3801 = vmatprep.mubr.f32.mxu1 %v4335_v23 }
  0xe7   : > { %4024 = vmatprep.subr.bf16.mxu1 %v4023_v48  ;;  %2628 = vmatmul.mubr.f32.gmra.mrb[12].mxu0 %v4384_v60 }
  0xe8   : > { %2633 = vmatprep.mubr.f32.mxu0 %v5466_v1 }
  0xe9   : > { %3802 = vmatmul.mubr.f32.vlgmr.msra.gmra.mrb[16].mxu1 %v4337_v24 }
  0xea   : > { %4026 = vmatpush3.bf16.msra.mxu1 %v4023_v48  ;;  %3804 = vmatprep.mubr.f32.mxu1 %v4344_v29 }
  0xeb   : > { %4028 = vmatprep.subr.bf16.mxu1 %v4027_v55  ;;  %2637 = vmatmul.mubr.f32.gmra.mrb[14].mxu0 %v4420_v5 }
  0xec   : > { %2731 = vmatprep.mubr.f32.mxu0 %v5466_v1 }
  0xed   : > { %3805 = vmatmul.mubr.f32.gmra.mrb[18].mxu1 %v4367_v45 }
  0xee   : > { %4030 = vmatpush3.bf16.msra.mxu1 %v4027_v55  ;;  %3815 = vmatprep.mubr.f32.mxu1 %v4352_v36  ;;  %v4039_v36 = vpack.c.bf16 %v3108_v6, %v3101_v16 }
  0xef   : > { %4032 = vmatprep.subr.bf16.mxu1 %v4976_v58  ;;  %2733 = vmatmul.mubr.f32.vlgmr.msra.gmra.mrb[8].mxu0 %v4335_v23 }
  0xf0   : > { %4002 = vmatpush1.bf16.msra.mxu0 %v4849_v37  ;;  %2738 = vmatprep.mubr.f32.mxu0 %v5466_v1  ;;  %v5501_v37 = vld [vmem:[#allocation8_spill] sm:$0xff] }
  0xf1   : > { %3816 = vmatmul.mubr.f32.vlgmr.msra.gmra.mrb[16].mxu1 %v5486_v51  ;;  %4004 = vmatprep.subr.bf16.mxu0 %v4854_v4 }
  0xf2   : > { %4034 = vmatpush3.bf16.msra.mxu1 %v4976_v58  ;;  %3818 = vmatprep.mubr.f32.mxu1 %v5487_v25 }
  0xf3   : > { %4036 = vmatprep.subr.bf16.mxu1 %v5008_v44  ;;  %2740 = vmatmul.mubr.f32.gmra.mrb[10].mxu0 %v4337_v24 }
  0xf4   : > { %2745 = vmatprep.mubr.f32.mxu0 %v5466_v1  ;;  %4006 = vmatpush1.bf16.msra.mxu0 %v4863_v59 }
  0xf5   : > { %3819 = vmatmul.mubr.f32.gmra.mrb[18].mxu1 %v5488_v42  ;;  %v5156_v42 = vstv %s167_s4 }
  0xf6   : > { %4038 = vmatpush3.bf16.msra.mxu1 %v5008_v44  ;;  %3829 = vmatprep.mubr.f32.mxu1 %v4370_v52 }
  0xf7   : > { %4040 = vmatprep.subr.bf16.mxu1 %v4039_v36  ;;  %2747 = vmatmul.mubr.f32.gmra.mrb[12].mxu0 %v4344_v29 }
  0xf8   : > { %2752 = vmatprep.mubr.f32.mxu0 %v5466_v1 }
  0xf9   : > { %3830 = vmatmul.mubr.f32.vlgmr.msra.gmra.mrb[16].mxu1 %v4373_v53 }
  0xfa   : > { %4042 = vmatpush3.bf16.msra.mxu1 %v4039_v36  ;;  %3832 = vmatprep.mubr.f32.mxu1 %v4384_v60 }
  0xfb   : > { %4044 = vmatprep.subr.bf16.mxu1 %v4043_v22  ;;  %2754 = vmatmul.mubr.f32.gmra.mrb[14].mxu0 %v4367_v45 }
  0xfc   : > { %2832 = vmatprep.mubr.f32.mxu0 %v5466_v1 }
  0xfd   : > { %3833 = vmatmul.mubr.f32.gmra.mrb[18].mxu1 %v4420_v5 }
  0xfe   : > { %4046 = vmatpush3.bf16.msra.mxu1 %v4043_v22  ;;  %3843 = vmatprep.mubr.f32.mxu1 %v4335_v23 }
  0xff   : > { %4048 = vmatprep.subr.bf16.mxu1 %v4976_v58  ;;  %2834 = vmatmul.mubr.f32.vlgmr.msra.gmra.mrb[8].mxu0 %v4335_v23 }
 0x100   : > { %2839 = vmatprep.mubr.f32.mxu0 %v5466_v1 }
 0x101   : > { %3844 = vmatmul.mubr.f32.vlgmr.msra.gmra.mrb[16].mxu1 %v4337_v24 }
 0x102   : > { %4050 = vmatpush3.bf16.msra.mxu1 %v4976_v58  ;;  %3846 = vmatprep.mubr.f32.mxu1 %v4344_v29 }
 0x103   : > { %4052 = vmatprep.subr.bf16.mxu1 %v5008_v44  ;;  %2841 = vmatmul.mubr.f32.gmra.mrb[10].mxu0 %v4337_v24 }
 0x104   : > { %2846 = vmatprep.mubr.f32.mxu0 %v5466_v1 }
 0x105   : > { %3847 = vmatmul.mubr.f32.gmra.mrb[18].mxu1 %v4367_v45 }
 0x106   : > { %4054 = vmatpush3.bf16.msra.mxu1 %v5008_v44  ;;  %3857 = vmatprep.mubr.f32.mxu1 %v4335_v23 }
 0x107   : > { %2848 = vmatmul.mubr.f32.gmra.mrb[12].mxu0 %v4344_v29 }
 0x108   : > { %2853 = vmatprep.mubr.f32.mxu0 %v5466_v1  ;;  %v5144_v1 = vstv %s165_s30 }
 0x109   : > { %3858 = vmatmul.mubr.f32.vlgmr.msra.gmra.mrb[16].mxu1 %v4337_v24  ;;  %v221_v4 = vmul.f32 %v5501_v37, %v5144_v1  ;;  %v222_v38 = vmul.f32 %v5503_v2, %v5144_v1 }
 0x10a   : > { %3860 = vmatprep.mubr.f32.mxu1 %v4344_v29 }
 0x10b   : > { %2855 = vmatmul.mubr.f32.gmra.mrb[14].mxu0 %v4367_v45 }
 0x10d   : > { %3861 = vmatmul.mubr.f32.gmra.mrb[18].mxu1 %v4367_v45  ;;  %v5142_v45 = vstv %s163_s29 }
 0x10e   : > { %v218_v33 = vmul.f32 %v5500_v39, %v5142_v45  ;;  %v219_v59 = vmul.f32 %v5502_v54, %v5142_v45 }
 0x110   : > { %v223_v25 = vadd.f32 %v221_v4, %v218_v33  ;;  %v224_v51 = vadd.f32 %v222_v38, %v219_v59  ;;  %v5504_v59 = vld [vmem:[#allocation16_spill] sm:$0xff]  ;;  %v5505_v38 = vld [vmem:[#allocation15_spill] sm:$0xff] }
 0x111   : > { %v1146_v2 = vmul.f32 %v5504_v59, %v5142_v45 }
 0x112   : > { %v226_v58 = vadd.f32 %v5156_v42, %v223_v25  ;;  %v227_v19 = vadd.f32 %v5156_v42, %v224_v51  ;;  %v1148_v25 = vmul.f32 %v5505_v38, %v5144_v1 }
 0x114   : > { %v236_v56 = vadd.f32 1.0, %v226_v58  ;;  %v237_v16 = vadd.f32 1.0, %v227_v19 }
 0x116   : > { %v238_v6 = vmul.f32 28.0, %v236_v56  ;;  %v239_v21 = vmul.f32 28.0, %v237_v16  ;;  %v5507_v56 = vld [vmem:[#allocation13_spill] sm:$0xff] }
 0x117   : > { %v1149_v16 = vmul.f32 %v5507_v56, %v5144_v1 }
 0x118   : > { %v3706_v35 = vadd.f32 -1.0, %v238_v6  ;;  %v3707_v0 = vadd.f32 -1.0, %v239_v21 }
 0x11a   : > { %v242_v50 = vmul.f32 0.5, %v3706_v35  ;;  %v243_v8 = vmul.f32 0.5, %v3707_v0 }
 0x11c   : > { %v246_v44 = vfloor.f32 %v242_v50  ;;  %v5160_v49 = vfloor.f32 %v243_v8 }
 0x11e   : > { %v250_v13 = vsub.f32 %v242_v50, %v246_v44  ;;  %v281_v20 = vadd.f32 1.0, %v246_v44  ;;  %v251_v7 = vsub.f32 %v243_v8, %v5160_v49  ;;  %v282_v31 = vadd.f32 1.0, %v5160_v49 }
 0x11f   : > { %vm265_vm14 = vcmp.eq.f32.partialorder %v4325_v12, %v246_v44  ;;  %vm267_vm15 = vcmp.eq.f32.partialorder %v4329_v17, %v246_v44  ;;  %vm266_vm0 = vcmp.eq.f32.partialorder %v4325_v12, %v5160_v49  ;;  %vm268_vm4 = vcmp.eq.f32.partialorder %v4329_v17, %v5160_v49 }
 0x120   : > { %v254_v10 = vsub.f32 1.0, %v250_v13  ;;  %vm283_vm13 = vcmp.eq.f32.partialorder %v4325_v12, %v281_v20  ;;  %v255_v41 = vsub.f32 1.0, %v251_v7  ;;  %vm284_vm1 = vcmp.eq.f32.partialorder %v4325_v12, %v282_v31 }
 0x121   : > { %vm285_vm2 = vcmp.eq.f32.partialorder %v4329_v17, %v281_v20  ;;  %vm286_vm3 = vcmp.eq.f32.partialorder %v4329_v17, %v282_v31  ;;  %v291_v43 = vsel %vm283_vm13, %v250_v13, 0.0  ;;  %vm269_vm5 = vcmp.eq.f32.partialorder %v4340_v26, %v246_v44 }
 0x122   : > { %vm287_vm6 = vcmp.eq.f32.partialorder %v4340_v26, %v281_v20  ;;  %v273_v40 = vsel %vm265_vm14, %v254_v10, 0.0  ;;  %v275_v15 = vsel %vm267_vm15, %v254_v10, 0.0  ;;  %vm270_vm7 = vcmp.eq.f32.partialorder %v4340_v26, %v5160_v49 }
 0x123   : > { %vm288_vm9 = vcmp.eq.f32.partialorder %v4340_v26, %v282_v31  ;;  %v274_v62 = vsel %vm266_vm0, %v255_v41, 0.0  ;;  %v292_v32 = vsel %vm284_vm1, %v251_v7, 0.0  ;;  %v293_v57 = vsel %vm285_vm2, %v250_v13, 0.0 }
 0x124   : > { %v294_v9 = vsel %vm286_vm3, %v251_v7, 0.0  ;;  %v276_v30 = vsel %vm268_vm4, %v255_v41, 0.0  ;;  %v277_v63 = vsel %vm269_vm5, %v254_v10, 0.0  ;;  %v295_v34 = vsel %vm287_vm6, %v250_v13, 0.0 }
 0x125   : > { %v278_v3 = vsel %vm270_vm7, %v255_v41, 0.0  ;;  %v296_v48 = vsel %vm288_vm9, %v251_v7, 0.0  ;;  %v299_v55 = vadd.f32 %v291_v43, %v273_v40  ;;  %v301_v36 = vadd.f32 %v293_v57, %v275_v15 }
 0x126   : > { %v300_v22 = vadd.f32 %v292_v32, %v274_v62  ;;  %v302_v33 = vadd.f32 %v294_v9, %v276_v30  ;;  %v303_v37 = vadd.f32 %v295_v34, %v277_v63  ;;  %vm271_vm10 = vcmp.eq.f32.partialorder %v4342_v27, %v246_v44 }
 0x127   : > { %vm289_vm11 = vcmp.eq.f32.partialorder %v4342_v27, %v281_v20  ;;  %vm272_vm12 = vcmp.eq.f32.partialorder %v4342_v27, %v5160_v49  ;;  %vm290_vm13 = vcmp.eq.f32.partialorder %v4342_v27, %v282_v31  ;;  %v1150_v62 = vadd.f32 %v1148_v25, %v1146_v2 }
 0x128   : > { %v297_v0 = vsel %vm289_vm11, %v250_v13, 0.0  ;;  %v280_v43 = vsel %vm272_vm12, %v255_v41, 0.0  ;;  %v298_v40 = vsel %vm290_vm13, %v251_v7, 0.0 }
 0x129   : > { %v306_v9 = vadd.f32 %v298_v40, %v280_v43  ;;  %v1152_v31 = vadd.f32 %v1150_v62, %v5156_v42 }
 0x131   : > { %v448_v52 = vpop.f32.mrb[0].mxu1 }
 0x132   : > { %v5127_v53 = vpop.f32.mrb[1].mxu1 }
 0x135   : > { %v5129_v60 = vpop.f32.mrb[2].mxu1 }
 0x136   : > { %v5131_v5 = vpop.f32.mrb[3].mxu1 }
 0x141   : > { %v5135_v23 = vpop.f32.mrb[4].mxu1 }
 0x142   : > { %v5137_v24 = vpop.f32.mrb[5].mxu1 }
 0x145   : > { %v5140_v29 = vpop.f32.mrb[6].mxu1 }
 0x146   : > { %v5146_v28 = vpop.f32.mrb[7].mxu1 }
 0x172   : > { %v1033_v46 = vpop.f32.mrb[0].mxu0 }
 0x173   : > { %v4059_v47 = vadd.f32 %v1033_v46, %v448_v52  ;;  %v1035_v14 = vpop.f32.mrb[1].mxu0  ;;  %v304_v52 = vadd.f32 %v296_v48, %v278_v3  ;;  %v1162_v3 = vadd.f32 1.0, %v1152_v31 }
 0x174   : > { %v4060_v61 = vadd.f32 %v1035_v14, %v5127_v53 }
 0x175   : > { %v1059_v51 = vmul.f32 %v4059_v47, %v299_v55 }
 0x176   : > { %v1040_v39 = vpop.f32.mrb[2].mxu0  ;;  %v1060_v6 = vmul.f32 %v4060_v61, %v300_v22 }
 0x177   : > { %v4061_v4 = vadd.f32 %v1040_v39, %v5129_v60  ;;  %v1042_v54 = vpop.f32.mrb[3].mxu0  ;;  %v5506_v60 = vld [vmem:[#allocation14_spill] sm:$0xff]  ;;  %v1164_v39 = vmul.f32 28.0, %v1162_v3 }
 0x178   : > { %v4062_v53 = vadd.f32 %v1042_v54, %v5131_v5  ;;  %v1147_v19 = vmul.f32 %v5506_v60, %v5142_v45  ;;  %v279_v5 = vsel %vm271_vm10, %v254_v10, 0.0 }
 0x179   : > { %v1061_v58 = vmul.f32 %v4061_v4, %v301_v36  ;;  %v305_v57 = vadd.f32 %v297_v0, %v279_v5  ;;  %v3714_v59 = vadd.f32 -1.0, %v1164_v39 }
 0x17a   : > { %v1062_v21 = vmul.f32 %v4062_v53, %v302_v33  ;;  %v1047_v35 = vpop.f32.mrb[4].mxu0  ;;  %v1151_v44 = vadd.f32 %v1149_v16, %v1147_v19  ;;  %v5508_v16 = vld [vmem:[#allocation5_spill] sm:$0xff] }
 0x17b   : > { %v1067_v50 = vadd.f32 %v1061_v58, %v1059_v51  ;;  %v4063_v8 = vadd.f32 %v1047_v35, %v5135_v23  ;;  %v1049_v20 = vpop.f32.mrb[5].mxu0  ;;  %v1168_v19 = vmul.f32 0.5, %v3714_v59 }
 0x17c   : > { %v1077_v15 = vadd.f32 %v1062_v21, %v1060_v6  ;;  %v4064_v46 = vadd.f32 %v1049_v20, %v5137_v24  ;;  %v1153_v41 = vadd.f32 %v1151_v44, %v5156_v42 }
 0x17d   : > { %v1063_v32 = vmul.f32 %v4063_v8, %v303_v37  ;;  %v1172_v5 = vfloor.f32 %v1168_v19  ;;  %v5509_v8 = vlaneseq }
 0x17e   : > { %v1064_v10 = vmul.f32 %v4064_v46, %v304_v52  ;;  %v1054_v13 = vpop.f32.mrb[6].mxu0  ;;  %v1163_v55 = vadd.f32 1.0, %v1153_v41 }
 0x17f   : > { %v1068_v47 = vadd.f32 %v1067_v50, %v1063_v32  ;;  %v4065_v23 = vadd.f32 %v1054_v13, %v5140_v29  ;;  %v1056_v14 = vpop.f32.mrb[7].mxu0  ;;  %vm5223_vm14 = vcmp.lt.s32.totalorder %v5509_v8, 256  ;;  %v1176_v40 = vsub.f32 %v1168_v19, %v1172_v5 }
 0x180   : > { %v1078_v30 = vadd.f32 %v1077_v15, %v1064_v10  ;;  %v4066_v49 = vadd.f32 %v1056_v14, %v5146_v28  ;;  %v4250_v28 = vmov 1966171168   ;;  %v1165_v4 = vmul.f32 28.0, %v1163_v55  ;;  %v5512_v55 = vld [vmem:[#allocation19_spill] sm:$0xff] }
 0x181   : > { %v1065_v7 = vmul.f32 %v4065_v23, %v305_v57  ;;  %v1091_v37 = vunpack.c.l.s4 %v4250_v28  ;;  %v1198_v15 = vadd.f32 1.0, %v1172_v5  ;;  %v1180_v32 = vsub.f32 1.0, %v1176_v40 }
 0x182   : > { %v1066_v24 = vmul.f32 %v4066_v49, %v306_v9  ;;  %v3715_v25 = vadd.f32 -1.0, %v1165_v4  ;;  %vm1182_vm15 = vcmp.eq.f32.partialorder %v4325_v12, %v1172_v5  ;;  %vm1184_vm3 = vcmp.eq.f32.partialorder %v4329_v17, %v1172_v5 }
 0x183   : > { %v1069_v63 = vsel %vm362_vm8, %v1065_v7, 0.0  ;;  %v1092_v38 = vunpack.c.0.s8 %v1091_v37  ;;  %vm1200_vm0 = vcmp.eq.f32.partialorder %v4325_v12, %v1198_v15  ;;  %vm1202_vm4 = vcmp.eq.f32.partialorder %v4329_v17, %v1198_v15  ;;  %v5515_v37 = vld [vmem:[#allocation18_spill] sm:$0xff] }
 0x184   : > { %v1070_v34 = vadd.f32 %v1069_v63, %v1068_v47  ;;  %v1079_v61 = vsel %vm362_vm8, %v1066_v24, 0.0  ;;  %v1169_v21 = vmul.f32 0.5, %v3715_v25  ;;  %v1190_v44 = vsel %vm1182_vm15, %v1180_v32, 0.0 }
 0x185   : > { %v1080_v48 = vadd.f32 %v1079_v61, %v1078_v30  ;;  %v5211_v6 = vsub.s32 %v1092_v38, %v5508_v16  ;;  %v1208_v10 = vsel %vm1200_vm0, %v1176_v40, 0.0  ;;  %vm1186_vm7 = vcmp.eq.f32.partialorder %v4340_v26, %v1172_v5 }
 0x186   : > { %v1071_v36 = vrot.slane %v1070_v34, 4  ;;  %v5215_v50 = vfloor.f32 %v1169_v21  ;;  %vm1204_vm9 = vcmp.eq.f32.partialorder %v4340_v26, %v1198_v15  ;;  %v1192_v47 = vsel %vm1184_vm3, %v1180_v32, 0.0 }
 0x187   : > { %v1081_v29 = vrot.slane %v1080_v48, 4  ;;  %v1210_v23 = vsel %vm1202_vm4, %v1176_v40, 0.0  ;;  %v1216_v49 = vadd.f32 %v1208_v10, %v1190_v44  ;;  %v1194_v41 = vsel %vm1186_vm7, %v1180_v32, 0.0 }
 0x188   : > { %v1072_v22 = vadd.f32 %v1071_v36, %v1070_v34  ;;  %v1177_v46 = vsub.f32 %v1169_v21, %v5215_v50  ;;  %v1199_v62 = vadd.f32 1.0, %v5215_v50  ;;  %vm1183_vm1 = vcmp.eq.f32.partialorder %v4325_v12, %v5215_v50 }
 0x189   : > { %v1082_v33 = vadd.f32 %v1081_v29, %v1080_v48  ;;  %vm1185_vm5 = vcmp.eq.f32.partialorder %v4329_v17, %v5215_v50  ;;  %vm1187_vm10 = vcmp.eq.f32.partialorder %v4340_v26, %v5215_v50  ;;  %v1212_v24 = vsel %vm1204_vm9, %v1176_v40, 0.0  ;;  %v5513_v29 = vld [vmem:[#allocation20_spill] sm:$0xff] }
 0x18a   : > { %v1073_v54 = vrot.slane %v1072_v22, 2  ;;  %v1181_v57 = vsub.f32 1.0, %v1177_v46  ;;  %vm1201_vm2 = vcmp.eq.f32.partialorder %v4325_v12, %v1199_v62  ;;  %vm1203_vm6 = vcmp.eq.f32.partialorder %v4329_v17, %v1199_v62 }
 0x18b   : > { %v1083_v52 = vrot.slane %v1082_v33, 2  ;;  %v1209_v9 = vsel %vm1201_vm2, %v1177_v46, 0.0  ;;  %vm1205_vm11 = vcmp.eq.f32.partialorder %v4340_v26, %v1199_v62  ;;  %v1211_v30 = vsel %vm1203_vm6, %v1177_v46, 0.0 }
 0x18c   : > { %v1074_v53 = vadd.f32 %v1073_v54, %v1072_v22  ;;  %v1191_v13 = vsel %vm1183_vm1, %v1181_v57, 0.0  ;;  %v1193_v14 = vsel %vm1185_vm5, %v1181_v57, 0.0  ;;  %v1218_v34 = vadd.f32 %v1210_v23, %v1192_v47 }
 0x18d   : > { %v1084_v2 = vadd.f32 %v1083_v52, %v1082_v33  ;;  %v1217_v7 = vadd.f32 %v1209_v9, %v1191_v13  ;;  %v1195_v61 = vsel %vm1187_vm10, %v1181_v57, 0.0  ;;  %v1213_v3 = vsel %vm1205_vm11, %v1177_v46, 0.0  ;;  %v5514_v33 = vld [vmem:[#allocation17_spill] sm:$0xff] }
 0x18e   : > { %v1075_v51 = vrot.slane %v1074_v53, 1  ;;  %vm1188_vm12 = vcmp.eq.f32.partialorder %v4342_v27, %v1172_v5  ;;  %v1219_v48 = vadd.f32 %v1211_v30, %v1193_v14  ;;  %vm1206_vm13 = vcmp.eq.f32.partialorder %v4342_v27, %v1198_v15 }
 0x18f   : > { %v1085_v58 = vrot.slane %v1084_v2, 1  ;;  %v2045_v36 = vmul.f32 %v5512_v55, %v5142_v45  ;;  %v2047_v22 = vmul.f32 %v5513_v29, %v5144_v1  ;;  %v1220_v39 = vadd.f32 %v1212_v24, %v1194_v41 }
 0x190   : > { %v1076_v60 = vadd.f32 %v1075_v51, %v1074_v53  ;;  %v2046_v28 = vmul.f32 %v5514_v33, %v5142_v45  ;;  %v2048_v4 = vmul.f32 %v5515_v37, %v5144_v1  ;;  %v1221_v52 = vadd.f32 %v1213_v3, %v1195_v61 }
 0x191   : > { %v1086_v56 = vadd.f32 %v1085_v58, %v1084_v2  ;;  %v1196_v53 = vsel %vm1188_vm12, %v1180_v32, 0.0  ;;  %vm1189_vm15 = vcmp.eq.f32.partialorder %v4342_v27, %v5215_v50  ;;  %vm1207_vm0 = vcmp.eq.f32.partialorder %v4342_v27, %v1199_v62 }
 0x192   : > { %v1214_v25 = vsel %vm1206_vm13, %v1176_v40, 0.0  ;;  %v2926_v51 = vmul.f32 %v4825_v11, %v5142_v45  ;;  %v2049_v19 = vadd.f32 %v2047_v22, %v2045_v36  ;;  %v1197_v21 = vsel %vm1189_vm15, %v1181_v57, 0.0 }
 0x193   : > { %v1089_v35 = vcombine.low %v1076_v60, %v1086_v56  ;;  %v2927_v56 = vmul.f32 %v4827_v18, %v5144_v1  ;;  %v2050_v5 = vadd.f32 %v2048_v4, %v2046_v28  ;;  %v1222_v62 = vadd.f32 %v1214_v25, %v1196_v53 }
 0x194   : > { %v2051_v44 = vadd.f32 %v2049_v19, %v5156_v42 }
 0x195   : > { %v1096_v0 = vrot.slane %v1089_v35, %v5211_v6  ;;  %v1215_v35 = vsel %vm1207_vm0, %v1177_v46, 0.0  ;;  %v2928_v11 = vadd.f32 %v2927_v56, %v2926_v51  ;;  %v2052_v10 = vadd.f32 %v2050_v5, %v5156_v42 }
 0x196   : > { %v1223_v40 = vadd.f32 %v1215_v35, %v1197_v21  ;;  %v2061_v46 = vadd.f32 1.0, %v2051_v44 }
 0x197   : > { %v1103_v43 = vrot.slane %v1096_v0, %v5211_v6  ;;  %v2929_v47 = vadd.f32 %v2928_v11, %v5156_v42  ;;  %v2062_v14 = vadd.f32 1.0, %v2052_v10 }
 0x198   : > { %v2063_v41 = vmul.f32 28.0, %v2061_v46 }
 0x199   : > { %1109 = vst.msk [vmem:[%s5220_s8] sm:$0x3] %vm5223_vm14, %v1103_v43  ;;  %v2934_v24 = vadd.f32 1.0, %v2929_v47 }
 0x19a   : > { %v3722_v55 = vadd.f32 -1.0, %v2063_v41 }
 0x19b   : > { %v2935_v36 = vmul.f32 28.0, %v2934_v24 }
 0x19c   : > { %v2067_v28 = vmul.f32 0.5, %v3722_v55 }
 0x19d   : > { %v3727_v37 = vadd.f32 -1.0, %v2935_v36 }
 0x1a4   : > { %v1936_v31 = vpop.f32.mrb[8].mxu1 }
 0x1a5   : > { %v1938_v63 = vpop.f32.mrb[9].mxu1  ;;  %v1962_v59 = vmul.f32 %v1936_v31, %v1216_v49 }
 0x1a6   : > { %v1963_v58 = vmul.f32 %v1938_v63, %v1217_v7 }
 0x1a8   : > { %v1943_v54 = vpop.f32.mrb[10].mxu1 }
 0x1a9   : > { %v1964_v2 = vmul.f32 %v1943_v54, %v1218_v34  ;;  %v1945_v38 = vpop.f32.mrb[11].mxu1  ;;  %v2064_v34 = vmul.f32 28.0, %v2062_v14 }
 0x1aa   : > { %v1965_v60 = vmul.f32 %v1945_v38, %v1219_v48 }
 0x1ab   : > { %v1970_v16 = vadd.f32 %v1964_v2, %v1962_v59  ;;  %v3723_v22 = vadd.f32 -1.0, %v2064_v34  ;;  %v5270_v59 = vfloor.f32 %v2067_v28  ;;  %v2937_v2 = vmul.f32 0.5, %v3727_v37 }
 0x1ac   : > { %v1980_v0 = vadd.f32 %v1965_v60, %v1963_v58  ;;  %v1950_v50 = vpop.f32.mrb[12].mxu1 }
 0x1ad   : > { %v1966_v43 = vmul.f32 %v1950_v50, %v1220_v39  ;;  %v1952_v15 = vpop.f32.mrb[13].mxu1  ;;  %v2068_v54 = vmul.f32 0.5, %v3723_v22  ;;  %v5276_v58 = vsub.f32 %v2067_v28, %v5270_v59  ;;  %v5278_v60 = vfloor.f32 %v2937_v2 }
 0x1ae   : > { %v1967_v32 = vmul.f32 %v1952_v15, %v1221_v52  ;;  %v5282_v56 = vadd.f32 1.0, %v5270_v59  ;;  %vm2081_vm1 = vcmp.eq.f32.partialorder %v4325_v12, %v5270_v59  ;;  %vm2083_vm6 = vcmp.eq.f32.partialorder %v4329_v17, %v5270_v59 }
 0x1af   : > { %v1971_v45 = vadd.f32 %v1970_v16, %v1966_v43  ;;  %v5272_v25 = vfloor.f32 %v2068_v54  ;;  %v2079_v35 = vsub.f32 1.0, %v5276_v58  ;;  %v5295_v5 = vsub.f32 %v2937_v2, %v5278_v60 }
 0x1b0   : > { %v1981_v13 = vadd.f32 %v1980_v0, %v1967_v32  ;;  %v1957_v9 = vpop.f32.mrb[14].mxu1  ;;  %v5298_v0 = vadd.f32 1.0, %v5278_v60  ;;  %vm2099_vm2 = vcmp.eq.f32.partialorder %v4325_v12, %v5282_v56  ;;  %vm2945_vm3 = vcmp.eq.f32.partialorder %v4329_v17, %v5278_v60 }
 0x1b1   : > { %v1968_v18 = vmul.f32 %v1957_v9, %v1222_v62  ;;  %v1959_v1 = vpop.f32.mrb[15].mxu1  ;;  %v5285_v16 = vsub.f32 %v2068_v54, %v5272_v25  ;;  %v5288_v21 = vadd.f32 1.0, %v5272_v25  ;;  %vm2082_vm4 = vcmp.eq.f32.partialorder %v4325_v12, %v5272_v25 }
 0x1b2   : > { %v1969_v57 = vmul.f32 %v1959_v1, %v1223_v40  ;;  %vm2101_vm7 = vcmp.eq.f32.partialorder %v4329_v17, %v5282_v56  ;;  %vm2084_vm9 = vcmp.eq.f32.partialorder %v4329_v17, %v5272_v25  ;;  %v2089_v43 = vsel %vm2081_vm1, %v2079_v35, 0.0 }
 0x1b3   : > { %v1972_v23 = vsel %vm362_vm8, %v1968_v18, 0.0  ;;  %v2080_v50 = vsub.f32 1.0, %v5285_v16  ;;  %vm2100_vm5 = vcmp.eq.f32.partialorder %v4325_v12, %v5288_v21  ;;  %vm2102_vm10 = vcmp.eq.f32.partialorder %v4329_v17, %v5288_v21 }
 0x1b4   : > { %v1973_v30 = vadd.f32 %v1972_v23, %v1971_v45  ;;  %v1982_v49 = vsel %vm362_vm8, %v1969_v57, 0.0  ;;  %v2107_v15 = vsel %vm2099_vm2, %v5276_v58, 0.0  ;;  %v2943_v62 = vsub.f32 1.0, %v5295_v5 }
 0x1b5   : > { %v1983_v31 = vadd.f32 %v1982_v49, %v1981_v13  ;;  %vm2954_vm11 = vcmp.eq.f32.partialorder %v4329_v17, %v5298_v0  ;;  %v2090_v32 = vsel %vm2082_vm4, %v2080_v50, 0.0  ;;  %v2108_v40 = vsel %vm2100_vm5, %v5285_v16, 0.0 }
 0x1b6   : > { %v1974_v7 = vrot.slane %v1973_v30, 4  ;;  %vm2944_vm12 = vcmp.eq.f32.partialorder %v4325_v12, %v5278_v60  ;;  %vm2953_vm13 = vcmp.eq.f32.partialorder %v4325_v12, %v5298_v0  ;;  %v2091_v44 = vsel %vm2083_vm6, %v2079_v35, 0.0 }
 0x1b7   : > { %v1984_v63 = vrot.slane %v1983_v31, 4  ;;  %v2109_v11 = vsel %vm2101_vm7, %v5276_v58, 0.0  ;;  %v2092_v45 = vsel %vm2084_vm9, %v2080_v50, 0.0  ;;  %v2110_v10 = vsel %vm2102_vm10, %v5285_v16, 0.0 }
 0x1b8   : > { %v1975_v61 = vadd.f32 %v1974_v7, %v1973_v30  ;;  %vm2085_vm15 = vcmp.eq.f32.partialorder %v4340_v26, %v5270_v59  ;;  %vm2103_vm0 = vcmp.eq.f32.partialorder %v4340_v26, %v5282_v56  ;;  %vm2086_vm1 = vcmp.eq.f32.partialorder %v4340_v26, %v5272_v25 }
 0x1b9   : > { %v1985_v3 = vadd.f32 %v1984_v63, %v1983_v31  ;;  %vm2104_vm2 = vcmp.eq.f32.partialorder %v4340_v26, %v5288_v21  ;;  %v2115_v13 = vadd.f32 %v2107_v15, %v2089_v43  ;;  %v2949_v18 = vsel %vm2945_vm3, %v2943_v62, 0.0 }
 0x1ba   : > { %v1976_v48 = vrot.slane %v1975_v61, 2  ;;  %v2958_v1 = vsel %vm2954_vm11, %v5295_v5, 0.0  ;;  %v2116_v57 = vadd.f32 %v2108_v40, %v2090_v32  ;;  %v2948_v47 = vsel %vm2944_vm12, %v2943_v62, 0.0 }
 0x1bb   : > { %v1986_v29 = vrot.slane %v1985_v3, 2  ;;  %v2957_v23 = vsel %vm2953_vm13, %v5295_v5, 0.0  ;;  %v2117_v14 = vadd.f32 %v2109_v11, %v2091_v44  ;;  %v2118_v30 = vadd.f32 %v2110_v10, %v2092_v45 }
 0x1bc   : > { %v1977_v42 = vadd.f32 %v1976_v48, %v1975_v61  ;;  %v2093_v49 = vsel %vm2085_vm15, %v2079_v35, 0.0  ;;  %v2111_v31 = vsel %vm2103_vm0, %v5276_v58, 0.0  ;;  %v2094_v7 = vsel %vm2086_vm1, %v2080_v50, 0.0 }
 0x1bd   : > { %v1987_v39 = vadd.f32 %v1986_v29, %v1985_v3  ;;  %v2112_v17 = vsel %vm2104_vm2, %v5285_v16, 0.0  ;;  %vm2947_vm3 = vcmp.eq.f32.partialorder %v4342_v27, %v5278_v60  ;;  %vm2956_vm4 = vcmp.eq.f32.partialorder %v4342_v27, %v5298_v0 }
 0x1be   : > { %v1978_v33 = vrot.slane %v1977_v42, 1  ;;  %vm2087_vm5 = vcmp.eq.f32.partialorder %v4342_v27, %v5270_v59  ;;  %vm2105_vm6 = vcmp.eq.f32.partialorder %v4342_v27, %v5282_v56  ;;  %vm2946_vm7 = vcmp.eq.f32.partialorder %v4340_v26, %v5278_v60 }
 0x1bf   : > { %v1988_v4 = vrot.slane %v1987_v39, 1  ;;  %vm2955_vm9 = vcmp.eq.f32.partialorder %v4340_v26, %v5298_v0  ;;  %vm2088_vm10 = vcmp.eq.f32.partialorder %v4342_v27, %v5272_v25  ;;  %vm2106_vm11 = vcmp.eq.f32.partialorder %v4342_v27, %v5288_v21 }
 0x1c0   : > { %v1979_v52 = vadd.f32 %v1978_v33, %v1977_v42  ;;  %v2119_v34 = vadd.f32 %v2111_v31, %v2093_v49  ;;  %v2120_v61 = vadd.f32 %v2112_v17, %v2094_v7  ;;  %v2095_v55 = vsel %vm2087_vm5, %v2079_v35, 0.0 }
 0x1c1   : > { %v1989_v53 = vadd.f32 %v1988_v4, %v1987_v39  ;;  %v2113_v36 = vsel %vm2105_vm6, %v5276_v58, 0.0  ;;  %v2962_v29 = vadd.f32 %v2958_v1, %v2949_v18  ;;  %v2096_v42 = vsel %vm2088_vm10, %v2080_v50, 0.0 }
 0x1c2   : > { %v2114_v39 = vsel %vm2106_vm11, %v5285_v16, 0.0  ;;  %v2961_v33 = vadd.f32 %v2957_v23, %v2948_v47  ;;  %v2951_v28 = vsel %vm2947_vm3, %v2943_v62, 0.0  ;;  %v2960_v37 = vsel %vm2956_vm4, %v5295_v5, 0.0 }
 0x1c3   : > { %v1992_v38 = vcombine.low %v1979_v52, %v1989_v53  ;;  %v2950_v52 = vsel %vm2946_vm7, %v2943_v62, 0.0  ;;  %v2959_v53 = vsel %vm2955_vm9, %v5295_v5, 0.0  ;;  %vm3607_vm12 = vcmask 130048  }
 0x1c4   : > { %v2122_v58 = vadd.f32 %v2114_v39, %v2096_v42  ;;  %v2964_v21 = vadd.f32 %v2960_v37, %v2951_v28  ;;  %v2963_v35 = vadd.f32 %v2959_v53, %v2950_v52  ;;  %vm3613_vm13 = vcmask 125952  }
 0x1c5   : > { %v1999_v51 = vrot.slane %v1992_v38, %v5211_v6  ;;  %v2121_v38 = vadd.f32 %v2113_v36, %v2095_v55 }
 0x1c7   : > { %v2006_v19 = vrot.slane %v1999_v51, %v5211_v6 }
 0x1c9   : > { %2008 = vst.msk [vmem:[%s5220_s8 + $0x2] sm:$0x3] %vm5223_vm14, %v2006_v19 }
 0x1d2   : > { %v2835_v9 = vpop.f32.mrb[8].mxu0 }
 0x1d3   : > { %v2837_v46 = vpop.f32.mrb[9].mxu0  ;;  %v2861_v41 = vmul.f32 %v2835_v9, %v2115_v13 }
 0x1d4   : > { %v2862_v3 = vmul.f32 %v2837_v46, %v2116_v57 }
 0x1d6   : > { %v2842_v12 = vpop.f32.mrb[10].mxu0 }
 0x1d7   : > { %v2863_v24 = vmul.f32 %v2842_v12, %v2117_v14  ;;  %v2844_v63 = vpop.f32.mrb[11].mxu0 }
 0x1d8   : > { %v2864_v48 = vmul.f32 %v2844_v63, %v2118_v30 }
 0x1d9   : > { %v2869_v22 = vadd.f32 %v2863_v24, %v2861_v41 }
 0x1da   : > { %v2879_v4 = vadd.f32 %v2864_v48, %v2862_v3  ;;  %v2849_v54 = vpop.f32.mrb[12].mxu0 }
 0x1db   : > { %v2865_v59 = vmul.f32 %v2849_v54, %v2119_v34  ;;  %v2851_v2 = vpop.f32.mrb[13].mxu0 }
 0x1dc   : > { %v3859_v25 = vpop.f32.mrb[16].mxu1  ;;  %v2866_v51 = vmul.f32 %v2851_v2, %v2120_v61 }
 0x1dd   : > { %v3604_v27 = vmul.f32 %v3859_v25, %v2962_v29  ;;  %v3581_v19 = vpop.f32.mrb[17].mxu1  ;;  %v2870_v56 = vadd.f32 %v2869_v22, %v2865_v59 }
 0x1de   : > { %v3603_v16 = vmul.f32 %v3581_v19, %v2961_v33  ;;  %v2880_v60 = vadd.f32 %v2879_v4, %v2866_v51  ;;  %v2856_v50 = vpop.f32.mrb[14].mxu0 }
 0x1df   : > { %v3609_v43 = vsel %vm3607_vm12, %v3604_v27, 0.0  ;;  %v2867_v15 = vmul.f32 %v2856_v50, %v2121_v38  ;;  %v2858_v26 = vpop.f32.mrb[15].mxu0 }
 0x1e0   : > { %v3608_v5 = vsel %vm3607_vm12, %v3603_v16, 0.0  ;;  %v3862_v0 = vpop.f32.mrb[18].mxu1  ;;  %v2868_v62 = vmul.f32 %v2858_v26, %v2122_v58 }
 0x1e1   : > { %v3610_v32 = vadd.f32 %v3609_v43, %v3608_v5  ;;  %v3593_v40 = vpop.f32.mrb[19].mxu1  ;;  %v2871_v44 = vsel %vm362_vm8, %v2867_v15, 0.0  ;;  %v3606_v11 = vmul.f32 %v3862_v0, %v2964_v21 }
 0x1e2   : > { %v3605_v45 = vmul.f32 %v3593_v40, %v2963_v35  ;;  %v2872_v10 = vadd.f32 %v2871_v44, %v2870_v56  ;;  %v2881_v13 = vsel %vm362_vm8, %v2868_v62, 0.0  ;;  %vm3622_vm8 = vcmp.lt.s32.totalorder %v5509_v8, 16 }
 0x1e3   : > { %v2882_v9 = vadd.f32 %v2881_v13, %v2880_v60  ;;  %v3614_v47 = vsel %vm3613_vm13, %v3606_v11, 0.0 }
 0x1e4   : > { %v3611_v18 = vsel %vm3607_vm12, %v3605_v45, 0.0  ;;  %v2873_v1 = vrot.slane %v2872_v10, 4 }
 0x1e5   : > { %v3612_v57 = vadd.f32 %v3611_v18, %v3610_v32  ;;  %v2883_v46 = vrot.slane %v2882_v9, 4 }
 0x1e6   : > { %v2874_v23 = vadd.f32 %v2873_v1, %v2872_v10 }
 0x1e7   : > { %v3615_v14 = vadd.f32 %v3614_v47, %v3612_v57  ;;  %v2884_v30 = vadd.f32 %v2883_v46, %v2882_v9 }
 0x1e8   : > { %v2875_v49 = vrot.slane %v2874_v23, 2 }
 0x1e9   : > { %v3616_v31 = vrot.slane %v3615_v14, 4  ;;  %v2885_v7 = vrot.slane %v2884_v30, 2 }
 0x1ea   : > { %v2876_v17 = vadd.f32 %v2875_v49, %v2874_v23 }
 0x1eb   : > { %v3617_v12 = vadd.f32 %v3616_v31, %v3615_v14  ;;  %v2886_v41 = vadd.f32 %v2885_v7, %v2884_v30 }
 0x1ec   : > { %v2877_v24 = vrot.slane %v2876_v17, 1 }
 0x1ed   : > { %v3618_v63 = vrot.slane %v3617_v12, 2  ;;  %v2887_v34 = vrot.slane %v2886_v41, 1 }
 0x1ee   : > { %v2878_v61 = vadd.f32 %v2877_v24, %v2876_v17 }
 0x1ef   : > { %v3619_v3 = vadd.f32 %v3618_v63, %v3617_v12  ;;  %v2888_v48 = vadd.f32 %v2887_v34, %v2886_v41 }
 0x1f1   : > { %v3620_v55 = vrot.slane %v3619_v3, 1  ;;  %v2891_v36 = vcombine.low %v2878_v61, %v2888_v48 }
 0x1f3   : > { %v3621_v29 = vadd.f32 %v3620_v55, %v3619_v3  ;;  %v2898_v22 = vrot.slane %v2891_v36, %v5211_v6 }
 0x1f5   : > { %3624 = vst.msk [vmem:[%s5220_s8 + $0x6] sm:$0x1] %vm3622_vm8, %v3621_v29  ;;  %v2905_v42 = vrot.slane %v2898_v22, %v5211_v6 }
 0x1f7   : > { %2907 = vst.msk [vmem:[%s5220_s8 + $0x4] sm:$0x3] %vm5223_vm14, %v2905_v42 }
 0x1f8 PF: > { %s13_s9 = sadd.s32 1, %s4246_s9  }
 0x1f9   : > { %p10_p1 = scmp.ge.s32.totalorder %s13_s9, 4  }
 0x1fb   :  { %12 = sbr.rel (!%p10_p1) target bundleno = 1 (0x1), region = 63 }
 0x202   :  { %3644 = vsyncpa [#allocation3], 1 }
 0x203   :  { %3646 = vsyncpa [#allocation3 + $0x1], 1 }

// kernel: spatial_transformer_forward.2
= control target key start
LH: loop header
LB: loop body
LE: loop exit
PB: predicated region body
PF: predicated region fallthrough
CT: control target
= control target key end

     0   :  { %s9037_s13 = smov 0   ;;  %s11217_s0 = inlined_call_operand.vmem [shape: f32[2,1,784], index: 0, kind: input, shape index: {}]   ;;  %s11218_s1 = inlined_call_operand.vmem [shape: f32[8,25], index: 1, kind: input, shape index: {}]   ;;  %s11219_s2 = inlined_call_operand.vmem [shape: f32[8,1], index: 2, kind: input, shape index: {}]   ;;  %s11220_s3 = inlined_call_operand.vmem [shape: f32[25,16,8], index: 3, kind: input, shape index: {}]   ;;  %s11221_s4 = inlined_call_operand.vmem [shape: f32[16,1], index: 4, kind: input, shape index: {}]   ;;  %s11222_s5 = inlined_call_operand.vmem [shape: f32[349,16], index: 5, kind: input, shape index: {}]   ;;  %s11223_s6 = inlined_call_operand.vmem [shape: f32[16,16,64], index: 6, kind: input, shape index: {}]   ;;  %s11224_s7 = inlined_call_operand.vmem [shape: f32[1,64], index: 7, kind: input, shape index: {}]   ;;  %s11225_s8 = inlined_call_operand.vmem [shape: f32[64,6], index: 8, kind: input, shape index: {}]   ;;  %s11226_s9 = inlined_call_operand.vmem [shape: f32[1,6], index: 9, kind: input, shape index: {}]   ;;  %s11227_s10 = inlined_call_operand.vmem [shape: f32[2,1,6], index: 10, kind: output, shape index: {}]  }
   0x1 LB: > { %s7968_s14 = sadd.s32 4294967295, %s8911_s13   ;;  %p7972_p0 = scmp.ge.s32.totalorder %s8911_s13, 1  ;;  %s8911_s13 = sphi %s9037_s13, %s20_s13  }
   0x2   : > { %p311_p1 = scmp.lt.s32.totalorder %s8911_s13, 3 }
   0x4   : > { %p312_p2 = pnand %p7972_p0, %p311_p1 }
   0x6   : > { %315 = sbr.rel (%p312_p2) target bundleno = 2376 (0x948), region = 60 }
   0xd   : > { %v9048_v0 = vld [vmem:[%s11218_s1] sm:$0xff]  ;;  %v8913_v1 = vmov 1   ;;  %v8914_v2 = vmov 3   ;;  %v8915_v3 = vmov 2   ;;  %v8916_v4 = vmov 4   ;;  %p346_p3 = scmp.lt.s32.totalorder %s7968_s14, 1 }
   0xe   : > { %8859 = vset.pattern.permute.xlu0 %v8913_v1  ;;  %8861 = vset.pattern.permute.xlu1 %v8914_v2  ;;  %v8917_v5 = vmov 5   ;;  %v8918_v6 = vmov 6   ;;  %v8919_v7 = vmov 7   ;;  %v8920_v8 = vmov 9   ;;  %s8938_s21 = smov 127   ;;  %s8939_s22 = smov 126  }
   0xf   : > { %404 = vperm.xlu0 %8859, %v9048_v0   ;;  %496 = vperm.xlu1 %8861, %v9048_v0   ;;  %v8921_v9 = vmov 8   ;;  %v8922_v10 = vmov 12   ;;  %v8923_v11 = vmov 10   ;;  %v8924_v12 = vmov 15   ;;  %s11431_s14 = smov (!%p346_p3, %s7968_s14), 1  ;;  %s8940_s23 = smov 125  }
  0x10   : > { %v8925_v13 = vmov 11   ;;  %v8926_v14 = vmov 18   ;;  %v8927_v15 = vmov 13   ;;  %v8928_v16 = vmov 21   ;;  %s8781_s17 = smul.u32 7, %s11431_s14  ;;  %s8941_s24 = smov 124  }
  0x11   : > { %v8929_v17 = vmov 14   ;;  %v8930_v18 = vmov 24   ;;  %v8931_v19 = vmov 16   ;;  %v8932_v20 = vmov 0   ;;  %s8942_s25 = smov 100   ;;  %s8943_s26 = smov 99  }
  0x12   : > { %v8933_v21 = vmov 17   ;;  %v8934_v22 = vmov 19   ;;  %v8935_v23 = vmov 20   ;;  %v8936_v24 = vmov 22   ;;  %s349_s20 = scalar_lea.vmem %s11217_s0, %s8781_s17  ;;  %s8944_s27 = smov 98  }
  0x13   : > { %8860 = vset.pattern.permute.xlu0 %v8915_v3  ;;  %8862 = vset.pattern.permute.xlu1 %v8916_v4  ;;  %v8937_v25 = vmov 23   ;;  %v361_v26 = vlaneseq  ;;  %v9089_v30 = vld [vmem:[%s349_s20] sm:$0x7f]  ;;  %s8945_s28 = smov 97   ;;  %s8946_s29 = smov 96   ;;  %vm431_vm0 = vcmask 1039360  }
  0x14   : > { %450 = vperm.xlu0 %8860, %v9048_v0   ;;  %542 = vperm.xlu1 %8862, %v9048_v0   ;;  %s8947_s30 = smov 72   ;;  %s8948_s11 = smov 71   ;;  %vm477_vm1 = vcmask 1031168   ;;  %vm523_vm2 = vcmask 1022976   ;;  %vm569_vm3 = vcmask 1014784   ;;  %vm615_vm4 = vcmask 818176  }
  0x15   : > { %v9082_v27 = vshrl.u32 %v361_v26, 7  ;;  %s8949_s12 = smov 70   ;;  %s8950_s15 = smov 69   ;;  %vm661_vm5 = vcmask 809984   ;;  %vm707_vm6 = vcmask 801792   ;;  %vm753_vm7 = vcmask 793600  }
  0x16   : > { %s8951_s16 = smov 68   ;;  %s8952_s17 = smov 44   ;;  %vm799_vm8 = vcmask 785408   ;;  %vm845_vm9 = vcmask 588800   ;;  %vm891_vm10 = vcmask 580608   ;;  %vm937_vm11 = vcmask 572416  }
  0x17   : > { %v371_v28 = vsub.s32 2, %v9082_v27  ;;  %v367_v29 = vsub.s32 1, %v9082_v27  ;;  %v379_v33 = vsub.s32 4, %v9082_v27  ;;  %v375_v34 = vsub.s32 3, %v9082_v27  ;;  %s8953_s18 = smov 43   ;;  %s8954_s19 = smov 42  }
  0x18   : > { %8863 = vset.pattern.permute.xlu1 %v8917_v5  ;;  %8864 = vset.pattern.permute.xlu0 %v8918_v6  ;;  %v383_v36 = vsub.s32 5, %v9082_v27  ;;  %v363_v37 = vsub.s32 0, %v9082_v27  ;;  %s8955_s20 = smov 41   ;;  %vm983_vm12 = vcmask 564224   ;;  %vm1029_vm13 = vcmask 556032  }
  0x19   : > { %588 = vperm.xlu1 %8863, %v9048_v0   ;;  %634 = vperm.xlu0 %8864, %v9048_v0   ;;  %v9092_v31 = vrot.slane %v9089_v30, %v371_v28  ;;  %v9095_v32 = vrot.slane %v9089_v30, %v367_v29  ;;  %v9104_v40 = vrot.slane %v9089_v30, %v379_v33  ;;  %vm1075_vm14 = vcmask 359424  }
  0x1a   : > { %v9107_v41 = vrot.slane %v9089_v30, %v375_v34  ;;  %v9114_v44 = vrot.slane %v9089_v30, %v383_v36  ;;  %v9117_v45 = vrot.slane %v9089_v30, %v363_v37  ;;  %vm1121_vm15 = vcmask 351232  }
  0x1d   : > { %8865 = vset.pattern.permute.xlu1 %v8919_v7  ;;  %8867 = vset.pattern.permute.xlu0 %v8920_v8 }
  0x1e   : > { %680 = vperm.xlu1 %8865, %v9048_v0   ;;  %772 = vperm.xlu0 %8867, %v9048_v0  }
  0x22   : > { %8866 = vset.pattern.permute.xlu1 %v8921_v9  ;;  %8870 = vset.pattern.permute.xlu0 %v8922_v10 }
  0x23   : > { %726 = vperm.xlu1 %8866, %v9048_v0   ;;  %910 = vperm.xlu0 %8870, %v9048_v0  }
  0x27   : > { %8868 = vset.pattern.permute.xlu1 %v8923_v11  ;;  %8873 = vset.pattern.permute.xlu0 %v8924_v12 }
  0x28   : > { %818 = vperm.xlu1 %8868, %v9048_v0   ;;  %1048 = vperm.xlu0 %8873, %v9048_v0  }
  0x2c   : > { %8869 = vset.pattern.permute.xlu1 %v8925_v13  ;;  %8876 = vset.pattern.permute.xlu0 %v8926_v14 }
  0x2d   : > { %864 = vperm.xlu1 %8869, %v9048_v0   ;;  %1186 = vperm.xlu0 %8876, %v9048_v0  }
  0x31   : > { %8871 = vset.pattern.permute.xlu1 %v8927_v15  ;;  %8879 = vset.pattern.permute.xlu0 %v8928_v16 }
  0x32   : > { %956 = vperm.xlu1 %8871, %v9048_v0   ;;  %1334 = vperm.xlu0 %8879, %v9048_v0  }
  0x36   : > { %8872 = vset.pattern.permute.xlu1 %v8929_v17  ;;  %8882 = vset.pattern.permute.xlu0 %v8930_v18 }
  0x37   : > { %1002 = vperm.xlu1 %8872, %v9048_v0   ;;  %1487 = vperm.xlu0 %8882, %v9048_v0  }
  0x3b   : > { %8874 = vset.pattern.permute.xlu1 %v8931_v19  ;;  %8884 = vset.pattern.permute.xlu0 %v8932_v20 }
  0x3c   : > { %1094 = vperm.xlu1 %8874, %v9048_v0  }
  0x40   : > { %8875 = vset.pattern.permute.xlu1 %v8933_v21 }
  0x41   : > { %1140 = vperm.xlu1 %8875, %v9048_v0  }
  0x45   : > { %8877 = vset.pattern.permute.xlu1 %v8934_v22 }
  0x46   : > { %1232 = vperm.xlu1 %8877, %v9048_v0  }
  0x4a   : > { %8878 = vset.pattern.permute.xlu1 %v8935_v23 }
  0x4b   : > { %1278 = vperm.xlu1 %8878, %v9048_v0  }
  0x4f   : > { %8880 = vset.pattern.permute.xlu1 %v8936_v24 }
  0x50   : > { %1385 = vperm.xlu1 %8880, %v9048_v0  }
  0x54   : > { %8881 = vset.pattern.permute.xlu1 %v8937_v25 }
  0x55   : > { %1436 = vperm.xlu1 %8881, %v9048_v0  }
  0x59   : > { %8883 = vset.pattern.permute.xlu1 %v8932_v20 }
  0x5a   : > { %357 = vperm.xlu1 %8883, %v9048_v0  }
  0x8e   : > { %v405_v35 = vpop.permute.xlu0 %404  ;;  %v497_v53 = vpop.permute.xlu1 %496 }
  0x8f   : > { %v409_v38 = vmul.f32 %v405_v35, %v9092_v31  ;;  %v408_v39 = vmul.f32 %v405_v35, %v9095_v32  ;;  %v411_v42 = vmul.f32 %v405_v35, %v9104_v40  ;;  %v410_v43 = vmul.f32 %v405_v35, %v9107_v41 }
  0x90   : > { %v412_v47 = vmul.f32 %v405_v35, %v9114_v44  ;;  %v407_v48 = vmul.f32 %v405_v35, %v9117_v45  ;;  %v500_v56 = vmul.f32 %v497_v53, %v9095_v32  ;;  %v501_v57 = vmul.f32 %v497_v53, %v9092_v31 }
  0x91   : > { %423 = vrot.lane.b32.xlu0 %v409_v38, %s8938_s21  ;;  %421 = vrot.lane.b32.xlu1 %v408_v39, %s8938_s21  ;;  %v502_v58 = vmul.f32 %v497_v53, %v9107_v41  ;;  %v503_v59 = vmul.f32 %v497_v53, %v9104_v40  ;;  %v504_v61 = vmul.f32 %v497_v53, %v9114_v44 }
  0x92   : > { %v499_v62 = vmul.f32 %v497_v53, %v9117_v45 }
  0x93   : > { %v451_v46 = vpop.permute.xlu0 %450  ;;  %v543_v60 = vpop.permute.xlu1 %542 }
  0x94   : > { %v454_v49 = vmul.f32 %v451_v46, %v9095_v32  ;;  %v455_v50 = vmul.f32 %v451_v46, %v9092_v31  ;;  %v456_v51 = vmul.f32 %v451_v46, %v9107_v41  ;;  %v457_v52 = vmul.f32 %v451_v46, %v9104_v40 }
  0x95   : > { %427 = vrot.lane.b32.xlu0 %v411_v42, %s8938_s21  ;;  %425 = vrot.lane.b32.xlu1 %v410_v43, %s8938_s21  ;;  %v458_v54 = vmul.f32 %v451_v46, %v9114_v44  ;;  %v453_v55 = vmul.f32 %v451_v46, %v9117_v45  ;;  %v546_v63 = vmul.f32 %v543_v60, %v9095_v32 }
  0x96   : > { %v547_v0 = vmul.f32 %v543_v60, %v9092_v31  ;;  %v548_v3 = vmul.f32 %v543_v60, %v9107_v41  ;;  %v549_v4 = vmul.f32 %v543_v60, %v9104_v40  ;;  %v550_v5 = vmul.f32 %v543_v60, %v9114_v44 }
  0x97   : > { %v545_v6 = vmul.f32 %v543_v60, %v9117_v45 }
  0x98   : > { %v589_v1 = vpop.permute.xlu1 %588  ;;  %v635_v13 = vpop.permute.xlu0 %634 }
  0x99   : > { %429 = vrot.lane.b32.xlu1 %v412_v47, %s8938_s21  ;;  %419 = vrot.lane.b32.xlu0 %v407_v48, %s8938_s21  ;;  %v592_v8 = vmul.f32 %v589_v1, %v9095_v32  ;;  %v593_v9 = vmul.f32 %v589_v1, %v9092_v31  ;;  %v594_v11 = vmul.f32 %v589_v1, %v9107_v41 }
  0x9a   : > { %v595_v12 = vmul.f32 %v589_v1, %v9104_v40  ;;  %v596_v14 = vmul.f32 %v589_v1, %v9114_v44  ;;  %v591_v15 = vmul.f32 %v589_v1, %v9117_v45  ;;  %v638_v17 = vmul.f32 %v635_v13, %v9095_v32 }
  0x9b   : > { %v639_v18 = vmul.f32 %v635_v13, %v9092_v31  ;;  %v640_v20 = vmul.f32 %v635_v13, %v9107_v41  ;;  %v641_v21 = vmul.f32 %v635_v13, %v9104_v40  ;;  %v642_v22 = vmul.f32 %v635_v13, %v9114_v44 }
  0x9c   : > { %v637_v23 = vmul.f32 %v635_v13, %v9117_v45 }
  0x9d   : > { %467 = vrot.lane.b32.xlu1 %v454_v49, %s8939_s22  ;;  %469 = vrot.lane.b32.xlu0 %v455_v50, %s8939_s22  ;;  %v681_v2 = vpop.permute.xlu1 %680  ;;  %v773_v37 = vpop.permute.xlu0 %772 }
  0x9e   : > { %v684_v25 = vmul.f32 %v681_v2, %v9095_v32  ;;  %v685_v26 = vmul.f32 %v681_v2, %v9092_v31  ;;  %v686_v29 = vmul.f32 %v681_v2, %v9107_v41  ;;  %v687_v33 = vmul.f32 %v681_v2, %v9104_v40 }
  0x9f   : > { %v688_v34 = vmul.f32 %v681_v2, %v9114_v44  ;;  %v683_v35 = vmul.f32 %v681_v2, %v9117_v45  ;;  %v777_v53 = vmul.f32 %v773_v37, %v9092_v31 }
  0xa1   : > { %471 = vrot.lane.b32.xlu1 %v456_v51, %s8939_s22  ;;  %473 = vrot.lane.b32.xlu0 %v457_v52, %s8939_s22  ;;  %v776_v52 = vmul.f32 %v773_v37, %v9095_v32 }
  0xa2   : > { %v727_v7 = vpop.permute.xlu1 %726  ;;  %v9195_v43 = vpop.permute.xlu0 %910 }
  0xa3   : > { %v730_v38 = vmul.f32 %v727_v7, %v9095_v32  ;;  %v731_v39 = vmul.f32 %v727_v7, %v9092_v31  ;;  %v732_v46 = vmul.f32 %v727_v7, %v9107_v41  ;;  %v733_v47 = vmul.f32 %v727_v7, %v9104_v40 }
  0xa4   : > { %v734_v48 = vmul.f32 %v727_v7, %v9114_v44  ;;  %v729_v49 = vmul.f32 %v727_v7, %v9117_v45 }
  0xa5   : > { %475 = vrot.lane.b32.xlu1 %v458_v54, %s8939_s22  ;;  %465 = vrot.lane.b32.xlu0 %v453_v55, %s8939_s22 }
  0xa7   : > { %v9159_v10 = vpop.permute.xlu1 %818  ;;  %v9203_v51 = vpop.permute.xlu0 %1048 }
  0xa8   : > { %v824_v2 = vmul.f32 %v9159_v10, %v9107_v41  ;;  %v821_v7 = vmul.f32 %v9159_v10, %v9117_v45 }
  0xa9   : > { %513 = vrot.lane.b32.xlu1 %v500_v56, %s8940_s23  ;;  %515 = vrot.lane.b32.xlu0 %v501_v57, %s8940_s23  ;;  %v778_v56 = vmul.f32 %v773_v37, %v9107_v41  ;;  %v779_v57 = vmul.f32 %v773_v37, %v9104_v40 }
  0xac   : > { %v9167_v16 = vpop.permute.xlu1 %864  ;;  %v9209_v55 = vpop.permute.xlu0 %1186 }
  0xad   : > { %517 = vrot.lane.b32.xlu1 %v502_v58, %s8940_s23  ;;  %519 = vrot.lane.b32.xlu0 %v503_v59, %s8940_s23  ;;  %v780_v58 = vmul.f32 %v773_v37, %v9114_v44  ;;  %v775_v59 = vmul.f32 %v773_v37, %v9117_v45 }
  0xb1   : > { %521 = vrot.lane.b32.xlu1 %v504_v61, %s8940_s23  ;;  %511 = vrot.lane.b32.xlu0 %v499_v62, %s8940_s23  ;;  %v9173_v19 = vpop.permute.xlu1 %956  ;;  %v9217_v61 = vpop.permute.xlu0 %1334  ;;  %v822_v62 = vmul.f32 %v9159_v10, %v9095_v32  ;;  %s8956_s23 = smov 40  }
  0xb5   : > { %559 = vrot.lane.b32.xlu1 %v546_v63, %s8941_s24  ;;  %561 = vrot.lane.b32.xlu0 %v547_v0, %s8941_s24  ;;  %v823_v63 = vmul.f32 %v9159_v10, %v9092_v31 }
  0xb6   : > { %v9179_v24 = vpop.permute.xlu1 %1002  ;;  %v9227_v1 = vpop.permute.xlu0 %1487 }
  0xb9   : > { %563 = vrot.lane.b32.xlu1 %v548_v3, %s8941_s24  ;;  %565 = vrot.lane.b32.xlu0 %v549_v4, %s8941_s24  ;;  %v825_v3 = vmul.f32 %v9159_v10, %v9104_v40 }
  0xbb   : > { %v9183_v28 = vpop.permute.xlu1 %1094 }
  0xbd   : > { %567 = vrot.lane.b32.xlu1 %v550_v5, %s8941_s24  ;;  %557 = vrot.lane.b32.xlu0 %v545_v6, %s8941_s24  ;;  %v826_v6 = vmul.f32 %v9159_v10, %v9114_v44 }
  0xc0   : > { %v9189_v36 = vpop.permute.xlu1 %1140 }
  0xc1   : > { %605 = vrot.lane.b32.xlu1 %v592_v8, %s8942_s25  ;;  %607 = vrot.lane.b32.xlu0 %v593_v9, %s8942_s25 }
  0xc5   : > { %609 = vrot.lane.b32.xlu1 %v594_v11, %s8942_s25  ;;  %611 = vrot.lane.b32.xlu0 %v595_v12, %s8942_s25  ;;  %v9193_v42 = vpop.permute.xlu1 %1232  ;;  %v868_v11 = vmul.f32 %v9167_v16, %v9095_v32  ;;  %v869_v12 = vmul.f32 %v9167_v16, %v9092_v31 }
  0xc9   : > { %613 = vrot.lane.b32.xlu1 %v596_v14, %s8942_s25  ;;  %603 = vrot.lane.b32.xlu0 %v591_v15, %s8942_s25  ;;  %v870_v14 = vmul.f32 %v9167_v16, %v9107_v41  ;;  %v871_v15 = vmul.f32 %v9167_v16, %v9104_v40 }
  0xca   : > { %v9201_v50 = vpop.permute.xlu1 %1278 }
  0xcd   : > { %651 = vrot.lane.b32.xlu1 %v638_v17, %s8943_s26  ;;  %653 = vrot.lane.b32.xlu0 %v639_v18, %s8943_s26 }
  0xcf   : > { %v9207_v54 = vpop.permute.xlu1 %1385 }
  0xd1   : > { %655 = vrot.lane.b32.xlu1 %v640_v20, %s8943_s26  ;;  %657 = vrot.lane.b32.xlu0 %v641_v21, %s8943_s26  ;;  %v872_v20 = vmul.f32 %v9167_v16, %v9114_v44  ;;  %v867_v21 = vmul.f32 %v9167_v16, %v9117_v45 }
  0xd4   : > { %v9215_v60 = vpop.permute.xlu1 %1436 }
  0xd5   : > { %659 = vrot.lane.b32.xlu1 %v642_v22, %s8943_s26  ;;  %649 = vrot.lane.b32.xlu0 %v637_v23, %s8943_s26  ;;  %s8957_s26 = smov 16  }
  0xd9   : > { %697 = vrot.lane.b32.xlu1 %v684_v25, %s8944_s27  ;;  %699 = vrot.lane.b32.xlu0 %v685_v26, %s8944_s27  ;;  %v9225_v0 = vpop.permute.xlu1 %357  ;;  %v914_v25 = vmul.f32 %v9195_v43, %v9095_v32  ;;  %v915_v26 = vmul.f32 %v9195_v43, %v9092_v31 }
  0xdd   : > { %701 = vrot.lane.b32.xlu1 %v686_v29, %s8944_s27  ;;  %703 = vrot.lane.b32.xlu0 %v687_v33, %s8944_s27  ;;  %v916_v33 = vmul.f32 %v9195_v43, %v9107_v41 }
  0xe1   : > { %705 = vrot.lane.b32.xlu1 %v688_v34, %s8944_s27  ;;  %695 = vrot.lane.b32.xlu0 %v683_v35, %s8944_s27  ;;  %v917_v34 = vmul.f32 %v9195_v43, %v9104_v40  ;;  %s8958_s27 = smov 15  }
  0xe5   : > { %743 = vrot.lane.b32.xlu1 %v730_v38, %s8945_s28  ;;  %745 = vrot.lane.b32.xlu0 %v731_v39, %s8945_s28  ;;  %v918_v38 = vmul.f32 %v9195_v43, %v9114_v44  ;;  %v913_v39 = vmul.f32 %v9195_v43, %v9117_v45 }
  0xe9   : > { %747 = vrot.lane.b32.xlu1 %v732_v46, %s8945_s28  ;;  %749 = vrot.lane.b32.xlu0 %v733_v47, %s8945_s28 }
  0xed   : > { %751 = vrot.lane.b32.xlu1 %v734_v48, %s8945_s28  ;;  %741 = vrot.lane.b32.xlu0 %v729_v49, %s8945_s28  ;;  %v960_v48 = vmul.f32 %v9173_v19, %v9095_v32  ;;  %v961_v49 = vmul.f32 %v9173_v19, %v9092_v31  ;;  %s8959_s28 = smov 14  }
  0xf1   : > { %789 = vrot.lane.b32.xlu1 %v776_v52, %s8946_s29  ;;  %791 = vrot.lane.b32.xlu0 %v777_v53, %s8946_s29  ;;  %v962_v53 = vmul.f32 %v9173_v19, %v9107_v41 }
  0xf5   : > { %793 = vrot.lane.b32.xlu1 %v778_v56, %s8946_s29  ;;  %795 = vrot.lane.b32.xlu0 %v779_v57, %s8946_s29  ;;  %v963_v56 = vmul.f32 %v9173_v19, %v9104_v40 }
  0xf9   : > { %797 = vrot.lane.b32.xlu1 %v780_v58, %s8946_s29  ;;  %787 = vrot.lane.b32.xlu0 %v775_v59, %s8946_s29  ;;  %v964_v59 = vmul.f32 %v9173_v19, %v9114_v44 }
  0xfd   : > { %835 = vrot.lane.b32.xlu1 %v822_v62, %s8947_s30  ;;  %837 = vrot.lane.b32.xlu0 %v823_v63, %s8947_s30  ;;  %v959_v62 = vmul.f32 %v9173_v19, %v9117_v45 }
 0x101   : > { %839 = vrot.lane.b32.xlu1 %v824_v2, %s8947_s30  ;;  %841 = vrot.lane.b32.xlu0 %v825_v3, %s8947_s30  ;;  %v1006_v3 = vmul.f32 %v9179_v24, %v9095_v32 }
 0x103   : > { %v9235_v4 = vpop.permute.xlu0 %423  ;;  %v9237_v5 = vpop.permute.xlu1 %421 }
 0x105   : > { %843 = vrot.lane.b32.xlu1 %v826_v6, %s8947_s30  ;;  %833 = vrot.lane.b32.xlu0 %v821_v7, %s8947_s30  ;;  %v1007_v6 = vmul.f32 %v9179_v24, %v9092_v31 }
 0x107   : > { %v9245_v8 = vpop.permute.xlu0 %427  ;;  %v9247_v9 = vpop.permute.xlu1 %425 }
 0x109   : > { %881 = vrot.lane.b32.xlu1 %v868_v11, %s8948_s11  ;;  %883 = vrot.lane.b32.xlu0 %v869_v12, %s8948_s11  ;;  %v1008_v11 = vmul.f32 %v9179_v24, %v9107_v41  ;;  %v1009_v12 = vmul.f32 %v9179_v24, %v9104_v40 }
 0x10b   : > { %v9253_v13 = vpop.permute.xlu1 %429  ;;  %v9255_v10 = vpop.permute.xlu0 %419 }
 0x10d   : > { %885 = vrot.lane.b32.xlu1 %v870_v14, %s8948_s11  ;;  %887 = vrot.lane.b32.xlu0 %v871_v15, %s8948_s11 }
 0x10f   : > { %v9261_v17 = vpop.permute.xlu1 %467  ;;  %v9263_v18 = vpop.permute.xlu0 %469 }
 0x111   : > { %889 = vrot.lane.b32.xlu1 %v872_v20, %s8948_s11  ;;  %879 = vrot.lane.b32.xlu0 %v867_v21, %s8948_s11  ;;  %v1010_v20 = vmul.f32 %v9179_v24, %v9114_v44  ;;  %v1005_v21 = vmul.f32 %v9179_v24, %v9117_v45  ;;  %s8970_s11 = smov 86  }
 0x113   : > { %v9269_v22 = vpop.permute.xlu1 %471  ;;  %v9271_v23 = vpop.permute.xlu0 %473 }
 0x115   : > { %927 = vrot.lane.b32.xlu1 %v914_v25, %s8949_s12  ;;  %929 = vrot.lane.b32.xlu0 %v915_v26, %s8949_s12 }
 0x117   : > { %v9279_v29 = vpop.permute.xlu1 %475  ;;  %v9281_v16 = vpop.permute.xlu0 %465 }
 0x119   : > { %931 = vrot.lane.b32.xlu1 %v916_v33, %s8949_s12  ;;  %933 = vrot.lane.b32.xlu0 %v917_v34, %s8949_s12  ;;  %v1052_v33 = vmul.f32 %v9203_v51, %v9095_v32  ;;  %v1053_v34 = vmul.f32 %v9203_v51, %v9092_v31 }
 0x11b   : > { %v9289_v35 = vpop.permute.xlu1 %513  ;;  %v9291_v37 = vpop.permute.xlu0 %515 }
 0x11d   : > { %935 = vrot.lane.b32.xlu1 %v918_v38, %s8949_s12  ;;  %925 = vrot.lane.b32.xlu0 %v913_v39, %s8949_s12  ;;  %v1054_v39 = vmul.f32 %v9203_v51, %v9107_v41 }
 0x11f   : > { %v9299_v46 = vpop.permute.xlu1 %517  ;;  %v9301_v47 = vpop.permute.xlu0 %519 }
 0x121   : > { %973 = vrot.lane.b32.xlu1 %v960_v48, %s8950_s15  ;;  %975 = vrot.lane.b32.xlu0 %v961_v49, %s8950_s15  ;;  %v1055_v48 = vmul.f32 %v9203_v51, %v9104_v40 }
 0x123   : > { %v9307_v52 = vpop.permute.xlu1 %521  ;;  %v9309_v43 = vpop.permute.xlu0 %511 }
 0x125   : > { %977 = vrot.lane.b32.xlu1 %v962_v53, %s8950_s15  ;;  %979 = vrot.lane.b32.xlu0 %v963_v56, %s8950_s15  ;;  %v1056_v56 = vmul.f32 %v9203_v51, %v9114_v44 }
 0x127   : > { %v9315_v57 = vpop.permute.xlu1 %559  ;;  %v9317_v58 = vpop.permute.xlu0 %561 }
 0x129   : > { %981 = vrot.lane.b32.xlu1 %v964_v59, %s8950_s15  ;;  %971 = vrot.lane.b32.xlu0 %v959_v62, %s8950_s15  ;;  %v1051_v59 = vmul.f32 %v9203_v51, %v9117_v45  ;;  %v1100_v51 = vmul.f32 %v9183_v28, %v9107_v41  ;;  %s8960_s15 = smov 13  }
 0x12b   : > { %v9323_v63 = vpop.permute.xlu1 %563  ;;  %v9325_v2 = vpop.permute.xlu0 %565 }
 0x12d   : > { %1019 = vrot.lane.b32.xlu1 %v1006_v3, %s8951_s16  ;;  %1021 = vrot.lane.b32.xlu0 %v1007_v6, %s8951_s16  ;;  %v1098_v6 = vmul.f32 %v9183_v28, %v9095_v32 }
 0x12f   : > { %v9333_v7 = vpop.permute.xlu1 %567  ;;  %v9335_v19 = vpop.permute.xlu0 %557 }
 0x131   : > { %1023 = vrot.lane.b32.xlu1 %v1008_v11, %s8951_s16  ;;  %1025 = vrot.lane.b32.xlu0 %v1009_v12, %s8951_s16  ;;  %v1099_v11 = vmul.f32 %v9183_v28, %v9092_v31 }
 0x133   : > { %v9343_v14 = vpop.permute.xlu1 %605  ;;  %v9345_v15 = vpop.permute.xlu0 %607 }
 0x135   : > { %1027 = vrot.lane.b32.xlu1 %v1010_v20, %s8951_s16  ;;  %1017 = vrot.lane.b32.xlu0 %v1005_v21, %s8951_s16  ;;  %v1101_v21 = vmul.f32 %v9183_v28, %v9104_v40 }
 0x137   : > { %v9353_v25 = vpop.permute.xlu1 %609  ;;  %v9355_v26 = vpop.permute.xlu0 %611 }
 0x139   : > { %1065 = vrot.lane.b32.xlu1 %v1052_v33, %s8952_s17  ;;  %1067 = vrot.lane.b32.xlu0 %v1053_v34, %s8952_s17 }
 0x13b   : > { %v9361_v38 = vpop.permute.xlu1 %613  ;;  %v9363_v24 = vpop.permute.xlu0 %603 }
 0x13d   : > { %1069 = vrot.lane.b32.xlu1 %v1054_v39, %s8952_s17  ;;  %1071 = vrot.lane.b32.xlu0 %v1055_v48, %s8952_s17  ;;  %v1102_v39 = vmul.f32 %v9183_v28, %v9114_v44  ;;  %v1097_v48 = vmul.f32 %v9183_v28, %v9117_v45  ;;  %v1146_v28 = vmul.f32 %v9189_v36, %v9107_v41 }
 0x13f   : > { %v9369_v49 = vpop.permute.xlu1 %651  ;;  %v9371_v53 = vpop.permute.xlu0 %653 }
 0x141   : > { %1073 = vrot.lane.b32.xlu1 %v1056_v56, %s8952_s17  ;;  %1063 = vrot.lane.b32.xlu0 %v1051_v59, %s8952_s17  ;;  %s8961_s17 = smov 12  }
 0x143   : > { %v9377_v62 = vpop.permute.xlu1 %655  ;;  %v9379_v3 = vpop.permute.xlu0 %657 }
 0x145   : > { %1111 = vrot.lane.b32.xlu1 %v1098_v6, %s8953_s18  ;;  %1113 = vrot.lane.b32.xlu0 %v1099_v11, %s8953_s18  ;;  %v1144_v6 = vmul.f32 %v9189_v36, %v9095_v32  ;;  %v1145_v11 = vmul.f32 %v9189_v36, %v9092_v31 }
 0x147   : > { %v9385_v12 = vpop.permute.xlu1 %659  ;;  %v9387_v20 = vpop.permute.xlu0 %649 }
 0x149   : > { %1115 = vrot.lane.b32.xlu1 %v1100_v51, %s8953_s18  ;;  %1117 = vrot.lane.b32.xlu0 %v1101_v21, %s8953_s18 }
 0x14b   : > { %v9393_v33 = vpop.permute.xlu1 %697  ;;  %v9395_v34 = vpop.permute.xlu0 %699 }
 0x14d   : > { %1119 = vrot.lane.b32.xlu1 %v1102_v39, %s8953_s18  ;;  %1109 = vrot.lane.b32.xlu0 %v1097_v48, %s8953_s18  ;;  %v1147_v39 = vmul.f32 %v9189_v36, %v9104_v40  ;;  %s8968_s18 = smov 8  }
 0x14f   : > { %v9401_v56 = vpop.permute.xlu1 %701  ;;  %v9403_v59 = vpop.permute.xlu0 %703 }
 0x150   : > { %11286 = vst [vmem:[#allocation2_spill] sm:$0xff] %v9403_v59 }
 0x151   : > { %1157 = vrot.lane.b32.xlu1 %v1144_v6, %s8954_s19  ;;  %1159 = vrot.lane.b32.xlu0 %v1145_v11, %s8954_s19  ;;  %v1148_v6 = vmul.f32 %v9189_v36, %v9114_v44  ;;  %v1143_v11 = vmul.f32 %v9189_v36, %v9117_v45  ;;  %v1192_v36 = vmul.f32 %v9209_v55, %v9107_v41 }
 0x153   : > { %v9409_v51 = vpop.permute.xlu1 %705  ;;  %v9411_v21 = vpop.permute.xlu0 %695 }
 0x154   : > { %11287 = vst [vmem:[#allocation3_spill] sm:$0xff] %v9409_v51  ;;  %11288 = vst [vmem:[#allocation4_spill] sm:$0xff] %v9411_v21 }
 0x155   : > { %1161 = vrot.lane.b32.xlu1 %v1146_v28, %s8954_s19  ;;  %1163 = vrot.lane.b32.xlu0 %v1147_v39, %s8954_s19  ;;  %v1190_v28 = vmul.f32 %v9209_v55, %v9095_v32  ;;  %v1191_v39 = vmul.f32 %v9209_v55, %v9092_v31 }
 0x157   : > { %v9417_v48 = vpop.permute.xlu1 %743  ;;  %v9419_v59 = vpop.permute.xlu0 %745 }
 0x158   : > { %11289 = vst [vmem:[#allocation5_spill] sm:$0xff] %v9417_v48  ;;  %11290 = vst [vmem:[#allocation6_spill] sm:$0xff] %v9419_v59 }
 0x159   : > { %1165 = vrot.lane.b32.xlu1 %v1148_v6, %s8954_s19  ;;  %1155 = vrot.lane.b32.xlu0 %v1143_v11, %s8954_s19  ;;  %v1193_v6 = vmul.f32 %v9209_v55, %v9104_v40 }
 0x15b   : > { %v9425_v21 = vpop.permute.xlu1 %747  ;;  %v9427_v51 = vpop.permute.xlu0 %749 }
 0x15c   : > { %11291 = vst [vmem:[#allocation7_spill] sm:$0xff] %v9427_v51 }
 0x15d   : > { %1203 = vrot.lane.b32.xlu1 %v1190_v28, %s8955_s20  ;;  %1205 = vrot.lane.b32.xlu0 %v1191_v39, %s8955_s20  ;;  %v1194_v28 = vmul.f32 %v9209_v55, %v9114_v44  ;;  %v1189_v39 = vmul.f32 %v9209_v55, %v9117_v45  ;;  %v1238_v55 = vmul.f32 %v9193_v42, %v9107_v41 }
 0x15f   : > { %v9433_v48 = vpop.permute.xlu1 %751  ;;  %v9435_v59 = vpop.permute.xlu0 %741 }
 0x160   : > { %11292 = vst [vmem:[#allocation8_spill] sm:$0xff] %v9433_v48  ;;  %11293 = vst [vmem:[#allocation9_spill] sm:$0xff] %v9435_v59 }
 0x161   : > { %1207 = vrot.lane.b32.xlu1 %v1192_v36, %s8955_s20  ;;  %1209 = vrot.lane.b32.xlu0 %v1193_v6, %s8955_s20  ;;  %v1236_v36 = vmul.f32 %v9193_v42, %v9095_v32  ;;  %v1237_v6 = vmul.f32 %v9193_v42, %v9092_v31 }
 0x163   : > { %v9441_v11 = vpop.permute.xlu1 %789  ;;  %v9443_v51 = vpop.permute.xlu0 %791 }
 0x164   : > { %11294 = vst [vmem:[#allocation10_spill] sm:$0xff] %v9441_v11  ;;  %11295 = vst [vmem:[#allocation11_spill] sm:$0xff] %v9443_v51 }
 0x165   : > { %1211 = vrot.lane.b32.xlu1 %v1194_v28, %s8955_s20  ;;  %1201 = vrot.lane.b32.xlu0 %v1189_v39, %s8955_s20  ;;  %v1239_v28 = vmul.f32 %v9193_v42, %v9104_v40  ;;  %s8972_s20 = smov 82  }
 0x167   : > { %v9449_v59 = vpop.permute.xlu1 %793  ;;  %v9451_v48 = vpop.permute.xlu0 %795 }
 0x168   : > { %11296 = vst [vmem:[#allocation12_spill] sm:$0xff] %v9451_v48 }
 0x169   : > { %1249 = vrot.lane.b32.xlu1 %v1236_v36, %s8956_s23  ;;  %1251 = vrot.lane.b32.xlu0 %v1237_v6, %s8956_s23  ;;  %v1240_v36 = vmul.f32 %v9193_v42, %v9114_v44  ;;  %v1235_v6 = vmul.f32 %v9193_v42, %v9117_v45 }
 0x16b   : > { %v9457_v11 = vpop.permute.xlu1 %797  ;;  %v9459_v51 = vpop.permute.xlu0 %787 }
 0x16c   : > { %11297 = vst [vmem:[#allocation13_spill] sm:$0xff] %v9457_v11  ;;  %11298 = vst [vmem:[#allocation14_spill] sm:$0xff] %v9459_v51 }
 0x16d   : > { %1253 = vrot.lane.b32.xlu1 %v1238_v55, %s8956_s23  ;;  %1255 = vrot.lane.b32.xlu0 %v1239_v28, %s8956_s23  ;;  %v1287_v55 = vmul.f32 %v9201_v50, %v9095_v32  ;;  %v1288_v28 = vmul.f32 %v9201_v50, %v9092_v31 }
 0x16f   : > { %v9465_v39 = vpop.permute.xlu1 %835  ;;  %v9467_v48 = vpop.permute.xlu0 %837 }
 0x170   : > { %11299 = vst [vmem:[#allocation15_spill] sm:$0xff] %v9465_v39 }
 0x171   : > { %1257 = vrot.lane.b32.xlu1 %v1240_v36, %s8956_s23  ;;  %1247 = vrot.lane.b32.xlu0 %v1235_v6, %s8956_s23  ;;  %v1289_v36 = vmul.f32 %v9201_v50, %v9107_v41  ;;  %v1290_v6 = vmul.f32 %v9201_v50, %v9104_v40  ;;  %s8969_s23 = smov 88  }
 0x173   : > { %v9473_v51 = vpop.permute.xlu1 %839  ;;  %v9475_v11 = vpop.permute.xlu0 %841 }
 0x174   : > { %11300 = vst [vmem:[#allocation16_spill] sm:$0xff] %v9473_v51  ;;  %11301 = vst [vmem:[#allocation17_spill] sm:$0xff] %v9475_v11  ;;  %v1283_v11 = vsub.s32 6, %v9082_v27 }
 0x175   : > { %1302 = vrot.lane.b32.xlu1 %v1287_v55, %s8957_s26  ;;  %1304 = vrot.lane.b32.xlu0 %v1288_v28, %s8957_s26  ;;  %v1291_v28 = vmul.f32 %v9201_v50, %v9114_v44 }
 0x177   : > { %v9483_v39 = vpop.permute.xlu1 %843  ;;  %v9485_v42 = vpop.permute.xlu0 %833 }
 0x178   : > { %11302 = vst [vmem:[#allocation18_spill] sm:$0xff] %v9483_v39  ;;  %11303 = vst [vmem:[#allocation19_spill] sm:$0xff] %v9485_v42  ;;  %v1286_v42 = vmul.f32 %v9201_v50, %v9117_v45  ;;  %v9503_v39 = vrot.slane %v9089_v30, %v1283_v11 }
 0x179   : > { %1306 = vrot.lane.b32.xlu1 %v1289_v36, %s8957_s26  ;;  %1308 = vrot.lane.b32.xlu0 %v1290_v6, %s8957_s26 }
 0x17a   : > { %v1292_v6 = vmul.f32 %v9503_v39, %v9201_v50 }
 0x17b   : > { %v9494_v51 = vpop.permute.xlu1 %881  ;;  %v9496_v55 = vpop.permute.xlu0 %883 }
 0x17c   : > { %11304 = vst [vmem:[#allocation20_spill] sm:$0xff] %v9494_v51  ;;  %v1338_v51 = vmul.f32 %v9217_v61, %v9095_v32 }
 0x17d   : > { %1310 = vrot.lane.b32.xlu1 %v1291_v28, %s8957_s26  ;;  %1300 = vrot.lane.b32.xlu0 %v1286_v42, %s8957_s26  ;;  %v1339_v42 = vmul.f32 %v9217_v61, %v9092_v31  ;;  %v1340_v28 = vmul.f32 %v9217_v61, %v9107_v41 }
 0x17f   : > { %v9507_v27 = vpop.permute.xlu1 %885  ;;  %v9509_v36 = vpop.permute.xlu0 %887 }
 0x180   : > { %11305 = vst [vmem:[#allocation21_spill] sm:$0xff] %v9509_v36 }
 0x181   : > { %1312 = vrot.lane.b32.xlu1 %v1292_v6, %s8957_s26  ;;  %1353 = vrot.lane.b32.xlu0 %v1338_v51, %s8958_s27  ;;  %v1341_v6 = vmul.f32 %v9217_v61, %v9104_v40  ;;  %v1342_v51 = vmul.f32 %v9217_v61, %v9114_v44 }
 0x183   : > { %v9516_v30 = vpop.permute.xlu1 %889  ;;  %v9518_v11 = vpop.permute.xlu0 %879 }
 0x184   : > { %11306 = vst [vmem:[#allocation22_spill] sm:$0xff] %v9516_v30  ;;  %11307 = vst [vmem:[#allocation23_spill] sm:$0xff] %v9518_v11 }
 0x185   : > { %1355 = vrot.lane.b32.xlu1 %v1339_v42, %s8958_s27  ;;  %1357 = vrot.lane.b32.xlu0 %v1340_v28, %s8958_s27  ;;  %v1337_v42 = vmul.f32 %v9217_v61, %v9117_v45  ;;  %v1343_v28 = vmul.f32 %v9217_v61, %v9503_v39 }
 0x187   : > { %v9524_v50 = vpop.permute.xlu1 %927  ;;  %v9526_v36 = vpop.permute.xlu0 %929 }
 0x188   : > { %11308 = vst [vmem:[#allocation24_spill] sm:$0xff] %v9524_v50  ;;  %11309 = vst [vmem:[#allocation25_spill] sm:$0xff] %v9526_v36 }
 0x189   : > { %1359 = vrot.lane.b32.xlu1 %v1341_v6, %s8958_s27  ;;  %1361 = vrot.lane.b32.xlu0 %v1342_v51, %s8958_s27  ;;  %v1389_v6 = vmul.f32 %v9207_v54, %v9095_v32  ;;  %v1390_v51 = vmul.f32 %v9207_v54, %v9092_v31 }
 0x18b   : > { %v9532_v11 = vpop.permute.xlu1 %931  ;;  %v9534_v30 = vpop.permute.xlu0 %933 }
 0x18c   : > { %11310 = vst [vmem:[#allocation26_spill] sm:$0xff] %v9534_v30 }
 0x18d   : > { %1351 = vrot.lane.b32.xlu1 %v1337_v42, %s8958_s27  ;;  %1363 = vrot.lane.b32.xlu0 %v1343_v28, %s8958_s27  ;;  %v1391_v42 = vmul.f32 %v9207_v54, %v9107_v41  ;;  %v1392_v28 = vmul.f32 %v9207_v54, %v9104_v40  ;;  %s8973_s27 = smov 80  }
 0x18f   : > { %v9540_v50 = vpop.permute.xlu1 %935  ;;  %v9542_v36 = vpop.permute.xlu0 %925 }
 0x190   : > { %11311 = vst [vmem:[#allocation27_spill] sm:$0xff] %v9540_v50  ;;  %11312 = vst [vmem:[#allocation28_spill] sm:$0xff] %v9542_v36 }
 0x191   : > { %1404 = vrot.lane.b32.xlu1 %v1389_v6, %s8959_s28  ;;  %1406 = vrot.lane.b32.xlu0 %v1390_v51, %s8959_s28  ;;  %v1537_v6 = vld [vmem:[%s11219_s2] sm:$0xff] }
 0x193   : > { %v9550_v30 = vpop.permute.xlu1 %973  ;;  %v9552_v61 = vpop.permute.xlu0 %975 }
 0x194   : > { %11313 = vst [vmem:[#allocation29_spill] sm:$0xff] %v9550_v30  ;;  %11314 = vst [vmem:[#allocation30_spill] sm:$0xff] %v9552_v61  ;;  %v1393_v30 = vmul.f32 %v9207_v54, %v9114_v44 }
 0x195   : > { %1408 = vrot.lane.b32.xlu1 %v1391_v42, %s8959_s28  ;;  %1410 = vrot.lane.b32.xlu0 %v1392_v28, %s8959_s28  ;;  %v1388_v42 = vmul.f32 %v9207_v54, %v9117_v45  ;;  %v1440_v28 = vmul.f32 %v9215_v60, %v9095_v32 }
 0x197   : > { %v9563_v36 = vpop.permute.xlu1 %977  ;;  %v9565_v51 = vpop.permute.xlu0 %979 }
 0x198   : > { %11315 = vst [vmem:[#allocation31_spill] sm:$0xff] %v9563_v36  ;;  %11316 = vst [vmem:[#allocation32_spill] sm:$0xff] %v9565_v51 }
 0x199   : > { %1412 = vrot.lane.b32.xlu1 %v1393_v30, %s8959_s28  ;;  %1540 = vperm.xlu0 %8884, %v1537_v6   ;;  %v1394_v30 = vmul.f32 %v9207_v54, %v9503_v39  ;;  %v1442_v6 = vmul.f32 %v9215_v60, %v9107_v41 }
 0x19b   : > { %v9570_v61 = vpop.permute.xlu1 %981  ;;  %v9572_v50 = vpop.permute.xlu0 %971 }
 0x19c   : > { %11317 = vst [vmem:[#allocation33_spill] sm:$0xff] %v9570_v61  ;;  %11318 = vst [vmem:[#allocation34_spill] sm:$0xff] %v9572_v50 }
 0x19d   : > { %1402 = vrot.lane.b32.xlu1 %v1388_v42, %s8959_s28  ;;  %1455 = vrot.lane.b32.xlu0 %v1440_v28, %s8960_s15  ;;  %v1441_v42 = vmul.f32 %v9215_v60, %v9092_v31  ;;  %v1444_v28 = vmul.f32 %v9215_v60, %v9114_v44 }
 0x19f   : > { %v9579_v51 = vpop.permute.xlu1 %1019  ;;  %v9581_v36 = vpop.permute.xlu0 %1021 }
 0x1a0   : > { %11319 = vst [vmem:[#allocation35_spill] sm:$0xff] %v9579_v51  ;;  %11320 = vst [vmem:[#allocation36_spill] sm:$0xff] %v9581_v36 }
 0x1a1   : > { %1414 = vrot.lane.b32.xlu1 %v1394_v30, %s8959_s28  ;;  %1459 = vrot.lane.b32.xlu0 %v1442_v6, %s8960_s15  ;;  %v1443_v30 = vmul.f32 %v9215_v60, %v9104_v40  ;;  %v1445_v6 = vmul.f32 %v9215_v60, %v9503_v39 }
 0x1a3   : > { %v9588_v50 = vpop.permute.xlu1 %1023  ;;  %v9590_v61 = vpop.permute.xlu0 %1025 }
 0x1a4   : > { %11321 = vst [vmem:[#allocation37_spill] sm:$0xff] %v9588_v50  ;;  %11322 = vst [vmem:[#allocation38_spill] sm:$0xff] %v9590_v61 }
 0x1a5   : > { %1457 = vrot.lane.b32.xlu1 %v1441_v42, %s8960_s15  ;;  %1463 = vrot.lane.b32.xlu0 %v1444_v28, %s8960_s15  ;;  %v1439_v42 = vmul.f32 %v9215_v60, %v9117_v45  ;;  %v1492_v28 = vmul.f32 %v9227_v1, %v9092_v31 }
 0x1a7   : > { %v9596_v51 = vpop.permute.xlu1 %1027  ;;  %v9598_v54 = vpop.permute.xlu0 %1017 }
 0x1a8   : > { %11323 = vst [vmem:[#allocation39_spill] sm:$0xff] %v9596_v51  ;;  %11324 = vst [vmem:[#allocation40_spill] sm:$0xff] %v9598_v54 }
 0x1a9   : > { %1461 = vrot.lane.b32.xlu1 %v1443_v30, %s8960_s15  ;;  %1465 = vrot.lane.b32.xlu0 %v1445_v6, %s8960_s15  ;;  %v1491_v30 = vmul.f32 %v9227_v1, %v9095_v32  ;;  %v1494_v6 = vmul.f32 %v9227_v1, %v9104_v40 }
 0x1ab   : > { %v9604_v61 = vpop.permute.xlu1 %1065  ;;  %v9606_v50 = vpop.permute.xlu0 %1067 }
 0x1ac   : > { %11325 = vst [vmem:[#allocation41_spill] sm:$0xff] %v9604_v61  ;;  %11326 = vst [vmem:[#allocation42_spill] sm:$0xff] %v9606_v50 }
 0x1ad   : > { %1453 = vrot.lane.b32.xlu1 %v1439_v42, %s8960_s15  ;;  %1508 = vrot.lane.b32.xlu0 %v1492_v28, %s8961_s17  ;;  %v1493_v28 = vmul.f32 %v9227_v1, %v9107_v41  ;;  %s8977_s15 = smov 26  }
 0x1af   : > { %v9613_v54 = vpop.permute.xlu1 %1069  ;;  %v9615_v51 = vpop.permute.xlu0 %1071 }
 0x1b0   : > { %11327 = vst [vmem:[#allocation43_spill] sm:$0xff] %v9613_v54  ;;  %11328 = vst [vmem:[#allocation44_spill] sm:$0xff] %v9615_v51  ;;  %v1490_v51 = vmul.f32 %v9227_v1, %v9117_v45 }
 0x1b1   : > { %1506 = vrot.lane.b32.xlu1 %v1491_v30, %s8961_s17  ;;  %1512 = vrot.lane.b32.xlu0 %v1494_v6, %s8961_s17  ;;  %v1495_v30 = vmul.f32 %v9227_v1, %v9114_v44 }
 0x1b3   : > { %v9623_v60 = vpop.permute.xlu1 %1073  ;;  %v9625_v42 = vpop.permute.xlu0 %1063 }
 0x1b4   : > { %11329 = vst [vmem:[#allocation45_spill] sm:$0xff] %v9623_v60  ;;  %11330 = vst [vmem:[#allocation46_spill] sm:$0xff] %v9625_v42  ;;  %v1496_v60 = vmul.f32 %v9227_v1, %v9503_v39 }
 0x1b5   : > { %1510 = vrot.lane.b32.xlu1 %v1493_v28, %s8961_s17  ;;  %1504 = vrot.lane.b32.xlu0 %v1490_v51, %s8961_s17 }
 0x1b7   : > { %v9633_v54 = vpop.permute.xlu1 %1111  ;;  %v9635_v61 = vpop.permute.xlu0 %1113 }
 0x1b8   : > { %11331 = vst [vmem:[#allocation47_spill] sm:$0xff] %v9633_v54  ;;  %11332 = vst [vmem:[#allocation48_spill] sm:$0xff] %v9635_v61 }
 0x1b9   : > { %1514 = vrot.lane.b32.xlu1 %v1495_v30, %s8961_s17 }
 0x1bb   : > { %v9640_v6 = vpop.permute.xlu1 %1115  ;;  %v9642_v42 = vpop.permute.xlu0 %1117 }
 0x1bc   : > { %11333 = vst [vmem:[#allocation49_spill] sm:$0xff] %v9640_v6  ;;  %11334 = vst [vmem:[#allocation50_spill] sm:$0xff] %v9642_v42 }
 0x1bd   : > { %1516 = vrot.lane.b32.xlu1 %v1496_v60, %s8961_s17 }
 0x1bf   : > { %v9647_v28 = vpop.permute.xlu1 %1119  ;;  %v9649_v51 = vpop.permute.xlu0 %1109 }
 0x1c0   : > { %11335 = vst [vmem:[#allocation51_spill] sm:$0xff] %v9649_v51 }
 0x1c3   : > { %v9651_v54 = vpop.permute.xlu1 %1157  ;;  %v9653_v61 = vpop.permute.xlu0 %1159 }
 0x1c4   : > { %11336 = vst [vmem:[#allocation52_spill] sm:$0xff] %v9651_v54  ;;  %11337 = vst [vmem:[#allocation53_spill] sm:$0xff] %v9653_v61 }
 0x1c7   : > { %v9655_v50 = vpop.permute.xlu1 %1161  ;;  %v9657_v30 = vpop.permute.xlu0 %1163 }
 0x1c8   : > { %11338 = vst [vmem:[#allocation54_spill] sm:$0xff] %v9655_v50  ;;  %11339 = vst [vmem:[#allocation55_spill] sm:$0xff] %v9657_v30 }
 0x1cb   : > { %v9659_v6 = vpop.permute.xlu1 %1165  ;;  %v9661_v42 = vpop.permute.xlu0 %1155 }
 0x1cc   : > { %11340 = vst [vmem:[#allocation56_spill] sm:$0xff] %v9659_v6  ;;  %11341 = vst [vmem:[#allocation57_spill] sm:$0xff] %v9661_v42 }
 0x1cf   : > { %v9663_v36 = vpop.permute.xlu1 %1203  ;;  %v9665_v1 = vpop.permute.xlu0 %1205 }
 0x1d0   : > { %11342 = vst [vmem:[#allocation58_spill] sm:$0xff] %v9663_v36  ;;  %11343 = vst [vmem:[#allocation59_spill] sm:$0xff] %v9665_v1 }
 0x1d3   : > { %v9667_v39 = vpop.permute.xlu1 %1207  ;;  %v9669_v60 = vpop.permute.xlu0 %1209 }
 0x1d4   : > { %11344 = vst [vmem:[#allocation60_spill] sm:$0xff] %v9667_v39 }
 0x1d7   : > { %v9671_v51 = vpop.permute.xlu1 %1211  ;;  %v9673_v54 = vpop.permute.xlu0 %1201 }
 0x1d8   : > { %11345 = vst [vmem:[#allocation61_spill] sm:$0xff] %v9671_v51  ;;  %11346 = vst [vmem:[#allocation62_spill] sm:$0xff] %v9673_v54 }
 0x1db   : > { %v9675_v61 = vpop.permute.xlu1 %1249  ;;  %v9677_v50 = vpop.permute.xlu0 %1251 }
 0x1dc   : > { %11347 = vst [vmem:[#allocation63_spill] sm:$0xff] %v9675_v61  ;;  %11348 = vst [vmem:[#allocation64_spill] sm:$0xff] %v9677_v50  ;;  %v392_v61 = vmul.f32 %v9095_v32, %v9225_v0  ;;  %v435_v32 = vsel %vm431_vm0, %v9247_v9, %v9245_v8 }
 0x1df   : > { %v9679_v30 = vpop.permute.xlu1 %1253  ;;  %v9681_v6 = vpop.permute.xlu0 %1255 }
 0x1e0   : > { %11349 = vst [vmem:[#allocation65_spill] sm:$0xff] %v9679_v30  ;;  %11350 = vst [vmem:[#allocation66_spill] sm:$0xff] %v9681_v6  ;;  %v433_v6 = vsel %vm431_vm0, %v9237_v5, %v9235_v4 }
 0x1e3   : > { %v9683_v42 = vpop.permute.xlu1 %1257  ;;  %v9685_v36 = vpop.permute.xlu0 %1247 }
 0x1e4   : > { %11351 = vst [vmem:[#allocation67_spill] sm:$0xff] %v9683_v42  ;;  %11352 = vst [vmem:[#allocation68_spill] sm:$0xff] %v9685_v36  ;;  %v396_v36 = vmul.f32 %v9114_v44, %v9225_v0  ;;  %v480_v44 = vsel %vm477_vm1, %v9263_v18, %v9269_v22 }
 0x1e7   : > { %v9687_v1 = vpop.permute.xlu1 %1302  ;;  %v9689_v39 = vpop.permute.xlu0 %1304 }
 0x1e8   : > { %11353 = vst [vmem:[#allocation69_spill] sm:$0xff] %v9687_v1  ;;  %11354 = vst [vmem:[#allocation70_spill] sm:$0xff] %v9689_v39  ;;  %v393_v1 = vmul.f32 %v9092_v31, %v9225_v0  ;;  %v394_v39 = vmul.f32 %v9107_v41, %v9225_v0  ;;  %v436_v31 = vsel %vm431_vm0, %v9245_v8, %v9253_v13 }
 0x1e9   : > { %v432_v41 = vsel %vm431_vm0, %v9255_v10, %v9237_v5  ;;  %v448_v5 = vadd.f32 %v9253_v13, %v396_v36  ;;  %v481_v10 = vsel %vm477_vm1, %v9269_v22, %v9271_v23  ;;  %v525_v13 = vsel %vm523_vm2, %v9289_v35, %v9291_v37 }
 0x1ea   : > { %v446_v50 = vadd.f32 %v435_v32, %v394_v39  ;;  %v526_v22 = vsel %vm523_vm2, %v9291_v37, %v9299_v46  ;;  %v524_v37 = vsel %vm523_vm2, %v9309_v43, %v9289_v35  ;;  %v574_v43 = vsel %vm569_vm3, %v9325_v2, %v9333_v7 }
 0x1eb   : > { %v9691_v51 = vpop.permute.xlu1 %1306  ;;  %v9693_v54 = vpop.permute.xlu0 %1308 }
 0x1ec   : > { %11355 = vst [vmem:[#allocation71_spill] sm:$0xff] %v9691_v51  ;;  %11356 = vst [vmem:[#allocation72_spill] sm:$0xff] %v9693_v54  ;;  %v434_v54 = vsel %vm431_vm0, %v9235_v4, %v9247_v9  ;;  %v395_v51 = vmul.f32 %v9104_v40, %v9225_v0  ;;  %v444_v4 = vadd.f32 %v433_v6, %v392_v61 }
 0x1ed   : > { %v391_v9 = vmul.f32 %v9117_v45, %v9225_v0  ;;  %v479_v40 = vsel %vm477_vm1, %v9261_v17, %v9263_v18  ;;  %v445_v30 = vadd.f32 %v434_v54, %v393_v1  ;;  %v482_v61 = vsel %vm477_vm1, %v9271_v23, %v9279_v29 }
 0x1ee   : > { %v447_v45 = vadd.f32 %v436_v31, %v395_v51  ;;  %v478_v18 = vsel %vm477_vm1, %v9281_v16, %v9261_v17  ;;  %v490_v6 = vadd.f32 %v479_v40, %v444_v4  ;;  %v492_v54 = vadd.f32 %v481_v10, %v446_v50 }
 0x1ef   : > { %v9720_v42 = vpop.permute.xlu1 %1310  ;;  %v9730_v8 = vpop.permute.xlu0 %1300  ;;  %v443_v0 = vadd.f32 %v432_v41, %v391_v9  ;;  %v494_v23 = vadd.f32 %v9279_v29, %v448_v5  ;;  %v527_v17 = vsel %vm523_vm2, %v9299_v46, %v9301_v47  ;;  %v528_v16 = vsel %vm523_vm2, %v9301_v47, %v9307_v52 }
 0x1f0   : > { %11357 = vst [vmem:[#allocation73_spill] sm:$0xff] %v9730_v8  ;;  %v491_v8 = vadd.f32 %v480_v44, %v445_v30  ;;  %v493_v51 = vadd.f32 %v482_v61, %v447_v45  ;;  %v571_v50 = vsel %vm569_vm3, %v9315_v57, %v9317_v58  ;;  %v536_v29 = vadd.f32 %v525_v13, %v490_v6 }
 0x1f1   : > { %v489_v30 = vadd.f32 %v478_v18, %v443_v0  ;;  %v572_v46 = vsel %vm569_vm3, %v9317_v58, %v9323_v63  ;;  %v573_v47 = vsel %vm569_vm3, %v9323_v63, %v9325_v2  ;;  %v538_v32 = vadd.f32 %v527_v17, %v492_v54 }
 0x1f2   : > { %v537_v1 = vadd.f32 %v526_v22, %v491_v8  ;;  %v539_v31 = vadd.f32 %v528_v16, %v493_v51  ;;  %v540_v35 = vadd.f32 %v9307_v52, %v494_v23  ;;  %v582_v9 = vadd.f32 %v571_v50, %v536_v29  ;;  %v11358_v16 = vld [vmem:[#allocation2_spill] sm:$0xff]  ;;  %v11359_v51 = vld [vmem:[#allocation3_spill] sm:$0xff]  ;;  %v11360_v50 = vld [vmem:[#allocation4_spill] sm:$0xff] }
 0x1f3   : > { %v9748_v36 = vpop.permute.xlu1 %1312  ;;  %v9769_v39 = vpop.permute.xlu0 %1353  ;;  %v535_v4 = vadd.f32 %v524_v37, %v489_v30  ;;  %v570_v58 = vsel %vm569_vm3, %v9335_v19, %v9315_v57  ;;  %v617_v63 = vsel %vm615_vm4, %v9343_v14, %v9345_v15  ;;  %v584_v44 = vadd.f32 %v573_v47, %v538_v32  ;;  %v11361_v29 = vld [vmem:[#allocation6_spill] sm:$0xff]  ;;  %v11363_v32 = vld [vmem:[#allocation7_spill] sm:$0xff] }
 0x1f4   : > { %v583_v40 = vadd.f32 %v572_v46, %v537_v1  ;;  %v618_v52 = vsel %vm615_vm4, %v9345_v15, %v9353_v25  ;;  %v619_v2 = vsel %vm615_vm4, %v9353_v25, %v9355_v26  ;;  %v585_v8 = vadd.f32 %v574_v43, %v539_v31  ;;  %v11362_v1 = vld [vmem:[#allocation5_spill] sm:$0xff] }
 0x1f5   : > { %v586_v5 = vadd.f32 %v9333_v7, %v540_v35  ;;  %v620_v57 = vsel %vm615_vm4, %v9355_v26, %v9361_v38  ;;  %v616_v19 = vsel %vm615_vm4, %v9363_v24, %v9343_v14  ;;  %v581_v10 = vadd.f32 %v570_v58, %v535_v4 }
 0x1f6   : > { %v628_v45 = vadd.f32 %v617_v63, %v582_v9  ;;  %v663_v15 = vsel %vm661_vm5, %v9369_v49, %v9371_v53  ;;  %v664_v25 = vsel %vm661_vm5, %v9371_v53, %v9377_v62  ;;  %v629_v0 = vadd.f32 %v618_v52, %v583_v40 }
 0x1f7   : > { %v9775_v41 = vpop.permute.xlu1 %1355  ;;  %v630_v61 = vadd.f32 %v619_v2, %v584_v44  ;;  %v632_v26 = vadd.f32 %v9361_v38, %v586_v5  ;;  %v665_v14 = vsel %vm661_vm5, %v9377_v62, %v9379_v3  ;;  %v9808_v24 = vpop.permute.xlu0 %1357  ;;  %v631_v18 = vadd.f32 %v620_v57, %v585_v8  ;;  %v11365_v44 = vld [vmem:[#allocation9_spill] sm:$0xff]  ;;  %v11366_v2 = vld [vmem:[#allocation11_spill] sm:$0xff]  ;;  %v11367_v8 = vld [vmem:[#allocation10_spill] sm:$0xff] }
 0x1f8   : > { %v627_v6 = vadd.f32 %v616_v19, %v581_v10  ;;  %v666_v13 = vsel %vm661_vm5, %v9379_v3, %v9385_v12  ;;  %v662_v53 = vsel %vm661_vm5, %v9387_v20, %v9369_v49  ;;  %v674_v22 = vadd.f32 %v663_v15, %v628_v45  ;;  %v11368_v45 = vld [vmem:[#allocation12_spill] sm:$0xff] }
 0x1f9   : > { %v675_v54 = vadd.f32 %v664_v25, %v629_v0  ;;  %v709_v38 = vsel %vm707_vm6, %v9393_v33, %v9395_v34  ;;  %v710_v62 = vsel %vm707_vm6, %v9395_v34, %v9401_v56  ;;  %v676_v23 = vadd.f32 %v665_v14, %v630_v61  ;;  %v11369_v61 = vld [vmem:[#allocation13_spill] sm:$0xff]  ;;  %v11370_v14 = vld [vmem:[#allocation14_spill] sm:$0xff] }
 0x1fa   : > { %v678_v17 = vadd.f32 %v9385_v12, %v632_v26  ;;  %v711_v3 = vsel %vm707_vm6, %v9401_v56, %v11358_v16  ;;  %v712_v49 = vsel %vm707_vm6, %v11358_v16, %v11359_v51  ;;  %v677_v30 = vadd.f32 %v666_v13, %v631_v18 }
 0x1fb   : > { %v9802_v7 = vpop.permute.xlu1 %1359  ;;  %v673_v37 = vadd.f32 %v662_v53, %v627_v6  ;;  %v708_v34 = vsel %vm707_vm6, %v11360_v50, %v9393_v33  ;;  %v755_v12 = vsel %vm753_vm7, %v11362_v1, %v11361_v29  ;;  %v720_v46 = vadd.f32 %v709_v38, %v674_v22  ;;  %v11364_v33 = vld [vmem:[#allocation8_spill] sm:$0xff]  ;;  %v9847_v58 = vpop.permute.xlu0 %1361  ;;  %v11371_v53 = vld [vmem:[#allocation15_spill] sm:$0xff] }
 0x1fc   : > { %v721_v47 = vadd.f32 %v710_v62, %v675_v54  ;;  %v756_v56 = vsel %vm753_vm7, %v11361_v29, %v9425_v21  ;;  %v757_v31 = vsel %vm753_vm7, %v9425_v21, %v11363_v32  ;;  %v722_v35 = vadd.f32 %v711_v3, %v676_v23  ;;  %v11372_v54 = vld [vmem:[#allocation16_spill] sm:$0xff]  ;;  %v11375_v50 = vld [vmem:[#allocation19_spill] sm:$0xff] }
 0x1fd   : > { %v723_v43 = vadd.f32 %v712_v49, %v677_v30  ;;  %v724_v4 = vadd.f32 %v11359_v51, %v678_v17  ;;  %v758_v9 = vsel %vm753_vm7, %v11363_v32, %v11364_v33  ;;  %v719_v63 = vadd.f32 %v708_v34, %v673_v37  ;;  %v11373_v17 = vld [vmem:[#allocation17_spill] sm:$0xff]  ;;  %v11374_v30 = vld [vmem:[#allocation18_spill] sm:$0xff] }
 0x1fe   : > { %v766_v40 = vadd.f32 %v755_v12, %v720_v46  ;;  %v754_v52 = vsel %vm753_vm7, %v11365_v44, %v11362_v1  ;;  %v801_v21 = vsel %vm799_vm8, %v11367_v8, %v11366_v2  ;;  %v767_v57 = vadd.f32 %v756_v56, %v721_v47  ;;  %v11376_v12 = vld [vmem:[#allocation20_spill] sm:$0xff]  ;;  %v11380_v44 = vld [vmem:[#allocation25_spill] sm:$0xff] }
 0x1ff   : > { %v9829_v20 = vpop.permute.xlu1 %1351  ;;  %v768_v19 = vadd.f32 %v757_v31, %v722_v35  ;;  %v802_v10 = vsel %vm799_vm8, %v11366_v2, %v9449_v59  ;;  %v803_v15 = vsel %vm799_vm8, %v9449_v59, %v11368_v45  ;;  %v769_v25 = vadd.f32 %v758_v9, %v723_v43  ;;  %v9888_v34 = vpop.permute.xlu0 %1363  ;;  %v11377_v31 = vld [vmem:[#allocation21_spill] sm:$0xff]  ;;  %v11378_v43 = vld [vmem:[#allocation22_spill] sm:$0xff] }
 0x200   : > { %v770_v0 = vadd.f32 %v11364_v33, %v724_v4  ;;  %v804_v26 = vsel %vm799_vm8, %v11368_v45, %v11369_v61  ;;  %v800_v18 = vsel %vm799_vm8, %v11370_v14, %v11367_v8  ;;  %v765_v6 = vadd.f32 %v754_v52, %v719_v63  ;;  %v11379_v63 = vld [vmem:[#allocation23_spill] sm:$0xff]  ;;  %v11384_v14 = vld [vmem:[#allocation28_spill] sm:$0xff] }
 0x201   : > { %v812_v13 = vadd.f32 %v801_v21, %v766_v40  ;;  %v847_v22 = vsel %vm845_vm9, %v11371_v53, %v9467_v48  ;;  %v848_v59 = vsel %vm845_vm9, %v9467_v48, %v11372_v54  ;;  %v813_v38 = vadd.f32 %v802_v10, %v767_v57  ;;  %v11382_v57 = vld [vmem:[#allocation26_spill] sm:$0xff] }
 0x202   : > { %v814_v62 = vadd.f32 %v803_v15, %v768_v19  ;;  %v816_v23 = vadd.f32 %v11369_v61, %v770_v0  ;;  %v849_v16 = vsel %vm845_vm9, %v11372_v54, %v11373_v17  ;;  %v815_v51 = vadd.f32 %v804_v26, %v769_v25  ;;  %v11383_v25 = vld [vmem:[#allocation27_spill] sm:$0xff] }
 0x203   : > { %v9855_v5 = vpop.permute.xlu1 %1404  ;;  %v811_v49 = vadd.f32 %v800_v18, %v765_v6  ;;  %v850_v37 = vsel %vm845_vm9, %v11373_v17, %v11374_v30  ;;  %v846_v48 = vsel %vm845_vm9, %v11375_v50, %v11371_v53  ;;  %v858_v29 = vadd.f32 %v847_v22, %v812_v13  ;;  %v11385_v6 = vld [vmem:[#allocation30_spill] sm:$0xff]  ;;  %v11386_v13 = vld [vmem:[#allocation29_spill] sm:$0xff] }
 0x204   : > { %v859_v1 = vadd.f32 %v848_v59, %v813_v38  ;;  %v893_v46 = vsel %vm891_vm10, %v11376_v12, %v9496_v55  ;;  %v894_v47 = vsel %vm891_vm10, %v9496_v55, %v9507_v27  ;;  %v860_v56 = vadd.f32 %v849_v16, %v814_v62  ;;  %v11381_v55 = vld [vmem:[#allocation24_spill] sm:$0xff]  ;;  %v11387_v59 = vld [vmem:[#allocation31_spill] sm:$0xff] }
 0x205   : > { %v862_v32 = vadd.f32 %v11374_v30, %v816_v23  ;;  %v895_v35 = vsel %vm891_vm10, %v9507_v27, %v11377_v31  ;;  %v896_v4 = vsel %vm891_vm10, %v11377_v31, %v11378_v43  ;;  %v861_v33 = vadd.f32 %v850_v37, %v815_v51  ;;  %v11388_v62 = vld [vmem:[#allocation32_spill] sm:$0xff]  ;;  %v11390_v37 = vld [vmem:[#allocation34_spill] sm:$0xff] }
 0x206   : > { %v857_v9 = vadd.f32 %v846_v48, %v811_v49  ;;  %v892_v40 = vsel %vm891_vm10, %v11379_v63, %v11376_v12  ;;  %v939_v52 = vsel %vm937_vm11, %v11381_v55, %v11380_v44  ;;  %v904_v8 = vadd.f32 %v893_v46, %v858_v29  ;;  %v11389_v49 = vld [vmem:[#allocation33_spill] sm:$0xff]  ;;  %v11392_v12 = vld [vmem:[#allocation35_spill] sm:$0xff] }
 0x207   : > { %v9880_v3 = vpop.permute.xlu1 %1408  ;;  %v905_v21 = vadd.f32 %v894_v47, %v859_v1  ;;  %v940_v27 = vsel %vm937_vm11, %v11380_v44, %v9532_v11  ;;  %v941_v19 = vsel %vm937_vm11, %v9532_v11, %v11382_v57  ;;  %v906_v10 = vadd.f32 %v895_v35, %v860_v56  ;;  %v9927_v11 = vpop.permute.xlu0 %1406  ;;  %v11391_v1 = vld [vmem:[#allocation36_spill] sm:$0xff]  ;;  %v11393_v47 = vld [vmem:[#allocation37_spill] sm:$0xff]  ;;  %v11395_v63 = vld [vmem:[#allocation39_spill] sm:$0xff] }
 0x208   : > { %v907_v45 = vadd.f32 %v896_v4, %v861_v33  ;;  %v908_v15 = vadd.f32 %v11378_v43, %v862_v32  ;;  %v942_v0 = vsel %vm937_vm11, %v11382_v57, %v11383_v25  ;;  %v903_v61 = vadd.f32 %v892_v40, %v857_v9  ;;  %v11394_v43 = vld [vmem:[#allocation38_spill] sm:$0xff]  ;;  %v11396_v44 = vld [vmem:[#allocation40_spill] sm:$0xff]  ;;  %v11398_v57 = vld [vmem:[#allocation41_spill] sm:$0xff] }
 0x209   : > { %v950_v26 = vadd.f32 %v939_v52, %v904_v8  ;;  %v938_v18 = vsel %vm937_vm11, %v11384_v14, %v11381_v55  ;;  %v985_v53 = vsel %vm983_vm12, %v11386_v13, %v11385_v6  ;;  %vm1167_vm2 = vcmask 343040   ;;  %v11401_v14 = vld [vmem:[#allocation45_spill] sm:$0xff] }
 0x20a   : > { %v951_v22 = vadd.f32 %v940_v27, %v905_v21  ;;  %v952_v54 = vadd.f32 %v941_v19, %v906_v10  ;;  %v986_v38 = vsel %vm983_vm12, %v11385_v6, %v11387_v59  ;;  %v987_v23 = vsel %vm983_vm12, %v11387_v59, %v11388_v62  ;;  %v11397_v27 = vld [vmem:[#allocation42_spill] sm:$0xff]  ;;  %v11399_v10 = vld [vmem:[#allocation43_spill] sm:$0xff] }
 0x20b   : > { %v9909_v2 = vpop.permute.xlu1 %1412  ;;  %v953_v16 = vadd.f32 %v942_v0, %v907_v45  ;;  %v954_v51 = vadd.f32 %v11383_v25, %v908_v15  ;;  %v988_v30 = vsel %vm983_vm12, %v11388_v62, %v11389_v49  ;;  %v984_v50 = vsel %vm983_vm12, %v11390_v37, %v11386_v13  ;;  %v9968_v15 = vpop.permute.xlu0 %1410  ;;  %v11404_v59 = vld [vmem:[#allocation47_spill] sm:$0xff] }
 0x20c   : > { %v949_v48 = vadd.f32 %v938_v18, %v903_v61  ;;  %v996_v29 = vadd.f32 %v985_v53, %v950_v26  ;;  %v1031_v46 = vsel %vm1029_vm13, %v11392_v12, %v11391_v1  ;;  %v1032_v56 = vsel %vm1029_vm13, %v11391_v1, %v11393_v47  ;;  %v11400_v61 = vld [vmem:[#allocation44_spill] sm:$0xff]  ;;  %v11402_v53 = vld [vmem:[#allocation46_spill] sm:$0xff] }
 0x20d   : > { %vm1213_vm5 = vcmask 334848   ;;  %v997_v32 = vadd.f32 %v986_v38, %v951_v22  ;;  %v998_v31 = vadd.f32 %v987_v23, %v952_v54  ;;  %v1000_v35 = vadd.f32 %v11389_v49, %v954_v51  ;;  %v11403_v54 = vld [vmem:[#allocation48_spill] sm:$0xff]  ;;  %v11406_v49 = vld [vmem:[#allocation50_spill] sm:$0xff] }
 0x20e   : > { %v1033_v4 = vsel %vm1029_vm13, %v11393_v47, %v11394_v43  ;;  %v999_v33 = vadd.f32 %v988_v30, %v953_v16  ;;  %v995_v9 = vadd.f32 %v984_v50, %v949_v48  ;;  %v1034_v40 = vsel %vm1029_vm13, %v11394_v43, %v11395_v63  ;;  %v11405_v16 = vld [vmem:[#allocation49_spill] sm:$0xff] }
 0x20f   : > { %v9935_v17 = vpop.permute.xlu1 %1402  ;;  %v1030_v55 = vsel %vm1029_vm13, %v11396_v44, %v11392_v12  ;;  %v1042_v8 = vadd.f32 %v1031_v46, %v996_v29  ;;  %v1043_v21 = vadd.f32 %v1032_v56, %v997_v32  ;;  %v1077_v19 = vsel %vm1075_vm14, %v11398_v57, %v11397_v27  ;;  %v11407_v56 = vld [vmem:[#allocation51_spill] sm:$0xff] }
 0x210   : > { %v1078_v45 = vsel %vm1075_vm14, %v11397_v27, %v11399_v10  ;;  %vm1259_vm6 = vcmask 326656   ;;  %v1044_v25 = vadd.f32 %v1033_v4, %v998_v31  ;;  %v1046_v0 = vadd.f32 %v11395_v63, %v1000_v35  ;;  %v11408_v31 = vld [vmem:[#allocation53_spill] sm:$0xff]  ;;  %v11409_v35 = vld [vmem:[#allocation52_spill] sm:$0xff] }
 0x211   : > { %v1079_v26 = vsel %vm1075_vm14, %v11399_v10, %v11400_v61  ;;  %v1080_v18 = vsel %vm1075_vm14, %v11400_v61, %v11401_v14  ;;  %v1045_v6 = vadd.f32 %v1034_v40, %v999_v33  ;;  %v1041_v13 = vadd.f32 %v1030_v55, %v995_v9  ;;  %v11410_v9 = vld [vmem:[#allocation54_spill] sm:$0xff]  ;;  %v11411_v40 = vld [vmem:[#allocation55_spill] sm:$0xff] }
 0x212   : > { %v1076_v22 = vsel %vm1075_vm14, %v11402_v53, %v11398_v57  ;;  %v1123_v38 = vsel %vm1121_vm15, %v11404_v59, %v11403_v54  ;;  %vm1314_vm7 = vcmask 130048   ;;  %v1088_v62 = vadd.f32 %v1077_v19, %v1042_v8  ;;  %v11413_v57 = vld [vmem:[#allocation57_spill] sm:$0xff]  ;;  %v11415_v61 = vld [vmem:[#allocation58_spill] sm:$0xff] }
 0x213   : > { %v9960_v52 = vpop.permute.xlu1 %1414  ;;  %v1089_v23 = vadd.f32 %v1078_v45, %v1043_v21  ;;  %v1124_v51 = vsel %vm1121_vm15, %v11403_v54, %v11405_v16  ;;  %v1125_v30 = vsel %vm1121_vm15, %v11405_v16, %v11406_v49  ;;  %v1090_v50 = vadd.f32 %v1079_v26, %v1044_v25  ;;  %v11412_v21 = vld [vmem:[#allocation56_spill] sm:$0xff] }
 0x214   : > { %v1091_v48 = vadd.f32 %v1080_v18, %v1045_v6  ;;  %v1092_v29 = vadd.f32 %v11401_v14, %v1046_v0  ;;  %v1126_v1 = vsel %vm1121_vm15, %v11406_v49, %v9647_v28  ;;  %v1087_v46 = vadd.f32 %v1076_v22, %v1041_v13  ;;  %v11414_v0 = vld [vmem:[#allocation59_spill] sm:$0xff]  ;;  %v11416_v14 = vld [vmem:[#allocation60_spill] sm:$0xff]  ;;  %v11417_v22 = vld [vmem:[#allocation61_spill] sm:$0xff] }
 0x215   : > { %v1134_v47 = vadd.f32 %v1123_v38, %v1088_v62  ;;  %v1122_v32 = vsel %vm1121_vm15, %v11407_v56, %v11404_v59  ;;  %v1169_v43 = vsel %vm1167_vm2, %v11409_v35, %v11408_v31  ;;  %v1135_v4 = vadd.f32 %v1124_v51, %v1089_v23  ;;  %v11418_v23 = vld [vmem:[#allocation62_spill] sm:$0xff] }
 0x216   : > { %v1136_v33 = vadd.f32 %v1125_v30, %v1090_v50  ;;  %v1170_v63 = vsel %vm1167_vm2, %v11408_v31, %v11410_v9  ;;  %v1171_v44 = vsel %vm1167_vm2, %v11410_v9, %v11411_v40  ;;  %vm1365_vm8 = vcmask 121856   ;;  %v11419_v30 = vld [vmem:[#allocation64_spill] sm:$0xff]  ;;  %v11420_v50 = vld [vmem:[#allocation63_spill] sm:$0xff] }
 0x217   : > { %v9989_v37 = vpop.permute.xlu1 %1457  ;;  %v1137_v55 = vadd.f32 %v1126_v1, %v1091_v48  ;;  %v1138_v8 = vadd.f32 %v9647_v28, %v1092_v29  ;;  %v1172_v27 = vsel %vm1167_vm2, %v11411_v40, %v11412_v21  ;;  %v1168_v19 = vsel %vm1167_vm2, %v11413_v57, %v11409_v35  ;;  %v11421_v29 = vld [vmem:[#allocation65_spill] sm:$0xff]  ;;  %v11424_v9 = vld [vmem:[#allocation68_spill] sm:$0xff]  ;;  %v11425_v40 = vld [vmem:[#allocation70_spill] sm:$0xff] }
 0x218   : > { %v9995_v12 = vpop.permute.xlu0 %1540  ;;  %v1133_v45 = vadd.f32 %v1122_v32, %v1087_v46  ;;  %v1180_v25 = vadd.f32 %v1169_v43, %v1134_v47  ;;  %v1215_v26 = vsel %vm1213_vm5, %v11415_v61, %v11414_v0  ;;  %v1216_v28 = vsel %vm1213_vm5, %v11414_v0, %v11416_v14  ;;  %v11422_v32 = vld [vmem:[#allocation66_spill] sm:$0xff] }
 0x219   : > { %vm1416_vm10 = vcmask 113664   ;;  %v1181_v6 = vadd.f32 %v1170_v63, %v1135_v4  ;;  %v1182_v13 = vadd.f32 %v1171_v44, %v1136_v33  ;;  %v1217_v53 = vsel %vm1213_vm5, %v11416_v14, %v9669_v60  ;;  %v11423_v4 = vld [vmem:[#allocation67_spill] sm:$0xff]  ;;  %v11426_v44 = vld [vmem:[#allocation69_spill] sm:$0xff] }
 0x21a   : > { %v1218_v54 = vsel %vm1213_vm5, %v9669_v60, %v11417_v22  ;;  %v1183_v59 = vadd.f32 %v1172_v27, %v1137_v55  ;;  %v1184_v38 = vadd.f32 %v11412_v21, %v1138_v8  ;;  %v1179_v62 = vadd.f32 %v1168_v19, %v1133_v45  ;;  %v11427_v27 = vld [vmem:[#allocation71_spill] sm:$0xff]  ;;  %v11428_v19 = vld [vmem:[#allocation72_spill] sm:$0xff] }
 0x21b   : > { %v10016_v10 = vpop.permute.xlu1 %1461  ;;  %v1214_v16 = vsel %vm1213_vm5, %v11418_v23, %v11415_v61  ;;  %vm1467_vm12 = vcmask 105472   ;;  %v1226_v51 = vadd.f32 %v1215_v26, %v1180_v25  ;;  %v1227_v49 = vadd.f32 %v1216_v28, %v1181_v6  ;;  %v11429_v26 = vld [vmem:[#allocation73_spill] sm:$0xff] }
 0x21c   : > { %v10024_v18 = vpop.permute.xlu0 %1455  ;;  %v1261_v48 = vsel %vm1259_vm6, %v11420_v50, %v11419_v30  ;;  %v1262_v1 = vsel %vm1259_vm6, %v11419_v30, %v11421_v29  ;;  %v1228_v46 = vadd.f32 %v1217_v53, %v1182_v13  ;;  %v1229_v47 = vadd.f32 %v1218_v54, %v1183_v59 }
 0x21d   : > { %v1230_v56 = vadd.f32 %v11417_v22, %v1184_v38  ;;  %v1263_v31 = vsel %vm1259_vm6, %v11421_v29, %v11422_v32  ;;  %v1225_v43 = vadd.f32 %v1214_v16, %v1179_v62  ;;  %v1264_v33 = vsel %vm1259_vm6, %v11422_v32, %v11423_v4 }
 0x21e   : > { %v1260_v63 = vsel %vm1259_vm6, %v11424_v9, %v11420_v50  ;;  %v1316_v55 = vsel %vm1314_vm7, %v11426_v44, %v11425_v40  ;;  %v1272_v8 = vadd.f32 %v1261_v48, %v1226_v51  ;;  %v1273_v21 = vadd.f32 %v1262_v1, %v1227_v49 }
 0x21f   : > { %v10042_v60 = vpop.permute.xlu1 %1453  ;;  %v1317_v57 = vsel %vm1314_vm7, %v11425_v40, %v11427_v27  ;;  %v1318_v45 = vsel %vm1314_vm7, %v11427_v27, %v11428_v19  ;;  %vm1518_vm14 = vcmask 97280   ;;  %v1274_v25 = vadd.f32 %v1263_v31, %v1228_v46 }
 0x220   : > { %v1460_v35 = vpop.permute.xlu0 %1459  ;;  %v1276_v0 = vadd.f32 %v11423_v4, %v1230_v56  ;;  %v1319_v61 = vsel %vm1314_vm7, %v11428_v19, %v9720_v42  ;;  %v1315_v14 = vsel %vm1314_vm7, %v11429_v26, %v11426_v44  ;;  %v1275_v6 = vadd.f32 %v1264_v33, %v1229_v47 }
 0x221   : > { %v1271_v13 = vadd.f32 %v1260_v63, %v1225_v43  ;;  %v1328_v53 = vadd.f32 %v1316_v55, %v1272_v8  ;;  %v1320_v22 = vsel %vm1314_vm7, %v9720_v42, %v9748_v36  ;;  %v1329_v59 = vadd.f32 %v1317_v57, %v1273_v21 }
 0x222   : > { %v1330_v38 = vadd.f32 %v1318_v45, %v1274_v25  ;;  %v1367_v62 = vsel %vm1365_vm8, %v9769_v39, %v9775_v41  ;;  %v1368_v23 = vsel %vm1365_vm8, %v9775_v41, %v9808_v24  ;;  %v1331_v16 = vadd.f32 %v1319_v61, %v1275_v6 }
 0x223   : > { %v10070_v28 = vpop.permute.xlu1 %1506  ;;  %v1327_v51 = vadd.f32 %v1315_v14, %v1271_v13  ;;  %v1369_v49 = vsel %vm1365_vm8, %v9808_v24, %v9802_v7  ;;  %v1370_v42 = vsel %vm1365_vm8, %v9802_v7, %v9847_v58  ;;  %v1332_v36 = vadd.f32 %v1320_v22, %v1276_v0 }
 0x224   : > { %v1464_v54 = vpop.permute.xlu0 %1463  ;;  %v1366_v30 = vsel %vm1365_vm8, %v9829_v20, %v9769_v39  ;;  %v1418_v50 = vsel %vm1416_vm10, %v9855_v5, %v9927_v11  ;;  %v1419_v41 = vsel %vm1416_vm10, %v9927_v11, %v9880_v3  ;;  %v1379_v29 = vadd.f32 %v1367_v62, %v1328_v53 }
 0x225   : > { %v1380_v24 = vadd.f32 %v1368_v23, %v1329_v59  ;;  %v1371_v7 = vsel %vm1365_vm8, %v9847_v58, %v9888_v34  ;;  %v1420_v1 = vsel %vm1416_vm10, %v9880_v3, %v9968_v15  ;;  %v1381_v20 = vadd.f32 %v1369_v49, %v1330_v38 }
 0x226   : > { %v1382_v46 = vadd.f32 %v1370_v42, %v1331_v16  ;;  %v1469_v47 = vsel %vm1467_vm12, %v10024_v18, %v9989_v37  ;;  %v1470_v11 = vsel %vm1467_vm12, %v9989_v37, %v1460_v35  ;;  %v1378_v56 = vadd.f32 %v1366_v30, %v1327_v51 }
 0x227   : > { %v1511_v48 = vpop.permute.xlu1 %1510  ;;  %v1430_v32 = vadd.f32 %v1418_v50, %v1379_v29  ;;  %v1431_v31 = vadd.f32 %v1419_v41, %v1380_v24  ;;  %v1422_v58 = vsel %vm1416_vm10, %v9909_v2, %v9960_v52  ;;  %v1383_v34 = vadd.f32 %v1371_v7, %v1332_v36 }
 0x228   : > { %v1466_v39 = vpop.permute.xlu0 %1465  ;;  %v1432_v43 = vadd.f32 %v1420_v1, %v1381_v20  ;;  %v1421_v3 = vsel %vm1416_vm10, %v9968_v15, %v9909_v2  ;;  %v1417_v4 = vsel %vm1416_vm10, %v9935_v17, %v9855_v5  ;;  %v1471_v37 = vsel %vm1467_vm12, %v1460_v35, %v10016_v10 }
 0x229   : > { %v1481_v9 = vadd.f32 %v1469_v47, %v1430_v32  ;;  %v1482_v63 = vadd.f32 %v1470_v11, %v1431_v31  ;;  %v1473_v40 = vsel %vm1467_vm12, %v1464_v54, %v1466_v39  ;;  %v1434_v52 = vadd.f32 %v1422_v58, %v1383_v34 }
 0x22a   : > { %v1472_v55 = vsel %vm1467_vm12, %v10016_v10, %v1464_v54  ;;  %v1433_v8 = vadd.f32 %v1421_v3, %v1382_v46  ;;  %v1429_v21 = vadd.f32 %v1417_v4, %v1378_v56  ;;  %v1483_v27 = vadd.f32 %v1471_v37, %v1432_v43 }
 0x22b   : > { %v1515_v33 = vpop.permute.xlu1 %1514  ;;  %v1485_v57 = vadd.f32 %v1473_v40, %v1434_v52  ;;  %v1468_v61 = vsel %vm1467_vm12, %v10042_v60, %v10024_v18  ;;  %v8962_v34 = vmov 0.0   ;;  %vm4043_vm15 = vcmask 80896  }
 0x22c   : > { %v1509_v44 = vpop.permute.xlu0 %1508  ;;  %v1484_v19 = vadd.f32 %v1472_v55, %v1433_v8  ;;  %v1480_v59 = vadd.f32 %v1468_v61, %v1429_v21  ;;  %1720 = vmatprep.mubr.f32.mxu0 %v8962_v34  ;;  %1797 = vmatprep.mubr.f32.mxu1 %v8962_v34  ;;  %vm4420_vm2 = vcmask 719872   ;;  %vm4607_vm5 = vcmask 703488  }
 0x22d   : > { %v1520_v2 = vsel %vm1518_vm14, %v10070_v28, %v1509_v44  ;;  %v1521_v15 = vsel %vm1518_vm14, %v1509_v44, %v1511_v48  ;;  %vm4794_vm6 = vcmask 687104   ;;  %vm4981_vm8 = vcmask 670720  }
 0x22e   : > { %v1532_v5 = vadd.f32 %v1520_v2, %v1481_v9  ;;  %v1533_v17 = vadd.f32 %v1521_v15, %v1482_v63  ;;  %vm5355_vm12 = vcmask 261120  }
 0x22f   : > { %v1517_v35 = vpop.permute.xlu1 %1516 }
 0x230   : > { %v1544_v45 = vadd.f32 %v9995_v12, %v1532_v5  ;;  %v1545_v25 = vadd.f32 %v9995_v12, %v1533_v17  ;;  %v1524_v0 = vsel %vm1518_vm14, %v1515_v33, %v1517_v35  ;;  %v1513_v10 = vpop.permute.xlu0 %1512 }
 0x231   : > { %v1536_v26 = vadd.f32 %v1524_v0, %v1485_v57  ;;  %v1522_v14 = vsel %vm1518_vm14, %v1511_v48, %v1513_v10  ;;  %v1523_v6 = vsel %vm1518_vm14, %v1513_v10, %v1515_v33  ;;  %v7973_v0 = vld [vmem:[%s11220_s3 + $0x10] sm:$0xff] }
 0x232   : > { %v1550_v13 = vmax.f32 %v1544_v45, 0.0  ;;  %v1551_v53 = vmax.f32 %v1545_v25, 0.0  ;;  %v1534_v22 = vadd.f32 %v1522_v14, %v1483_v27  ;;  %v1535_v54 = vadd.f32 %v1523_v6, %v1484_v19  ;;  %v7974_v14 = vld [vmem:[%s11220_s3 + $0x18] sm:$0xff] }
 0x233   : > { %v1548_v60 = vadd.f32 %v9995_v12, %v1536_v26 }
 0x234   : > { %v1546_v38 = vadd.f32 %v9995_v12, %v1534_v22  ;;  %v1547_v62 = vadd.f32 %v9995_v12, %v1535_v54  ;;  %1564 = vrot.lane.b32.xlu1 %v1551_v53, %s8938_s21  ;;  %1562 = vrot.lane.b32.xlu0 %v1550_v13, %s8938_s21  ;;  %v1505_v23 = vpop.permute.xlu0 %1504 }
 0x235   : > { %v1519_v18 = vsel %vm1518_vm14, %v1505_v23, %v10070_v28  ;;  %v1554_v36 = vmax.f32 %v1548_v60, 0.0  ;;  %v1626_v23 = vld [vmem:[%s11220_s3 + $0x8] sm:$0xff] }
 0x236   : > { %v1552_v16 = vmax.f32 %v1546_v38, 0.0  ;;  %v10139_v51 = vmax.f32 %v1547_v62, 0.0  ;;  %v1531_v49 = vadd.f32 %v1519_v18, %v1480_v59 }
 0x238   : > { %v1543_v42 = vadd.f32 %v9995_v12, %v1531_v49  ;;  %1568 = vrot.lane.b32.xlu1 %v10139_v51, %s8938_s21  ;;  %1566 = vrot.lane.b32.xlu0 %v1552_v16, %s8938_s21 }
 0x23a   : > { %v1549_v30 = vmax.f32 %v1543_v42, 0.0 }
 0x23c   : > { %1585 = vrot.lane.b32.xlu1 %v1554_v36, %s8938_s21  ;;  %1560 = vrot.lane.b32.xlu0 %v1549_v30, %s8938_s21  ;;  %s8963_s21 = smov 122  }
 0x2a6   : > { %v1565_v28 = vpop.permute.xlu1 %1564  ;;  %v1563_v50 = vpop.permute.xlu0 %1562 }
 0x2a7   : > { %v1571_v41 = vsel %vm431_vm0, %v1563_v50, %v1565_v28 }
 0x2a8   : > { %v1580_v48 = vmax.f32 %v1550_v13, %v1571_v41 }
 0x2aa   : > { %v10148_v29 = vpop.permute.xlu1 %1568  ;;  %v1567_v24 = vpop.permute.xlu0 %1566  ;;  %1600 = vrot.lane.b32.xlu0 %v1580_v48, %s8942_s25 }
 0x2ab   : > { %v1572_v12 = vsel %vm431_vm0, %v1565_v28, %v1567_v24  ;;  %v1573_v7 = vsel %vm431_vm0, %v1567_v24, %v10148_v29  ;;  %v1583_v5 = vmax.f32 %v10139_v51, %v10148_v29  ;;  %v7984_v28 = vld [vmem:[%s11220_s3 + $0x28] sm:$0xff] }
 0x2ac   : > { %v1581_v1 = vmax.f32 %v1551_v53, %v1572_v12  ;;  %v1582_v39 = vmax.f32 %v1552_v16, %v1573_v7  ;;  %v1625_v53 = vld [vmem:[%s11220_s3] sm:$0xff] }
 0x2ad   : > { %v7983_v16 = vld [vmem:[%s11220_s3 + $0x20] sm:$0xff] }
 0x2ae   : > { %v1586_v20 = vpop.permute.xlu1 %1585  ;;  %1602 = vrot.lane.b32.xlu1 %v1581_v1, %s8942_s25  ;;  %1604 = vrot.lane.b32.xlu0 %v1582_v39, %s8942_s25  ;;  %v1561_v46 = vpop.permute.xlu0 %1560 }
 0x2af   : > { %v1587_v47 = vsel %vm431_vm0, %v10148_v29, %v1586_v20  ;;  %v1570_v11 = vsel %vm431_vm0, %v1561_v46, %v1563_v50  ;;  %v1591_v31 = vmax.f32 %v1554_v36, %v1586_v20  ;;  %vm1649_vm0 = vcmask 64512  }
 0x2b0   : > { %v1590_v56 = vmax.f32 %v10139_v51, %v1587_v47  ;;  %v1579_v32 = vmax.f32 %v1549_v30, %v1570_v11  ;;  %v7995_v47 = vld [vmem:[%s11220_s3 + $0x40] sm:$0xff] }
 0x2b2   : > { %1606 = vrot.lane.b32.xlu0 %v1590_v56, %s8942_s25  ;;  %1598 = vrot.lane.b32.xlu1 %v1579_v32, %s8942_s25 }
 0x2b6   : > { %1608 = vrot.lane.b32.xlu1 %v1591_v31, %s8942_s25  ;;  %s8964_s25 = smov 120  }
 0x31c   : > { %v1601_v58 = vpop.permute.xlu0 %1600 }
 0x320   : > { %v1603_v43 = vpop.permute.xlu1 %1602  ;;  %v1605_v3 = vpop.permute.xlu0 %1604 }
 0x321   : > { %v1611_v4 = vsel %vm615_vm4, %v1601_v58, %v1603_v43  ;;  %v1612_v33 = vsel %vm615_vm4, %v1603_v43, %v1605_v3  ;;  %v7996_v43 = vld [vmem:[%s11220_s3 + $0x48] sm:$0xff] }
 0x322   : > { %v10167_v9 = vmax.f32 %v1580_v48, %v1611_v4  ;;  %v10169_v37 = vmax.f32 %v1581_v1, %v1612_v33  ;;  %v7989_v48 = vld [vmem:[%s11220_s3 + $0x30] sm:$0xff] }
 0x323   : > { %v8001_v33 = vld [vmem:[%s11220_s3 + $0x50] sm:$0xff] }
 0x324   : > { %v1599_v63 = vpop.permute.xlu1 %1598  ;;  %1636 = vrot.lane.b32.xlu1 %v10167_v9, %s8939_s22  ;;  %1638 = vrot.lane.b32.xlu0 %v10169_v37, %s8939_s22  ;;  %v1607_v40 = vpop.permute.xlu0 %1606 }
 0x325   : > { %v1610_v44 = vsel %vm615_vm4, %v1599_v63, %v1601_v58  ;;  %v1613_v52 = vsel %vm615_vm4, %v1605_v3, %v1607_v40 }
 0x326   : > { %v10177_v55 = vmax.f32 %v1579_v32, %v1610_v44  ;;  %v10179_v2 = vmax.f32 %v1582_v39, %v1613_v52  ;;  %v7990_v39 = vld [vmem:[%s11220_s3 + $0x38] sm:$0xff] }
 0x328   : > { %1634 = vrot.lane.b32.xlu1 %v10177_v55, %s8939_s22  ;;  %1640 = vrot.lane.b32.xlu0 %v10179_v2, %s8939_s22  ;;  %v1609_v15 = vpop.permute.xlu1 %1608 }
 0x329   : > { %v1614_v8 = vsel %vm615_vm4, %v1607_v40, %v1609_v15  ;;  %vm2167_vm4 = vcmask 998400  }
 0x32a   : > { %v10240_v17 = vmax.f32 %v1583_v5, %v1614_v8  ;;  %v8002_v5 = vld [vmem:[%s11220_s3 + $0x58] sm:$0xff] }
 0x32c   : > { %1975 = vrot.lane.b32.xlu1 %v10167_v9, %s8941_s24  ;;  %1977 = vrot.lane.b32.xlu0 %v10169_v37, %s8941_s24 }
 0x330   : > { %1973 = vrot.lane.b32.xlu1 %v10177_v55, %s8941_s24  ;;  %1979 = vrot.lane.b32.xlu0 %v10179_v2, %s8941_s24  ;;  %s8965_s24 = smov 66  }
 0x334   : > { %2163 = vrot.lane.b32.xlu1 %v10169_v37, %s8963_s21  ;;  %2161 = vrot.lane.b32.xlu0 %v10167_v9, %s8963_s21 }
 0x338   : > { %2165 = vrot.lane.b32.xlu1 %v10179_v2, %s8963_s21  ;;  %2159 = vrot.lane.b32.xlu0 %v10177_v55, %s8963_s21  ;;  %s8971_s21 = smov 84  }
 0x33c   : > { %2350 = vrot.lane.b32.xlu1 %v10169_v37, %s8964_s25  ;;  %2348 = vrot.lane.b32.xlu0 %v10167_v9, %s8964_s25 }
 0x340   : > { %2352 = vrot.lane.b32.xlu1 %v10179_v2, %s8964_s25  ;;  %2346 = vrot.lane.b32.xlu0 %v10177_v55, %s8964_s25  ;;  %s8974_s25 = smov 32  }
 0x344   : > { %2537 = vrot.lane.b32.xlu1 %v10169_v37, %s8947_s30  ;;  %2535 = vrot.lane.b32.xlu0 %v10167_v9, %s8947_s30 }
 0x348   : > { %2539 = vrot.lane.b32.xlu1 %v10179_v2, %s8947_s30  ;;  %2533 = vrot.lane.b32.xlu0 %v10177_v55, %s8947_s30 }
 0x34c   : > { %2723 = vrot.lane.b32.xlu1 %v10169_v37, %s8949_s12  ;;  %2721 = vrot.lane.b32.xlu0 %v10167_v9, %s8949_s12 }
 0x350   : > { %2725 = vrot.lane.b32.xlu1 %v10179_v2, %s8949_s12  ;;  %2719 = vrot.lane.b32.xlu0 %v10177_v55, %s8949_s12  ;;  %s8966_s12 = smov 64  }
 0x354   : > { %2909 = vrot.lane.b32.xlu1 %v10169_v37, %s8951_s16  ;;  %2907 = vrot.lane.b32.xlu0 %v10167_v9, %s8951_s16 }
 0x358   : > { %2911 = vrot.lane.b32.xlu1 %v10179_v2, %s8951_s16  ;;  %2905 = vrot.lane.b32.xlu0 %v10177_v55, %s8951_s16  ;;  %s8967_s16 = smov 10  }
 0x35c   : > { %3095 = vrot.lane.b32.xlu1 %v10169_v37, %s8965_s24  ;;  %3093 = vrot.lane.b32.xlu0 %v10167_v9, %s8965_s24 }
 0x360   : > { %3097 = vrot.lane.b32.xlu1 %v10179_v2, %s8965_s24  ;;  %3091 = vrot.lane.b32.xlu0 %v10177_v55, %s8965_s24 }
 0x364   : > { %3282 = vrot.lane.b32.xlu1 %v10169_v37, %s8966_s12  ;;  %3280 = vrot.lane.b32.xlu0 %v10167_v9, %s8966_s12 }
 0x368   : > { %3284 = vrot.lane.b32.xlu1 %v10179_v2, %s8966_s12  ;;  %3278 = vrot.lane.b32.xlu0 %v10177_v55, %s8966_s12 }
 0x36c   : > { %3470 = vrot.lane.b32.xlu1 %v10169_v37, %s8957_s26  ;;  %3468 = vrot.lane.b32.xlu0 %v10167_v9, %s8957_s26 }
 0x370   : > { %3474 = vrot.lane.b32.xlu1 %v10240_v17, %s8957_s26  ;;  %3472 = vrot.lane.b32.xlu0 %v10179_v2, %s8957_s26 }
 0x374   : > { %3657 = vrot.lane.b32.xlu1 %v10167_v9, %s8959_s28  ;;  %3466 = vrot.lane.b32.xlu0 %v10177_v55, %s8957_s26 }
 0x378   : > { %3661 = vrot.lane.b32.xlu1 %v10179_v2, %s8959_s28  ;;  %3659 = vrot.lane.b32.xlu0 %v10169_v37, %s8959_s28 }
 0x37c   : > { %3655 = vrot.lane.b32.xlu1 %v10177_v55, %s8959_s28  ;;  %3663 = vrot.lane.b32.xlu0 %v10240_v17, %s8959_s28  ;;  %s8976_s28 = smov 28  }
 0x380   : > { %3848 = vrot.lane.b32.xlu1 %v10169_v37, %s8961_s17  ;;  %3846 = vrot.lane.b32.xlu0 %v10167_v9, %s8961_s17 }
 0x384   : > { %3852 = vrot.lane.b32.xlu1 %v10240_v17, %s8961_s17  ;;  %3850 = vrot.lane.b32.xlu0 %v10179_v2, %s8961_s17 }
 0x388   : > { %4035 = vrot.lane.b32.xlu1 %v10167_v9, %s8967_s16  ;;  %3844 = vrot.lane.b32.xlu0 %v10177_v55, %s8961_s17 }
 0x38c   : > { %4039 = vrot.lane.b32.xlu1 %v10179_v2, %s8967_s16  ;;  %4037 = vrot.lane.b32.xlu0 %v10169_v37, %s8967_s16 }
 0x390   : > { %4033 = vrot.lane.b32.xlu1 %v10177_v55, %s8967_s16  ;;  %4041 = vrot.lane.b32.xlu0 %v10240_v17, %s8967_s16  ;;  %s8975_s16 = smov 30  }
 0x394   : > { %4227 = vrot.lane.b32.xlu1 %v10169_v37, %s8968_s18  ;;  %4225 = vrot.lane.b32.xlu0 %v10167_v9, %s8968_s18 }
 0x396   : > { %v1637_v21 = vpop.permute.xlu1 %1636  ;;  %v1639_v27 = vpop.permute.xlu0 %1638 }
 0x397   : > { %v1643_v57 = vsel %vm477_vm1, %v1637_v21, %v1639_v27 }
 0x398   : > { %4231 = vrot.lane.b32.xlu1 %v10240_v17, %s8968_s18  ;;  %4229 = vrot.lane.b32.xlu0 %v10179_v2, %s8968_s18 }
 0x399   : > { %1656 = vmatprep.subr.mxu0 %v1643_v57  ;;  %v8007_v57 = vld [vmem:[%s11220_s3 + $0x60] sm:$0xff] }
 0x39a   : > { %v1635_v35 = vpop.permute.xlu1 %1634  ;;  %v1641_v19 = vpop.permute.xlu0 %1640 }
 0x39b   : > { %1733 = vmatprep.subr.mxu1 %v1641_v19  ;;  %v1642_v45 = vsel %vm477_vm1, %v1635_v35, %v1637_v21  ;;  %v1644_v25 = vsel %vm477_vm1, %v1639_v27, %v1641_v19 }
 0x39c   : > { %4414 = vrot.lane.b32.xlu1 %v10169_v37, %s8969_s23  ;;  %4223 = vrot.lane.b32.xlu0 %v10177_v55, %s8968_s18  ;;  %s8978_s18 = smov 24  }
 0x39d   : > { %1657 = vmatpush1.msra.mxu0 %v1642_v45  ;;  %1734 = vmatpush1.msra.mxu1 %v1644_v25 }
 0x39e   : > { %7975 = vmatmul.mubr.msk.f32.vlgmr.msra.gmra.mrb[0].mxu0 %vm1649_vm0, %v7973_v0  ;;  %7977 = vmatmul.mubr.msk.f32.vlgmr.msra.gmra.mrb[0].mxu1 %vm1649_vm0, %v7973_v0  ;;  %v1976_v10 = vpop.permute.xlu1 %1975  ;;  %v1978_v61 = vpop.permute.xlu0 %1977 }
 0x39f   : > { %1816 = vmatprep.subr.mxu0 %v10167_v9  ;;  %1893 = vmatprep.subr.mxu1 %v10179_v2  ;;  %v1982_v26 = vsel %vm569_vm3, %v1976_v10, %v1978_v61 }
 0x3a0   : > { %1817 = vmatpush1.msra.mxu0 %v10177_v55  ;;  %1894 = vmatpush1.msra.mxu1 %v10169_v37 }
 0x3a1   : > { %4412 = vrot.lane.b32.xlu1 %v10167_v9, %s8969_s23  ;;  %4416 = vrot.lane.b32.xlu0 %v10179_v2, %s8969_s23 }
 0x3a2   : > { %1726 = vmatprep.mubr.f32.mxu0 %v8962_v34  ;;  %1803 = vmatprep.mubr.f32.mxu1 %v8962_v34  ;;  %v1974_v6 = vpop.permute.xlu1 %1973  ;;  %v1980_v13 = vpop.permute.xlu0 %1979 }
 0x3a3   : > { %1994 = vmatprep.subr.mxu0 %v1982_v26  ;;  %7976 = vmatmul.mubr.msk.f32.gmra.mrb[2].mxu0 %vm1649_vm0, %v7974_v14  ;;  %v1981_v22 = vsel %vm569_vm3, %v1974_v6, %v1976_v10  ;;  %v1983_v54 = vsel %vm569_vm3, %v1978_v61, %v1980_v13  ;;  %vm2354_vm3 = vcmask 982016   ;;  %v8008_v10 = vld [vmem:[%s11220_s3 + $0x68] sm:$0xff] }
 0x3a4   : > { %7978 = vmatmul.mubr.msk.f32.gmra.mrb[2].mxu1 %vm1649_vm0, %v7974_v14  ;;  %2071 = vmatprep.subr.mxu1 %v1980_v13  ;;  %v8013_v14 = vld [vmem:[%s11220_s3 + $0x70] sm:$0xff] }
 0x3a5   : > { %4601 = vrot.lane.b32.xlu1 %v10169_v37, %s8970_s11  ;;  %4418 = vrot.lane.b32.xlu0 %v10240_v17, %s8969_s23 }
 0x3a6   : > { %1880 = vmatprep.mubr.f32.mxu0 %v8962_v34  ;;  %1957 = vmatprep.mubr.f32.mxu1 %v8962_v34  ;;  %v2164_v59 = vpop.permute.xlu1 %2163  ;;  %v2162_v38 = vpop.permute.xlu0 %2161 }
 0x3a7   : > { %7979 = vmatmul.mubr.msk.f32.vlgmr.msra.gmra.mrb[0].mxu0 %vm1649_vm0, %v1625_v53  ;;  %v2169_v62 = vsel %vm2167_vm4, %v2162_v38, %v2164_v59 }
 0x3a8   : > { %7981 = vmatmul.mubr.msk.f32.vlgmr.msra.gmra.mrb[0].mxu1 %vm1649_vm0, %v1625_v53  ;;  %1995 = vmatpush1.msra.mxu0 %v1981_v22 }
 0x3a9   : > { %2072 = vmatpush1.msra.mxu1 %v1983_v54  ;;  %4599 = vrot.lane.b32.xlu1 %v10167_v9, %s8970_s11 }
 0x3aa   : > { %4603 = vrot.lane.b32.xlu0 %v10179_v2, %s8970_s11  ;;  %1886 = vmatprep.mubr.f32.mxu0 %v8962_v34  ;;  %v2166_v18 = vpop.permute.xlu1 %2165  ;;  %v2160_v60 = vpop.permute.xlu0 %2159 }
 0x3ab   : > { %1963 = vmatprep.mubr.f32.mxu1 %v8962_v34  ;;  %2181 = vmatprep.subr.mxu0 %v2169_v62  ;;  %v2168_v51 = vsel %vm2167_vm4, %v2160_v60, %v2162_v38  ;;  %v2170_v49 = vsel %vm2167_vm4, %v2164_v59, %v2166_v18  ;;  %v8014_v59 = vld [vmem:[%s11220_s3 + $0x78] sm:$0xff]  ;;  %vm5729_vm4 = vcmask 228352  }
 0x3ac   : > { %7980 = vmatmul.mubr.msk.f32.gmra.mrb[2].mxu0 %vm1649_vm0, %v1626_v23  ;;  %7982 = vmatmul.mubr.msk.f32.gmra.mrb[2].mxu1 %vm1649_vm0, %v1626_v23  ;;  %v8019_v23 = vld [vmem:[%s11220_s3 + $0x80] sm:$0xff] }
 0x3ad   : > { %2258 = vmatprep.subr.mxu1 %v2166_v18  ;;  %4788 = vrot.lane.b32.xlu1 %v10169_v37, %s8971_s21 }
 0x3ae   : > { %4605 = vrot.lane.b32.xlu0 %v10240_v17, %s8970_s11  ;;  %2058 = vmatprep.mubr.f32.mxu0 %v8962_v34  ;;  %v2351_v42 = vpop.permute.xlu1 %2350  ;;  %v2349_v36 = vpop.permute.xlu0 %2348 }
 0x3af   : > { %2135 = vmatprep.mubr.f32.mxu1 %v8962_v34  ;;  %v2356_v30 = vsel %vm2354_vm3, %v2349_v36, %v2351_v42 }
 0x3b0   : > { %7985 = vmatmul.mubr.msk.f32.vlgmr.msra.gmra.mrb[0].mxu0 %vm1649_vm0, %v7983_v16  ;;  %7987 = vmatmul.mubr.msk.f32.vlgmr.msra.gmra.mrb[0].mxu1 %vm1649_vm0, %v7983_v16 }
 0x3b1   : > { %2182 = vmatpush1.msra.mxu0 %v2168_v51  ;;  %2259 = vmatpush1.msra.mxu1 %v2170_v49 }
 0x3b2   : > { %4786 = vrot.lane.b32.xlu1 %v10167_v9, %s8971_s21  ;;  %4790 = vrot.lane.b32.xlu0 %v10179_v2, %s8971_s21  ;;  %v2353_v50 = vpop.permute.xlu1 %2352  ;;  %v2347_v41 = vpop.permute.xlu0 %2346 }
 0x3b3   : > { %2064 = vmatprep.mubr.f32.mxu0 %v8962_v34  ;;  %2141 = vmatprep.mubr.f32.mxu1 %v8962_v34  ;;  %v2355_v29 = vsel %vm2354_vm3, %v2347_v41, %v2349_v36  ;;  %v2357_v7 = vsel %vm2354_vm3, %v2351_v42, %v2353_v50  ;;  %v8020_v42 = vld [vmem:[%s11220_s3 + $0x88] sm:$0xff]  ;;  %vm5916_vm3 = vcmask 211968  }
 0x3b4   : > { %2368 = vmatprep.subr.mxu0 %v2356_v30  ;;  %7986 = vmatmul.mubr.msk.f32.gmra.mrb[2].mxu0 %vm1649_vm0, %v7984_v28 }
 0x3b5   : > { %7988 = vmatmul.mubr.msk.f32.gmra.mrb[2].mxu1 %vm1649_vm0, %v7984_v28  ;;  %2445 = vmatprep.subr.mxu1 %v2353_v50  ;;  %v8025_v50 = vld [vmem:[%s11220_s3 + $0x90] sm:$0xff] }
 0x3b6   : > { %4975 = vrot.lane.b32.xlu1 %v10169_v37, %s8972_s20  ;;  %4792 = vrot.lane.b32.xlu0 %v10240_v17, %s8971_s21  ;;  %v2538_v24 = vpop.permute.xlu1 %2537  ;;  %v2536_v12 = vpop.permute.xlu0 %2535 }
 0x3b7   : > { %2245 = vmatprep.mubr.f32.mxu0 %v8962_v34  ;;  %2322 = vmatprep.mubr.f32.mxu1 %v8962_v34  ;;  %v2542_v1 = vsel %vm845_vm9, %v2536_v12, %v2538_v24 }
 0x3b8   : > { %7991 = vmatmul.mubr.msk.f32.vlgmr.msra.gmra.mrb[0].mxu0 %vm1649_vm0, %v7989_v48 }
 0x3b9   : > { %7993 = vmatmul.mubr.msk.f32.vlgmr.msra.gmra.mrb[0].mxu1 %vm1649_vm0, %v7989_v48  ;;  %2369 = vmatpush1.msra.mxu0 %v2355_v29 }
 0x3ba   : > { %2446 = vmatpush1.msra.mxu1 %v2357_v7  ;;  %4973 = vrot.lane.b32.xlu1 %v10167_v9, %s8972_s20  ;;  %v2540_v20 = vpop.permute.xlu1 %2539  ;;  %v2534_v46 = vpop.permute.xlu0 %2533  ;;  %v6279_v7 = vld [vmem:[%s11221_s4] sm:$0xff] }
 0x3bb   : > { %4977 = vrot.lane.b32.xlu0 %v10179_v2, %s8972_s20  ;;  %2251 = vmatprep.mubr.f32.mxu0 %v8962_v34  ;;  %v2543_v32 = vsel %vm845_vm9, %v2538_v24, %v2540_v20  ;;  %v2541_v31 = vsel %vm845_vm9, %v2534_v46, %v2536_v12  ;;  %v6280_v46 = vld [vmem:[%s11221_s4 + $0x8] sm:$0xff] }
 0x3bc   : > { %2328 = vmatprep.mubr.f32.mxu1 %v8962_v34  ;;  %2554 = vmatprep.subr.mxu0 %v2542_v1 }
 0x3bd   : > { %7992 = vmatmul.mubr.msk.f32.gmra.mrb[2].mxu0 %vm1649_vm0, %v7990_v39  ;;  %7994 = vmatmul.mubr.msk.f32.gmra.mrb[2].mxu1 %vm1649_vm0, %v7990_v39 }
 0x3be   : > { %2631 = vmatprep.subr.mxu1 %v2540_v20  ;;  %5162 = vrot.lane.b32.xlu1 %v10169_v37, %s8973_s27  ;;  %v2724_v11 = vpop.permute.xlu1 %2723  ;;  %v2722_v56 = vpop.permute.xlu0 %2721 }
 0x3bf   : > { %4979 = vrot.lane.b32.xlu0 %v10240_v17, %s8972_s20  ;;  %2432 = vmatprep.mubr.f32.mxu0 %v8962_v34  ;;  %v2728_v58 = vsel %vm937_vm11, %v2722_v56, %v2724_v11  ;;  %s352_s20 = scalar_lea.vmem %s11227_s10, %s11431_s14 }
 0x3c0   : > { %2509 = vmatprep.mubr.f32.mxu1 %v8962_v34 }
 0x3c1   : > { %7997 = vmatmul.mubr.msk.f32.vlgmr.msra.gmra.mrb[0].mxu0 %vm1649_vm0, %v7995_v47  ;;  %7999 = vmatmul.mubr.msk.f32.vlgmr.msra.gmra.mrb[0].mxu1 %vm1649_vm0, %v7995_v47 }
 0x3c2   : > { %2555 = vmatpush1.msra.mxu0 %v2541_v31  ;;  %2632 = vmatpush1.msra.mxu1 %v2543_v32  ;;  %v2726_v3 = vpop.permute.xlu1 %2725  ;;  %v2720_v4 = vpop.permute.xlu0 %2719  ;;  %v8032_v32 = vld [vmem:[%s11220_s3 + $0xa8] sm:$0xff] }
 0x3c3   : > { %5160 = vrot.lane.b32.xlu1 %v10167_v9, %s8973_s27  ;;  %5164 = vrot.lane.b32.xlu0 %v10179_v2, %s8973_s27  ;;  %v2727_v44 = vsel %vm937_vm11, %v2720_v4, %v2722_v56  ;;  %v2729_v52 = vsel %vm937_vm11, %v2724_v11, %v2726_v3  ;;  %vm3099_vm11 = vcmask 539648  }
 0x3c4   : > { %2438 = vmatprep.mubr.f32.mxu0 %v8962_v34  ;;  %2515 = vmatprep.mubr.f32.mxu1 %v8962_v34 }
 0x3c5   : > { %2740 = vmatprep.subr.mxu0 %v2728_v58  ;;  %7998 = vmatmul.mubr.msk.f32.gmra.mrb[2].mxu0 %vm1649_vm0, %v7996_v43 }
 0x3c6   : > { %8000 = vmatmul.mubr.msk.f32.gmra.mrb[2].mxu1 %vm1649_vm0, %v7996_v43  ;;  %2817 = vmatprep.subr.mxu1 %v2726_v3  ;;  %v2910_v63 = vpop.permute.xlu1 %2909  ;;  %v2908_v40 = vpop.permute.xlu0 %2907  ;;  %v8037_v3 = vld [vmem:[%s11220_s3 + $0xb0] sm:$0xff] }
 0x3c7   : > { %5349 = vrot.lane.b32.xlu1 %v10169_v37, %s8974_s25  ;;  %5166 = vrot.lane.b32.xlu0 %v10240_v17, %s8973_s27  ;;  %v2914_v55 = vsel %vm1029_vm13, %v2908_v40, %v2910_v63 }
 0x3c8   : > { %2618 = vmatprep.mubr.f32.mxu0 %v8962_v34  ;;  %2695 = vmatprep.mubr.f32.mxu1 %v8962_v34 }
 0x3c9   : > { %8003 = vmatmul.mubr.msk.f32.vlgmr.msra.gmra.mrb[0].mxu0 %vm1649_vm0, %v8001_v33 }
 0x3ca   : > { %8005 = vmatmul.mubr.msk.f32.vlgmr.msra.gmra.mrb[0].mxu1 %vm1649_vm0, %v8001_v33  ;;  %2741 = vmatpush1.msra.mxu0 %v2727_v44  ;;  %v2912_v15 = vpop.permute.xlu1 %2911  ;;  %v2906_v8 = vpop.permute.xlu0 %2905  ;;  %v8038_v44 = vld [vmem:[%s11220_s3 + $0xb8] sm:$0xff] }
 0x3cb   : > { %2818 = vmatpush1.msra.mxu1 %v2729_v52  ;;  %5347 = vrot.lane.b32.xlu1 %v10167_v9, %s8974_s25  ;;  %v2915_v35 = vsel %vm1029_vm13, %v2910_v63, %v2912_v15  ;;  %v2913_v19 = vsel %vm1029_vm13, %v2906_v8, %v2908_v40  ;;  %vm3286_vm13 = vcmask 523264   ;;  %v8043_v8 = vld [vmem:[%s11220_s3 + $0xc0] sm:$0xff] }
 0x3cc   : > { %5351 = vrot.lane.b32.xlu0 %v10179_v2, %s8974_s25  ;;  %2624 = vmatprep.mubr.f32.mxu0 %v8962_v34 }
 0x3cd   : > { %2701 = vmatprep.mubr.f32.mxu1 %v8962_v34  ;;  %2926 = vmatprep.subr.mxu0 %v2914_v55 }
 0x3ce   : > { %8004 = vmatmul.mubr.msk.f32.gmra.mrb[2].mxu0 %vm1649_vm0, %v8002_v5  ;;  %8006 = vmatmul.mubr.msk.f32.gmra.mrb[2].mxu1 %vm1649_vm0, %v8002_v5  ;;  %v3096_v21 = vpop.permute.xlu1 %3095  ;;  %v3094_v27 = vpop.permute.xlu0 %3093 }
 0x3cf   : > { %3003 = vmatprep.subr.mxu1 %v2912_v15  ;;  %5536 = vrot.lane.b32.xlu1 %v10169_v37, %s8975_s16  ;;  %v3101_v0 = vsel %vm3099_vm11, %v3094_v27, %v3096_v21 }
 0x3d0   : > { %5353 = vrot.lane.b32.xlu0 %v10240_v17, %s8974_s25  ;;  %2804 = vmatprep.mubr.f32.mxu0 %v8962_v34 }
 0x3d1   : > { %2881 = vmatprep.mubr.f32.mxu1 %v8962_v34 }
 0x3d2   : > { %8009 = vmatmul.mubr.msk.f32.vlgmr.msra.gmra.mrb[0].mxu0 %vm1649_vm0, %v8007_v57  ;;  %8011 = vmatmul.mubr.msk.f32.vlgmr.msra.gmra.mrb[0].mxu1 %vm1649_vm0, %v8007_v57  ;;  %v3098_v45 = vpop.permute.xlu1 %3097  ;;  %v3092_v25 = vpop.permute.xlu0 %3091 }
 0x3d3   : > { %2927 = vmatpush1.msra.mxu0 %v2913_v19  ;;  %3004 = vmatpush1.msra.mxu1 %v2915_v35  ;;  %v3100_v6 = vsel %vm3099_vm11, %v3092_v25, %v3094_v27  ;;  %v3102_v13 = vsel %vm3099_vm11, %v3096_v21, %v3098_v45  ;;  %v8044_v35 = vld [vmem:[%s11220_s3 + $0xc8] sm:$0xff]  ;;  %vm6103_vm11 = vcmask 195584  }
 0x3d4   : > { %5534 = vrot.lane.b32.xlu1 %v10167_v9, %s8975_s16  ;;  %5538 = vrot.lane.b32.xlu0 %v10179_v2, %s8975_s16 }
 0x3d5   : > { %2810 = vmatprep.mubr.f32.mxu0 %v8962_v34  ;;  %2887 = vmatprep.mubr.f32.mxu1 %v8962_v34 }
 0x3d6   : > { %3113 = vmatprep.subr.mxu0 %v3101_v0  ;;  %8010 = vmatmul.mubr.msk.f32.gmra.mrb[2].mxu0 %vm1649_vm0, %v8008_v10  ;;  %v3283_v61 = vpop.permute.xlu1 %3282  ;;  %v3281_v26 = vpop.permute.xlu0 %3280 }
 0x3d7   : > { %8012 = vmatmul.mubr.msk.f32.gmra.mrb[2].mxu1 %vm1649_vm0, %v8008_v10  ;;  %3190 = vmatprep.subr.mxu1 %v3098_v45  ;;  %v3288_v54 = vsel %vm3286_vm13, %v3281_v26, %v3283_v61  ;;  %v8049_v10 = vld [vmem:[%s11220_s3 + $0xd0] sm:$0xff] }
 0x3d8   : > { %5723 = vrot.lane.b32.xlu1 %v10169_v37, %s8976_s28  ;;  %5540 = vrot.lane.b32.xlu0 %v10240_v17, %s8975_s16 }
 0x3d9   : > { %2990 = vmatprep.mubr.f32.mxu0 %v8962_v34  ;;  %3067 = vmatprep.mubr.f32.mxu1 %v8962_v34 }
 0x3da   : > { %8015 = vmatmul.mubr.msk.f32.vlgmr.msra.gmra.mrb[0].mxu0 %vm1649_vm0, %v8013_v14  ;;  %v3285_v53 = vpop.permute.xlu1 %3284  ;;  %v3279_v22 = vpop.permute.xlu0 %3278 }
 0x3db   : > { %8017 = vmatmul.mubr.msk.f32.vlgmr.msra.gmra.mrb[0].mxu1 %vm1649_vm0, %v8013_v14  ;;  %3114 = vmatpush1.msra.mxu0 %v3100_v6  ;;  %v3289_v18 = vsel %vm3286_vm13, %v3283_v61, %v3285_v53  ;;  %v3287_v60 = vsel %vm3286_vm13, %v3279_v22, %v3281_v26 }
 0x3dc   : > { %3191 = vmatpush1.msra.mxu1 %v3102_v13  ;;  %5721 = vrot.lane.b32.xlu1 %v10167_v9, %s8976_s28  ;;  %v8050_v13 = vld [vmem:[%s11220_s3 + $0xd8] sm:$0xff] }
 0x3dd   : > { %5725 = vrot.lane.b32.xlu0 %v10179_v2, %s8976_s28  ;;  %2996 = vmatprep.mubr.f32.mxu0 %v8962_v34 }
 0x3de   : > { %3073 = vmatprep.mubr.f32.mxu1 %v8962_v34  ;;  %3300 = vmatprep.subr.mxu0 %v3288_v54  ;;  %v3471_v38 = vpop.permute.xlu1 %3470  ;;  %v3469_v62 = vpop.permute.xlu0 %3468 }
 0x3df   : > { %8016 = vmatmul.mubr.msk.f32.gmra.mrb[2].mxu0 %vm1649_vm0, %v8014_v59  ;;  %8018 = vmatmul.mubr.msk.f32.gmra.mrb[2].mxu1 %vm1649_vm0, %v8014_v59  ;;  %v3477_v49 = vsel %vm1314_vm7, %v3469_v62, %v3471_v38  ;;  %v8055_v59 = vld [vmem:[%s11220_s3 + $0xe0] sm:$0xff] }
 0x3e0   : > { %3377 = vmatprep.subr.mxu1 %v3285_v53  ;;  %5910 = vrot.lane.b32.xlu1 %v10169_v37, %s8977_s15 }
 0x3e1   : > { %5727 = vrot.lane.b32.xlu0 %v10240_v17, %s8976_s28  ;;  %3177 = vmatprep.mubr.f32.mxu0 %v8962_v34 }
 0x3e2   : > { %3254 = vmatprep.mubr.f32.mxu1 %v8962_v34  ;;  %v3475_v16 = vpop.permute.xlu1 %3474  ;;  %v3473_v51 = vpop.permute.xlu0 %3472 }
 0x3e3   : > { %8021 = vmatmul.mubr.msk.f32.vlgmr.msra.gmra.mrb[0].mxu0 %vm1649_vm0, %v8019_v23  ;;  %8023 = vmatmul.mubr.msk.f32.vlgmr.msra.gmra.mrb[0].mxu1 %vm1649_vm0, %v8019_v23  ;;  %v3479_v28 = vsel %vm1314_vm7, %v3473_v51, %v3475_v16  ;;  %v3478_v41 = vsel %vm1314_vm7, %v3471_v38, %v3473_v51 }
 0x3e4   : > { %3301 = vmatpush1.msra.mxu0 %v3287_v60  ;;  %3378 = vmatpush1.msra.mxu1 %v3289_v18  ;;  %v8056_v60 = vld [vmem:[%s11220_s3 + $0xe8] sm:$0xff] }
 0x3e5   : > { %5908 = vrot.lane.b32.xlu1 %v10167_v9, %s8977_s15  ;;  %5912 = vrot.lane.b32.xlu0 %v10179_v2, %s8977_s15 }
 0x3e6   : > { %3260 = vmatprep.mubr.f32.mxu1 %v8962_v34  ;;  %3490 = vmatprep.subr.mxu0 %v3477_v49  ;;  %v3658_v36 = vpop.permute.xlu1 %3657  ;;  %v3467_v30 = vpop.permute.xlu0 %3466 }
 0x3e7   : > { %8024 = vmatmul.mubr.msk.f32.gmra.mrb[2].mxu1 %vm1649_vm0, %v8020_v42  ;;  %3183 = vmatprep.mubr.f32.mxu0 %v8962_v34  ;;  %v3476_v24 = vsel %vm1314_vm7, %v3467_v30, %v3469_v62 }
 0x3e8   : > { %8022 = vmatmul.mubr.msk.f32.gmra.mrb[2].mxu0 %vm1649_vm0, %v8020_v42  ;;  %3441 = vmatprep.mubr.f32.mxu1 %v8962_v34  ;;  %v8061_v42 = vld [vmem:[%s11220_s3 + $0xf0] sm:$0xff] }
 0x3e9   : > { %6097 = vrot.lane.b32.xlu1 %v10169_v37, %s8978_s18  ;;  %5914 = vrot.lane.b32.xlu0 %v10240_v17, %s8977_s15  ;;  %v8026_v37 = vld [vmem:[%s11220_s3 + $0x98] sm:$0xff] }
 0x3ea   : > { %3567 = vmatprep.subr.mxu1 %v3479_v28  ;;  %3364 = vmatprep.mubr.f32.mxu0 %v8962_v34  ;;  %v3662_v48 = vpop.permute.xlu1 %3661  ;;  %v3660_v29 = vpop.permute.xlu0 %3659 }
 0x3eb   : > { %8029 = vmatmul.mubr.msk.f32.vlgmr.msra.gmra.mrb[0].mxu1 %vm1649_vm0, %v8025_v50  ;;  %v3666_v12 = vsel %vm1416_vm10, %v3658_v36, %v3660_v29  ;;  %v3667_v56 = vsel %vm1416_vm10, %v3660_v29, %v3662_v48 }
 0x3ec   : > { %3568 = vmatpush1.msra.mxu1 %v3478_v41  ;;  %8027 = vmatmul.mubr.msk.f32.vlgmr.msra.gmra.mrb[0].mxu0 %vm1649_vm0, %v8025_v50  ;;  %v8062_v41 = vld [vmem:[%s11220_s3 + $0xf8] sm:$0xff] }
 0x3ed   : > { %6095 = vrot.lane.b32.xlu1 %v10167_v9, %s8978_s18  ;;  %6099 = vrot.lane.b32.xlu0 %v10179_v2, %s8978_s18  ;;  %v8031_v2 = vld [vmem:[%s11220_s3 + $0xa0] sm:$0xff] }
 0x3ee   : > { %3491 = vmatpush1.msra.mxu0 %v3476_v24  ;;  %3370 = vmatprep.mubr.f32.mxu0 %v8962_v34  ;;  %v3656_v1 = vpop.permute.xlu1 %3655  ;;  %v3664_v39 = vpop.permute.xlu0 %3663 }
 0x3ef   : > { %3447 = vmatprep.mubr.f32.mxu1 %v8962_v34  ;;  %3679 = vmatprep.subr.mxu0 %v3666_v12  ;;  %v3668_v9 = vsel %vm1416_vm10, %v3662_v48, %v3664_v39  ;;  %v3665_v20 = vsel %vm1416_vm10, %v3656_v1, %v3658_v36  ;;  %v8067_v12 = vld [vmem:[%s11220_s3 + $0x100] sm:$0xff]  ;;  %vm5168_vm10 = vcmask 654336  }
 0x3f0   : > { %8028 = vmatmul.mubr.msk.f32.gmra.mrb[2].mxu0 %vm1649_vm0, %v8026_v37  ;;  %8030 = vmatmul.mubr.msk.f32.gmra.mrb[2].mxu1 %vm1649_vm0, %v8026_v37 }
 0x3f1   : > { %6283 = vperm.xlu1 %8883, %v6279_v7   ;;  %6101 = vrot.lane.b32.xlu0 %v10240_v17, %s8978_s18 }
 0x3f2   : > { %3554 = vmatprep.mubr.f32.mxu0 %v8962_v34  ;;  %3631 = vmatprep.mubr.f32.mxu1 %v8962_v34  ;;  %v3849_v47 = vpop.permute.xlu1 %3848  ;;  %v3847_v11 = vpop.permute.xlu0 %3846 }
 0x3f3   : > { %3756 = vmatprep.subr.mxu1 %v3668_v9  ;;  %v3855_v17 = vsel %vm1518_vm14, %v3847_v11, %v3849_v47  ;;  %v8068_v9 = vld [vmem:[%s11220_s3 + $0x108] sm:$0xff] }
 0x3f4   : > { %8033 = vmatmul.mubr.msk.f32.vlgmr.msra.gmra.mrb[0].mxu0 %vm1649_vm0, %v8031_v2  ;;  %8035 = vmatmul.mubr.msk.f32.vlgmr.msra.gmra.mrb[0].mxu1 %vm1649_vm0, %v8031_v2 }
 0x3f5   : > { %6288 = vperm.xlu0 %8884, %v6280_v46   ;;  %3680 = vmatpush1.msra.mxu0 %v3665_v20 }
 0x3f6   : > { %3757 = vmatpush1.msra.mxu1 %v3667_v56  ;;  %3560 = vmatprep.mubr.f32.mxu0 %v8962_v34  ;;  %v3853_v31 = vpop.permute.xlu1 %3852  ;;  %v3851_v58 = vpop.permute.xlu0 %3850  ;;  %v8074_v56 = vld [vmem:[%s11220_s3 + $0x118] sm:$0xff] }
 0x3f7   : > { %3637 = vmatprep.mubr.f32.mxu1 %v8962_v34  ;;  %3868 = vmatprep.subr.mxu0 %v3855_v17  ;;  %v3857_v43 = vsel %vm1518_vm14, %v3851_v58, %v3853_v31  ;;  %v3856_v4 = vsel %vm1518_vm14, %v3849_v47, %v3851_v58  ;;  %v8073_v47 = vld [vmem:[%s11220_s3 + $0x110] sm:$0xff] }
 0x3f8   : > { %8034 = vmatmul.mubr.msk.f32.gmra.mrb[2].mxu0 %vm1649_vm0, %v8032_v32  ;;  %8036 = vmatmul.mubr.msk.f32.gmra.mrb[2].mxu1 %vm1649_vm0, %v8032_v32 }
 0x3f9   : > { %3743 = vmatprep.mubr.f32.mxu0 %v8962_v34  ;;  %3820 = vmatprep.mubr.f32.mxu1 %v8962_v34 }
 0x3fa   : > { %3945 = vmatprep.subr.mxu1 %v3857_v43  ;;  %v4036_v33 = vpop.permute.xlu1 %4035  ;;  %v3845_v63 = vpop.permute.xlu0 %3844 }
 0x3fb   : > { %v3854_v40 = vsel %vm1518_vm14, %v3845_v63, %v3847_v11  ;;  %vm5542_vm14 = vcmask 244736  }
 0x3fc   : > { %8039 = vmatmul.mubr.msk.f32.vlgmr.msra.gmra.mrb[0].mxu0 %vm1649_vm0, %v8037_v3  ;;  %8041 = vmatmul.mubr.msk.f32.vlgmr.msra.gmra.mrb[0].mxu1 %vm1649_vm0, %v8037_v3  ;;  %v8079_v3 = vld [vmem:[%s11220_s3 + $0x120] sm:$0xff] }
 0x3fd   : > { %3946 = vmatpush1.msra.mxu1 %v3856_v4  ;;  %3749 = vmatprep.mubr.f32.mxu0 %v8962_v34 }
 0x3fe   : > { %3826 = vmatprep.mubr.f32.mxu1 %v8962_v34  ;;  %3869 = vmatpush1.msra.mxu0 %v3854_v40  ;;  %v4040_v52 = vpop.permute.xlu1 %4039  ;;  %v4038_v55 = vpop.permute.xlu0 %4037  ;;  %v8080_v40 = vld [vmem:[%s11220_s3 + $0x128] sm:$0xff] }
 0x3ff   : > { %v4045_v15 = vsel %vm4043_vm15, %v4036_v33, %v4038_v55  ;;  %v4046_v19 = vsel %vm4043_vm15, %v4038_v55, %v4040_v52 }
 0x400   : > { %8040 = vmatmul.mubr.msk.f32.gmra.mrb[2].mxu0 %vm1649_vm0, %v8038_v44  ;;  %8042 = vmatmul.mubr.msk.f32.gmra.mrb[2].mxu1 %vm1649_vm0, %v8038_v44 }
 0x401   : > { %3932 = vmatprep.mubr.f32.mxu0 %v8962_v34  ;;  %4009 = vmatprep.mubr.f32.mxu1 %v8962_v34 }
 0x402   : > { %4058 = vmatprep.subr.mxu0 %v4045_v15  ;;  %v4034_v5 = vpop.permute.xlu1 %4033  ;;  %v4042_v21 = vpop.permute.xlu0 %4041 }
 0x403   : > { %v4044_v27 = vsel %vm4043_vm15, %v4034_v5, %v4036_v33  ;;  %v4047_v57 = vsel %vm4043_vm15, %v4040_v52, %v4042_v21  ;;  %vm8979_vm15 = vmmov 1  }
 0x404   : > { %8045 = vmatmul.mubr.msk.f32.vlgmr.msra.gmra.mrb[0].mxu0 %vm1649_vm0, %v8043_v8  ;;  %8047 = vmatmul.mubr.msk.f32.vlgmr.msra.gmra.mrb[0].mxu1 %vm1649_vm0, %v8043_v8  ;;  %v8085_v8 = vld [vmem:[%s11220_s3 + $0x130] sm:$0xff] }
 0x405   : > { %3938 = vmatprep.mubr.f32.mxu0 %v8962_v34  ;;  %4015 = vmatprep.mubr.f32.mxu1 %v8962_v34 }
 0x406   : > { %4059 = vmatpush1.msra.mxu0 %v4044_v27  ;;  %4135 = vmatprep.subr.mxu1 %v4047_v57  ;;  %v4228_v45 = vpop.permute.xlu1 %4227  ;;  %v4226_v25 = vpop.permute.xlu0 %4225  ;;  %v8086_v27 = vld [vmem:[%s11220_s3 + $0x138] sm:$0xff] }
 0x407   : > { %4136 = vmatpush1.msra.mxu1 %v4046_v19  ;;  %v4234_v0 = vsel %vm1649_vm0, %v4226_v25, %v4228_v45 }
 0x408   : > { %8046 = vmatmul.mubr.msk.f32.gmra.mrb[2].mxu0 %vm1649_vm0, %v8044_v35  ;;  %8048 = vmatmul.mubr.msk.f32.gmra.mrb[2].mxu1 %vm1649_vm0, %v8044_v35 }
 0x409   : > { %4122 = vmatprep.mubr.f32.mxu0 %v8962_v34  ;;  %4199 = vmatprep.mubr.f32.mxu1 %v8962_v34 }
 0x40a   : > { %4247 = vmatprep.subr.mxu0 %v4234_v0  ;;  %v4232_v61 = vpop.permute.xlu1 %4231  ;;  %v4230_v26 = vpop.permute.xlu0 %4229 }
 0x40b   : > { %v4236_v14 = vsel %vm1649_vm0, %v4230_v26, %v4232_v61  ;;  %v4235_v6 = vsel %vm1649_vm0, %v4228_v45, %v4230_v26  ;;  %v8092_v61 = vld [vmem:[%s11220_s3 + $0x148] sm:$0xff] }
 0x40c   : > { %8051 = vmatmul.mubr.msk.f32.vlgmr.msra.gmra.mrb[0].mxu0 %vm1649_vm0, %v8049_v10  ;;  %8053 = vmatmul.mubr.msk.f32.vlgmr.msra.gmra.mrb[0].mxu1 %vm1649_vm0, %v8049_v10 }
 0x40d   : > { %4128 = vmatprep.mubr.f32.mxu0 %v8962_v34  ;;  %4205 = vmatprep.mubr.f32.mxu1 %v8962_v34 }
 0x40e   : > { %4324 = vmatprep.subr.mxu1 %v4236_v14  ;;  %v4415_v53 = vpop.permute.xlu1 %4414  ;;  %v4224_v22 = vpop.permute.xlu0 %4223 }
 0x40f   : > { %4325 = vmatpush1.msra.mxu1 %v4235_v6  ;;  %v4233_v54 = vsel %vm1649_vm0, %v4224_v22, %v4226_v25  ;;  %v8091_v25 = vld [vmem:[%s11220_s3 + $0x140] sm:$0xff] }
 0x410   : > { %8052 = vmatmul.mubr.msk.f32.gmra.mrb[2].mxu0 %vm1649_vm0, %v8050_v13  ;;  %8054 = vmatmul.mubr.msk.f32.gmra.mrb[2].mxu1 %vm1649_vm0, %v8050_v13 }
 0x411   : > { %4248 = vmatpush1.msra.mxu0 %v4233_v54  ;;  %4311 = vmatprep.mubr.f32.mxu0 %v8962_v34 }
 0x412   : > { %4388 = vmatprep.mubr.f32.mxu1 %v8962_v34 }
 0x413   : > { %v4413_v38 = vpop.permute.xlu1 %4412  ;;  %v4417_v62 = vpop.permute.xlu0 %4416 }
 0x414   : > { %8057 = vmatmul.mubr.msk.f32.vlgmr.msra.gmra.mrb[0].mxu0 %vm1649_vm0, %v8055_v59  ;;  %8059 = vmatmul.mubr.msk.f32.vlgmr.msra.gmra.mrb[0].mxu1 %vm1649_vm0, %v8055_v59  ;;  %v4421_v23 = vsel %vm4420_vm2, %v4413_v38, %v4415_v53  ;;  %v4422_v18 = vsel %vm4420_vm2, %v4415_v53, %v4417_v62  ;;  %v8097_v53 = vld [vmem:[%s11220_s3 + $0x150] sm:$0xff]  ;;  %v8098_v38 = vld [vmem:[%s11220_s3 + $0x158] sm:$0xff] }
 0x415   : > { %4317 = vmatprep.mubr.f32.mxu0 %v8962_v34  ;;  %4394 = vmatprep.mubr.f32.mxu1 %v8962_v34 }
 0x416   : > { %4434 = vmatprep.subr.mxu0 %v4422_v18 }
 0x417   : > { %4435 = vmatpush1.msra.mxu0 %v4421_v23  ;;  %v4602_v16 = vpop.permute.xlu1 %4601  ;;  %v4419_v51 = vpop.permute.xlu0 %4418 }
 0x418   : > { %8058 = vmatmul.mubr.msk.f32.gmra.mrb[2].mxu0 %vm1649_vm0, %v8056_v60  ;;  %8060 = vmatmul.mubr.msk.f32.gmra.mrb[2].mxu1 %vm1649_vm0, %v8056_v60  ;;  %v4423_v49 = vsel %vm4420_vm2, %v4417_v62, %v4419_v51 }
 0x419   : > { %4511 = vmatprep.subr.mxu1 %v4419_v51  ;;  %4498 = vmatprep.mubr.f32.mxu0 %v8962_v34 }
 0x41a   : > { %4512 = vmatpush1.msra.mxu1 %v4423_v49  ;;  %4575 = vmatprep.mubr.f32.mxu1 %v8962_v34 }
 0x41b   : > { %v4600_v36 = vpop.permute.xlu1 %4599 }
 0x41c   : > { %8063 = vmatmul.mubr.msk.f32.vlgmr.msra.gmra.mrb[0].mxu0 %vm1649_vm0, %v8061_v42  ;;  %8065 = vmatmul.mubr.msk.f32.vlgmr.msra.gmra.mrb[0].mxu1 %vm1649_vm0, %v8061_v42  ;;  %v4608_v30 = vsel %vm4607_vm5, %v4600_v36, %v4602_v16  ;;  %v4604_v28 = vpop.permute.xlu0 %4603  ;;  %v8104_v36 = vld [vmem:[%s11220_s3 + $0x168] sm:$0xff] }
 0x41d   : > { %4504 = vmatprep.mubr.f32.mxu0 %v8962_v34  ;;  %4581 = vmatprep.mubr.f32.mxu1 %v8962_v34  ;;  %v4609_v50 = vsel %vm4607_vm5, %v4602_v16, %v4604_v28  ;;  %v8103_v16 = vld [vmem:[%s11220_s3 + $0x160] sm:$0xff] }
 0x41e   : > { %4621 = vmatprep.subr.mxu0 %v4609_v50 }
 0x41f   : > { %4622 = vmatpush1.msra.mxu0 %v4608_v30  ;;  %v4789_v48 = vpop.permute.xlu1 %4788 }
 0x420   : > { %8064 = vmatmul.mubr.msk.f32.gmra.mrb[2].mxu0 %vm1649_vm0, %v8062_v41  ;;  %8066 = vmatmul.mubr.msk.f32.gmra.mrb[2].mxu1 %vm1649_vm0, %v8062_v41  ;;  %v4606_v29 = vpop.permute.xlu0 %4605 }
 0x421   : > { %v4610_v24 = vsel %vm4607_vm5, %v4604_v28, %v4606_v29  ;;  %4698 = vmatprep.subr.mxu1 %v4606_v29  ;;  %4685 = vmatprep.mubr.f32.mxu0 %v8962_v34 }
 0x422   : > { %4699 = vmatpush1.msra.mxu1 %v4610_v24  ;;  %4762 = vmatprep.mubr.f32.mxu1 %v8962_v34 }
 0x424   : > { %8069 = vmatmul.mubr.msk.f32.vlgmr.msra.gmra.mrb[0].mxu0 %vm1649_vm0, %v8067_v12  ;;  %8071 = vmatmul.mubr.msk.f32.vlgmr.msra.gmra.mrb[0].mxu1 %vm1649_vm0, %v8067_v12  ;;  %v4787_v37 = vpop.permute.xlu1 %4786  ;;  %v4791_v7 = vpop.permute.xlu0 %4790 }
 0x425   : > { %v4795_v1 = vsel %vm4794_vm6, %v4787_v37, %v4789_v48  ;;  %4691 = vmatprep.mubr.f32.mxu0 %v8962_v34  ;;  %4768 = vmatprep.mubr.f32.mxu1 %v8962_v34  ;;  %v4796_v39 = vsel %vm4794_vm6, %v4789_v48, %v4791_v7  ;;  %v8109_v48 = vld [vmem:[%s11220_s3 + $0x170] sm:$0xff]  ;;  %v8110_v37 = vld [vmem:[%s11220_s3 + $0x178] sm:$0xff] }
 0x426   : > { %4808 = vmatprep.subr.mxu0 %v4796_v39 }
 0x427   : > { %4809 = vmatpush1.msra.mxu0 %v4795_v1 }
 0x428   : > { %8070 = vmatmul.mubr.msk.f32.gmra.mrb[2].mxu0 %vm1649_vm0, %v8068_v9  ;;  %8072 = vmatmul.mubr.msk.f32.gmra.mrb[2].mxu1 %vm1649_vm0, %v8068_v9  ;;  %v4976_v2 = vpop.permute.xlu1 %4975  ;;  %v4793_v20 = vpop.permute.xlu0 %4792 }
 0x429   : > { %v4797_v46 = vsel %vm4794_vm6, %v4791_v7, %v4793_v20  ;;  %4885 = vmatprep.subr.mxu1 %v4793_v20  ;;  %4872 = vmatprep.mubr.f32.mxu0 %v8962_v34 }
 0x42a   : > { %4886 = vmatpush1.msra.mxu1 %v4797_v46  ;;  %4949 = vmatprep.mubr.f32.mxu1 %v8962_v34 }
 0x42c   : > { %8075 = vmatmul.mubr.msk.f32.vlgmr.msra.gmra.mrb[0].mxu0 %vm1649_vm0, %v8073_v47  ;;  %8077 = vmatmul.mubr.msk.f32.vlgmr.msra.gmra.mrb[0].mxu1 %vm1649_vm0, %v8073_v47  ;;  %v4974_v11 = vpop.permute.xlu1 %4973  ;;  %v8116_v47 = vld [vmem:[%s11220_s3 + $0x188] sm:$0xff] }
 0x42d   : > { %v4978_v17 = vpop.permute.xlu0 %4977  ;;  %4878 = vmatprep.mubr.f32.mxu0 %v8962_v34  ;;  %4955 = vmatprep.mubr.f32.mxu1 %v8962_v34  ;;  %v4982_v32 = vsel %vm4981_vm8, %v4974_v11, %v4976_v2 }
 0x42e   : > { %v4983_v31 = vsel %vm4981_vm8, %v4976_v2, %v4978_v17  ;;  %v8115_v2 = vld [vmem:[%s11220_s3 + $0x180] sm:$0xff] }
 0x42f   : > { %4995 = vmatprep.subr.mxu0 %v4983_v31 }
 0x430   : > { %8076 = vmatmul.mubr.msk.f32.gmra.mrb[2].mxu0 %vm1649_vm0, %v8074_v56  ;;  %8078 = vmatmul.mubr.msk.f32.gmra.mrb[2].mxu1 %vm1649_vm0, %v8074_v56  ;;  %v5163_v58 = vpop.permute.xlu1 %5162 }
 0x431   : > { %4996 = vmatpush1.msra.mxu0 %v4982_v32  ;;  %v4980_v43 = vpop.permute.xlu0 %4979  ;;  %5059 = vmatprep.mubr.f32.mxu0 %v8962_v34 }
 0x432   : > { %v4984_v4 = vsel %vm4981_vm8, %v4978_v17, %v4980_v43  ;;  %5072 = vmatprep.subr.mxu1 %v4980_v43  ;;  %5136 = vmatprep.mubr.f32.mxu1 %v8962_v34 }
 0x433   : > { %5073 = vmatpush1.msra.mxu1 %v4984_v4 }
 0x434   : > { %8081 = vmatmul.mubr.msk.f32.vlgmr.msra.gmra.mrb[0].mxu0 %vm1649_vm0, %v8079_v3  ;;  %8083 = vmatmul.mubr.msk.f32.vlgmr.msra.gmra.mrb[0].mxu1 %vm1649_vm0, %v8079_v3 }
 0x435   : > { %v5161_v33 = vpop.permute.xlu1 %5160  ;;  %v5165_v63 = vpop.permute.xlu0 %5164  ;;  %5065 = vmatprep.mubr.f32.mxu0 %v8962_v34  ;;  %5142 = vmatprep.mubr.f32.mxu1 %v8962_v34 }
 0x436   : > { %v5169_v44 = vsel %vm5168_vm10, %v5161_v33, %v5163_v58  ;;  %v5170_v52 = vsel %vm5168_vm10, %v5163_v58, %v5165_v63 }
 0x437   : > { %5182 = vmatprep.subr.mxu0 %v5170_v52 }
 0x438   : > { %8082 = vmatmul.mubr.msk.f32.gmra.mrb[2].mxu0 %vm1649_vm0, %v8080_v40  ;;  %8084 = vmatmul.mubr.msk.f32.gmra.mrb[2].mxu1 %vm1649_vm0, %v8080_v40 }
 0x439   : > { %5183 = vmatpush1.msra.mxu0 %v5169_v44  ;;  %v5350_v55 = vpop.permute.xlu1 %5349  ;;  %v5167_v15 = vpop.permute.xlu0 %5166  ;;  %5246 = vmatprep.mubr.f32.mxu0 %v8962_v34 }
 0x43a   : > { %v5171_v5 = vsel %vm5168_vm10, %v5165_v63, %v5167_v15  ;;  %5259 = vmatprep.subr.mxu1 %v5167_v15  ;;  %5323 = vmatprep.mubr.f32.mxu1 %v8962_v34 }
 0x43b   : > { %5260 = vmatpush1.msra.mxu1 %v5171_v5 }
 0x43c   : > { %8087 = vmatmul.mubr.msk.f32.vlgmr.msra.gmra.mrb[0].mxu0 %vm1649_vm0, %v8085_v8  ;;  %8089 = vmatmul.mubr.msk.f32.vlgmr.msra.gmra.mrb[0].mxu1 %vm1649_vm0, %v8085_v8 }
 0x43d   : > { %v5348_v21 = vpop.permute.xlu1 %5347  ;;  %5252 = vmatprep.mubr.f32.mxu0 %v8962_v34  ;;  %5329 = vmatprep.mubr.f32.mxu1 %v8962_v34 }
 0x43e   : > { %v5356_v57 = vsel %vm5355_vm12, %v5348_v21, %v5350_v55  ;;  %v5352_v35 = vpop.permute.xlu0 %5351 }
 0x43f   : > { %v5357_v19 = vsel %vm5355_vm12, %v5350_v55, %v5352_v35 }
 0x440   : > { %5369 = vmatprep.subr.mxu0 %v5357_v19  ;;  %8088 = vmatmul.mubr.msk.f32.gmra.mrb[2].mxu0 %vm1649_vm0, %v8086_v27 }
 0x441   : > { %8090 = vmatmul.mubr.msk.f32.gmra.mrb[2].mxu1 %vm1649_vm0, %v8086_v27  ;;  %5370 = vmatpush1.msra.mxu0 %v5356_v57  ;;  %v5537_v45 = vpop.permute.xlu1 %5536 }
 0x442   : > { %v5354_v0 = vpop.permute.xlu0 %5353  ;;  %5433 = vmatprep.mubr.f32.mxu0 %v8962_v34  ;;  %5510 = vmatprep.mubr.f32.mxu1 %v8962_v34 }
 0x443   : > { %v5358_v10 = vsel %vm5355_vm12, %v5352_v35, %v5354_v0  ;;  %5446 = vmatprep.subr.mxu1 %v5354_v0 }
 0x444   : > { %5447 = vmatpush1.msra.mxu1 %v5358_v10  ;;  %8093 = vmatmul.mubr.msk.f32.vlgmr.msra.gmra.mrb[0].mxu0 %vm1649_vm0, %v8091_v25  ;;  %v6415_v10 = vld [vmem:[%s11222_s5 + $0x80] sm:$0xff] }
 0x445   : > { %8095 = vmatmul.mubr.msk.f32.vlgmr.msra.gmra.mrb[0].mxu1 %vm1649_vm0, %v8091_v25  ;;  %5439 = vmatprep.mubr.f32.mxu0 %v8962_v34 }
 0x446   : > { %v5535_v26 = vpop.permute.xlu1 %5534  ;;  %v5539_v14 = vpop.permute.xlu0 %5538  ;;  %5516 = vmatprep.mubr.f32.mxu1 %v8962_v34 }
 0x447   : > { %v5543_v6 = vsel %vm5542_vm14, %v5535_v26, %v5537_v45  ;;  %v5544_v13 = vsel %vm5542_vm14, %v5537_v45, %v5539_v14 }
 0x448   : > { %5556 = vmatprep.subr.mxu0 %v5544_v13  ;;  %8094 = vmatmul.mubr.msk.f32.gmra.mrb[2].mxu0 %vm1649_vm0, %v8092_v61  ;;  %v6417_v13 = vld [vmem:[%s11222_s5 + $0x90] sm:$0xff] }
 0x449   : > { %8096 = vmatmul.mubr.msk.f32.gmra.mrb[2].mxu1 %vm1649_vm0, %v8092_v61  ;;  %5557 = vmatpush1.msra.mxu0 %v5543_v6  ;;  %v6416_v61 = vld [vmem:[%s11222_s5 + $0x88] sm:$0xff] }
 0x44a   : > { %v5724_v22 = vpop.permute.xlu1 %5723  ;;  %v5541_v54 = vpop.permute.xlu0 %5540  ;;  %5620 = vmatprep.mubr.f32.mxu0 %v8962_v34  ;;  %5697 = vmatprep.mubr.f32.mxu1 %v8962_v34  ;;  %v8440_v26 = vpack.c.bf16 %v6416_v61, %v6415_v10  ;;  %v6400_v6 = vld [vmem:[%s11222_s5 + $0x8] sm:$0xff]  ;;  %v6431_v61 = vld [vmem:[%s11222_s5 + $0x100] sm:$0xff] }
 0x44b   : > { %v5545_v59 = vsel %vm5542_vm14, %v5539_v14, %v5541_v54  ;;  %5633 = vmatprep.subr.mxu1 %v5541_v54  ;;  %v6399_v14 = vld [vmem:[%s11222_s5] sm:$0xff] }
 0x44c   : > { %5634 = vmatpush1.msra.mxu1 %v5545_v59  ;;  %8099 = vmatmul.mubr.msk.f32.vlgmr.msra.gmra.mrb[0].mxu0 %vm1649_vm0, %v8097_v53  ;;  %v8442_v54 = vpack.c.bf16 %v6400_v6, %v6399_v14  ;;  %v6418_v59 = vld [vmem:[%s11222_s5 + $0x98] sm:$0xff] }
 0x44d   : > { %8101 = vmatmul.mubr.msk.f32.vlgmr.msra.gmra.mrb[0].mxu1 %vm1649_vm0, %v8097_v53  ;;  %5626 = vmatprep.mubr.f32.mxu0 %v8962_v34 }
 0x44e   : > { %v5722_v62 = vpop.permute.xlu1 %5721  ;;  %5703 = vmatprep.mubr.f32.mxu1 %v8962_v34 }
 0x44f   : > { %v5730_v23 = vsel %vm5729_vm4, %v5722_v62, %v5724_v22  ;;  %v5726_v18 = vpop.permute.xlu0 %5725  ;;  %v6402_v62 = vld [vmem:[%s11222_s5 + $0x18] sm:$0xff] }
 0x450   : > { %v5731_v60 = vsel %vm5729_vm4, %v5724_v22, %v5726_v18  ;;  %8100 = vmatmul.mubr.msk.f32.gmra.mrb[2].mxu0 %vm1649_vm0, %v8098_v38 }
 0x451   : > { %5743 = vmatprep.subr.mxu0 %v5731_v60  ;;  %8102 = vmatmul.mubr.msk.f32.gmra.mrb[2].mxu1 %vm1649_vm0, %v8098_v38  ;;  %v6401_v38 = vld [vmem:[%s11222_s5 + $0x10] sm:$0xff]  ;;  %v6420_v60 = vld [vmem:[%s11222_s5 + $0xa8] sm:$0xff] }
 0x452   : > { %5744 = vmatpush1.msra.mxu0 %v5730_v23  ;;  %v5911_v51 = vpop.permute.xlu1 %5910  ;;  %5807 = vmatprep.mubr.f32.mxu0 %v8962_v34  ;;  %v8444_v23 = vpack.c.bf16 %v6418_v59, %v6417_v13 }
 0x453   : > { %v5728_v49 = vpop.permute.xlu0 %5727  ;;  %5884 = vmatprep.mubr.f32.mxu1 %v8962_v34 }
 0x454   : > { %v5732_v42 = vsel %vm5729_vm4, %v5726_v18, %v5728_v49  ;;  %5820 = vmatprep.subr.mxu1 %v5728_v49  ;;  %8105 = vmatmul.mubr.msk.f32.vlgmr.msra.gmra.mrb[0].mxu0 %vm1649_vm0, %v8103_v16  ;;  %v6419_v18 = vld [vmem:[%s11222_s5 + $0xa0] sm:$0xff] }
 0x455   : > { %5821 = vmatpush1.msra.mxu1 %v5732_v42  ;;  %5813 = vmatprep.mubr.f32.mxu0 %v8962_v34  ;;  %v6403_v49 = vld [vmem:[%s11222_s5 + $0x20] sm:$0xff]  ;;  %v6404_v42 = vld [vmem:[%s11222_s5 + $0x28] sm:$0xff] }
 0x456   : > { %8107 = vmatmul.mubr.msk.f32.vlgmr.msra.gmra.mrb[0].mxu1 %vm1649_vm0, %v8103_v16  ;;  %v8446_v16 = vpack.c.bf16 %v6402_v62, %v6401_v38 }
 0x457   : > { %v5909_v30 = vpop.permute.xlu1 %5908  ;;  %v5913_v28 = vpop.permute.xlu0 %5912  ;;  %5890 = vmatprep.mubr.f32.mxu1 %v8962_v34 }
 0x458   : > { %v5917_v50 = vsel %vm5916_vm3, %v5909_v30, %v5911_v51  ;;  %v5918_v41 = vsel %vm5916_vm3, %v5911_v51, %v5913_v28  ;;  %8106 = vmatmul.mubr.msk.f32.gmra.mrb[2].mxu0 %vm1649_vm0, %v8104_v36  ;;  %v8448_v51 = vpack.c.bf16 %v6420_v60, %v6419_v18  ;;  %v6422_v30 = vld [vmem:[%s11222_s5 + $0xb8] sm:$0xff] }
 0x459   : > { %5930 = vmatprep.subr.mxu0 %v5918_v41  ;;  %5994 = vmatprep.mubr.f32.mxu0 %v8962_v34  ;;  %v6405_v41 = vld [vmem:[%s11222_s5 + $0x30] sm:$0xff] }
 0x45a   : > { %8108 = vmatmul.mubr.msk.f32.gmra.mrb[2].mxu1 %vm1649_vm0, %v8104_v36  ;;  %5931 = vmatpush1.msra.mxu0 %v5917_v50  ;;  %v6421_v36 = vld [vmem:[%s11222_s5 + $0xb0] sm:$0xff] }
 0x45b   : > { %v6098_v29 = vpop.permute.xlu1 %6097  ;;  %v5915_v24 = vpop.permute.xlu0 %5914  ;;  %6071 = vmatprep.mubr.f32.mxu1 %v8962_v34  ;;  %v8452_v50 = vpack.c.bf16 %v6422_v30, %v6421_v36 }
 0x45c   : > { %v5919_v12 = vsel %vm5916_vm3, %v5913_v28, %v5915_v24  ;;  %6007 = vmatprep.subr.mxu1 %v5915_v24  ;;  %8111 = vmatmul.mubr.msk.f32.vlgmr.msra.gmra.mrb[0].mxu0 %vm1649_vm0, %v8109_v48  ;;  %v8450_v28 = vpack.c.bf16 %v6404_v42, %v6403_v49  ;;  %v6424_v24 = vld [vmem:[%s11222_s5 + $0xc8] sm:$0xff] }
 0x45d   : > { %6008 = vmatpush1.msra.mxu1 %v5919_v12  ;;  %6000 = vmatprep.mubr.f32.mxu0 %v8962_v34 }
 0x45e   : > { %8113 = vmatmul.mubr.msk.f32.vlgmr.msra.gmra.mrb[0].mxu1 %vm1649_vm0, %v8109_v48  ;;  %v6406_v48 = vld [vmem:[%s11222_s5 + $0x38] sm:$0xff] }
 0x45f   : > { %v6096_v7 = vpop.permute.xlu1 %6095  ;;  %v6100_v1 = vpop.permute.xlu0 %6099  ;;  %6077 = vmatprep.mubr.f32.mxu1 %v8962_v34  ;;  %v8454_v12 = vpack.c.bf16 %v6406_v48, %v6405_v41 }
 0x460   : > { %v6104_v39 = vsel %vm6103_vm11, %v6096_v7, %v6098_v29  ;;  %v6105_v9 = vsel %vm6103_vm11, %v6098_v29, %v6100_v1  ;;  %8112 = vmatmul.mubr.msk.f32.gmra.mrb[2].mxu0 %vm1649_vm0, %v8110_v37  ;;  %v6423_v29 = vld [vmem:[%s11222_s5 + $0xc0] sm:$0xff] }
 0x461   : > { %6117 = vmatprep.subr.mxu0 %v6105_v9  ;;  %6181 = vmatprep.mubr.f32.mxu0 %v8962_v34  ;;  %v6407_v7 = vld [vmem:[%s11222_s5 + $0x40] sm:$0xff]  ;;  %v6426_v9 = vld [vmem:[%s11222_s5 + $0xd8] sm:$0xff] }
 0x462   : > { %8114 = vmatmul.mubr.msk.f32.gmra.mrb[2].mxu1 %vm1649_vm0, %v8110_v37  ;;  %6118 = vmatpush1.msra.mxu0 %v6104_v39  ;;  %v8456_v37 = vpack.c.bf16 %v6424_v24, %v6423_v29  ;;  %v6425_v39 = vld [vmem:[%s11222_s5 + $0xd0] sm:$0xff] }
 0x463   : > { %v6102_v20 = vpop.permute.xlu0 %6101  ;;  %6258 = vmatprep.mubr.f32.mxu1 %v8962_v34  ;;  %8441 = vmatprep.subr.bf16.mxu0 %v8440_v26  ;;  %v6432_v26 = vld [vmem:[%s11222_s5 + $0x108] sm:$0xff]  ;;  %v6433_v24 = vld [vmem:[%s11222_s5 + $0x110] sm:$0xff] }
 0x464   : > { %v6106_v46 = vsel %vm6103_vm11, %v6100_v1, %v6102_v20  ;;  %6194 = vmatprep.subr.mxu1 %v6102_v20  ;;  %8117 = vmatmul.mubr.msk.f32.vlgmr.msra.gmra.mrb[0].mxu0 %vm1649_vm0, %v8115_v2  ;;  %v6408_v1 = vld [vmem:[%s11222_s5 + $0x48] sm:$0xff]  ;;  %v8460_v20 = vpack.c.bf16 %v6426_v9, %v6425_v39  ;;  %v8472_v13 = vpack.c.bf16 %v6432_v26, %v6431_v61 }
 0x465   : > { %6195 = vmatpush1.msra.mxu1 %v6106_v46  ;;  %6187 = vmatprep.mubr.f32.mxu0 %v8962_v34  ;;  %v6409_v46 = vld [vmem:[%s11222_s5 + $0x50] sm:$0xff]  ;;  %v6436_v39 = vld [vmem:[%s11222_s5 + $0x128] sm:$0xff] }
 0x466   : > { %8119 = vmatmul.mubr.msk.f32.vlgmr.msra.gmra.mrb[0].mxu1 %vm1649_vm0, %v8115_v2  ;;  %8443 = vmatpush3.bf16.msra.mxu0 %v8442_v54  ;;  %v8458_v2 = vpack.c.bf16 %v6408_v1, %v6407_v7  ;;  %v6435_v1 = vld [vmem:[%s11222_s5 + $0x120] sm:$0xff] }
 0x467   : > { %6264 = vmatprep.mubr.f32.mxu1 %v8962_v34  ;;  %8445 = vmatprep.subr.bf16.mxu0 %v8444_v23 }
 0x468   : > { %8118 = vmatmul.mubr.msk.f32.gmra.mrb[2].mxu0 %vm1649_vm0, %v8116_v47 }
 0x46a   : > { %8120 = vmatmul.mubr.msk.f32.gmra.mrb[2].mxu1 %vm1649_vm0, %v8116_v47  ;;  %8447 = vmatpush3.bf16.msra.mxu0 %v8446_v16  ;;  %v6410_v47 = vld [vmem:[%s11222_s5 + $0x58] sm:$0xff]  ;;  %vm6450_vm0 = vcmask 1044480  }
 0x46b   : > { %8449 = vmatprep.subr.bf16.mxu0 %v8448_v51  ;;  %vm8493_vm2 = vmpackc.low %vm6450_vm0, %vm8979_vm15 }
 0x46e   : > { %8451 = vmatpush3.bf16.msra.mxu0 %v8450_v28 }
 0x46f   : > { %8453 = vmatprep.subr.bf16.mxu0 %v8452_v50 }
 0x470   : > { %v6284_v11 = vpop.permute.xlu1 %6283 }
 0x472   : > { %8455 = vmatpush3.bf16.msra.mxu0 %v8454_v12 }
 0x473   : > { %8457 = vmatprep.subr.bf16.mxu0 %v8456_v37 }
 0x474   : > { %v6289_v33 = vpop.permute.xlu0 %6288 }
 0x476   : > { %8459 = vmatpush3.bf16.msra.mxu0 %v8458_v2 }
 0x477   : > { %8461 = vmatprep.subr.bf16.mxu0 %v8460_v20 }
 0x537   : > { %v6183_v17 = vpop.f32.mrb[0].mxu0 }
 0x538   : > { %v10773_v56 = vadd.f32 %v6284_v11, %v6183_v17  ;;  %v6185_v32 = vpop.f32.mrb[1].mxu0  ;;  %v6428_v17 = vld [vmem:[%s11222_s5 + $0xe8] sm:$0xff] }
 0x539   : > { %v6260_v31 = vpop.f32.mrb[0].mxu1  ;;  %v10775_v58 = vadd.f32 %v6284_v11, %v6185_v32  ;;  %v8462_v32 = vpack.c.bf16 %v6410_v47, %v6409_v46 }
 0x53a   : > { %v6299_v43 = vmax.f32 %v10773_v56, 0.0  ;;  %v6293_v3 = vadd.f32 %v6284_v11, %v6260_v31  ;;  %v6262_v4 = vpop.f32.mrb[1].mxu1 }
 0x53b   : > { %v6300_v63 = vmax.f32 %v10775_v58, 0.0  ;;  %v6189_v40 = vpop.f32.mrb[2].mxu0  ;;  %v10787_v8 = vadd.f32 %v6284_v11, %v6262_v4  ;;  %v6427_v11 = vld [vmem:[%s11222_s5 + $0xe0] sm:$0xff]  ;;  %v6412_v4 = vld [vmem:[%s11222_s5 + $0x68] sm:$0xff]  ;;  %8463 = vmatpush3.bf16.msra.mxu0 %v8462_v32 }
 0x53c   : > { %v10779_v44 = vmax.f32 %v6293_v3, 0.0  ;;  %v10781_v52 = vadd.f32 %v6289_v33, %v6189_v40  ;;  %v6191_v55 = vpop.f32.mrb[3].mxu0  ;;  %v8464_v31 = vpack.c.bf16 %v6428_v17, %v6427_v11  ;;  %v6411_v3 = vld [vmem:[%s11222_s5 + $0x60] sm:$0xff]  ;;  %v6429_v40 = vld [vmem:[%s11222_s5 + $0xf0] sm:$0xff]  ;;  %v8480_v11 = vpack.c.bf16 %v6436_v39, %v6435_v1 }
 0x53d   : > { %v8885_v15 = vpack.i.bf16 %v6299_v43, %v6300_v63  ;;  %v6266_v5 = vpop.f32.mrb[2].mxu1  ;;  %v10789_v21 = vadd.f32 %v6289_v33, %v6191_v55  ;;  %v6302_v19 = vmax.f32 %v10787_v8, 0.0  ;;  %v6430_v55 = vld [vmem:[%s11222_s5 + $0xf8] sm:$0xff] }
 0x53e   : > { %v6303_v27 = vmax.f32 %v10781_v52, 0.0  ;;  %6317 = vrot.lane.b32.xlu0 %v10779_v44, %s8939_s22  ;;  %v6268_v57 = vpop.f32.mrb[3].mxu1  ;;  %v6297_v45 = vadd.f32 %v6289_v33, %v6266_v5  ;;  %8465 = vmatprep.subr.bf16.mxu0 %v8464_v31  ;;  %v6413_v5 = vld [vmem:[%s11222_s5 + $0x70] sm:$0xff] }
 0x53f   : > { %v6304_v35 = vmax.f32 %v10789_v21, 0.0  ;;  %8886 = vrot.lane.b32.xlu1 %v8885_v15, %s8939_s22  ;;  %v10801_v0 = vadd.f32 %v6289_v33, %v6268_v57  ;;  %v8466_v33 = vpack.c.bf16 %v6412_v4, %v6411_v3  ;;  %v8468_v15 = vpack.c.bf16 %v6430_v55, %v6429_v40  ;;  %v6414_v57 = vld [vmem:[%s11222_s5 + $0x78] sm:$0xff]  ;;  %v6437_v4 = vld [vmem:[%s11222_s5 + $0x130] sm:$0xff] }
 0x540   : > { %v10822_v53 = vmax.f32 %v6297_v45, 0.0  ;;  %v8470_v45 = vpack.c.bf16 %v6414_v57, %v6413_v5  ;;  %v6440_v5 = vld [vmem:[%s11222_s5 + $0x148] sm:$0xff] }
 0x541   : > { %v8890_v25 = vpack.i.bf16 %v6303_v27, %v6304_v35  ;;  %v6306_v22 = vmax.f32 %v10801_v0, 0.0  ;;  %8467 = vmatpush3.bf16.msra.mxu0 %v8466_v33  ;;  %v6434_v0 = vld [vmem:[%s11222_s5 + $0x118] sm:$0xff] }
 0x542   : > { %8469 = vmatprep.subr.bf16.mxu0 %v8468_v15  ;;  %v8476_v37 = vpack.c.bf16 %v6434_v0, %v6433_v24  ;;  %v6438_v33 = vld [vmem:[%s11222_s5 + $0x138] sm:$0xff]  ;;  %v6439_v15 = vld [vmem:[%s11222_s5 + $0x140] sm:$0xff] }
 0x543   : > { %6343 = vrot.lane.b32.xlu1 %v6302_v19, %s8939_s22  ;;  %8891 = vrot.lane.b32.xlu0 %v8890_v25, %s8939_s22  ;;  %v8488_v57 = vpack.c.bf16 %v6440_v5, %v6439_v15  ;;  %v8149_v5 = vld [vmem:[%s11223_s6 + $0x90] sm:$0xff] }
 0x545   : > { %8471 = vmatpush3.bf16.msra.mxu0 %v8470_v45  ;;  %v6441_v45 = vld [vmem:[%s11222_s5 + $0x150] sm:$0xff] }
 0x546   : > { %8473 = vmatprep.subr.bf16.mxu0 %v8472_v13 }
 0x547   : > { %6323 = vrot.lane.b32.xlu1 %v10822_v53, %s8939_s22  ;;  %6345 = vrot.lane.b32.xlu0 %v6306_v22, %s8939_s22 }
 0x5b0   : > { %v10911_v25 = vpop.permute.xlu0 %6317 }
 0x5b1   : > { %v8887_v10 = vpop.permute.xlu1 %8886  ;;  %v6337_v17 = vmax.f32 %v10779_v44, %v10911_v25 }
 0x5b2   : > { %v8889_v14 = vunpack.i.h.bf16 %v8887_v10  ;;  %v8888_v6 = vunpack.i.l.bf16 %v8887_v10 }
 0x5b4   : > { %v6325_v54 = vsel %vm477_vm1, %v8889_v14, %v8888_v6  ;;  %v6326_v59 = vsel %vm477_vm1, %v8888_v6, %v10911_v25 }
 0x5b5   : > { %v6335_v38 = vmax.f32 %v6299_v43, %v6325_v54  ;;  %v6336_v62 = vmax.f32 %v6300_v63, %v6326_v59  ;;  %v6344_v23 = vpop.permute.xlu1 %6343  ;;  %v8892_v18 = vpop.permute.xlu0 %8891  ;;  %v6606_v54 = vld [vmem:[%s11223_s6 + $0x8] sm:$0xff]  ;;  %v8980_v59 = vmov 0.0|0.0  }
 0x5b6   : > { %v6347_v60 = vsel %vm477_vm1, %v10911_v25, %v6344_v23  ;;  %v8894_v16 = vunpack.i.h.bf16 %v8892_v18  ;;  %v8893_v51 = vunpack.i.l.bf16 %v8892_v18  ;;  %v6354_v29 = vmax.f32 %v6302_v19, %v6344_v23  ;;  %v6442_v25 = vld [vmem:[%s11222_s5 + $0x158] sm:$0x1f]  ;;  %8498 = vmatprep.subr.bf16.mxu1 %v8980_v59 }
 0x5b7   : > { %v6353_v49 = vmax.f32 %v10779_v44, %v6347_v60  ;;  %v8895_v42 = vpack.i.bf16 %v6335_v38, %v6336_v62  ;;  %v8484_v44 = vpack.c.bf16 %v6438_v33, %v6437_v4  ;;  %v8492_v10 = vpack.c.bf16 %v6442_v25, %v6441_v45  ;;  %v8152_v25 = vld [vmem:[%s11223_s6 + $0xa0] sm:$0xff] }
 0x5b8   : > { %v6327_v36 = vsel %vm477_vm1, %v8894_v16, %v8893_v51 }
 0x5b9   : > { %v10930_v30 = vpop.permute.xlu1 %6323  ;;  %6369 = vrot.lane.b32.xlu0 %v6353_v49, %s8947_s30  ;;  %8896 = vrot.lane.b32.xlu1 %v8895_v42, %s8947_s30  ;;  %v6346_v56 = vpop.permute.xlu0 %6345  ;;  %v6338_v63 = vmax.f32 %v6303_v27, %v6327_v36  ;;  %v7838_v49 = vld [vmem:[%s11225_s8 + $0x8] sm:$0xff]  ;;  %v7839_v42 = vld [vmem:[%s11225_s8 + $0x10] sm:$0xff] }
 0x5ba   : > { %v6328_v58 = vsel %vm477_vm1, %v8893_v51, %v10930_v30  ;;  %v6348_v43 = vsel %vm477_vm1, %v10930_v30, %v6346_v56  ;;  %v6356_v48 = vmax.f32 %v6306_v22, %v6346_v56  ;;  %vm6443_vm1 = vcmask 760832   ;;  %v7837_v51 = vld [vmem:[%s11225_s8] sm:$0xff]  ;;  %v8125_v56 = vld [vmem:[%s11223_s6 + $0x10] sm:$0xff] }
 0x5bb   : > { %v6339_v28 = vmax.f32 %v6304_v35, %v6328_v58  ;;  %v6355_v50 = vmax.f32 %v10822_v53, %v6348_v43  ;;  %v6340_v14 = vmax.f32 %v10822_v53, %v10930_v30  ;;  %v8547_v36 = vpack.c.bf16 %v7838_v49, %v7837_v51  ;;  %v7840_v30 = vld [vmem:[%s11225_s8 + $0x18] sm:$0xff]  ;;  %v8164_v49 = vld [vmem:[%s11223_s6 + $0xe0] sm:$0xff] }
 0x5bc   : > { %v8126_v58 = vld [vmem:[%s11223_s6 + $0x18] sm:$0xff]  ;;  %v8550_v43 = vpack.c.bf16 %v7840_v30, %v7839_v42  ;;  %v8165_v42 = vld [vmem:[%s11223_s6 + $0xe8] sm:$0xff] }
 0x5bd   : > { %v8900_v41 = vpack.i.bf16 %v6338_v63, %v6339_v28  ;;  %6377 = vrot.lane.b32.xlu0 %v6355_v50, %s8947_s30  ;;  %v7842_v50 = vld [vmem:[%s11225_s8 + $0x28] sm:$0xff] }
 0x5bf   : > { %8901 = vrot.lane.b32.xlu1 %v8900_v41, %s8947_s30 }
 0x5c1   : > { %6379 = vrot.lane.b32.xlu0 %v6356_v48, %s8947_s30 }
 0x5c3   : > { %6371 = vrot.lane.b32.xlu1 %v6354_v29, %s8947_s30  ;;  %v8502_v29 = vpack.c.bf16 %v8126_v58, %v8125_v56  ;;  %v8167_v56 = vld [vmem:[%s11223_s6 + $0xf0] sm:$0xff]  ;;  %v8168_v58 = vld [vmem:[%s11223_s6 + $0xf8] sm:$0xff] }
 0x62b   : > { %v8897_v52 = vpop.permute.xlu1 %8896  ;;  %v6370_v35 = vpop.permute.xlu0 %6369 }
 0x62c   : > { %v8899_v21 = vunpack.i.h.bf16 %v8897_v52  ;;  %v8898_v27 = vunpack.i.l.bf16 %v8897_v52 }
 0x62e   : > { %v6381_v22 = vsel %vm845_vm9, %v8899_v21, %v8898_v27  ;;  %v6382_v8 = vsel %vm845_vm9, %v8898_v27, %v6370_v35  ;;  %v8128_v27 = vld [vmem:[%s11223_s6 + $0x20] sm:$0xff] }
 0x62f   : > { %v6393_v19 = vmax.f32 %v6335_v38, %v6381_v22  ;;  %v6394_v12 = vmax.f32 %v6336_v62, %v6382_v8  ;;  %v6378_v20 = vpop.permute.xlu0 %6377  ;;  %v8131_v22 = vld [vmem:[%s11223_s6 + $0x30] sm:$0xff]  ;;  %v8132_v8 = vld [vmem:[%s11223_s6 + $0x38] sm:$0xff] }
 0x631   : > { %6518 = vmatprep.mubr.f32.mxu0 %v6394_v12  ;;  %v8902_v7 = vpop.permute.xlu1 %8901 }
 0x632   : > { %v8904_v9 = vunpack.i.h.bf16 %v8902_v7  ;;  %v8903_v2 = vunpack.i.l.bf16 %v8902_v7  ;;  %6519 = vmatmul.mubr.f32.vlgmr.msra.gmra.mrb[4].mxu0 %v6393_v19  ;;  %v8508_v19 = vpack.c.bf16 %v8132_v8, %v8131_v22  ;;  %v8135_v7 = vld [vmem:[%s11223_s6 + $0x48] sm:$0xff] }
 0x633   : > { %8475 = vmatpush3.bf16.msra.mxu0 %v8472_v13  ;;  %v6380_v61 = vpop.permute.xlu0 %6379  ;;  %v6605_v13 = vld [vmem:[%s11223_s6] sm:$0xff] }
 0x634   : > { %8477 = vmatprep.subr.bf16.mxu0 %v8476_v37  ;;  %v6385_v46 = vsel %vm845_vm9, %v8903_v2, %v6378_v20  ;;  %v6384_v47 = vsel %vm845_vm9, %v8904_v9, %v8903_v2  ;;  %v6386_v26 = vsel %vm845_vm9, %v6378_v20, %v6380_v61  ;;  %v8499_v38 = vpack.c.bf16 %v6606_v54, %v6605_v13  ;;  %v8137_v9 = vld [vmem:[%s11223_s6 + $0x50] sm:$0xff]  ;;  %v8138_v2 = vld [vmem:[%s11223_s6 + $0x58] sm:$0xff] }
 0x635   : > { %v6372_v32 = vpop.permute.xlu1 %6371  ;;  %v6397_v31 = vmax.f32 %v6339_v28, %v6385_v46  ;;  %v6396_v3 = vmax.f32 %v6338_v63, %v6384_v47  ;;  %v6398_v6 = vmax.f32 %v6340_v14, %v6386_v26  ;;  %v7841_v28 = vld [vmem:[%s11225_s8 + $0x20] sm:$0xff]  ;;  %v8514_v20 = vpack.c.bf16 %v8138_v2, %v8137_v9  ;;  %v8155_v14 = vld [vmem:[%s11223_s6 + $0xb0] sm:$0xff] }
 0x636   : > { %v6383_v40 = vsel %vm845_vm9, %v6370_v35, %v6372_v32  ;;  %vm8981_vm9 = vmmov 0   ;;  %8500 = vmatpush3.bf16.msra.mxu1 %v8499_v38  ;;  %v8553_v21 = vpack.c.bf16 %v7842_v50, %v7841_v28  ;;  %v8129_v35 = vld [vmem:[%s11223_s6 + $0x28] sm:$0xff]  ;;  %v8140_v47 = vld [vmem:[%s11223_s6 + $0x60] sm:$0xff]  ;;  %v7843_v28 = vld [vmem:[%s11225_s8 + $0x30] sm:$0xff] }
 0x637   : > { %v6395_v55 = vmax.f32 %v6337_v17, %v6383_v40  ;;  %8479 = vmatpush3.bf16.msra.mxu0 %v8476_v37  ;;  %6523 = vmatprep.mubr.f32.mxu0 %v6397_v31  ;;  %v8505_v24 = vpack.c.bf16 %v8129_v35, %v8128_v27  ;;  %v8134_v37 = vld [vmem:[%s11223_s6 + $0x40] sm:$0xff]  ;;  %v8143_v31 = vld [vmem:[%s11223_s6 + $0x70] sm:$0xff]  ;;  %v7844_v50 = vld [vmem:[%s11225_s8 + $0x38] sm:$0xff] }
 0x638   : > { %6524 = vmatmul.mubr.f32.gmra.mrb[6].mxu0 %v6396_v3  ;;  %8481 = vmatprep.subr.bf16.mxu0 %v8480_v11  ;;  %v8511_v1 = vpack.c.bf16 %v8135_v7, %v8134_v37  ;;  %v8144_v3 = vld [vmem:[%s11223_s6 + $0x78] sm:$0xff]  ;;  %v8146_v40 = vld [vmem:[%s11223_s6 + $0x80] sm:$0xff] }
 0x639   : > { %8306 = vmatprep.mubr.msk.f32.mxu0 %vm6443_vm1, %v6395_v55  ;;  %8313 = vmatprep.mubr.msk.f32.mxu1 %vm8981_vm9, %v8962_v34  ;;  %v8520_v4 = vpack.c.bf16 %v8144_v3, %v8143_v31  ;;  %v8147_v55 = vld [vmem:[%s11223_s6 + $0x88] sm:$0xff]  ;;  %v8158_v38 = vld [vmem:[%s11223_s6 + $0xc0] sm:$0xff] }
 0x63a   : > { %8501 = vmatprep.subr.bf16.mxu1 %v8980_v59  ;;  %v7845_v27 = vld [vmem:[%s11226_s9] sm:$0x1] }
 0x63b   : > { %8483 = vmatpush3.bf16.msra.mxu0 %v8480_v11  ;;  %v8141_v11 = vld [vmem:[%s11223_s6 + $0x68] sm:$0xff] }
 0x63c   : > { %8485 = vmatprep.subr.bf16.mxu0 %v8484_v44  ;;  %v8517_v17 = vpack.c.bf16 %v8141_v11, %v8140_v47 }
 0x63f   : > { %8487 = vmatpush3.bf16.msra.mxu0 %v8484_v44  ;;  %v8523_v44 = vpack.c.bf16 %v8147_v55, %v8146_v40 }
 0x640   : > { %8489 = vmatprep.subr.bf16.mxu0 %v8488_v57 }
 0x643   : > { %8491 = vmatpush3.bf16.msra.mxu0 %v8488_v57  ;;  %v8150_v57 = vld [vmem:[%s11223_s6 + $0x98] sm:$0xff] }
 0x644   : > { %8494 = vmatprep.subr.msk.bf16.mxu0 %vm8493_vm2, %v8492_v10  ;;  %v8526_v45 = vpack.c.bf16 %v8150_v57, %v8149_v5 }
 0x647   : > { %8497 = vmatpush3.bf16.msk.msra.mxu0 %vm8493_vm2, %v8492_v10  ;;  %v8153_v10 = vld [vmem:[%s11223_s6 + $0xa8] sm:$0xff] }
 0x648   : > { %8546 = vmatprep.subr.bf16.mxu0 %v8980_v59  ;;  %v8529_v61 = vpack.c.bf16 %v8153_v10, %v8152_v25 }
 0x64a   : > { %8307 = vmatmul.mubr.msk.f32.vlgmr.msra.gmra.mrb[8].mxu0 %vm6443_vm1, %v6398_v6  ;;  %v8156_v6 = vld [vmem:[%s11223_s6 + $0xb8] sm:$0xff] }
 0x64b   : > { %8437 = vmatprep.mubr.msk.f32.mxu0 %vm8981_vm9, %v8962_v34  ;;  %8548 = vmatpush3.bf16.msra.mxu0 %v8547_v36  ;;  %v8532_v13 = vpack.c.bf16 %v8156_v6, %v8155_v14  ;;  %v8541_v36 = vpack.c.bf16 %v8165_v42, %v8164_v49 }
 0x64c   : > { %8549 = vmatprep.subr.bf16.mxu0 %v8980_v59 }
 0x64f   : > { %8551 = vmatpush3.bf16.msra.mxu0 %v8550_v43  ;;  %v8544_v43 = vpack.c.bf16 %v8168_v58, %v8167_v56 }
 0x650   : > { %8552 = vmatprep.subr.bf16.mxu0 %v8980_v59 }
 0x653   : > { %8554 = vmatpush3.bf16.msra.mxu0 %v8553_v21 }
 0x654   : > { %8555 = vmatprep.subr.bf16.mxu0 %v8980_v59 }
 0x705   : > { %v8205_v53 = vpop.f32.mrb[4].mxu0 }
 0x706   : > { %v8206_v62 = vpop.f32.mrb[5].mxu0 }
 0x707   : > { %v8207_v23 = vadd.f32 %v8206_v62, %v8205_v53  ;;  %v8159_v53 = vld [vmem:[%s11223_s6 + $0xc8] sm:$0xff] }
 0x708   : > { %v8535_v62 = vpack.c.bf16 %v8159_v53, %v8158_v38 }
 0x70b   : > { %v8208_v18 = vpop.f32.mrb[6].mxu0 }
 0x70c   : > { %v8209_v60 = vpop.f32.mrb[7].mxu0 }
 0x70d   : > { %v8210_v16 = vadd.f32 %v8209_v60, %v8208_v18  ;;  %v8161_v18 = vld [vmem:[%s11223_s6 + $0xd0] sm:$0xff]  ;;  %v8162_v60 = vld [vmem:[%s11223_s6 + $0xd8] sm:$0xff] }
 0x71d   : > { %v8308_v63 = vpop.f32.mrb[8].mxu0 }
 0x71e   : > { %v11031_v41 = vadd.f32 %v8308_v63, %v8210_v16  ;;  %v6595_v48 = vpop.f32.mrb[9].mxu0  ;;  %v8538_v16 = vpack.c.bf16 %v8162_v60, %v8161_v18 }
 0x71f   : > { %v11033_v52 = vadd.f32 %v8207_v23, %v6595_v48  ;;  %v8556_v48 = vpack.c.bf16 %v7844_v50, %v7843_v28 }
 0x720   : > { %v7300_v26 = vrot.slane %v11031_v41, 1  ;;  %v7377_v54 = vrot.slane %v11031_v41, 2  ;;  %v7454_v23 = vrot.slane %v11031_v41, 3  ;;  %v7531_v51 = vrot.slane %v11031_v41, 4 }
 0x721   : > { %8314 = vmatmul.mubr.msk.f32.vlgmr.msra.gmra.mrb[4].mxu1 %vm1314_vm7, %v11033_v52  ;;  %v6684_v0 = vrot.slane %v11033_v52, 1  ;;  %v6761_v12 = vrot.slane %v11033_v52, 2  ;;  %v6838_v39 = vrot.slane %v11033_v52, 3  ;;  %v6915_v46 = vrot.slane %v11033_v52, 4  ;;  %8557 = vmatpush3.bf16.msra.mxu0 %v8556_v48 }
 0x722   : > { %8503 = vmatpush3.bf16.msra.mxu1 %v8502_v29  ;;  %8320 = vmatprep.mubr.msk.f32.mxu1 %vm8981_vm9, %v8962_v34  ;;  %v6992_v32 = vrot.slane %v11033_v52, 5  ;;  %v7069_v33 = vrot.slane %v11033_v52, 6  ;;  %v7146_v15 = vrot.slane %v11033_v52, 7  ;;  %v7608_v30 = vrot.slane %v11031_v41, 5  ;;  %v6604_v29 = vld [vmem:[%s11224_s7] sm:$0x1] }
 0x723   : > { %8504 = vmatprep.subr.bf16.mxu1 %v8980_v59  ;;  %v7685_v63 = vrot.slane %v11031_v41, 6 }
 0x729   : > { %8321 = vmatmul.mubr.msk.f32.vlgmr.msra.gmra.mrb[4].mxu1 %vm1314_vm7, %v6684_v0 }
 0x72a   : > { %8506 = vmatpush3.bf16.msra.mxu1 %v8505_v24  ;;  %8327 = vmatprep.mubr.msk.f32.mxu1 %vm8981_vm9, %v8962_v34 }
 0x72b   : > { %8507 = vmatprep.subr.bf16.mxu1 %v8980_v59 }
 0x731   : > { %8328 = vmatmul.mubr.msk.f32.vlgmr.msra.gmra.mrb[4].mxu1 %vm1314_vm7, %v6761_v12 }
 0x732   : > { %8509 = vmatpush3.bf16.msra.mxu1 %v8508_v19  ;;  %8334 = vmatprep.mubr.msk.f32.mxu1 %vm8981_vm9, %v8962_v34 }
 0x733   : > { %8510 = vmatprep.subr.bf16.mxu1 %v8980_v59 }
 0x739   : > { %8335 = vmatmul.mubr.msk.f32.vlgmr.msra.gmra.mrb[4].mxu1 %vm1314_vm7, %v6838_v39 }
 0x73a   : > { %8512 = vmatpush3.bf16.msra.mxu1 %v8511_v1  ;;  %8341 = vmatprep.mubr.msk.f32.mxu1 %vm8981_vm9, %v8962_v34 }
 0x73b   : > { %8513 = vmatprep.subr.bf16.mxu1 %v8980_v59 }
 0x741   : > { %8342 = vmatmul.mubr.msk.f32.vlgmr.msra.gmra.mrb[4].mxu1 %vm1314_vm7, %v6915_v46 }
 0x742   : > { %8515 = vmatpush3.bf16.msra.mxu1 %v8514_v20  ;;  %8348 = vmatprep.mubr.msk.f32.mxu1 %vm8981_vm9, %v8962_v34 }
 0x743   : > { %8516 = vmatprep.subr.bf16.mxu1 %v8980_v59 }
 0x749   : > { %8349 = vmatmul.mubr.msk.f32.vlgmr.msra.gmra.mrb[4].mxu1 %vm1314_vm7, %v6992_v32 }
 0x74a   : > { %8518 = vmatpush3.bf16.msra.mxu1 %v8517_v17  ;;  %8355 = vmatprep.mubr.msk.f32.mxu1 %vm8981_vm9, %v8962_v34 }
 0x74b   : > { %8519 = vmatprep.subr.bf16.mxu1 %v8980_v59 }
 0x751   : > { %8356 = vmatmul.mubr.msk.f32.vlgmr.msra.gmra.mrb[4].mxu1 %vm1314_vm7, %v7069_v33 }
 0x752   : > { %8521 = vmatpush3.bf16.msra.mxu1 %v8520_v4  ;;  %8362 = vmatprep.mubr.msk.f32.mxu1 %vm8981_vm9, %v8962_v34 }
 0x753   : > { %8522 = vmatprep.subr.bf16.mxu1 %v8980_v59 }
 0x759   : > { %8363 = vmatmul.mubr.msk.f32.vlgmr.msra.gmra.mrb[4].mxu1 %vm1314_vm7, %v7146_v15 }
 0x75a   : > { %8524 = vmatpush3.bf16.msra.mxu1 %v8523_v44  ;;  %8369 = vmatprep.mubr.msk.f32.mxu1 %vm8981_vm9, %v8962_v34 }
 0x75b   : > { %8525 = vmatprep.subr.bf16.mxu1 %v8980_v59 }
 0x761   : > { %8370 = vmatmul.mubr.msk.f32.vlgmr.msra.gmra.mrb[4].mxu1 %vm1314_vm7, %v11031_v41 }
 0x762   : > { %8527 = vmatpush3.bf16.msra.mxu1 %v8526_v45  ;;  %8376 = vmatprep.mubr.msk.f32.mxu1 %vm8981_vm9, %v8962_v34 }
 0x763   : > { %8528 = vmatprep.subr.bf16.mxu1 %v8980_v59 }
 0x769   : > { %8377 = vmatmul.mubr.msk.f32.vlgmr.msra.gmra.mrb[4].mxu1 %vm1314_vm7, %v7300_v26 }
 0x76a   : > { %8530 = vmatpush3.bf16.msra.mxu1 %v8529_v61  ;;  %8383 = vmatprep.mubr.msk.f32.mxu1 %vm8981_vm9, %v8962_v34 }
 0x76b   : > { %8531 = vmatprep.subr.bf16.mxu1 %v8980_v59 }
 0x771   : > { %8384 = vmatmul.mubr.msk.f32.vlgmr.msra.gmra.mrb[4].mxu1 %vm1314_vm7, %v7377_v54 }
 0x772   : > { %8533 = vmatpush3.bf16.msra.mxu1 %v8532_v13  ;;  %8390 = vmatprep.mubr.msk.f32.mxu1 %vm8981_vm9, %v8962_v34 }
 0x773   : > { %8534 = vmatprep.subr.bf16.mxu1 %v8980_v59 }
 0x779   : > { %8391 = vmatmul.mubr.msk.f32.vlgmr.msra.gmra.mrb[4].mxu1 %vm1314_vm7, %v7454_v23 }
 0x77a   : > { %8536 = vmatpush3.bf16.msra.mxu1 %v8535_v62  ;;  %8397 = vmatprep.mubr.msk.f32.mxu1 %vm8981_vm9, %v8962_v34 }
 0x77b   : > { %8537 = vmatprep.subr.bf16.mxu1 %v8980_v59 }
 0x781   : > { %8398 = vmatmul.mubr.msk.f32.vlgmr.msra.gmra.mrb[4].mxu1 %vm1314_vm7, %v7531_v51 }
 0x782   : > { %8539 = vmatpush3.bf16.msra.mxu1 %v8538_v16  ;;  %8404 = vmatprep.mubr.msk.f32.mxu1 %vm8981_vm9, %v8962_v34 }
 0x783   : > { %8540 = vmatprep.subr.bf16.mxu1 %v8980_v59 }
 0x789   : > { %8405 = vmatmul.mubr.msk.f32.vlgmr.msra.gmra.mrb[4].mxu1 %vm1314_vm7, %v7608_v30 }
 0x78a   : > { %8542 = vmatpush3.bf16.msra.mxu1 %v8541_v36  ;;  %8411 = vmatprep.mubr.msk.f32.mxu1 %vm8981_vm9, %v8962_v34 }
 0x78b   : > { %8543 = vmatprep.subr.bf16.mxu1 %v8980_v59  ;;  %v7762_v59 = vrot.slane %v11031_v41, 7 }
 0x791   : > { %8412 = vmatmul.mubr.msk.f32.vlgmr.msra.gmra.mrb[4].mxu1 %vm1314_vm7, %v7685_v63 }
 0x792   : > { %8545 = vmatpush3.bf16.msra.mxu1 %v8544_v43  ;;  %8418 = vmatprep.mubr.msk.f32.mxu1 %vm8981_vm9, %v8962_v34 }
 0x799   : > { %8419 = vmatmul.mubr.msk.f32.vlgmr.msra.gmra.mrb[4].mxu1 %vm1314_vm7, %v7762_v59  ;;  %vm7919_vm7 = vcmask 40960  }
 0x86c   : > { %v7831_v52 = vpop.f32.mrb[4].mxu1 }
 0x86d   : > { %v8558_v34 = vadd.f32 %v7831_v52, %v6604_v29  ;;  %v8420_v21 = vpop.f32.mrb[5].mxu1 }
 0x86f   : > { %v7836_v41 = vmax.f32 %v8558_v34, 0.0 }
 0x871   : > { %8438 = vmatmul.mubr.msk.f32.vlgmr.msra.gmra.mrb[10].mxu0 %vm3286_vm13, %v7836_v41 }
 0x944   : > { %v7915_v35 = vpop.f32.mrb[10].mxu0 }
 0x945   : > { %v7916_v24 = vadd.f32 %v7915_v35, %v7845_v27  ;;  %v8439_v0 = vpop.f32.mrb[11].mxu0 }
 0x947   : > { %7920 = vst.msk [vmem:[%s352_s20] sm:$0x1] %vm7919_vm7, %v7916_v24 }
 0x948 PF: > { %s20_s13 = sadd.s32 1, %s8911_s13  }
 0x949   : > { %p17_p4 = scmp.ge.s32.totalorder %s20_s13, 4  }
 0x94b   :  { %19 = sbr.rel (!%p17_p4) target bundleno = 1 (0x1), region = 129 }

</bundles_post_ra>
